<compile_context>
chip_gen: v6e
topology: v6e:2x2x1
jax: 0.10.0
libtpu: 0.0.40
codegen_flags: <defaults>
</compile_context>

<pallas_src>
import functools

import jax
import jax.numpy as jnp
from jax import lax
from jax.experimental import pallas as pl
from jax.experimental.pallas import tpu as pltpu

PAD, START_TAG, STOP_TAG = "<PAD>", "<START>", "<STOP>"


# --------------------------------------------------------------------------
# Fused bidirectional LSTM layer kernel (both directions, one layer)
# --------------------------------------------------------------------------
def _bilstm_layer_kernel(x_ref, wih_ref, whh_ref, b_ref, out_ref,
                         gx_scr, outf_scr, outb_scr):
    # x_ref:   [T*B, Din]   time-major rows, flattened so the input-gate
    #                       matmul is a single MXU op
    # wih_ref: [Din, 8*Hh]  fwd gates (i,f,g,o) | bwd gates (i,f,g,o)
    # whh_ref: [2*Hh, 8*Hh] block-diagonal (fwd | bwd)
    # b_ref:   [1, 8*Hh]    b_ih + b_hh, both directions
    # out_ref: [T, B, 2*Hh] concatenated fwd | bwd hidden states
    # gx_scr:  [T, B, 8*Hh] precomputed input gates
    # outf_scr/outb_scr: [T, B, Hh]
    T, B, H2 = out_ref.shape
    Hh = H2 // 2
    G = 4 * Hh

    # ---- prologue: hoisted input-gate matmul + single bias add ----
    gx = jnp.dot(x_ref[...], wih_ref[...],
                 preferred_element_type=jnp.float32) + b_ref[...]     # [T*B, 2G]
    for t in range(T):                       # static scatter into [T, B, 2G]
        gx_scr[t] = gx[t * B:(t + 1) * B, :]

    whh = whh_ref[...]

    def cell(g, c):
        # PyTorch gate order: i, f, g, o
        i = jax.nn.sigmoid(g[:, 0 * Hh:1 * Hh])
        f = jax.nn.sigmoid(g[:, 1 * Hh:2 * Hh])
        gg = jnp.tanh(g[:, 2 * Hh:3 * Hh])
        o = jax.nn.sigmoid(g[:, 3 * Hh:4 * Hh])
        c = f * c + i * gg
        return o * jnp.tanh(c), c

    def body(t, carry):
        h_f, c_f, h_b, c_b = carry
        t_rev = T - 1 - t
        # one stacked recurrent matmul for both directions (block-diag Whh)
        gh = jnp.dot(jnp.concatenate([h_f, h_b], axis=-1), whh,
                     preferred_element_type=jnp.float32)              # [B, 2G]
        g_f = gx_scr[t][:, :G] + gh[:, :G]
        g_b = gx_scr[t_rev][:, G:] + gh[:, G:]
        h_f, c_f = cell(g_f, c_f)
        h_b, c_b = cell(g_b, c_b)
        outf_scr[t] = h_f
        outb_scr[t_rev] = h_b
        return h_f, c_f, h_b, c_b

    zero = jnp.zeros((B, Hh), jnp.float32)
    lax.fori_loop(0, T, body, (zero, zero, zero, zero), unroll=True)

    # epilogue: write the concatenated (fwd | bwd) features once
    out_ref[:, :, 0:Hh] = outf_scr[...]
    out_ref[:, :, Hh:2 * Hh] = outb_scr[...]


def bilstm_layer(x2d, wih_cat, whh_cat, b_cat, *, seq_len, batch):
    Hh = whh_cat.shape[0] // 2
    vm = lambda: pl.BlockSpec(memory_space=pltpu.MemorySpace.VMEM)
    return pl.pallas_call(
        _bilstm_layer_kernel,
        out_shape=jax.ShapeDtypeStruct((seq_len, batch, 2 * Hh), jnp.float32),
        in_specs=[vm(), vm(), vm(), vm()],
        out_specs=vm(),
        scratch_shapes=[pltpu.VMEM((seq_len, batch, 8 * Hh), jnp.float32),
                        pltpu.VMEM((seq_len, batch, Hh), jnp.float32),
                        pltpu.VMEM((seq_len, batch, Hh), jnp.float32)],
    )(x2d, wih_cat, whh_cat, b_cat)


# --------------------------------------------------------------------------
# Fused FC projection + mask + CRF (log-partition + gold score) kernel
# --------------------------------------------------------------------------
def _fc_crf_kernel(h_ref, wfc_ref, bfc_ref, mask_ref, y_ref, trans_ref,
                   out_ref, e_scr, *, start_idx, stop_idx):
    # h_ref:    [T*B, H]    BiLSTM features (time-major rows)
    # wfc_ref:  [H, K]      bfc_ref: [1, K]
    # mask_ref: [T, B, 1]   float mask
    # y_ref:    [T+1, B, 1] int32 gold tags, START prepended at t=0
    # trans_ref:[K, K]      trans[to, from]
    # out_ref:  [B, 1]      forward (log-partition) - gold score, per sequence
    # e_scr:    [T, B, K]   masked emissions scratch
    T, B, K = e_scr.shape

    # ---- fused FC projection (one MXU matmul for the whole sequence) + mask --
    e = jnp.dot(h_ref[...], wfc_ref[...],
                preferred_element_type=jnp.float32) + bfc_ref[...]    # [T*B, K]
    for t in range(T):
        e_scr[t] = e[t * B:(t + 1) * B, :] * mask_ref[t]

    trans = trans_ref[...]
    col = lax.broadcasted_iota(jnp.int32, (B, K), 1)
    init_fwd = jnp.where(col == start_idx, 0.0, -10000.0).astype(jnp.float32)
    init_gold = jnp.zeros((B, 1), jnp.float32)

    def body(t, carry):
        fwd, gold = carry
        h_t = e_scr[t]                            # [B, K]
        m_t = mask_ref[t]                         # [B, 1]
        y_prev = y_ref[t]                         # [B, 1] int32
        y_next = y_ref[t + 1]                     # [B, 1] int32

        # ---- forward recursion (emission term hoisted out of the lse) ----
        s = fwd[:, None, :] + trans[None, :, :]                      # [B, K, K]
        m = jnp.max(s, axis=-1)                                      # [B, K]
        lse = m + jnp.log(jnp.sum(jnp.exp(s - m[..., None]), axis=-1)) + h_t
        fwd = lse * m_t + fwd * (1.0 - m_t)

        # ---- gold path score (one-hot gathers) ----
        oh_next = (col == y_next).astype(jnp.float32)                # [B, K]
        oh_prev = (col == y_prev).astype(jnp.float32)                # [B, K]
        emit = jnp.sum(h_t * oh_next, axis=-1, keepdims=True)        # [B, 1]
        tr = jnp.sum(jnp.dot(oh_next, trans,
                             preferred_element_type=jnp.float32) * oh_prev,
                     axis=-1, keepdims=True)                         # [B, 1]
        gold = gold + (emit + tr) * m_t
        return fwd, gold

    fwd, gold = lax.fori_loop(0, T, body, (init_fwd, init_gold), unroll=True)

    # forward terminal: transition into STOP, then logsumexp over tags
    final = fwd + trans[stop_idx][None, :]                           # [B, K]
    m = jnp.max(final, axis=-1, keepdims=True)
    fwd_score = m + jnp.log(jnp.sum(jnp.exp(final - m), axis=-1, keepdims=True))

    # gold terminal: trans[STOP, last_tag];  last_tag = y_pad[b, sum(mask[b])]
    lengths = jnp.sum(mask_ref[...], axis=0).astype(jnp.int32)       # [B, 1]
    t_iota = lax.broadcasted_iota(jnp.int32, (T + 1, B, 1), 0)
    sel = (t_iota == lengths[None, :, :]).astype(jnp.int32)          # [T+1, B, 1]
    last_tag = jnp.sum(y_ref[...] * sel, axis=0)                     # [B, 1]
    oh_last = (col == last_tag).astype(jnp.float32)                  # [B, K]
    gold = gold + jnp.sum(trans[stop_idx][None, :] * oh_last,
                          axis=-1, keepdims=True)

    out_ref[...] = fwd_score - gold


def fc_crf_loss(h2d, fc_w_t, fc_b, mask_tb1, y_tb1, trans, start_idx, stop_idx):
    T, B, _ = mask_tb1.shape
    K = trans.shape[0]
    vm = lambda: pl.BlockSpec(memory_space=pltpu.MemorySpace.VMEM)
    kernel = functools.partial(_fc_crf_kernel,
                               start_idx=start_idx, stop_idx=stop_idx)
    return pl.pallas_call(
        kernel,
        out_shape=jax.ShapeDtypeStruct((B, 1), jnp.float32),
        in_specs=[vm()] * 6,
        out_specs=vm(),
        scratch_shapes=[pltpu.VMEM((T, B, K), jnp.float32)],
    )(h2d, fc_w_t, fc_b, mask_tb1, y_tb1, trans)


# --------------------------------------------------------------------------
# Parameter init (deterministic, mirrors module's __init__ shapes)
# --------------------------------------------------------------------------
def init_params(key, vocab_size, emb_size, hidden_size, num_tags,
                pad_i, start_i, stop_i):
    Hh = hidden_size // 2
    keys = iter(jax.random.split(key, 32))

    def rnd(shape, scale=0.1):
        return (scale * jax.random.normal(next(keys), shape)).astype(jnp.float32)

    params = {"embedding": rnd((vocab_size, emb_size), 1.0)}

    lstm = []
    in_dims = [emb_size, hidden_size]
    for layer in range(2):
        Din = in_dims[layer]
        wih_t, whh_t, biases = [], [], []
        for _direction in range(2):
            wih = rnd((4 * Hh, Din))                 # PyTorch weight_ih
            whh = rnd((4 * Hh, Hh))                  # PyTorch weight_hh
            b_ih = rnd((4 * Hh,))
            b_hh = rnd((4 * Hh,))
            wih_t.append(jnp.transpose(wih))         # [Din, 4*Hh]
            whh_t.append(jnp.transpose(whh))         # [Hh, 4*Hh]
            biases.append(b_ih + b_hh)
        wih_cat = jnp.concatenate(wih_t, axis=1)     # [Din, 8*Hh]
        whh_cat = jnp.zeros((2 * Hh, 8 * Hh), jnp.float32)
        whh_cat = whh_cat.at[:Hh, :4 * Hh].set(whh_t[0])   # block-diag
        whh_cat = whh_cat.at[Hh:, 4 * Hh:].set(whh_t[1])
        b_cat = jnp.concatenate(biases)[None, :]     # [1, 8*Hh]
        lstm.append({"wih": wih_cat, "whh": whh_cat, "b": b_cat})
    params["lstm"] = lstm

    w_fc = rnd((num_tags, hidden_size))
    b_fc = rnd((num_tags,))
    params["fc_w_t"] = jnp.transpose(w_fc)           # [H, K]
    params["fc_b"] = b_fc[None, :]                   # [1, K]

    trans = jax.random.normal(next(keys), (num_tags, num_tags)).astype(jnp.float32)
    trans = trans.at[start_i, :].set(-10000.0)
    trans = trans.at[:, stop_i].set(-10000.0)
    trans = trans.at[:, pad_i].set(-10000.0)
    trans = trans.at[pad_i, :].set(-10000.0)
    trans = trans.at[pad_i, stop_i].set(0.0)
    trans = trans.at[pad_i, pad_i].set(0.0)
    params["trans"] = trans
    return params


# --------------------------------------------------------------------------
# Full forward pass (mirrors BiLSTM_CRF.forward)
# --------------------------------------------------------------------------
def bilstm_crf_forward(params, sentence, tags, start_idx, stop_idx):
    B, T = sentence.shape
    mask = (sentence > 0).astype(jnp.float32)                        # [B, T]
    embeds = jnp.take(params["embedding"], sentence, axis=0)         # [B, T, E]

    h = jnp.transpose(embeds, (1, 0, 2)).astype(jnp.float32)         # [T, B, E]

    # 2-layer bidirectional LSTM: both directions fused per layer, time
    # reversal done in-kernel, no h[::-1]/concatenate HBM copies.
    for lp in params["lstm"]:
        x2d = h.reshape(T * B, h.shape[-1])                          # free reshape
        h = bilstm_layer(x2d, lp["wih"], lp["whh"], lp["b"],
                         seq_len=T, batch=B)                         # [T, B, H]

    mask_tb1 = jnp.transpose(mask)[:, :, None]                       # [T, B, 1]
    y_pad = jnp.concatenate(
        [jnp.full((B, 1), start_idx, dtype=jnp.int32), tags.astype(jnp.int32)],
        axis=1)                                                      # [B, T+1]
    y_tb1 = jnp.transpose(y_pad)[:, :, None]                         # [T+1, B, 1]

    # TODO(synk): dropout is identity here (p=0 / eval mode); training-mode
    # dropout would use pltpu.prng_seed / prng_random_bits inside the fused
    # FC+CRF kernel.
    diff = fc_crf_loss(h.reshape(T * B, h.shape[-1]), params["fc_w_t"],
                       params["fc_b"], mask_tb1, y_tb1, params["trans"],
                       start_idx, stop_idx)                          # [B, 1]
    return jnp.mean(diff)


# --------------------------------------------------------------------------
if __name__ == "__main__":
    tag_dict = ["<PAD>", "B", "I", "O", "<START>", "<STOP>"]
    tag2int = {t: i for i, t in enumerate(tag_dict)}
    pad_i, start_i, stop_i = tag2int[PAD], tag2int[START_TAG], tag2int[STOP_TAG]
    K = len(tag_dict)

    B, T, VOCAB, E, H = 2, 8, 32, 16, 32

    key = jax.random.PRNGKey(0)
    k_par, k_sent, k_tag = jax.random.split(key, 3)
    params = init_params(k_par, VOCAB, E, H, K, pad_i, start_i, stop_i)

    sentence = jax.random.randint(k_sent, (B, T), 1, VOCAB, dtype=jnp.int32)
    sentence = sentence.at[1, 5:].set(0)            # second seq is padded (len 5)
    tags = jax.random.randint(k_tag, (B, T), 1, 4, dtype=jnp.int32)
    tags = jnp.where(sentence > 0, tags, 0)         # PAD tag where masked

    fwd_fn = jax.jit(functools.partial(bilstm_crf_forward,
                                       start_idx=start_i, stop_idx=stop_i))
    loss = fwd_fn(params, sentence, tags)
    jax.block_until_ready(loss)
    assert loss.shape == () and bool(jnp.isfinite(loss))
    print("KERNEL_OK")
</pallas_src>

<mosaic_0001>
module attributes {stable_mosaic.version = 11 : i64} {
  func.func @_bilstm_layer_kernel(%arg0: memref<16x32xf32, #tpu.memory_space<vmem>>, %arg1: memref<32x128xf32, #tpu.memory_space<vmem>>, %arg2: memref<32x128xf32, #tpu.memory_space<vmem>>, %arg3: memref<1x128xf32, #tpu.memory_space<vmem>>, %arg4: memref<8x2x32xf32, #tpu.memory_space<vmem>>, %arg5: memref<8x2x128xf32, #tpu.memory_space<vmem>>, %arg6: memref<8x2x16xf32, #tpu.memory_space<vmem>>, %arg7: memref<8x2x16xf32, #tpu.memory_space<vmem>>) attributes {dimension_semantics = [], scalar_prefetch = 0 : i64, scratch_operands = 3 : i64, tpu.core_type = #tpu.core_type<tc>} {
    %c0 = arith.constant 0 : index
    %c0_0 = arith.constant 0 : index
    %0 = vector.load %arg0[%c0, %c0_0] : memref<16x32xf32, #tpu.memory_space<vmem>>, vector<16x32xf32>
    %c0_1 = arith.constant 0 : index
    %c0_2 = arith.constant 0 : index
    %1 = vector.load %arg1[%c0_1, %c0_2] : memref<32x128xf32, #tpu.memory_space<vmem>>, vector<32x128xf32>
    %cst = arith.constant dense<0.000000e+00> : vector<16x128xf32>
    %2 = tpu.matmul %0, %1, %cst {dimension_numbers = #tpu.dot_dimension_numbers<[1], [0], [0], [1], [0, 0, 1, 1], [], []>} : vector<16x32xf32>, vector<32x128xf32>, vector<16x128xf32> -> vector<16x128xf32>
    %c0_3 = arith.constant 0 : index
    %c0_4 = arith.constant 0 : index
    %3 = vector.load %arg3[%c0_3, %c0_4] : memref<1x128xf32, #tpu.memory_space<vmem>>, vector<1x128xf32>
    %4 = vector.broadcast %3 : vector<1x128xf32> to vector<16x128xf32>
    %5 = arith.addf %2, %4 : vector<16x128xf32>
    %6 = vector.extract_strided_slice %5 {offsets = [0, 0], sizes = [2, 128], strides = [1, 1]} : vector<16x128xf32> to vector<2x128xf32>
    %c0_5 = arith.constant 0 : index
    %c0_6 = arith.constant 0 : index
    %c0_7 = arith.constant 0 : index
    %7 = vector.load %arg5[%c0_5, %c0_6, %c0_7] : memref<8x2x128xf32, #tpu.memory_space<vmem>>, vector<1x2x128xf32>
    %8 = vector.shape_cast %7 : vector<1x2x128xf32> to vector<2x128xf32>
    %9 = vector.shape_cast %6 : vector<2x128xf32> to vector<1x2x128xf32>
    tpu.vector_store %arg5[%c0_5, %c0_6, %c0_7], %9 {strides = array<i32>} : memref<8x2x128xf32, #tpu.memory_space<vmem>>, vector<1x2x128xf32>,
    %10 = vector.extract_strided_slice %5 {offsets = [2, 0], sizes = [2, 128], strides = [1, 1]} : vector<16x128xf32> to vector<2x128xf32>
    %c1 = arith.constant 1 : index
    %c0_8 = arith.constant 0 : index
    %c0_9 = arith.constant 0 : index
    %11 = vector.load %arg5[%c1, %c0_8, %c0_9] : memref<8x2x128xf32, #tpu.memory_space<vmem>>, vector<1x2x128xf32>
    %12 = vector.shape_cast %11 : vector<1x2x128xf32> to vector<2x128xf32>
    %13 = vector.shape_cast %10 : vector<2x128xf32> to vector<1x2x128xf32>
    tpu.vector_store %arg5[%c1, %c0_8, %c0_9], %13 {strides = array<i32>} : memref<8x2x128xf32, #tpu.memory_space<vmem>>, vector<1x2x128xf32>,
    %14 = vector.extract_strided_slice %5 {offsets = [4, 0], sizes = [2, 128], strides = [1, 1]} : vector<16x128xf32> to vector<2x128xf32>
    %c2 = arith.constant 2 : index
    %c0_10 = arith.constant 0 : index
    %c0_11 = arith.constant 0 : index
    %15 = vector.load %arg5[%c2, %c0_10, %c0_11] : memref<8x2x128xf32, #tpu.memory_space<vmem>>, vector<1x2x128xf32>
    %16 = vector.shape_cast %15 : vector<1x2x128xf32> to vector<2x128xf32>
    %17 = vector.shape_cast %14 : vector<2x128xf32> to vector<1x2x128xf32>
    tpu.vector_store %arg5[%c2, %c0_10, %c0_11], %17 {strides = array<i32>} : memref<8x2x128xf32, #tpu.memory_space<vmem>>, vector<1x2x128xf32>,
    %18 = vector.extract_strided_slice %5 {offsets = [6, 0], sizes = [2, 128], strides = [1, 1]} : vector<16x128xf32> to vector<2x128xf32>
    %c3 = arith.constant 3 : index
    %c0_12 = arith.constant 0 : index
    %c0_13 = arith.constant 0 : index
    %19 = vector.load %arg5[%c3, %c0_12, %c0_13] : memref<8x2x128xf32, #tpu.memory_space<vmem>>, vector<1x2x128xf32>
    %20 = vector.shape_cast %19 : vector<1x2x128xf32> to vector<2x128xf32>
    %21 = vector.shape_cast %18 : vector<2x128xf32> to vector<1x2x128xf32>
    tpu.vector_store %arg5[%c3, %c0_12, %c0_13], %21 {strides = array<i32>} : memref<8x2x128xf32, #tpu.memory_space<vmem>>, vector<1x2x128xf32>,
    %22 = vector.extract_strided_slice %5 {offsets = [8, 0], sizes = [2, 128], strides = [1, 1]} : vector<16x128xf32> to vector<2x128xf32>
    %c4 = arith.constant 4 : index
    %c0_14 = arith.constant 0 : index
    %c0_15 = arith.constant 0 : index
    %23 = vector.load %arg5[%c4, %c0_14, %c0_15] : memref<8x2x128xf32, #tpu.memory_space<vmem>>, vector<1x2x128xf32>
    %24 = vector.shape_cast %23 : vector<1x2x128xf32> to vector<2x128xf32>
    %25 = vector.shape_cast %22 : vector<2x128xf32> to vector<1x2x128xf32>
    tpu.vector_store %arg5[%c4, %c0_14, %c0_15], %25 {strides = array<i32>} : memref<8x2x128xf32, #tpu.memory_space<vmem>>, vector<1x2x128xf32>,
    %26 = vector.extract_strided_slice %5 {offsets = [10, 0], sizes = [2, 128], strides = [1, 1]} : vector<16x128xf32> to vector<2x128xf32>
    %c5 = arith.constant 5 : index
    %c0_16 = arith.constant 0 : index
    %c0_17 = arith.constant 0 : index
    %27 = vector.load %arg5[%c5, %c0_16, %c0_17] : memref<8x2x128xf32, #tpu.memory_space<vmem>>, vector<1x2x128xf32>
    %28 = vector.shape_cast %27 : vector<1x2x128xf32> to vector<2x128xf32>
    %29 = vector.shape_cast %26 : vector<2x128xf32> to vector<1x2x128xf32>
    tpu.vector_store %arg5[%c5, %c0_16, %c0_17], %29 {strides = array<i32>} : memref<8x2x128xf32, #tpu.memory_space<vmem>>, vector<1x2x128xf32>,
    %30 = vector.extract_strided_slice %5 {offsets = [12, 0], sizes = [2, 128], strides = [1, 1]} : vector<16x128xf32> to vector<2x128xf32>
    %c6 = arith.constant 6 : index
    %c0_18 = arith.constant 0 : index
    %c0_19 = arith.constant 0 : index
    %31 = vector.load %arg5[%c6, %c0_18, %c0_19] : memref<8x2x128xf32, #tpu.memory_space<vmem>>, vector<1x2x128xf32>
    %32 = vector.shape_cast %31 : vector<1x2x128xf32> to vector<2x128xf32>
    %33 = vector.shape_cast %30 : vector<2x128xf32> to vector<1x2x128xf32>
    tpu.vector_store %arg5[%c6, %c0_18, %c0_19], %33 {strides = array<i32>} : memref<8x2x128xf32, #tpu.memory_space<vmem>>, vector<1x2x128xf32>,
    %34 = vector.extract_strided_slice %5 {offsets = [14, 0], sizes = [2, 128], strides = [1, 1]} : vector<16x128xf32> to vector<2x128xf32>
    %c7 = arith.constant 7 : index
    %c0_20 = arith.constant 0 : index
    %c0_21 = arith.constant 0 : index
    %35 = vector.load %arg5[%c7, %c0_20, %c0_21] : memref<8x2x128xf32, #tpu.memory_space<vmem>>, vector<1x2x128xf32>
    %36 = vector.shape_cast %35 : vector<1x2x128xf32> to vector<2x128xf32>
    %37 = vector.shape_cast %34 : vector<2x128xf32> to vector<1x2x128xf32>
    tpu.vector_store %arg5[%c7, %c0_20, %c0_21], %37 {strides = array<i32>} : memref<8x2x128xf32, #tpu.memory_space<vmem>>, vector<1x2x128xf32>,
    %c0_22 = arith.constant 0 : index
    %c0_23 = arith.constant 0 : index
    %38 = vector.load %arg2[%c0_22, %c0_23] : memref<32x128xf32, #tpu.memory_space<vmem>>, vector<32x128xf32>
    %cst_24 = arith.constant 0.000000e+00 : f32
    %39 = vector.broadcast %cst_24 : f32 to vector<2x16xf32>
    %c0_i32 = arith.constant 0 : i32
    %c7_i32 = arith.constant 7 : i32
    %40 = arith.subi %c7_i32, %c0_i32 : i32
    %41 = tpu.concatenate %39, %39 in 1 : vector<2x16xf32>, vector<2x16xf32> -> vector<2x32xf32>
    %cst_25 = arith.constant dense<0.000000e+00> : vector<2x128xf32>
    %42 = tpu.matmul %41, %38, %cst_25 {dimension_numbers = #tpu.dot_dimension_numbers<[1], [0], [0], [1], [0, 0, 1, 1], [], []>} : vector<2x32xf32>, vector<32x128xf32>, vector<2x128xf32> -> vector<2x128xf32>
    %43 = arith.index_cast %c0_i32 : i32 to index
    %c0_26 = arith.constant 0 : index
    %c0_27 = arith.constant 0 : index
    %44 = vector.load %arg5[%43, %c0_26, %c0_27] : memref<8x2x128xf32, #tpu.memory_space<vmem>>, vector<1x2x128xf32>
    %45 = vector.shape_cast %44 : vector<1x2x128xf32> to vector<2x128xf32>
    %46 = vector.extract_strided_slice %45 {offsets = [0, 0], sizes = [2, 64], strides = [1, 1]} : vector<2x128xf32> to vector<2x64xf32>
    %47 = vector.extract_strided_slice %42 {offsets = [0, 0], sizes = [2, 64], strides = [1, 1]} : vector<2x128xf32> to vector<2x64xf32>
    %48 = arith.addf %46, %47 : vector<2x64xf32>
    %49 = arith.index_cast %40 : i32 to index
    %c0_28 = arith.constant 0 : index
    %c0_29 = arith.constant 0 : index
    %50 = vector.load %arg5[%49, %c0_28, %c0_29] : memref<8x2x128xf32, #tpu.memory_space<vmem>>, vector<1x2x128xf32>
    %51 = vector.shape_cast %50 : vector<1x2x128xf32> to vector<2x128xf32>
    %52 = vector.extract_strided_slice %51 {offsets = [0, 64], sizes = [2, 64], strides = [1, 1]} : vector<2x128xf32> to vector<2x64xf32>
    %53 = vector.extract_strided_slice %42 {offsets = [0, 64], sizes = [2, 64], strides = [1, 1]} : vector<2x128xf32> to vector<2x64xf32>
    %54 = arith.addf %52, %53 : vector<2x64xf32>
    %55 = vector.extract_strided_slice %48 {offsets = [0, 0], sizes = [2, 16], strides = [1, 1]} : vector<2x64xf32> to vector<2x16xf32>
    %56 = arith.negf %55 : vector<2x16xf32>
    %57 = math.exp %56 : vector<2x16xf32>
    %cst_30 = arith.constant 1.000000e+00 : f32
    %58 = vector.broadcast %cst_30 : f32 to vector<2x16xf32>
    %59 = arith.addf %58, %57 : vector<2x16xf32>
    %60 = arith.divf %58, %59 : vector<2x16xf32>
    %61 = vector.extract_strided_slice %48 {offsets = [0, 16], sizes = [2, 16], strides = [1, 1]} : vector<2x64xf32> to vector<2x16xf32>
    %62 = arith.negf %61 : vector<2x16xf32>
    %63 = math.exp %62 : vector<2x16xf32>
    %cst_31 = arith.constant 1.000000e+00 : f32
    %64 = vector.broadcast %cst_31 : f32 to vector<2x16xf32>
    %65 = arith.addf %64, %63 : vector<2x16xf32>
    %66 = arith.divf %64, %65 : vector<2x16xf32>
    %67 = vector.extract_strided_slice %48 {offsets = [0, 32], sizes = [2, 16], strides = [1, 1]} : vector<2x64xf32> to vector<2x16xf32>
    %68 = math.tanh %67 : vector<2x16xf32>
    %69 = vector.extract_strided_slice %48 {offsets = [0, 48], sizes = [2, 16], strides = [1, 1]} : vector<2x64xf32> to vector<2x16xf32>
    %70 = arith.negf %69 : vector<2x16xf32>
    %71 = math.exp %70 : vector<2x16xf32>
    %cst_32 = arith.constant 1.000000e+00 : f32
    %72 = vector.broadcast %cst_32 : f32 to vector<2x16xf32>
    %73 = arith.addf %72, %71 : vector<2x16xf32>
    %74 = arith.divf %72, %73 : vector<2x16xf32>
    %75 = arith.mulf %66, %39 : vector<2x16xf32>
    %76 = arith.mulf %60, %68 : vector<2x16xf32>
    %77 = arith.addf %75, %76 : vector<2x16xf32>
    %78 = math.tanh %77 : vector<2x16xf32>
    %79 = arith.mulf %74, %78 : vector<2x16xf32>
    %80 = vector.extract_strided_slice %54 {offsets = [0, 0], sizes = [2, 16], strides = [1, 1]} : vector<2x64xf32> to vector<2x16xf32>
    %81 = arith.negf %80 : vector<2x16xf32>
    %82 = math.exp %81 : vector<2x16xf32>
    %cst_33 = arith.constant 1.000000e+00 : f32
    %83 = vector.broadcast %cst_33 : f32 to vector<2x16xf32>
    %84 = arith.addf %83, %82 : vector<2x16xf32>
    %85 = arith.divf %83, %84 : vector<2x16xf32>
    %86 = vector.extract_strided_slice %54 {offsets = [0, 16], sizes = [2, 16], strides = [1, 1]} : vector<2x64xf32> to vector<2x16xf32>
    %87 = arith.negf %86 : vector<2x16xf32>
    %88 = math.exp %87 : vector<2x16xf32>
    %cst_34 = arith.constant 1.000000e+00 : f32
    %89 = vector.broadcast %cst_34 : f32 to vector<2x16xf32>
    %90 = arith.addf %89, %88 : vector<2x16xf32>
    %91 = arith.divf %89, %90 : vector<2x16xf32>
    %92 = vector.extract_strided_slice %54 {offsets = [0, 32], sizes = [2, 16], strides = [1, 1]} : vector<2x64xf32> to vector<2x16xf32>
    %93 = math.tanh %92 : vector<2x16xf32>
    %94 = vector.extract_strided_slice %54 {offsets = [0, 48], sizes = [2, 16], strides = [1, 1]} : vector<2x64xf32> to vector<2x16xf32>
    %95 = arith.negf %94 : vector<2x16xf32>
    %96 = math.exp %95 : vector<2x16xf32>
    %cst_35 = arith.constant 1.000000e+00 : f32
    %97 = vector.broadcast %cst_35 : f32 to vector<2x16xf32>
    %98 = arith.addf %97, %96 : vector<2x16xf32>
    %99 = arith.divf %97, %98 : vector<2x16xf32>
    %100 = arith.mulf %91, %39 : vector<2x16xf32>
    %101 = arith.mulf %85, %93 : vector<2x16xf32>
    %102 = arith.addf %100, %101 : vector<2x16xf32>
    %103 = math.tanh %102 : vector<2x16xf32>
    %104 = arith.mulf %99, %103 : vector<2x16xf32>
    %105 = arith.index_cast %c0_i32 : i32 to index
    %c0_36 = arith.constant 0 : index
    %c0_37 = arith.constant 0 : index
    %106 = vector.load %arg6[%105, %c0_36, %c0_37] : memref<8x2x16xf32, #tpu.memory_space<vmem>>, vector<1x2x16xf32>
    %107 = vector.shape_cast %106 : vector<1x2x16xf32> to vector<2x16xf32>
    %108 = vector.shape_cast %79 : vector<2x16xf32> to vector<1x2x16xf32>
    tpu.vector_store %arg6[%105, %c0_36, %c0_37], %108 {strides = array<i32>} : memref<8x2x16xf32, #tpu.memory_space<vmem>>, vector<1x2x16xf32>,
    %109 = arith.index_cast %40 : i32 to index
    %c0_38 = arith.constant 0 : index
    %c0_39 = arith.constant 0 : index
    %110 = vector.load %arg7[%109, %c0_38, %c0_39] : memref<8x2x16xf32, #tpu.memory_space<vmem>>, vector<1x2x16xf32>
    %111 = vector.shape_cast %110 : vector<1x2x16xf32> to vector<2x16xf32>
    %112 = vector.shape_cast %104 : vector<2x16xf32> to vector<1x2x16xf32>
    tpu.vector_store %arg7[%109, %c0_38, %c0_39], %112 {strides = array<i32>} : memref<8x2x16xf32, #tpu.memory_space<vmem>>, vector<1x2x16xf32>,
    %c1_i32 = arith.constant 1 : i32
    %c7_i32_40 = arith.constant 7 : i32
    %113 = arith.subi %c7_i32_40, %c1_i32 : i32
    %114 = tpu.concatenate %79, %104 in 1 : vector<2x16xf32>, vector<2x16xf32> -> vector<2x32xf32>
    %cst_41 = arith.constant dense<0.000000e+00> : vector<2x128xf32>
    %115 = tpu.matmul %114, %38, %cst_41 {dimension_numbers = #tpu.dot_dimension_numbers<[1], [0], [0], [1], [0, 0, 1, 1], [], []>} : vector<2x32xf32>, vector<32x128xf32>, vector<2x128xf32> -> vector<2x128xf32>
    %116 = arith.index_cast %c1_i32 : i32 to index
    %c0_42 = arith.constant 0 : index
    %c0_43 = arith.constant 0 : index
    %117 = vector.load %arg5[%116, %c0_42, %c0_43] : memref<8x2x128xf32, #tpu.memory_space<vmem>>, vector<1x2x128xf32>
    %118 = vector.shape_cast %117 : vector<1x2x128xf32> to vector<2x128xf32>
    %119 = vector.extract_strided_slice %118 {offsets = [0, 0], sizes = [2, 64], strides = [1, 1]} : vector<2x128xf32> to vector<2x64xf32>
    %120 = vector.extract_strided_slice %115 {offsets = [0, 0], sizes = [2, 64], strides = [1, 1]} : vector<2x128xf32> to vector<2x64xf32>
    %121 = arith.addf %119, %120 : vector<2x64xf32>
    %122 = arith.index_cast %113 : i32 to index
    %c0_44 = arith.constant 0 : index
    %c0_45 = arith.constant 0 : index
    %123 = vector.load %arg5[%122, %c0_44, %c0_45] : memref<8x2x128xf32, #tpu.memory_space<vmem>>, vector<1x2x128xf32>
    %124 = vector.shape_cast %123 : vector<1x2x128xf32> to vector<2x128xf32>
    %125 = vector.extract_strided_slice %124 {offsets = [0, 64], sizes = [2, 64], strides = [1, 1]} : vector<2x128xf32> to vector<2x64xf32>
    %126 = vector.extract_strided_slice %115 {offsets = [0, 64], sizes = [2, 64], strides = [1, 1]} : vector<2x128xf32> to vector<2x64xf32>
    %127 = arith.addf %125, %126 : vector<2x64xf32>
    %128 = vector.extract_strided_slice %121 {offsets = [0, 0], sizes = [2, 16], strides = [1, 1]} : vector<2x64xf32> to vector<2x16xf32>
    %129 = arith.negf %128 : vector<2x16xf32>
    %130 = math.exp %129 : vector<2x16xf32>
    %cst_46 = arith.constant 1.000000e+00 : f32
    %131 = vector.broadcast %cst_46 : f32 to vector<2x16xf32>
    %132 = arith.addf %131, %130 : vector<2x16xf32>
    %133 = arith.divf %131, %132 : vector<2x16xf32>
    %134 = vector.extract_strided_slice %121 {offsets = [0, 16], sizes = [2, 16], strides = [1, 1]} : vector<2x64xf32> to vector<2x16xf32>
    %135 = arith.negf %134 : vector<2x16xf32>
    %136 = math.exp %135 : vector<2x16xf32>
    %cst_47 = arith.constant 1.000000e+00 : f32
    %137 = vector.broadcast %cst_47 : f32 to vector<2x16xf32>
    %138 = arith.addf %137, %136 : vector<2x16xf32>
    %139 = arith.divf %137, %138 : vector<2x16xf32>
    %140 = vector.extract_strided_slice %121 {offsets = [0, 32], sizes = [2, 16], strides = [1, 1]} : vector<2x64xf32> to vector<2x16xf32>
    %141 = math.tanh %140 : vector<2x16xf32>
    %142 = vector.extract_strided_slice %121 {offsets = [0, 48], sizes = [2, 16], strides = [1, 1]} : vector<2x64xf32> to vector<2x16xf32>
    %143 = arith.negf %142 : vector<2x16xf32>
    %144 = math.exp %143 : vector<2x16xf32>
    %cst_48 = arith.constant 1.000000e+00 : f32
    %145 = vector.broadcast %cst_48 : f32 to vector<2x16xf32>
    %146 = arith.addf %145, %144 : vector<2x16xf32>
    %147 = arith.divf %145, %146 : vector<2x16xf32>
    %148 = arith.mulf %139, %77 : vector<2x16xf32>
    %149 = arith.mulf %133, %141 : vector<2x16xf32>
    %150 = arith.addf %148, %149 : vector<2x16xf32>
    %151 = math.tanh %150 : vector<2x16xf32>
    %152 = arith.mulf %147, %151 : vector<2x16xf32>
    %153 = vector.extract_strided_slice %127 {offsets = [0, 0], sizes = [2, 16], strides = [1, 1]} : vector<2x64xf32> to vector<2x16xf32>
    %154 = arith.negf %153 : vector<2x16xf32>
    %155 = math.exp %154 : vector<2x16xf32>
    %cst_49 = arith.constant 1.000000e+00 : f32
    %156 = vector.broadcast %cst_49 : f32 to vector<2x16xf32>
    %157 = arith.addf %156, %155 : vector<2x16xf32>
    %158 = arith.divf %156, %157 : vector<2x16xf32>
    %159 = vector.extract_strided_slice %127 {offsets = [0, 16], sizes = [2, 16], strides = [1, 1]} : vector<2x64xf32> to vector<2x16xf32>
    %160 = arith.negf %159 : vector<2x16xf32>
    %161 = math.exp %160 : vector<2x16xf32>
    %cst_50 = arith.constant 1.000000e+00 : f32
    %162 = vector.broadcast %cst_50 : f32 to vector<2x16xf32>
    %163 = arith.addf %162, %161 : vector<2x16xf32>
    %164 = arith.divf %162, %163 : vector<2x16xf32>
    %165 = vector.extract_strided_slice %127 {offsets = [0, 32], sizes = [2, 16], strides = [1, 1]} : vector<2x64xf32> to vector<2x16xf32>
    %166 = math.tanh %165 : vector<2x16xf32>
    %167 = vector.extract_strided_slice %127 {offsets = [0, 48], sizes = [2, 16], strides = [1, 1]} : vector<2x64xf32> to vector<2x16xf32>
    %168 = arith.negf %167 : vector<2x16xf32>
    %169 = math.exp %168 : vector<2x16xf32>
    %cst_51 = arith.constant 1.000000e+00 : f32
    %170 = vector.broadcast %cst_51 : f32 to vector<2x16xf32>
    %171 = arith.addf %170, %169 : vector<2x16xf32>
    %172 = arith.divf %170, %171 : vector<2x16xf32>
    %173 = arith.mulf %164, %102 : vector<2x16xf32>
    %174 = arith.mulf %158, %166 : vector<2x16xf32>
    %175 = arith.addf %173, %174 : vector<2x16xf32>
    %176 = math.tanh %175 : vector<2x16xf32>
    %177 = arith.mulf %172, %176 : vector<2x16xf32>
    %178 = arith.index_cast %c1_i32 : i32 to index
    %c0_52 = arith.constant 0 : index
    %c0_53 = arith.constant 0 : index
    %179 = vector.load %arg6[%178, %c0_52, %c0_53] : memref<8x2x16xf32, #tpu.memory_space<vmem>>, vector<1x2x16xf32>
    %180 = vector.shape_cast %179 : vector<1x2x16xf32> to vector<2x16xf32>
    %181 = vector.shape_cast %152 : vector<2x16xf32> to vector<1x2x16xf32>
    tpu.vector_store %arg6[%178, %c0_52, %c0_53], %181 {strides = array<i32>} : memref<8x2x16xf32, #tpu.memory_space<vmem>>, vector<1x2x16xf32>,
    %182 = arith.index_cast %113 : i32 to index
    %c0_54 = arith.constant 0 : index
    %c0_55 = arith.constant 0 : index
    %183 = vector.load %arg7[%182, %c0_54, %c0_55] : memref<8x2x16xf32, #tpu.memory_space<vmem>>, vector<1x2x16xf32>
    %184 = vector.shape_cast %183 : vector<1x2x16xf32> to vector<2x16xf32>
    %185 = vector.shape_cast %177 : vector<2x16xf32> to vector<1x2x16xf32>
    tpu.vector_store %arg7[%182, %c0_54, %c0_55], %185 {strides = array<i32>} : memref<8x2x16xf32, #tpu.memory_space<vmem>>, vector<1x2x16xf32>,
    %c2_i32 = arith.constant 2 : i32
    %c7_i32_56 = arith.constant 7 : i32
    %186 = arith.subi %c7_i32_56, %c2_i32 : i32
    %187 = tpu.concatenate %152, %177 in 1 : vector<2x16xf32>, vector<2x16xf32> -> vector<2x32xf32>
    %cst_57 = arith.constant dense<0.000000e+00> : vector<2x128xf32>
    %188 = tpu.matmul %187, %38, %cst_57 {dimension_numbers = #tpu.dot_dimension_numbers<[1], [0], [0], [1], [0, 0, 1, 1], [], []>} : vector<2x32xf32>, vector<32x128xf32>, vector<2x128xf32> -> vector<2x128xf32>
    %189 = arith.index_cast %c2_i32 : i32 to index
    %c0_58 = arith.constant 0 : index
    %c0_59 = arith.constant 0 : index
    %190 = vector.load %arg5[%189, %c0_58, %c0_59] : memref<8x2x128xf32, #tpu.memory_space<vmem>>, vector<1x2x128xf32>
    %191 = vector.shape_cast %190 : vector<1x2x128xf32> to vector<2x128xf32>
    %192 = vector.extract_strided_slice %191 {offsets = [0, 0], sizes = [2, 64], strides = [1, 1]} : vector<2x128xf32> to vector<2x64xf32>
    %193 = vector.extract_strided_slice %188 {offsets = [0, 0], sizes = [2, 64], strides = [1, 1]} : vector<2x128xf32> to vector<2x64xf32>
    %194 = arith.addf %192, %193 : vector<2x64xf32>
    %195 = arith.index_cast %186 : i32 to index
    %c0_60 = arith.constant 0 : index
    %c0_61 = arith.constant 0 : index
    %196 = vector.load %arg5[%195, %c0_60, %c0_61] : memref<8x2x128xf32, #tpu.memory_space<vmem>>, vector<1x2x128xf32>
    %197 = vector.shape_cast %196 : vector<1x2x128xf32> to vector<2x128xf32>
    %198 = vector.extract_strided_slice %197 {offsets = [0, 64], sizes = [2, 64], strides = [1, 1]} : vector<2x128xf32> to vector<2x64xf32>
    %199 = vector.extract_strided_slice %188 {offsets = [0, 64], sizes = [2, 64], strides = [1, 1]} : vector<2x128xf32> to vector<2x64xf32>
    %200 = arith.addf %198, %199 : vector<2x64xf32>
    %201 = vector.extract_strided_slice %194 {offsets = [0, 0], sizes = [2, 16], strides = [1, 1]} : vector<2x64xf32> to vector<2x16xf32>
    %202 = arith.negf %201 : vector<2x16xf32>
    %203 = math.exp %202 : vector<2x16xf32>
    %cst_62 = arith.constant 1.000000e+00 : f32
    %204 = vector.broadcast %cst_62 : f32 to vector<2x16xf32>
    %205 = arith.addf %204, %203 : vector<2x16xf32>
    %206 = arith.divf %204, %205 : vector<2x16xf32>
    %207 = vector.extract_strided_slice %194 {offsets = [0, 16], sizes = [2, 16], strides = [1, 1]} : vector<2x64xf32> to vector<2x16xf32>
    %208 = arith.negf %207 : vector<2x16xf32>
    %209 = math.exp %208 : vector<2x16xf32>
    %cst_63 = arith.constant 1.000000e+00 : f32
    %210 = vector.broadcast %cst_63 : f32 to vector<2x16xf32>
    %211 = arith.addf %210, %209 : vector<2x16xf32>
    %212 = arith.divf %210, %211 : vector<2x16xf32>
    %213 = vector.extract_strided_slice %194 {offsets = [0, 32], sizes = [2, 16], strides = [1, 1]} : vector<2x64xf32> to vector<2x16xf32>
    %214 = math.tanh %213 : vector<2x16xf32>
    %215 = vector.extract_strided_slice %194 {offsets = [0, 48], sizes = [2, 16], strides = [1, 1]} : vector<2x64xf32> to vector<2x16xf32>
    %216 = arith.negf %215 : vector<2x16xf32>
    %217 = math.exp %216 : vector<2x16xf32>
    %cst_64 = arith.constant 1.000000e+00 : f32
    %218 = vector.broadcast %cst_64 : f32 to vector<2x16xf32>
    %219 = arith.addf %218, %217 : vector<2x16xf32>
    %220 = arith.divf %218, %219 : vector<2x16xf32>
    %221 = arith.mulf %212, %150 : vector<2x16xf32>
    %222 = arith.mulf %206, %214 : vector<2x16xf32>
    %223 = arith.addf %221, %222 : vector<2x16xf32>
    %224 = math.tanh %223 : vector<2x16xf32>
    %225 = arith.mulf %220, %224 : vector<2x16xf32>
    %226 = vector.extract_strided_slice %200 {offsets = [0, 0], sizes = [2, 16], strides = [1, 1]} : vector<2x64xf32> to vector<2x16xf32>
    %227 = arith.negf %226 : vector<2x16xf32>
    %228 = math.exp %227 : vector<2x16xf32>
    %cst_65 = arith.constant 1.000000e+00 : f32
    %229 = vector.broadcast %cst_65 : f32 to vector<2x16xf32>
    %230 = arith.addf %229, %228 : vector<2x16xf32>
    %231 = arith.divf %229, %230 : vector<2x16xf32>
    %232 = vector.extract_strided_slice %200 {offsets = [0, 16], sizes = [2, 16], strides = [1, 1]} : vector<2x64xf32> to vector<2x16xf32>
    %233 = arith.negf %232 : vector<2x16xf32>
    %234 = math.exp %233 : vector<2x16xf32>
    %cst_66 = arith.constant 1.000000e+00 : f32
    %235 = vector.broadcast %cst_66 : f32 to vector<2x16xf32>
    %236 = arith.addf %235, %234 : vector<2x16xf32>
    %237 = arith.divf %235, %236 : vector<2x16xf32>
    %238 = vector.extract_strided_slice %200 {offsets = [0, 32], sizes = [2, 16], strides = [1, 1]} : vector<2x64xf32> to vector<2x16xf32>
    %239 = math.tanh %238 : vector<2x16xf32>
    %240 = vector.extract_strided_slice %200 {offsets = [0, 48], sizes = [2, 16], strides = [1, 1]} : vector<2x64xf32> to vector<2x16xf32>
    %241 = arith.negf %240 : vector<2x16xf32>
    %242 = math.exp %241 : vector<2x16xf32>
    %cst_67 = arith.constant 1.000000e+00 : f32
    %243 = vector.broadcast %cst_67 : f32 to vector<2x16xf32>
    %244 = arith.addf %243, %242 : vector<2x16xf32>
    %245 = arith.divf %243, %244 : vector<2x16xf32>
    %246 = arith.mulf %237, %175 : vector<2x16xf32>
    %247 = arith.mulf %231, %239 : vector<2x16xf32>
    %248 = arith.addf %246, %247 : vector<2x16xf32>
    %249 = math.tanh %248 : vector<2x16xf32>
    %250 = arith.mulf %245, %249 : vector<2x16xf32>
    %251 = arith.index_cast %c2_i32 : i32 to index
    %c0_68 = arith.constant 0 : index
    %c0_69 = arith.constant 0 : index
    %252 = vector.load %arg6[%251, %c0_68, %c0_69] : memref<8x2x16xf32, #tpu.memory_space<vmem>>, vector<1x2x16xf32>
    %253 = vector.shape_cast %252 : vector<1x2x16xf32> to vector<2x16xf32>
    %254 = vector.shape_cast %225 : vector<2x16xf32> to vector<1x2x16xf32>
    tpu.vector_store %arg6[%251, %c0_68, %c0_69], %254 {strides = array<i32>} : memref<8x2x16xf32, #tpu.memory_space<vmem>>, vector<1x2x16xf32>,
    %255 = arith.index_cast %186 : i32 to index
    %c0_70 = arith.constant 0 : index
    %c0_71 = arith.constant 0 : index
    %256 = vector.load %arg7[%255, %c0_70, %c0_71] : memref<8x2x16xf32, #tpu.memory_space<vmem>>, vector<1x2x16xf32>
    %257 = vector.shape_cast %256 : vector<1x2x16xf32> to vector<2x16xf32>
    %258 = vector.shape_cast %250 : vector<2x16xf32> to vector<1x2x16xf32>
    tpu.vector_store %arg7[%255, %c0_70, %c0_71], %258 {strides = array<i32>} : memref<8x2x16xf32, #tpu.memory_space<vmem>>, vector<1x2x16xf32>,
    %c3_i32 = arith.constant 3 : i32
    %c7_i32_72 = arith.constant 7 : i32
    %259 = arith.subi %c7_i32_72, %c3_i32 : i32
    %260 = tpu.concatenate %225, %250 in 1 : vector<2x16xf32>, vector<2x16xf32> -> vector<2x32xf32>
    %cst_73 = arith.constant dense<0.000000e+00> : vector<2x128xf32>
    %261 = tpu.matmul %260, %38, %cst_73 {dimension_numbers = #tpu.dot_dimension_numbers<[1], [0], [0], [1], [0, 0, 1, 1], [], []>} : vector<2x32xf32>, vector<32x128xf32>, vector<2x128xf32> -> vector<2x128xf32>
    %262 = arith.index_cast %c3_i32 : i32 to index
    %c0_74 = arith.constant 0 : index
    %c0_75 = arith.constant 0 : index
    %263 = vector.load %arg5[%262, %c0_74, %c0_75] : memref<8x2x128xf32, #tpu.memory_space<vmem>>, vector<1x2x128xf32>
    %264 = vector.shape_cast %263 : vector<1x2x128xf32> to vector<2x128xf32>
    %265 = vector.extract_strided_slice %264 {offsets = [0, 0], sizes = [2, 64], strides = [1, 1]} : vector<2x128xf32> to vector<2x64xf32>
    %266 = vector.extract_strided_slice %261 {offsets = [0, 0], sizes = [2, 64], strides = [1, 1]} : vector<2x128xf32> to vector<2x64xf32>
    %267 = arith.addf %265, %266 : vector<2x64xf32>
    %268 = arith.index_cast %259 : i32 to index
    %c0_76 = arith.constant 0 : index
    %c0_77 = arith.constant 0 : index
    %269 = vector.load %arg5[%268, %c0_76, %c0_77] : memref<8x2x128xf32, #tpu.memory_space<vmem>>, vector<1x2x128xf32>
    %270 = vector.shape_cast %269 : vector<1x2x128xf32> to vector<2x128xf32>
    %271 = vector.extract_strided_slice %270 {offsets = [0, 64], sizes = [2, 64], strides = [1, 1]} : vector<2x128xf32> to vector<2x64xf32>
    %272 = vector.extract_strided_slice %261 {offsets = [0, 64], sizes = [2, 64], strides = [1, 1]} : vector<2x128xf32> to vector<2x64xf32>
    %273 = arith.addf %271, %272 : vector<2x64xf32>
    %274 = vector.extract_strided_slice %267 {offsets = [0, 0], sizes = [2, 16], strides = [1, 1]} : vector<2x64xf32> to vector<2x16xf32>
    %275 = arith.negf %274 : vector<2x16xf32>
    %276 = math.exp %275 : vector<2x16xf32>
    %cst_78 = arith.constant 1.000000e+00 : f32
    %277 = vector.broadcast %cst_78 : f32 to vector<2x16xf32>
    %278 = arith.addf %277, %276 : vector<2x16xf32>
    %279 = arith.divf %277, %278 : vector<2x16xf32>
    %280 = vector.extract_strided_slice %267 {offsets = [0, 16], sizes = [2, 16], strides = [1, 1]} : vector<2x64xf32> to vector<2x16xf32>
    %281 = arith.negf %280 : vector<2x16xf32>
    %282 = math.exp %281 : vector<2x16xf32>
    %cst_79 = arith.constant 1.000000e+00 : f32
    %283 = vector.broadcast %cst_79 : f32 to vector<2x16xf32>
    %284 = arith.addf %283, %282 : vector<2x16xf32>
    %285 = arith.divf %283, %284 : vector<2x16xf32>
    %286 = vector.extract_strided_slice %267 {offsets = [0, 32], sizes = [2, 16], strides = [1, 1]} : vector<2x64xf32> to vector<2x16xf32>
    %287 = math.tanh %286 : vector<2x16xf32>
    %288 = vector.extract_strided_slice %267 {offsets = [0, 48], sizes = [2, 16], strides = [1, 1]} : vector<2x64xf32> to vector<2x16xf32>
    %289 = arith.negf %288 : vector<2x16xf32>
    %290 = math.exp %289 : vector<2x16xf32>
    %cst_80 = arith.constant 1.000000e+00 : f32
    %291 = vector.broadcast %cst_80 : f32 to vector<2x16xf32>
    %292 = arith.addf %291, %290 : vector<2x16xf32>
    %293 = arith.divf %291, %292 : vector<2x16xf32>
    %294 = arith.mulf %285, %223 : vector<2x16xf32>
    %295 = arith.mulf %279, %287 : vector<2x16xf32>
    %296 = arith.addf %294, %295 : vector<2x16xf32>
    %297 = math.tanh %296 : vector<2x16xf32>
    %298 = arith.mulf %293, %297 : vector<2x16xf32>
    %299 = vector.extract_strided_slice %273 {offsets = [0, 0], sizes = [2, 16], strides = [1, 1]} : vector<2x64xf32> to vector<2x16xf32>
    %300 = arith.negf %299 : vector<2x16xf32>
    %301 = math.exp %300 : vector<2x16xf32>
    %cst_81 = arith.constant 1.000000e+00 : f32
    %302 = vector.broadcast %cst_81 : f32 to vector<2x16xf32>
    %303 = arith.addf %302, %301 : vector<2x16xf32>
    %304 = arith.divf %302, %303 : vector<2x16xf32>
    %305 = vector.extract_strided_slice %273 {offsets = [0, 16], sizes = [2, 16], strides = [1, 1]} : vector<2x64xf32> to vector<2x16xf32>
    %306 = arith.negf %305 : vector<2x16xf32>
    %307 = math.exp %306 : vector<2x16xf32>
    %cst_82 = arith.constant 1.000000e+00 : f32
    %308 = vector.broadcast %cst_82 : f32 to vector<2x16xf32>
    %309 = arith.addf %308, %307 : vector<2x16xf32>
    %310 = arith.divf %308, %309 : vector<2x16xf32>
    %311 = vector.extract_strided_slice %273 {offsets = [0, 32], sizes = [2, 16], strides = [1, 1]} : vector<2x64xf32> to vector<2x16xf32>
    %312 = math.tanh %311 : vector<2x16xf32>
    %313 = vector.extract_strided_slice %273 {offsets = [0, 48], sizes = [2, 16], strides = [1, 1]} : vector<2x64xf32> to vector<2x16xf32>
    %314 = arith.negf %313 : vector<2x16xf32>
    %315 = math.exp %314 : vector<2x16xf32>
    %cst_83 = arith.constant 1.000000e+00 : f32
    %316 = vector.broadcast %cst_83 : f32 to vector<2x16xf32>
    %317 = arith.addf %316, %315 : vector<2x16xf32>
    %318 = arith.divf %316, %317 : vector<2x16xf32>
    %319 = arith.mulf %310, %248 : vector<2x16xf32>
    %320 = arith.mulf %304, %312 : vector<2x16xf32>
    %321 = arith.addf %319, %320 : vector<2x16xf32>
    %322 = math.tanh %321 : vector<2x16xf32>
    %323 = arith.mulf %318, %322 : vector<2x16xf32>
    %324 = arith.index_cast %c3_i32 : i32 to index
    %c0_84 = arith.constant 0 : index
    %c0_85 = arith.constant 0 : index
    %325 = vector.load %arg6[%324, %c0_84, %c0_85] : memref<8x2x16xf32, #tpu.memory_space<vmem>>, vector<1x2x16xf32>
    %326 = vector.shape_cast %325 : vector<1x2x16xf32> to vector<2x16xf32>
    %327 = vector.shape_cast %298 : vector<2x16xf32> to vector<1x2x16xf32>
    tpu.vector_store %arg6[%324, %c0_84, %c0_85], %327 {strides = array<i32>} : memref<8x2x16xf32, #tpu.memory_space<vmem>>, vector<1x2x16xf32>,
    %328 = arith.index_cast %259 : i32 to index
    %c0_86 = arith.constant 0 : index
    %c0_87 = arith.constant 0 : index
    %329 = vector.load %arg7[%328, %c0_86, %c0_87] : memref<8x2x16xf32, #tpu.memory_space<vmem>>, vector<1x2x16xf32>
    %330 = vector.shape_cast %329 : vector<1x2x16xf32> to vector<2x16xf32>
    %331 = vector.shape_cast %323 : vector<2x16xf32> to vector<1x2x16xf32>
    tpu.vector_store %arg7[%328, %c0_86, %c0_87], %331 {strides = array<i32>} : memref<8x2x16xf32, #tpu.memory_space<vmem>>, vector<1x2x16xf32>,
    %c4_i32 = arith.constant 4 : i32
    %c7_i32_88 = arith.constant 7 : i32
    %332 = arith.subi %c7_i32_88, %c4_i32 : i32
    %333 = tpu.concatenate %298, %323 in 1 : vector<2x16xf32>, vector<2x16xf32> -> vector<2x32xf32>
    %cst_89 = arith.constant dense<0.000000e+00> : vector<2x128xf32>
    %334 = tpu.matmul %333, %38, %cst_89 {dimension_numbers = #tpu.dot_dimension_numbers<[1], [0], [0], [1], [0, 0, 1, 1], [], []>} : vector<2x32xf32>, vector<32x128xf32>, vector<2x128xf32> -> vector<2x128xf32>
    %335 = arith.index_cast %c4_i32 : i32 to index
    %c0_90 = arith.constant 0 : index
    %c0_91 = arith.constant 0 : index
    %336 = vector.load %arg5[%335, %c0_90, %c0_91] : memref<8x2x128xf32, #tpu.memory_space<vmem>>, vector<1x2x128xf32>
    %337 = vector.shape_cast %336 : vector<1x2x128xf32> to vector<2x128xf32>
    %338 = vector.extract_strided_slice %337 {offsets = [0, 0], sizes = [2, 64], strides = [1, 1]} : vector<2x128xf32> to vector<2x64xf32>
    %339 = vector.extract_strided_slice %334 {offsets = [0, 0], sizes = [2, 64], strides = [1, 1]} : vector<2x128xf32> to vector<2x64xf32>
    %340 = arith.addf %338, %339 : vector<2x64xf32>
    %341 = arith.index_cast %332 : i32 to index
    %c0_92 = arith.constant 0 : index
    %c0_93 = arith.constant 0 : index
    %342 = vector.load %arg5[%341, %c0_92, %c0_93] : memref<8x2x128xf32, #tpu.memory_space<vmem>>, vector<1x2x128xf32>
    %343 = vector.shape_cast %342 : vector<1x2x128xf32> to vector<2x128xf32>
    %344 = vector.extract_strided_slice %343 {offsets = [0, 64], sizes = [2, 64], strides = [1, 1]} : vector<2x128xf32> to vector<2x64xf32>
    %345 = vector.extract_strided_slice %334 {offsets = [0, 64], sizes = [2, 64], strides = [1, 1]} : vector<2x128xf32> to vector<2x64xf32>
    %346 = arith.addf %344, %345 : vector<2x64xf32>
    %347 = vector.extract_strided_slice %340 {offsets = [0, 0], sizes = [2, 16], strides = [1, 1]} : vector<2x64xf32> to vector<2x16xf32>
    %348 = arith.negf %347 : vector<2x16xf32>
    %349 = math.exp %348 : vector<2x16xf32>
    %cst_94 = arith.constant 1.000000e+00 : f32
    %350 = vector.broadcast %cst_94 : f32 to vector<2x16xf32>
    %351 = arith.addf %350, %349 : vector<2x16xf32>
    %352 = arith.divf %350, %351 : vector<2x16xf32>
    %353 = vector.extract_strided_slice %340 {offsets = [0, 16], sizes = [2, 16], strides = [1, 1]} : vector<2x64xf32> to vector<2x16xf32>
    %354 = arith.negf %353 : vector<2x16xf32>
    %355 = math.exp %354 : vector<2x16xf32>
    %cst_95 = arith.constant 1.000000e+00 : f32
    %356 = vector.broadcast %cst_95 : f32 to vector<2x16xf32>
    %357 = arith.addf %356, %355 : vector<2x16xf32>
    %358 = arith.divf %356, %357 : vector<2x16xf32>
    %359 = vector.extract_strided_slice %340 {offsets = [0, 32], sizes = [2, 16], strides = [1, 1]} : vector<2x64xf32> to vector<2x16xf32>
    %360 = math.tanh %359 : vector<2x16xf32>
    %361 = vector.extract_strided_slice %340 {offsets = [0, 48], sizes = [2, 16], strides = [1, 1]} : vector<2x64xf32> to vector<2x16xf32>
    %362 = arith.negf %361 : vector<2x16xf32>
    %363 = math.exp %362 : vector<2x16xf32>
    %cst_96 = arith.constant 1.000000e+00 : f32
    %364 = vector.broadcast %cst_96 : f32 to vector<2x16xf32>
    %365 = arith.addf %364, %363 : vector<2x16xf32>
    %366 = arith.divf %364, %365 : vector<2x16xf32>
    %367 = arith.mulf %358, %296 : vector<2x16xf32>
    %368 = arith.mulf %352, %360 : vector<2x16xf32>
    %369 = arith.addf %367, %368 : vector<2x16xf32>
    %370 = math.tanh %369 : vector<2x16xf32>
    %371 = arith.mulf %366, %370 : vector<2x16xf32>
    %372 = vector.extract_strided_slice %346 {offsets = [0, 0], sizes = [2, 16], strides = [1, 1]} : vector<2x64xf32> to vector<2x16xf32>
    %373 = arith.negf %372 : vector<2x16xf32>
    %374 = math.exp %373 : vector<2x16xf32>
    %cst_97 = arith.constant 1.000000e+00 : f32
    %375 = vector.broadcast %cst_97 : f32 to vector<2x16xf32>
    %376 = arith.addf %375, %374 : vector<2x16xf32>
    %377 = arith.divf %375, %376 : vector<2x16xf32>
    %378 = vector.extract_strided_slice %346 {offsets = [0, 16], sizes = [2, 16], strides = [1, 1]} : vector<2x64xf32> to vector<2x16xf32>
    %379 = arith.negf %378 : vector<2x16xf32>
    %380 = math.exp %379 : vector<2x16xf32>
    %cst_98 = arith.constant 1.000000e+00 : f32
    %381 = vector.broadcast %cst_98 : f32 to vector<2x16xf32>
    %382 = arith.addf %381, %380 : vector<2x16xf32>
    %383 = arith.divf %381, %382 : vector<2x16xf32>
    %384 = vector.extract_strided_slice %346 {offsets = [0, 32], sizes = [2, 16], strides = [1, 1]} : vector<2x64xf32> to vector<2x16xf32>
    %385 = math.tanh %384 : vector<2x16xf32>
    %386 = vector.extract_strided_slice %346 {offsets = [0, 48], sizes = [2, 16], strides = [1, 1]} : vector<2x64xf32> to vector<2x16xf32>
    %387 = arith.negf %386 : vector<2x16xf32>
    %388 = math.exp %387 : vector<2x16xf32>
    %cst_99 = arith.constant 1.000000e+00 : f32
    %389 = vector.broadcast %cst_99 : f32 to vector<2x16xf32>
    %390 = arith.addf %389, %388 : vector<2x16xf32>
    %391 = arith.divf %389, %390 : vector<2x16xf32>
    %392 = arith.mulf %383, %321 : vector<2x16xf32>
    %393 = arith.mulf %377, %385 : vector<2x16xf32>
    %394 = arith.addf %392, %393 : vector<2x16xf32>
    %395 = math.tanh %394 : vector<2x16xf32>
    %396 = arith.mulf %391, %395 : vector<2x16xf32>
    %397 = arith.index_cast %c4_i32 : i32 to index
    %c0_100 = arith.constant 0 : index
    %c0_101 = arith.constant 0 : index
    %398 = vector.load %arg6[%397, %c0_100, %c0_101] : memref<8x2x16xf32, #tpu.memory_space<vmem>>, vector<1x2x16xf32>
    %399 = vector.shape_cast %398 : vector<1x2x16xf32> to vector<2x16xf32>
    %400 = vector.shape_cast %371 : vector<2x16xf32> to vector<1x2x16xf32>
    tpu.vector_store %arg6[%397, %c0_100, %c0_101], %400 {strides = array<i32>} : memref<8x2x16xf32, #tpu.memory_space<vmem>>, vector<1x2x16xf32>,
    %401 = arith.index_cast %332 : i32 to index
    %c0_102 = arith.constant 0 : index
    %c0_103 = arith.constant 0 : index
    %402 = vector.load %arg7[%401, %c0_102, %c0_103] : memref<8x2x16xf32, #tpu.memory_space<vmem>>, vector<1x2x16xf32>
    %403 = vector.shape_cast %402 : vector<1x2x16xf32> to vector<2x16xf32>
    %404 = vector.shape_cast %396 : vector<2x16xf32> to vector<1x2x16xf32>
    tpu.vector_store %arg7[%401, %c0_102, %c0_103], %404 {strides = array<i32>} : memref<8x2x16xf32, #tpu.memory_space<vmem>>, vector<1x2x16xf32>,
    %c5_i32 = arith.constant 5 : i32
    %c7_i32_104 = arith.constant 7 : i32
    %405 = arith.subi %c7_i32_104, %c5_i32 : i32
    %406 = tpu.concatenate %371, %396 in 1 : vector<2x16xf32>, vector<2x16xf32> -> vector<2x32xf32>
    %cst_105 = arith.constant dense<0.000000e+00> : vector<2x128xf32>
    %407 = tpu.matmul %406, %38, %cst_105 {dimension_numbers = #tpu.dot_dimension_numbers<[1], [0], [0], [1], [0, 0, 1, 1], [], []>} : vector<2x32xf32>, vector<32x128xf32>, vector<2x128xf32> -> vector<2x128xf32>
    %408 = arith.index_cast %c5_i32 : i32 to index
    %c0_106 = arith.constant 0 : index
    %c0_107 = arith.constant 0 : index
    %409 = vector.load %arg5[%408, %c0_106, %c0_107] : memref<8x2x128xf32, #tpu.memory_space<vmem>>, vector<1x2x128xf32>
    %410 = vector.shape_cast %409 : vector<1x2x128xf32> to vector<2x128xf32>
    %411 = vector.extract_strided_slice %410 {offsets = [0, 0], sizes = [2, 64], strides = [1, 1]} : vector<2x128xf32> to vector<2x64xf32>
    %412 = vector.extract_strided_slice %407 {offsets = [0, 0], sizes = [2, 64], strides = [1, 1]} : vector<2x128xf32> to vector<2x64xf32>
    %413 = arith.addf %411, %412 : vector<2x64xf32>
    %414 = arith.index_cast %405 : i32 to index
    %c0_108 = arith.constant 0 : index
    %c0_109 = arith.constant 0 : index
    %415 = vector.load %arg5[%414, %c0_108, %c0_109] : memref<8x2x128xf32, #tpu.memory_space<vmem>>, vector<1x2x128xf32>
    %416 = vector.shape_cast %415 : vector<1x2x128xf32> to vector<2x128xf32>
    %417 = vector.extract_strided_slice %416 {offsets = [0, 64], sizes = [2, 64], strides = [1, 1]} : vector<2x128xf32> to vector<2x64xf32>
    %418 = vector.extract_strided_slice %407 {offsets = [0, 64], sizes = [2, 64], strides = [1, 1]} : vector<2x128xf32> to vector<2x64xf32>
    %419 = arith.addf %417, %418 : vector<2x64xf32>
    %420 = vector.extract_strided_slice %413 {offsets = [0, 0], sizes = [2, 16], strides = [1, 1]} : vector<2x64xf32> to vector<2x16xf32>
    %421 = arith.negf %420 : vector<2x16xf32>
    %422 = math.exp %421 : vector<2x16xf32>
    %cst_110 = arith.constant 1.000000e+00 : f32
    %423 = vector.broadcast %cst_110 : f32 to vector<2x16xf32>
    %424 = arith.addf %423, %422 : vector<2x16xf32>
    %425 = arith.divf %423, %424 : vector<2x16xf32>
    %426 = vector.extract_strided_slice %413 {offsets = [0, 16], sizes = [2, 16], strides = [1, 1]} : vector<2x64xf32> to vector<2x16xf32>
    %427 = arith.negf %426 : vector<2x16xf32>
    %428 = math.exp %427 : vector<2x16xf32>
    %cst_111 = arith.constant 1.000000e+00 : f32
    %429 = vector.broadcast %cst_111 : f32 to vector<2x16xf32>
    %430 = arith.addf %429, %428 : vector<2x16xf32>
    %431 = arith.divf %429, %430 : vector<2x16xf32>
    %432 = vector.extract_strided_slice %413 {offsets = [0, 32], sizes = [2, 16], strides = [1, 1]} : vector<2x64xf32> to vector<2x16xf32>
    %433 = math.tanh %432 : vector<2x16xf32>
    %434 = vector.extract_strided_slice %413 {offsets = [0, 48], sizes = [2, 16], strides = [1, 1]} : vector<2x64xf32> to vector<2x16xf32>
    %435 = arith.negf %434 : vector<2x16xf32>
    %436 = math.exp %435 : vector<2x16xf32>
    %cst_112 = arith.constant 1.000000e+00 : f32
    %437 = vector.broadcast %cst_112 : f32 to vector<2x16xf32>
    %438 = arith.addf %437, %436 : vector<2x16xf32>
    %439 = arith.divf %437, %438 : vector<2x16xf32>
    %440 = arith.mulf %431, %369 : vector<2x16xf32>
    %441 = arith.mulf %425, %433 : vector<2x16xf32>
    %442 = arith.addf %440, %441 : vector<2x16xf32>
    %443 = math.tanh %442 : vector<2x16xf32>
    %444 = arith.mulf %439, %443 : vector<2x16xf32>
    %445 = vector.extract_strided_slice %419 {offsets = [0, 0], sizes = [2, 16], strides = [1, 1]} : vector<2x64xf32> to vector<2x16xf32>
    %446 = arith.negf %445 : vector<2x16xf32>
    %447 = math.exp %446 : vector<2x16xf32>
    %cst_113 = arith.constant 1.000000e+00 : f32
    %448 = vector.broadcast %cst_113 : f32 to vector<2x16xf32>
    %449 = arith.addf %448, %447 : vector<2x16xf32>
    %450 = arith.divf %448, %449 : vector<2x16xf32>
    %451 = vector.extract_strided_slice %419 {offsets = [0, 16], sizes = [2, 16], strides = [1, 1]} : vector<2x64xf32> to vector<2x16xf32>
    %452 = arith.negf %451 : vector<2x16xf32>
    %453 = math.exp %452 : vector<2x16xf32>
    %cst_114 = arith.constant 1.000000e+00 : f32
    %454 = vector.broadcast %cst_114 : f32 to vector<2x16xf32>
    %455 = arith.addf %454, %453 : vector<2x16xf32>
    %456 = arith.divf %454, %455 : vector<2x16xf32>
    %457 = vector.extract_strided_slice %419 {offsets = [0, 32], sizes = [2, 16], strides = [1, 1]} : vector<2x64xf32> to vector<2x16xf32>
    %458 = math.tanh %457 : vector<2x16xf32>
    %459 = vector.extract_strided_slice %419 {offsets = [0, 48], sizes = [2, 16], strides = [1, 1]} : vector<2x64xf32> to vector<2x16xf32>
    %460 = arith.negf %459 : vector<2x16xf32>
    %461 = math.exp %460 : vector<2x16xf32>
    %cst_115 = arith.constant 1.000000e+00 : f32
    %462 = vector.broadcast %cst_115 : f32 to vector<2x16xf32>
    %463 = arith.addf %462, %461 : vector<2x16xf32>
    %464 = arith.divf %462, %463 : vector<2x16xf32>
    %465 = arith.mulf %456, %394 : vector<2x16xf32>
    %466 = arith.mulf %450, %458 : vector<2x16xf32>
    %467 = arith.addf %465, %466 : vector<2x16xf32>
    %468 = math.tanh %467 : vector<2x16xf32>
    %469 = arith.mulf %464, %468 : vector<2x16xf32>
    %470 = arith.index_cast %c5_i32 : i32 to index
    %c0_116 = arith.constant 0 : index
    %c0_117 = arith.constant 0 : index
    %471 = vector.load %arg6[%470, %c0_116, %c0_117] : memref<8x2x16xf32, #tpu.memory_space<vmem>>, vector<1x2x16xf32>
    %472 = vector.shape_cast %471 : vector<1x2x16xf32> to vector<2x16xf32>
    %473 = vector.shape_cast %444 : vector<2x16xf32> to vector<1x2x16xf32>
    tpu.vector_store %arg6[%470, %c0_116, %c0_117], %473 {strides = array<i32>} : memref<8x2x16xf32, #tpu.memory_space<vmem>>, vector<1x2x16xf32>,
    %474 = arith.index_cast %405 : i32 to index
    %c0_118 = arith.constant 0 : index
    %c0_119 = arith.constant 0 : index
    %475 = vector.load %arg7[%474, %c0_118, %c0_119] : memref<8x2x16xf32, #tpu.memory_space<vmem>>, vector<1x2x16xf32>
    %476 = vector.shape_cast %475 : vector<1x2x16xf32> to vector<2x16xf32>
    %477 = vector.shape_cast %469 : vector<2x16xf32> to vector<1x2x16xf32>
    tpu.vector_store %arg7[%474, %c0_118, %c0_119], %477 {strides = array<i32>} : memref<8x2x16xf32, #tpu.memory_space<vmem>>, vector<1x2x16xf32>,
    %c6_i32 = arith.constant 6 : i32
    %c7_i32_120 = arith.constant 7 : i32
    %478 = arith.subi %c7_i32_120, %c6_i32 : i32
    %479 = tpu.concatenate %444, %469 in 1 : vector<2x16xf32>, vector<2x16xf32> -> vector<2x32xf32>
    %cst_121 = arith.constant dense<0.000000e+00> : vector<2x128xf32>
    %480 = tpu.matmul %479, %38, %cst_121 {dimension_numbers = #tpu.dot_dimension_numbers<[1], [0], [0], [1], [0, 0, 1, 1], [], []>} : vector<2x32xf32>, vector<32x128xf32>, vector<2x128xf32> -> vector<2x128xf32>
    %481 = arith.index_cast %c6_i32 : i32 to index
    %c0_122 = arith.constant 0 : index
    %c0_123 = arith.constant 0 : index
    %482 = vector.load %arg5[%481, %c0_122, %c0_123] : memref<8x2x128xf32, #tpu.memory_space<vmem>>, vector<1x2x128xf32>
    %483 = vector.shape_cast %482 : vector<1x2x128xf32> to vector<2x128xf32>
    %484 = vector.extract_strided_slice %483 {offsets = [0, 0], sizes = [2, 64], strides = [1, 1]} : vector<2x128xf32> to vector<2x64xf32>
    %485 = vector.extract_strided_slice %480 {offsets = [0, 0], sizes = [2, 64], strides = [1, 1]} : vector<2x128xf32> to vector<2x64xf32>
    %486 = arith.addf %484, %485 : vector<2x64xf32>
    %487 = arith.index_cast %478 : i32 to index
    %c0_124 = arith.constant 0 : index
    %c0_125 = arith.constant 0 : index
    %488 = vector.load %arg5[%487, %c0_124, %c0_125] : memref<8x2x128xf32, #tpu.memory_space<vmem>>, vector<1x2x128xf32>
    %489 = vector.shape_cast %488 : vector<1x2x128xf32> to vector<2x128xf32>
    %490 = vector.extract_strided_slice %489 {offsets = [0, 64], sizes = [2, 64], strides = [1, 1]} : vector<2x128xf32> to vector<2x64xf32>
    %491 = vector.extract_strided_slice %480 {offsets = [0, 64], sizes = [2, 64], strides = [1, 1]} : vector<2x128xf32> to vector<2x64xf32>
    %492 = arith.addf %490, %491 : vector<2x64xf32>
    %493 = vector.extract_strided_slice %486 {offsets = [0, 0], sizes = [2, 16], strides = [1, 1]} : vector<2x64xf32> to vector<2x16xf32>
    %494 = arith.negf %493 : vector<2x16xf32>
    %495 = math.exp %494 : vector<2x16xf32>
    %cst_126 = arith.constant 1.000000e+00 : f32
    %496 = vector.broadcast %cst_126 : f32 to vector<2x16xf32>
    %497 = arith.addf %496, %495 : vector<2x16xf32>
    %498 = arith.divf %496, %497 : vector<2x16xf32>
    %499 = vector.extract_strided_slice %486 {offsets = [0, 16], sizes = [2, 16], strides = [1, 1]} : vector<2x64xf32> to vector<2x16xf32>
    %500 = arith.negf %499 : vector<2x16xf32>
    %501 = math.exp %500 : vector<2x16xf32>
    %cst_127 = arith.constant 1.000000e+00 : f32
    %502 = vector.broadcast %cst_127 : f32 to vector<2x16xf32>
    %503 = arith.addf %502, %501 : vector<2x16xf32>
    %504 = arith.divf %502, %503 : vector<2x16xf32>
    %505 = vector.extract_strided_slice %486 {offsets = [0, 32], sizes = [2, 16], strides = [1, 1]} : vector<2x64xf32> to vector<2x16xf32>
    %506 = math.tanh %505 : vector<2x16xf32>
    %507 = vector.extract_strided_slice %486 {offsets = [0, 48], sizes = [2, 16], strides = [1, 1]} : vector<2x64xf32> to vector<2x16xf32>
    %508 = arith.negf %507 : vector<2x16xf32>
    %509 = math.exp %508 : vector<2x16xf32>
    %cst_128 = arith.constant 1.000000e+00 : f32
    %510 = vector.broadcast %cst_128 : f32 to vector<2x16xf32>
    %511 = arith.addf %510, %509 : vector<2x16xf32>
    %512 = arith.divf %510, %511 : vector<2x16xf32>
    %513 = arith.mulf %504, %442 : vector<2x16xf32>
    %514 = arith.mulf %498, %506 : vector<2x16xf32>
    %515 = arith.addf %513, %514 : vector<2x16xf32>
    %516 = math.tanh %515 : vector<2x16xf32>
    %517 = arith.mulf %512, %516 : vector<2x16xf32>
    %518 = vector.extract_strided_slice %492 {offsets = [0, 0], sizes = [2, 16], strides = [1, 1]} : vector<2x64xf32> to vector<2x16xf32>
    %519 = arith.negf %518 : vector<2x16xf32>
    %520 = math.exp %519 : vector<2x16xf32>
    %cst_129 = arith.constant 1.000000e+00 : f32
    %521 = vector.broadcast %cst_129 : f32 to vector<2x16xf32>
    %522 = arith.addf %521, %520 : vector<2x16xf32>
    %523 = arith.divf %521, %522 : vector<2x16xf32>
    %524 = vector.extract_strided_slice %492 {offsets = [0, 16], sizes = [2, 16], strides = [1, 1]} : vector<2x64xf32> to vector<2x16xf32>
    %525 = arith.negf %524 : vector<2x16xf32>
    %526 = math.exp %525 : vector<2x16xf32>
    %cst_130 = arith.constant 1.000000e+00 : f32
    %527 = vector.broadcast %cst_130 : f32 to vector<2x16xf32>
    %528 = arith.addf %527, %526 : vector<2x16xf32>
    %529 = arith.divf %527, %528 : vector<2x16xf32>
    %530 = vector.extract_strided_slice %492 {offsets = [0, 32], sizes = [2, 16], strides = [1, 1]} : vector<2x64xf32> to vector<2x16xf32>
    %531 = math.tanh %530 : vector<2x16xf32>
    %532 = vector.extract_strided_slice %492 {offsets = [0, 48], sizes = [2, 16], strides = [1, 1]} : vector<2x64xf32> to vector<2x16xf32>
    %533 = arith.negf %532 : vector<2x16xf32>
    %534 = math.exp %533 : vector<2x16xf32>
    %cst_131 = arith.constant 1.000000e+00 : f32
    %535 = vector.broadcast %cst_131 : f32 to vector<2x16xf32>
    %536 = arith.addf %535, %534 : vector<2x16xf32>
    %537 = arith.divf %535, %536 : vector<2x16xf32>
    %538 = arith.mulf %529, %467 : vector<2x16xf32>
    %539 = arith.mulf %523, %531 : vector<2x16xf32>
    %540 = arith.addf %538, %539 : vector<2x16xf32>
    %541 = math.tanh %540 : vector<2x16xf32>
    %542 = arith.mulf %537, %541 : vector<2x16xf32>
    %543 = arith.index_cast %c6_i32 : i32 to index
    %c0_132 = arith.constant 0 : index
    %c0_133 = arith.constant 0 : index
    %544 = vector.load %arg6[%543, %c0_132, %c0_133] : memref<8x2x16xf32, #tpu.memory_space<vmem>>, vector<1x2x16xf32>
    %545 = vector.shape_cast %544 : vector<1x2x16xf32> to vector<2x16xf32>
    %546 = vector.shape_cast %517 : vector<2x16xf32> to vector<1x2x16xf32>
    tpu.vector_store %arg6[%543, %c0_132, %c0_133], %546 {strides = array<i32>} : memref<8x2x16xf32, #tpu.memory_space<vmem>>, vector<1x2x16xf32>,
    %547 = arith.index_cast %478 : i32 to index
    %c0_134 = arith.constant 0 : index
    %c0_135 = arith.constant 0 : index
    %548 = vector.load %arg7[%547, %c0_134, %c0_135] : memref<8x2x16xf32, #tpu.memory_space<vmem>>, vector<1x2x16xf32>
    %549 = vector.shape_cast %548 : vector<1x2x16xf32> to vector<2x16xf32>
    %550 = vector.shape_cast %542 : vector<2x16xf32> to vector<1x2x16xf32>
    tpu.vector_store %arg7[%547, %c0_134, %c0_135], %550 {strides = array<i32>} : memref<8x2x16xf32, #tpu.memory_space<vmem>>, vector<1x2x16xf32>,
    %c7_i32_136 = arith.constant 7 : i32
    %c7_i32_137 = arith.constant 7 : i32
    %551 = arith.subi %c7_i32_137, %c7_i32_136 : i32
    %552 = tpu.concatenate %517, %542 in 1 : vector<2x16xf32>, vector<2x16xf32> -> vector<2x32xf32>
    %cst_138 = arith.constant dense<0.000000e+00> : vector<2x128xf32>
    %553 = tpu.matmul %552, %38, %cst_138 {dimension_numbers = #tpu.dot_dimension_numbers<[1], [0], [0], [1], [0, 0, 1, 1], [], []>} : vector<2x32xf32>, vector<32x128xf32>, vector<2x128xf32> -> vector<2x128xf32>
    %554 = arith.index_cast %c7_i32_136 : i32 to index
    %c0_139 = arith.constant 0 : index
    %c0_140 = arith.constant 0 : index
    %555 = vector.load %arg5[%554, %c0_139, %c0_140] : memref<8x2x128xf32, #tpu.memory_space<vmem>>, vector<1x2x128xf32>
    %556 = vector.shape_cast %555 : vector<1x2x128xf32> to vector<2x128xf32>
    %557 = vector.extract_strided_slice %556 {offsets = [0, 0], sizes = [2, 64], strides = [1, 1]} : vector<2x128xf32> to vector<2x64xf32>
    %558 = vector.extract_strided_slice %553 {offsets = [0, 0], sizes = [2, 64], strides = [1, 1]} : vector<2x128xf32> to vector<2x64xf32>
    %559 = arith.addf %557, %558 : vector<2x64xf32>
    %560 = arith.index_cast %551 : i32 to index
    %c0_141 = arith.constant 0 : index
    %c0_142 = arith.constant 0 : index
    %561 = vector.load %arg5[%560, %c0_141, %c0_142] : memref<8x2x128xf32, #tpu.memory_space<vmem>>, vector<1x2x128xf32>
    %562 = vector.shape_cast %561 : vector<1x2x128xf32> to vector<2x128xf32>
    %563 = vector.extract_strided_slice %562 {offsets = [0, 64], sizes = [2, 64], strides = [1, 1]} : vector<2x128xf32> to vector<2x64xf32>
    %564 = vector.extract_strided_slice %553 {offsets = [0, 64], sizes = [2, 64], strides = [1, 1]} : vector<2x128xf32> to vector<2x64xf32>
    %565 = arith.addf %563, %564 : vector<2x64xf32>
    %566 = vector.extract_strided_slice %559 {offsets = [0, 0], sizes = [2, 16], strides = [1, 1]} : vector<2x64xf32> to vector<2x16xf32>
    %567 = arith.negf %566 : vector<2x16xf32>
    %568 = math.exp %567 : vector<2x16xf32>
    %cst_143 = arith.constant 1.000000e+00 : f32
    %569 = vector.broadcast %cst_143 : f32 to vector<2x16xf32>
    %570 = arith.addf %569, %568 : vector<2x16xf32>
    %571 = arith.divf %569, %570 : vector<2x16xf32>
    %572 = vector.extract_strided_slice %559 {offsets = [0, 16], sizes = [2, 16], strides = [1, 1]} : vector<2x64xf32> to vector<2x16xf32>
    %573 = arith.negf %572 : vector<2x16xf32>
    %574 = math.exp %573 : vector<2x16xf32>
    %cst_144 = arith.constant 1.000000e+00 : f32
    %575 = vector.broadcast %cst_144 : f32 to vector<2x16xf32>
    %576 = arith.addf %575, %574 : vector<2x16xf32>
    %577 = arith.divf %575, %576 : vector<2x16xf32>
    %578 = vector.extract_strided_slice %559 {offsets = [0, 32], sizes = [2, 16], strides = [1, 1]} : vector<2x64xf32> to vector<2x16xf32>
    %579 = math.tanh %578 : vector<2x16xf32>
    %580 = vector.extract_strided_slice %559 {offsets = [0, 48], sizes = [2, 16], strides = [1, 1]} : vector<2x64xf32> to vector<2x16xf32>
    %581 = arith.negf %580 : vector<2x16xf32>
    %582 = math.exp %581 : vector<2x16xf32>
    %cst_145 = arith.constant 1.000000e+00 : f32
    %583 = vector.broadcast %cst_145 : f32 to vector<2x16xf32>
    %584 = arith.addf %583, %582 : vector<2x16xf32>
    %585 = arith.divf %583, %584 : vector<2x16xf32>
    %586 = arith.mulf %577, %515 : vector<2x16xf32>
    %587 = arith.mulf %571, %579 : vector<2x16xf32>
    %588 = arith.addf %586, %587 : vector<2x16xf32>
    %589 = math.tanh %588 : vector<2x16xf32>
    %590 = arith.mulf %585, %589 : vector<2x16xf32>
    %591 = vector.extract_strided_slice %565 {offsets = [0, 0], sizes = [2, 16], strides = [1, 1]} : vector<2x64xf32> to vector<2x16xf32>
    %592 = arith.negf %591 : vector<2x16xf32>
    %593 = math.exp %592 : vector<2x16xf32>
    %cst_146 = arith.constant 1.000000e+00 : f32
    %594 = vector.broadcast %cst_146 : f32 to vector<2x16xf32>
    %595 = arith.addf %594, %593 : vector<2x16xf32>
    %596 = arith.divf %594, %595 : vector<2x16xf32>
    %597 = vector.extract_strided_slice %565 {offsets = [0, 16], sizes = [2, 16], strides = [1, 1]} : vector<2x64xf32> to vector<2x16xf32>
    %598 = arith.negf %597 : vector<2x16xf32>
    %599 = math.exp %598 : vector<2x16xf32>
    %cst_147 = arith.constant 1.000000e+00 : f32
    %600 = vector.broadcast %cst_147 : f32 to vector<2x16xf32>
    %601 = arith.addf %600, %599 : vector<2x16xf32>
    %602 = arith.divf %600, %601 : vector<2x16xf32>
    %603 = vector.extract_strided_slice %565 {offsets = [0, 32], sizes = [2, 16], strides = [1, 1]} : vector<2x64xf32> to vector<2x16xf32>
    %604 = math.tanh %603 : vector<2x16xf32>
    %605 = vector.extract_strided_slice %565 {offsets = [0, 48], sizes = [2, 16], strides = [1, 1]} : vector<2x64xf32> to vector<2x16xf32>
    %606 = arith.negf %605 : vector<2x16xf32>
    %607 = math.exp %606 : vector<2x16xf32>
    %cst_148 = arith.constant 1.000000e+00 : f32
    %608 = vector.broadcast %cst_148 : f32 to vector<2x16xf32>
    %609 = arith.addf %608, %607 : vector<2x16xf32>
    %610 = arith.divf %608, %609 : vector<2x16xf32>
    %611 = arith.mulf %602, %540 : vector<2x16xf32>
    %612 = arith.mulf %596, %604 : vector<2x16xf32>
    %613 = arith.addf %611, %612 : vector<2x16xf32>
    %614 = math.tanh %613 : vector<2x16xf32>
    %615 = arith.mulf %610, %614 : vector<2x16xf32>
    %616 = arith.index_cast %c7_i32_136 : i32 to index
    %c0_149 = arith.constant 0 : index
    %c0_150 = arith.constant 0 : index
    %617 = vector.load %arg6[%616, %c0_149, %c0_150] : memref<8x2x16xf32, #tpu.memory_space<vmem>>, vector<1x2x16xf32>
    %618 = vector.shape_cast %617 : vector<1x2x16xf32> to vector<2x16xf32>
    %619 = vector.shape_cast %590 : vector<2x16xf32> to vector<1x2x16xf32>
    tpu.vector_store %arg6[%616, %c0_149, %c0_150], %619 {strides = array<i32>} : memref<8x2x16xf32, #tpu.memory_space<vmem>>, vector<1x2x16xf32>,
    %620 = arith.index_cast %551 : i32 to index
    %c0_151 = arith.constant 0 : index
    %c0_152 = arith.constant 0 : index
    %621 = vector.load %arg7[%620, %c0_151, %c0_152] : memref<8x2x16xf32, #tpu.memory_space<vmem>>, vector<1x2x16xf32>
    %622 = vector.shape_cast %621 : vector<1x2x16xf32> to vector<2x16xf32>
    %623 = vector.shape_cast %615 : vector<2x16xf32> to vector<1x2x16xf32>
    tpu.vector_store %arg7[%620, %c0_151, %c0_152], %623 {strides = array<i32>} : memref<8x2x16xf32, #tpu.memory_space<vmem>>, vector<1x2x16xf32>,
    %c8_i32 = arith.constant 8 : i32
    %c0_153 = arith.constant 0 : index
    %c0_154 = arith.constant 0 : index
    %c0_155 = arith.constant 0 : index
    %624 = vector.load %arg6[%c0_153, %c0_154, %c0_155] : memref<8x2x16xf32, #tpu.memory_space<vmem>>, vector<8x2x16xf32>
    %c0_156 = arith.constant 0 : index
    %c0_157 = arith.constant 0 : index
    %c0_158 = arith.constant 0 : index
    %625 = vector.load %arg4[%c0_156, %c0_157, %c0_158] : memref<8x2x32xf32, #tpu.memory_space<vmem>>, vector<8x2x16xf32>
    tpu.vector_store %arg4[%c0_156, %c0_157, %c0_158], %624 {strides = array<i32>} : memref<8x2x32xf32, #tpu.memory_space<vmem>>, vector<8x2x16xf32>,
    %c0_159 = arith.constant 0 : index
    %c0_160 = arith.constant 0 : index
    %c0_161 = arith.constant 0 : index
    %626 = vector.load %arg7[%c0_159, %c0_160, %c0_161] : memref<8x2x16xf32, #tpu.memory_space<vmem>>, vector<8x2x16xf32>
    %c0_162 = arith.constant 0 : index
    %c0_163 = arith.constant 0 : index
    %c16 = arith.constant 16 : index
    %627 = vector.load %arg4[%c0_162, %c0_163, %c16] : memref<8x2x32xf32, #tpu.memory_space<vmem>>, vector<8x2x16xf32>
    tpu.vector_store %arg4[%c0_162, %c0_163, %c16], %626 {strides = array<i32>} : memref<8x2x32xf32, #tpu.memory_space<vmem>>, vector<8x2x16xf32>,
    return
  }
}

module attributes {stable_mosaic.version = 11 : i64} {
  func.func @_bilstm_layer_kernel(%arg0: memref<16x16xf32, #tpu.memory_space<vmem>>, %arg1: memref<16x128xf32, #tpu.memory_space<vmem>>, %arg2: memref<32x128xf32, #tpu.memory_space<vmem>>, %arg3: memref<1x128xf32, #tpu.memory_space<vmem>>, %arg4: memref<8x2x32xf32, #tpu.memory_space<vmem>>, %arg5: memref<8x2x128xf32, #tpu.memory_space<vmem>>, %arg6: memref<8x2x16xf32, #tpu.memory_space<vmem>>, %arg7: memref<8x2x16xf32, #tpu.memory_space<vmem>>) attributes {dimension_semantics = [], scalar_prefetch = 0 : i64, scratch_operands = 3 : i64, tpu.core_type = #tpu.core_type<tc>} {
    %c0 = arith.constant 0 : index
    %c0_0 = arith.constant 0 : index
    %0 = vector.load %arg0[%c0, %c0_0] : memref<16x16xf32, #tpu.memory_space<vmem>>, vector<16x16xf32>
    %c0_1 = arith.constant 0 : index
    %c0_2 = arith.constant 0 : index
    %1 = vector.load %arg1[%c0_1, %c0_2] : memref<16x128xf32, #tpu.memory_space<vmem>>, vector<16x128xf32>
    %cst = arith.constant dense<0.000000e+00> : vector<16x128xf32>
    %2 = tpu.matmul %0, %1, %cst {dimension_numbers = #tpu.dot_dimension_numbers<[1], [0], [0], [1], [0, 0, 1, 1], [], []>} : vector<16x16xf32>, vector<16x128xf32>, vector<16x128xf32> -> vector<16x128xf32>
    %c0_3 = arith.constant 0 : index
    %c0_4 = arith.constant 0 : index
    %3 = vector.load %arg3[%c0_3, %c0_4] : memref<1x128xf32, #tpu.memory_space<vmem>>, vector<1x128xf32>
    %4 = vector.broadcast %3 : vector<1x128xf32> to vector<16x128xf32>
    %5 = arith.addf %2, %4 : vector<16x128xf32>
    %6 = vector.extract_strided_slice %5 {offsets = [0, 0], sizes = [2, 128], strides = [1, 1]} : vector<16x128xf32> to vector<2x128xf32>
    %c0_5 = arith.constant 0 : index
    %c0_6 = arith.constant 0 : index
    %c0_7 = arith.constant 0 : index
    %7 = vector.load %arg5[%c0_5, %c0_6, %c0_7] : memref<8x2x128xf32, #tpu.memory_space<vmem>>, vector<1x2x128xf32>
    %8 = vector.shape_cast %7 : vector<1x2x128xf32> to vector<2x128xf32>
    %9 = vector.shape_cast %6 : vector<2x128xf32> to vector<1x2x128xf32>
    tpu.vector_store %arg5[%c0_5, %c0_6, %c0_7], %9 {strides = array<i32>} : memref<8x2x128xf32, #tpu.memory_space<vmem>>, vector<1x2x128xf32>,
    %10 = vector.extract_strided_slice %5 {offsets = [2, 0], sizes = [2, 128], strides = [1, 1]} : vector<16x128xf32> to vector<2x128xf32>
    %c1 = arith.constant 1 : index
    %c0_8 = arith.constant 0 : index
    %c0_9 = arith.constant 0 : index
    %11 = vector.load %arg5[%c1, %c0_8, %c0_9] : memref<8x2x128xf32, #tpu.memory_space<vmem>>, vector<1x2x128xf32>
    %12 = vector.shape_cast %11 : vector<1x2x128xf32> to vector<2x128xf32>
    %13 = vector.shape_cast %10 : vector<2x128xf32> to vector<1x2x128xf32>
    tpu.vector_store %arg5[%c1, %c0_8, %c0_9], %13 {strides = array<i32>} : memref<8x2x128xf32, #tpu.memory_space<vmem>>, vector<1x2x128xf32>,
    %14 = vector.extract_strided_slice %5 {offsets = [4, 0], sizes = [2, 128], strides = [1, 1]} : vector<16x128xf32> to vector<2x128xf32>
    %c2 = arith.constant 2 : index
    %c0_10 = arith.constant 0 : index
    %c0_11 = arith.constant 0 : index
    %15 = vector.load %arg5[%c2, %c0_10, %c0_11] : memref<8x2x128xf32, #tpu.memory_space<vmem>>, vector<1x2x128xf32>
    %16 = vector.shape_cast %15 : vector<1x2x128xf32> to vector<2x128xf32>
    %17 = vector.shape_cast %14 : vector<2x128xf32> to vector<1x2x128xf32>
    tpu.vector_store %arg5[%c2, %c0_10, %c0_11], %17 {strides = array<i32>} : memref<8x2x128xf32, #tpu.memory_space<vmem>>, vector<1x2x128xf32>,
    %18 = vector.extract_strided_slice %5 {offsets = [6, 0], sizes = [2, 128], strides = [1, 1]} : vector<16x128xf32> to vector<2x128xf32>
    %c3 = arith.constant 3 : index
    %c0_12 = arith.constant 0 : index
    %c0_13 = arith.constant 0 : index
    %19 = vector.load %arg5[%c3, %c0_12, %c0_13] : memref<8x2x128xf32, #tpu.memory_space<vmem>>, vector<1x2x128xf32>
    %20 = vector.shape_cast %19 : vector<1x2x128xf32> to vector<2x128xf32>
    %21 = vector.shape_cast %18 : vector<2x128xf32> to vector<1x2x128xf32>
    tpu.vector_store %arg5[%c3, %c0_12, %c0_13], %21 {strides = array<i32>} : memref<8x2x128xf32, #tpu.memory_space<vmem>>, vector<1x2x128xf32>,
    %22 = vector.extract_strided_slice %5 {offsets = [8, 0], sizes = [2, 128], strides = [1, 1]} : vector<16x128xf32> to vector<2x128xf32>
    %c4 = arith.constant 4 : index
    %c0_14 = arith.constant 0 : index
    %c0_15 = arith.constant 0 : index
    %23 = vector.load %arg5[%c4, %c0_14, %c0_15] : memref<8x2x128xf32, #tpu.memory_space<vmem>>, vector<1x2x128xf32>
    %24 = vector.shape_cast %23 : vector<1x2x128xf32> to vector<2x128xf32>
    %25 = vector.shape_cast %22 : vector<2x128xf32> to vector<1x2x128xf32>
    tpu.vector_store %arg5[%c4, %c0_14, %c0_15], %25 {strides = array<i32>} : memref<8x2x128xf32, #tpu.memory_space<vmem>>, vector<1x2x128xf32>,
    %26 = vector.extract_strided_slice %5 {offsets = [10, 0], sizes = [2, 128], strides = [1, 1]} : vector<16x128xf32> to vector<2x128xf32>
    %c5 = arith.constant 5 : index
    %c0_16 = arith.constant 0 : index
    %c0_17 = arith.constant 0 : index
    %27 = vector.load %arg5[%c5, %c0_16, %c0_17] : memref<8x2x128xf32, #tpu.memory_space<vmem>>, vector<1x2x128xf32>
    %28 = vector.shape_cast %27 : vector<1x2x128xf32> to vector<2x128xf32>
    %29 = vector.shape_cast %26 : vector<2x128xf32> to vector<1x2x128xf32>
    tpu.vector_store %arg5[%c5, %c0_16, %c0_17], %29 {strides = array<i32>} : memref<8x2x128xf32, #tpu.memory_space<vmem>>, vector<1x2x128xf32>,
    %30 = vector.extract_strided_slice %5 {offsets = [12, 0], sizes = [2, 128], strides = [1, 1]} : vector<16x128xf32> to vector<2x128xf32>
    %c6 = arith.constant 6 : index
    %c0_18 = arith.constant 0 : index
    %c0_19 = arith.constant 0 : index
    %31 = vector.load %arg5[%c6, %c0_18, %c0_19] : memref<8x2x128xf32, #tpu.memory_space<vmem>>, vector<1x2x128xf32>
    %32 = vector.shape_cast %31 : vector<1x2x128xf32> to vector<2x128xf32>
    %33 = vector.shape_cast %30 : vector<2x128xf32> to vector<1x2x128xf32>
    tpu.vector_store %arg5[%c6, %c0_18, %c0_19], %33 {strides = array<i32>} : memref<8x2x128xf32, #tpu.memory_space<vmem>>, vector<1x2x128xf32>,
    %34 = vector.extract_strided_slice %5 {offsets = [14, 0], sizes = [2, 128], strides = [1, 1]} : vector<16x128xf32> to vector<2x128xf32>
    %c7 = arith.constant 7 : index
    %c0_20 = arith.constant 0 : index
    %c0_21 = arith.constant 0 : index
    %35 = vector.load %arg5[%c7, %c0_20, %c0_21] : memref<8x2x128xf32, #tpu.memory_space<vmem>>, vector<1x2x128xf32>
    %36 = vector.shape_cast %35 : vector<1x2x128xf32> to vector<2x128xf32>
    %37 = vector.shape_cast %34 : vector<2x128xf32> to vector<1x2x128xf32>
    tpu.vector_store %arg5[%c7, %c0_20, %c0_21], %37 {strides = array<i32>} : memref<8x2x128xf32, #tpu.memory_space<vmem>>, vector<1x2x128xf32>,
    %c0_22 = arith.constant 0 : index
    %c0_23 = arith.constant 0 : index
    %38 = vector.load %arg2[%c0_22, %c0_23] : memref<32x128xf32, #tpu.memory_space<vmem>>, vector<32x128xf32>
    %cst_24 = arith.constant 0.000000e+00 : f32
    %39 = vector.broadcast %cst_24 : f32 to vector<2x16xf32>
    %c0_i32 = arith.constant 0 : i32
    %c7_i32 = arith.constant 7 : i32
    %40 = arith.subi %c7_i32, %c0_i32 : i32
    %41 = tpu.concatenate %39, %39 in 1 : vector<2x16xf32>, vector<2x16xf32> -> vector<2x32xf32>
    %cst_25 = arith.constant dense<0.000000e+00> : vector<2x128xf32>
    %42 = tpu.matmul %41, %38, %cst_25 {dimension_numbers = #tpu.dot_dimension_numbers<[1], [0], [0], [1], [0, 0, 1, 1], [], []>} : vector<2x32xf32>, vector<32x128xf32>, vector<2x128xf32> -> vector<2x128xf32>
    %43 = arith.index_cast %c0_i32 : i32 to index
    %c0_26 = arith.constant 0 : index
    %c0_27 = arith.constant 0 : index
    %44 = vector.load %arg5[%43, %c0_26, %c0_27] : memref<8x2x128xf32, #tpu.memory_space<vmem>>, vector<1x2x128xf32>
    %45 = vector.shape_cast %44 : vector<1x2x128xf32> to vector<2x128xf32>
    %46 = vector.extract_strided_slice %45 {offsets = [0, 0], sizes = [2, 64], strides = [1, 1]} : vector<2x128xf32> to vector<2x64xf32>
    %47 = vector.extract_strided_slice %42 {offsets = [0, 0], sizes = [2, 64], strides = [1, 1]} : vector<2x128xf32> to vector<2x64xf32>
    %48 = arith.addf %46, %47 : vector<2x64xf32>
    %49 = arith.index_cast %40 : i32 to index
    %c0_28 = arith.constant 0 : index
    %c0_29 = arith.constant 0 : index
    %50 = vector.load %arg5[%49, %c0_28, %c0_29] : memref<8x2x128xf32, #tpu.memory_space<vmem>>, vector<1x2x128xf32>
    %51 = vector.shape_cast %50 : vector<1x2x128xf32> to vector<2x128xf32>
    %52 = vector.extract_strided_slice %51 {offsets = [0, 64], sizes = [2, 64], strides = [1, 1]} : vector<2x128xf32> to vector<2x64xf32>
    %53 = vector.extract_strided_slice %42 {offsets = [0, 64], sizes = [2, 64], strides = [1, 1]} : vector<2x128xf32> to vector<2x64xf32>
    %54 = arith.addf %52, %53 : vector<2x64xf32>
    %55 = vector.extract_strided_slice %48 {offsets = [0, 0], sizes = [2, 16], strides = [1, 1]} : vector<2x64xf32> to vector<2x16xf32>
    %56 = arith.negf %55 : vector<2x16xf32>
    %57 = math.exp %56 : vector<2x16xf32>
    %cst_30 = arith.constant 1.000000e+00 : f32
    %58 = vector.broadcast %cst_30 : f32 to vector<2x16xf32>
    %59 = arith.addf %58, %57 : vector<2x16xf32>
    %60 = arith.divf %58, %59 : vector<2x16xf32>
    %61 = vector.extract_strided_slice %48 {offsets = [0, 16], sizes = [2, 16], strides = [1, 1]} : vector<2x64xf32> to vector<2x16xf32>
    %62 = arith.negf %61 : vector<2x16xf32>
    %63 = math.exp %62 : vector<2x16xf32>
    %cst_31 = arith.constant 1.000000e+00 : f32
    %64 = vector.broadcast %cst_31 : f32 to vector<2x16xf32>
    %65 = arith.addf %64, %63 : vector<2x16xf32>
    %66 = arith.divf %64, %65 : vector<2x16xf32>
    %67 = vector.extract_strided_slice %48 {offsets = [0, 32], sizes = [2, 16], strides = [1, 1]} : vector<2x64xf32> to vector<2x16xf32>
    %68 = math.tanh %67 : vector<2x16xf32>
    %69 = vector.extract_strided_slice %48 {offsets = [0, 48], sizes = [2, 16], strides = [1, 1]} : vector<2x64xf32> to vector<2x16xf32>
    %70 = arith.negf %69 : vector<2x16xf32>
    %71 = math.exp %70 : vector<2x16xf32>
    %cst_32 = arith.constant 1.000000e+00 : f32
    %72 = vector.broadcast %cst_32 : f32 to vector<2x16xf32>
    %73 = arith.addf %72, %71 : vector<2x16xf32>
    %74 = arith.divf %72, %73 : vector<2x16xf32>
    %75 = arith.mulf %66, %39 : vector<2x16xf32>
    %76 = arith.mulf %60, %68 : vector<2x16xf32>
    %77 = arith.addf %75, %76 : vector<2x16xf32>
    %78 = math.tanh %77 : vector<2x16xf32>
    %79 = arith.mulf %74, %78 : vector<2x16xf32>
    %80 = vector.extract_strided_slice %54 {offsets = [0, 0], sizes = [2, 16], strides = [1, 1]} : vector<2x64xf32> to vector<2x16xf32>
    %81 = arith.negf %80 : vector<2x16xf32>
    %82 = math.exp %81 : vector<2x16xf32>
    %cst_33 = arith.constant 1.000000e+00 : f32
    %83 = vector.broadcast %cst_33 : f32 to vector<2x16xf32>
    %84 = arith.addf %83, %82 : vector<2x16xf32>
    %85 = arith.divf %83, %84 : vector<2x16xf32>
    %86 = vector.extract_strided_slice %54 {offsets = [0, 16], sizes = [2, 16], strides = [1, 1]} : vector<2x64xf32> to vector<2x16xf32>
    %87 = arith.negf %86 : vector<2x16xf32>
    %88 = math.exp %87 : vector<2x16xf32>
    %cst_34 = arith.constant 1.000000e+00 : f32
    %89 = vector.broadcast %cst_34 : f32 to vector<2x16xf32>
    %90 = arith.addf %89, %88 : vector<2x16xf32>
    %91 = arith.divf %89, %90 : vector<2x16xf32>
    %92 = vector.extract_strided_slice %54 {offsets = [0, 32], sizes = [2, 16], strides = [1, 1]} : vector<2x64xf32> to vector<2x16xf32>
    %93 = math.tanh %92 : vector<2x16xf32>
    %94 = vector.extract_strided_slice %54 {offsets = [0, 48], sizes = [2, 16], strides = [1, 1]} : vector<2x64xf32> to vector<2x16xf32>
    %95 = arith.negf %94 : vector<2x16xf32>
    %96 = math.exp %95 : vector<2x16xf32>
    %cst_35 = arith.constant 1.000000e+00 : f32
    %97 = vector.broadcast %cst_35 : f32 to vector<2x16xf32>
    %98 = arith.addf %97, %96 : vector<2x16xf32>
    %99 = arith.divf %97, %98 : vector<2x16xf32>
    %100 = arith.mulf %91, %39 : vector<2x16xf32>
    %101 = arith.mulf %85, %93 : vector<2x16xf32>
    %102 = arith.addf %100, %101 : vector<2x16xf32>
    %103 = math.tanh %102 : vector<2x16xf32>
    %104 = arith.mulf %99, %103 : vector<2x16xf32>
    %105 = arith.index_cast %c0_i32 : i32 to index
    %c0_36 = arith.constant 0 : index
    %c0_37 = arith.constant 0 : index
    %106 = vector.load %arg6[%105, %c0_36, %c0_37] : memref<8x2x16xf32, #tpu.memory_space<vmem>>, vector<1x2x16xf32>
    %107 = vector.shape_cast %106 : vector<1x2x16xf32> to vector<2x16xf32>
    %108 = vector.shape_cast %79 : vector<2x16xf32> to vector<1x2x16xf32>
    tpu.vector_store %arg6[%105, %c0_36, %c0_37], %108 {strides = array<i32>} : memref<8x2x16xf32, #tpu.memory_space<vmem>>, vector<1x2x16xf32>,
    %109 = arith.index_cast %40 : i32 to index
    %c0_38 = arith.constant 0 : index
    %c0_39 = arith.constant 0 : index
    %110 = vector.load %arg7[%109, %c0_38, %c0_39] : memref<8x2x16xf32, #tpu.memory_space<vmem>>, vector<1x2x16xf32>
    %111 = vector.shape_cast %110 : vector<1x2x16xf32> to vector<2x16xf32>
    %112 = vector.shape_cast %104 : vector<2x16xf32> to vector<1x2x16xf32>
    tpu.vector_store %arg7[%109, %c0_38, %c0_39], %112 {strides = array<i32>} : memref<8x2x16xf32, #tpu.memory_space<vmem>>, vector<1x2x16xf32>,
    %c1_i32 = arith.constant 1 : i32
    %c7_i32_40 = arith.constant 7 : i32
    %113 = arith.subi %c7_i32_40, %c1_i32 : i32
    %114 = tpu.concatenate %79, %104 in 1 : vector<2x16xf32>, vector<2x16xf32> -> vector<2x32xf32>
    %cst_41 = arith.constant dense<0.000000e+00> : vector<2x128xf32>
    %115 = tpu.matmul %114, %38, %cst_41 {dimension_numbers = #tpu.dot_dimension_numbers<[1], [0], [0], [1], [0, 0, 1, 1], [], []>} : vector<2x32xf32>, vector<32x128xf32>, vector<2x128xf32> -> vector<2x128xf32>
    %116 = arith.index_cast %c1_i32 : i32 to index
    %c0_42 = arith.constant 0 : index
    %c0_43 = arith.constant 0 : index
    %117 = vector.load %arg5[%116, %c0_42, %c0_43] : memref<8x2x128xf32, #tpu.memory_space<vmem>>, vector<1x2x128xf32>
    %118 = vector.shape_cast %117 : vector<1x2x128xf32> to vector<2x128xf32>
    %119 = vector.extract_strided_slice %118 {offsets = [0, 0], sizes = [2, 64], strides = [1, 1]} : vector<2x128xf32> to vector<2x64xf32>
    %120 = vector.extract_strided_slice %115 {offsets = [0, 0], sizes = [2, 64], strides = [1, 1]} : vector<2x128xf32> to vector<2x64xf32>
    %121 = arith.addf %119, %120 : vector<2x64xf32>
    %122 = arith.index_cast %113 : i32 to index
    %c0_44 = arith.constant 0 : index
    %c0_45 = arith.constant 0 : index
    %123 = vector.load %arg5[%122, %c0_44, %c0_45] : memref<8x2x128xf32, #tpu.memory_space<vmem>>, vector<1x2x128xf32>
    %124 = vector.shape_cast %123 : vector<1x2x128xf32> to vector<2x128xf32>
    %125 = vector.extract_strided_slice %124 {offsets = [0, 64], sizes = [2, 64], strides = [1, 1]} : vector<2x128xf32> to vector<2x64xf32>
    %126 = vector.extract_strided_slice %115 {offsets = [0, 64], sizes = [2, 64], strides = [1, 1]} : vector<2x128xf32> to vector<2x64xf32>
    %127 = arith.addf %125, %126 : vector<2x64xf32>
    %128 = vector.extract_strided_slice %121 {offsets = [0, 0], sizes = [2, 16], strides = [1, 1]} : vector<2x64xf32> to vector<2x16xf32>
    %129 = arith.negf %128 : vector<2x16xf32>
    %130 = math.exp %129 : vector<2x16xf32>
    %cst_46 = arith.constant 1.000000e+00 : f32
    %131 = vector.broadcast %cst_46 : f32 to vector<2x16xf32>
    %132 = arith.addf %131, %130 : vector<2x16xf32>
    %133 = arith.divf %131, %132 : vector<2x16xf32>
    %134 = vector.extract_strided_slice %121 {offsets = [0, 16], sizes = [2, 16], strides = [1, 1]} : vector<2x64xf32> to vector<2x16xf32>
    %135 = arith.negf %134 : vector<2x16xf32>
    %136 = math.exp %135 : vector<2x16xf32>
    %cst_47 = arith.constant 1.000000e+00 : f32
    %137 = vector.broadcast %cst_47 : f32 to vector<2x16xf32>
    %138 = arith.addf %137, %136 : vector<2x16xf32>
    %139 = arith.divf %137, %138 : vector<2x16xf32>
    %140 = vector.extract_strided_slice %121 {offsets = [0, 32], sizes = [2, 16], strides = [1, 1]} : vector<2x64xf32> to vector<2x16xf32>
    %141 = math.tanh %140 : vector<2x16xf32>
    %142 = vector.extract_strided_slice %121 {offsets = [0, 48], sizes = [2, 16], strides = [1, 1]} : vector<2x64xf32> to vector<2x16xf32>
    %143 = arith.negf %142 : vector<2x16xf32>
    %144 = math.exp %143 : vector<2x16xf32>
    %cst_48 = arith.constant 1.000000e+00 : f32
    %145 = vector.broadcast %cst_48 : f32 to vector<2x16xf32>
    %146 = arith.addf %145, %144 : vector<2x16xf32>
    %147 = arith.divf %145, %146 : vector<2x16xf32>
    %148 = arith.mulf %139, %77 : vector<2x16xf32>
    %149 = arith.mulf %133, %141 : vector<2x16xf32>
    %150 = arith.addf %148, %149 : vector<2x16xf32>
    %151 = math.tanh %150 : vector<2x16xf32>
    %152 = arith.mulf %147, %151 : vector<2x16xf32>
    %153 = vector.extract_strided_slice %127 {offsets = [0, 0], sizes = [2, 16], strides = [1, 1]} : vector<2x64xf32> to vector<2x16xf32>
    %154 = arith.negf %153 : vector<2x16xf32>
    %155 = math.exp %154 : vector<2x16xf32>
    %cst_49 = arith.constant 1.000000e+00 : f32
    %156 = vector.broadcast %cst_49 : f32 to vector<2x16xf32>
    %157 = arith.addf %156, %155 : vector<2x16xf32>
    %158 = arith.divf %156, %157 : vector<2x16xf32>
    %159 = vector.extract_strided_slice %127 {offsets = [0, 16], sizes = [2, 16], strides = [1, 1]} : vector<2x64xf32> to vector<2x16xf32>
    %160 = arith.negf %159 : vector<2x16xf32>
    %161 = math.exp %160 : vector<2x16xf32>
    %cst_50 = arith.constant 1.000000e+00 : f32
    %162 = vector.broadcast %cst_50 : f32 to vector<2x16xf32>
    %163 = arith.addf %162, %161 : vector<2x16xf32>
    %164 = arith.divf %162, %163 : vector<2x16xf32>
    %165 = vector.extract_strided_slice %127 {offsets = [0, 32], sizes = [2, 16], strides = [1, 1]} : vector<2x64xf32> to vector<2x16xf32>
    %166 = math.tanh %165 : vector<2x16xf32>
    %167 = vector.extract_strided_slice %127 {offsets = [0, 48], sizes = [2, 16], strides = [1, 1]} : vector<2x64xf32> to vector<2x16xf32>
    %168 = arith.negf %167 : vector<2x16xf32>
    %169 = math.exp %168 : vector<2x16xf32>
    %cst_51 = arith.constant 1.000000e+00 : f32
    %170 = vector.broadcast %cst_51 : f32 to vector<2x16xf32>
    %171 = arith.addf %170, %169 : vector<2x16xf32>
    %172 = arith.divf %170, %171 : vector<2x16xf32>
    %173 = arith.mulf %164, %102 : vector<2x16xf32>
    %174 = arith.mulf %158, %166 : vector<2x16xf32>
    %175 = arith.addf %173, %174 : vector<2x16xf32>
    %176 = math.tanh %175 : vector<2x16xf32>
    %177 = arith.mulf %172, %176 : vector<2x16xf32>
    %178 = arith.index_cast %c1_i32 : i32 to index
    %c0_52 = arith.constant 0 : index
    %c0_53 = arith.constant 0 : index
    %179 = vector.load %arg6[%178, %c0_52, %c0_53] : memref<8x2x16xf32, #tpu.memory_space<vmem>>, vector<1x2x16xf32>
    %180 = vector.shape_cast %179 : vector<1x2x16xf32> to vector<2x16xf32>
    %181 = vector.shape_cast %152 : vector<2x16xf32> to vector<1x2x16xf32>
    tpu.vector_store %arg6[%178, %c0_52, %c0_53], %181 {strides = array<i32>} : memref<8x2x16xf32, #tpu.memory_space<vmem>>, vector<1x2x16xf32>,
    %182 = arith.index_cast %113 : i32 to index
    %c0_54 = arith.constant 0 : index
    %c0_55 = arith.constant 0 : index
    %183 = vector.load %arg7[%182, %c0_54, %c0_55] : memref<8x2x16xf32, #tpu.memory_space<vmem>>, vector<1x2x16xf32>
    %184 = vector.shape_cast %183 : vector<1x2x16xf32> to vector<2x16xf32>
    %185 = vector.shape_cast %177 : vector<2x16xf32> to vector<1x2x16xf32>
    tpu.vector_store %arg7[%182, %c0_54, %c0_55], %185 {strides = array<i32>} : memref<8x2x16xf32, #tpu.memory_space<vmem>>, vector<1x2x16xf32>,
    %c2_i32 = arith.constant 2 : i32
    %c7_i32_56 = arith.constant 7 : i32
    %186 = arith.subi %c7_i32_56, %c2_i32 : i32
    %187 = tpu.concatenate %152, %177 in 1 : vector<2x16xf32>, vector<2x16xf32> -> vector<2x32xf32>
    %cst_57 = arith.constant dense<0.000000e+00> : vector<2x128xf32>
    %188 = tpu.matmul %187, %38, %cst_57 {dimension_numbers = #tpu.dot_dimension_numbers<[1], [0], [0], [1], [0, 0, 1, 1], [], []>} : vector<2x32xf32>, vector<32x128xf32>, vector<2x128xf32> -> vector<2x128xf32>
    %189 = arith.index_cast %c2_i32 : i32 to index
    %c0_58 = arith.constant 0 : index
    %c0_59 = arith.constant 0 : index
    %190 = vector.load %arg5[%189, %c0_58, %c0_59] : memref<8x2x128xf32, #tpu.memory_space<vmem>>, vector<1x2x128xf32>
    %191 = vector.shape_cast %190 : vector<1x2x128xf32> to vector<2x128xf32>
    %192 = vector.extract_strided_slice %191 {offsets = [0, 0], sizes = [2, 64], strides = [1, 1]} : vector<2x128xf32> to vector<2x64xf32>
    %193 = vector.extract_strided_slice %188 {offsets = [0, 0], sizes = [2, 64], strides = [1, 1]} : vector<2x128xf32> to vector<2x64xf32>
    %194 = arith.addf %192, %193 : vector<2x64xf32>
    %195 = arith.index_cast %186 : i32 to index
    %c0_60 = arith.constant 0 : index
    %c0_61 = arith.constant 0 : index
    %196 = vector.load %arg5[%195, %c0_60, %c0_61] : memref<8x2x128xf32, #tpu.memory_space<vmem>>, vector<1x2x128xf32>
    %197 = vector.shape_cast %196 : vector<1x2x128xf32> to vector<2x128xf32>
    %198 = vector.extract_strided_slice %197 {offsets = [0, 64], sizes = [2, 64], strides = [1, 1]} : vector<2x128xf32> to vector<2x64xf32>
    %199 = vector.extract_strided_slice %188 {offsets = [0, 64], sizes = [2, 64], strides = [1, 1]} : vector<2x128xf32> to vector<2x64xf32>
    %200 = arith.addf %198, %199 : vector<2x64xf32>
    %201 = vector.extract_strided_slice %194 {offsets = [0, 0], sizes = [2, 16], strides = [1, 1]} : vector<2x64xf32> to vector<2x16xf32>
    %202 = arith.negf %201 : vector<2x16xf32>
    %203 = math.exp %202 : vector<2x16xf32>
    %cst_62 = arith.constant 1.000000e+00 : f32
    %204 = vector.broadcast %cst_62 : f32 to vector<2x16xf32>
    %205 = arith.addf %204, %203 : vector<2x16xf32>
    %206 = arith.divf %204, %205 : vector<2x16xf32>
    %207 = vector.extract_strided_slice %194 {offsets = [0, 16], sizes = [2, 16], strides = [1, 1]} : vector<2x64xf32> to vector<2x16xf32>
    %208 = arith.negf %207 : vector<2x16xf32>
    %209 = math.exp %208 : vector<2x16xf32>
    %cst_63 = arith.constant 1.000000e+00 : f32
    %210 = vector.broadcast %cst_63 : f32 to vector<2x16xf32>
    %211 = arith.addf %210, %209 : vector<2x16xf32>
    %212 = arith.divf %210, %211 : vector<2x16xf32>
    %213 = vector.extract_strided_slice %194 {offsets = [0, 32], sizes = [2, 16], strides = [1, 1]} : vector<2x64xf32> to vector<2x16xf32>
    %214 = math.tanh %213 : vector<2x16xf32>
    %215 = vector.extract_strided_slice %194 {offsets = [0, 48], sizes = [2, 16], strides = [1, 1]} : vector<2x64xf32> to vector<2x16xf32>
    %216 = arith.negf %215 : vector<2x16xf32>
    %217 = math.exp %216 : vector<2x16xf32>
    %cst_64 = arith.constant 1.000000e+00 : f32
    %218 = vector.broadcast %cst_64 : f32 to vector<2x16xf32>
    %219 = arith.addf %218, %217 : vector<2x16xf32>
    %220 = arith.divf %218, %219 : vector<2x16xf32>
    %221 = arith.mulf %212, %150 : vector<2x16xf32>
    %222 = arith.mulf %206, %214 : vector<2x16xf32>
    %223 = arith.addf %221, %222 : vector<2x16xf32>
    %224 = math.tanh %223 : vector<2x16xf32>
    %225 = arith.mulf %220, %224 : vector<2x16xf32>
    %226 = vector.extract_strided_slice %200 {offsets = [0, 0], sizes = [2, 16], strides = [1, 1]} : vector<2x64xf32> to vector<2x16xf32>
    %227 = arith.negf %226 : vector<2x16xf32>
    %228 = math.exp %227 : vector<2x16xf32>
    %cst_65 = arith.constant 1.000000e+00 : f32
    %229 = vector.broadcast %cst_65 : f32 to vector<2x16xf32>
    %230 = arith.addf %229, %228 : vector<2x16xf32>
    %231 = arith.divf %229, %230 : vector<2x16xf32>
    %232 = vector.extract_strided_slice %200 {offsets = [0, 16], sizes = [2, 16], strides = [1, 1]} : vector<2x64xf32> to vector<2x16xf32>
    %233 = arith.negf %232 : vector<2x16xf32>
    %234 = math.exp %233 : vector<2x16xf32>
    %cst_66 = arith.constant 1.000000e+00 : f32
    %235 = vector.broadcast %cst_66 : f32 to vector<2x16xf32>
    %236 = arith.addf %235, %234 : vector<2x16xf32>
    %237 = arith.divf %235, %236 : vector<2x16xf32>
    %238 = vector.extract_strided_slice %200 {offsets = [0, 32], sizes = [2, 16], strides = [1, 1]} : vector<2x64xf32> to vector<2x16xf32>
    %239 = math.tanh %238 : vector<2x16xf32>
    %240 = vector.extract_strided_slice %200 {offsets = [0, 48], sizes = [2, 16], strides = [1, 1]} : vector<2x64xf32> to vector<2x16xf32>
    %241 = arith.negf %240 : vector<2x16xf32>
    %242 = math.exp %241 : vector<2x16xf32>
    %cst_67 = arith.constant 1.000000e+00 : f32
    %243 = vector.broadcast %cst_67 : f32 to vector<2x16xf32>
    %244 = arith.addf %243, %242 : vector<2x16xf32>
    %245 = arith.divf %243, %244 : vector<2x16xf32>
    %246 = arith.mulf %237, %175 : vector<2x16xf32>
    %247 = arith.mulf %231, %239 : vector<2x16xf32>
    %248 = arith.addf %246, %247 : vector<2x16xf32>
    %249 = math.tanh %248 : vector<2x16xf32>
    %250 = arith.mulf %245, %249 : vector<2x16xf32>
    %251 = arith.index_cast %c2_i32 : i32 to index
    %c0_68 = arith.constant 0 : index
    %c0_69 = arith.constant 0 : index
    %252 = vector.load %arg6[%251, %c0_68, %c0_69] : memref<8x2x16xf32, #tpu.memory_space<vmem>>, vector<1x2x16xf32>
    %253 = vector.shape_cast %252 : vector<1x2x16xf32> to vector<2x16xf32>
    %254 = vector.shape_cast %225 : vector<2x16xf32> to vector<1x2x16xf32>
    tpu.vector_store %arg6[%251, %c0_68, %c0_69], %254 {strides = array<i32>} : memref<8x2x16xf32, #tpu.memory_space<vmem>>, vector<1x2x16xf32>,
    %255 = arith.index_cast %186 : i32 to index
    %c0_70 = arith.constant 0 : index
    %c0_71 = arith.constant 0 : index
    %256 = vector.load %arg7[%255, %c0_70, %c0_71] : memref<8x2x16xf32, #tpu.memory_space<vmem>>, vector<1x2x16xf32>
    %257 = vector.shape_cast %256 : vector<1x2x16xf32> to vector<2x16xf32>
    %258 = vector.shape_cast %250 : vector<2x16xf32> to vector<1x2x16xf32>
    tpu.vector_store %arg7[%255, %c0_70, %c0_71], %258 {strides = array<i32>} : memref<8x2x16xf32, #tpu.memory_space<vmem>>, vector<1x2x16xf32>,
    %c3_i32 = arith.constant 3 : i32
    %c7_i32_72 = arith.constant 7 : i32
    %259 = arith.subi %c7_i32_72, %c3_i32 : i32
    %260 = tpu.concatenate %225, %250 in 1 : vector<2x16xf32>, vector<2x16xf32> -> vector<2x32xf32>
    %cst_73 = arith.constant dense<0.000000e+00> : vector<2x128xf32>
    %261 = tpu.matmul %260, %38, %cst_73 {dimension_numbers = #tpu.dot_dimension_numbers<[1], [0], [0], [1], [0, 0, 1, 1], [], []>} : vector<2x32xf32>, vector<32x128xf32>, vector<2x128xf32> -> vector<2x128xf32>
    %262 = arith.index_cast %c3_i32 : i32 to index
    %c0_74 = arith.constant 0 : index
    %c0_75 = arith.constant 0 : index
    %263 = vector.load %arg5[%262, %c0_74, %c0_75] : memref<8x2x128xf32, #tpu.memory_space<vmem>>, vector<1x2x128xf32>
    %264 = vector.shape_cast %263 : vector<1x2x128xf32> to vector<2x128xf32>
    %265 = vector.extract_strided_slice %264 {offsets = [0, 0], sizes = [2, 64], strides = [1, 1]} : vector<2x128xf32> to vector<2x64xf32>
    %266 = vector.extract_strided_slice %261 {offsets = [0, 0], sizes = [2, 64], strides = [1, 1]} : vector<2x128xf32> to vector<2x64xf32>
    %267 = arith.addf %265, %266 : vector<2x64xf32>
    %268 = arith.index_cast %259 : i32 to index
    %c0_76 = arith.constant 0 : index
    %c0_77 = arith.constant 0 : index
    %269 = vector.load %arg5[%268, %c0_76, %c0_77] : memref<8x2x128xf32, #tpu.memory_space<vmem>>, vector<1x2x128xf32>
    %270 = vector.shape_cast %269 : vector<1x2x128xf32> to vector<2x128xf32>
    %271 = vector.extract_strided_slice %270 {offsets = [0, 64], sizes = [2, 64], strides = [1, 1]} : vector<2x128xf32> to vector<2x64xf32>
    %272 = vector.extract_strided_slice %261 {offsets = [0, 64], sizes = [2, 64], strides = [1, 1]} : vector<2x128xf32> to vector<2x64xf32>
    %273 = arith.addf %271, %272 : vector<2x64xf32>
    %274 = vector.extract_strided_slice %267 {offsets = [0, 0], sizes = [2, 16], strides = [1, 1]} : vector<2x64xf32> to vector<2x16xf32>
    %275 = arith.negf %274 : vector<2x16xf32>
    %276 = math.exp %275 : vector<2x16xf32>
    %cst_78 = arith.constant 1.000000e+00 : f32
    %277 = vector.broadcast %cst_78 : f32 to vector<2x16xf32>
    %278 = arith.addf %277, %276 : vector<2x16xf32>
    %279 = arith.divf %277, %278 : vector<2x16xf32>
    %280 = vector.extract_strided_slice %267 {offsets = [0, 16], sizes = [2, 16], strides = [1, 1]} : vector<2x64xf32> to vector<2x16xf32>
    %281 = arith.negf %280 : vector<2x16xf32>
    %282 = math.exp %281 : vector<2x16xf32>
    %cst_79 = arith.constant 1.000000e+00 : f32
    %283 = vector.broadcast %cst_79 : f32 to vector<2x16xf32>
    %284 = arith.addf %283, %282 : vector<2x16xf32>
    %285 = arith.divf %283, %284 : vector<2x16xf32>
    %286 = vector.extract_strided_slice %267 {offsets = [0, 32], sizes = [2, 16], strides = [1, 1]} : vector<2x64xf32> to vector<2x16xf32>
    %287 = math.tanh %286 : vector<2x16xf32>
    %288 = vector.extract_strided_slice %267 {offsets = [0, 48], sizes = [2, 16], strides = [1, 1]} : vector<2x64xf32> to vector<2x16xf32>
    %289 = arith.negf %288 : vector<2x16xf32>
    %290 = math.exp %289 : vector<2x16xf32>
    %cst_80 = arith.constant 1.000000e+00 : f32
    %291 = vector.broadcast %cst_80 : f32 to vector<2x16xf32>
    %292 = arith.addf %291, %290 : vector<2x16xf32>
    %293 = arith.divf %291, %292 : vector<2x16xf32>
    %294 = arith.mulf %285, %223 : vector<2x16xf32>
    %295 = arith.mulf %279, %287 : vector<2x16xf32>
    %296 = arith.addf %294, %295 : vector<2x16xf32>
    %297 = math.tanh %296 : vector<2x16xf32>
    %298 = arith.mulf %293, %297 : vector<2x16xf32>
    %299 = vector.extract_strided_slice %273 {offsets = [0, 0], sizes = [2, 16], strides = [1, 1]} : vector<2x64xf32> to vector<2x16xf32>
    %300 = arith.negf %299 : vector<2x16xf32>
    %301 = math.exp %300 : vector<2x16xf32>
    %cst_81 = arith.constant 1.000000e+00 : f32
    %302 = vector.broadcast %cst_81 : f32 to vector<2x16xf32>
    %303 = arith.addf %302, %301 : vector<2x16xf32>
    %304 = arith.divf %302, %303 : vector<2x16xf32>
    %305 = vector.extract_strided_slice %273 {offsets = [0, 16], sizes = [2, 16], strides = [1, 1]} : vector<2x64xf32> to vector<2x16xf32>
    %306 = arith.negf %305 : vector<2x16xf32>
    %307 = math.exp %306 : vector<2x16xf32>
    %cst_82 = arith.constant 1.000000e+00 : f32
    %308 = vector.broadcast %cst_82 : f32 to vector<2x16xf32>
    %309 = arith.addf %308, %307 : vector<2x16xf32>
    %310 = arith.divf %308, %309 : vector<2x16xf32>
    %311 = vector.extract_strided_slice %273 {offsets = [0, 32], sizes = [2, 16], strides = [1, 1]} : vector<2x64xf32> to vector<2x16xf32>
    %312 = math.tanh %311 : vector<2x16xf32>
    %313 = vector.extract_strided_slice %273 {offsets = [0, 48], sizes = [2, 16], strides = [1, 1]} : vector<2x64xf32> to vector<2x16xf32>
    %314 = arith.negf %313 : vector<2x16xf32>
    %315 = math.exp %314 : vector<2x16xf32>
    %cst_83 = arith.constant 1.000000e+00 : f32
    %316 = vector.broadcast %cst_83 : f32 to vector<2x16xf32>
    %317 = arith.addf %316, %315 : vector<2x16xf32>
    %318 = arith.divf %316, %317 : vector<2x16xf32>
    %319 = arith.mulf %310, %248 : vector<2x16xf32>
    %320 = arith.mulf %304, %312 : vector<2x16xf32>
    %321 = arith.addf %319, %320 : vector<2x16xf32>
    %322 = math.tanh %321 : vector<2x16xf32>
    %323 = arith.mulf %318, %322 : vector<2x16xf32>
    %324 = arith.index_cast %c3_i32 : i32 to index
    %c0_84 = arith.constant 0 : index
    %c0_85 = arith.constant 0 : index
    %325 = vector.load %arg6[%324, %c0_84, %c0_85] : memref<8x2x16xf32, #tpu.memory_space<vmem>>, vector<1x2x16xf32>
    %326 = vector.shape_cast %325 : vector<1x2x16xf32> to vector<2x16xf32>
    %327 = vector.shape_cast %298 : vector<2x16xf32> to vector<1x2x16xf32>
    tpu.vector_store %arg6[%324, %c0_84, %c0_85], %327 {strides = array<i32>} : memref<8x2x16xf32, #tpu.memory_space<vmem>>, vector<1x2x16xf32>,
    %328 = arith.index_cast %259 : i32 to index
    %c0_86 = arith.constant 0 : index
    %c0_87 = arith.constant 0 : index
    %329 = vector.load %arg7[%328, %c0_86, %c0_87] : memref<8x2x16xf32, #tpu.memory_space<vmem>>, vector<1x2x16xf32>
    %330 = vector.shape_cast %329 : vector<1x2x16xf32> to vector<2x16xf32>
    %331 = vector.shape_cast %323 : vector<2x16xf32> to vector<1x2x16xf32>
    tpu.vector_store %arg7[%328, %c0_86, %c0_87], %331 {strides = array<i32>} : memref<8x2x16xf32, #tpu.memory_space<vmem>>, vector<1x2x16xf32>,
    %c4_i32 = arith.constant 4 : i32
    %c7_i32_88 = arith.constant 7 : i32
    %332 = arith.subi %c7_i32_88, %c4_i32 : i32
    %333 = tpu.concatenate %298, %323 in 1 : vector<2x16xf32>, vector<2x16xf32> -> vector<2x32xf32>
    %cst_89 = arith.constant dense<0.000000e+00> : vector<2x128xf32>
    %334 = tpu.matmul %333, %38, %cst_89 {dimension_numbers = #tpu.dot_dimension_numbers<[1], [0], [0], [1], [0, 0, 1, 1], [], []>} : vector<2x32xf32>, vector<32x128xf32>, vector<2x128xf32> -> vector<2x128xf32>
    %335 = arith.index_cast %c4_i32 : i32 to index
    %c0_90 = arith.constant 0 : index
    %c0_91 = arith.constant 0 : index
    %336 = vector.load %arg5[%335, %c0_90, %c0_91] : memref<8x2x128xf32, #tpu.memory_space<vmem>>, vector<1x2x128xf32>
    %337 = vector.shape_cast %336 : vector<1x2x128xf32> to vector<2x128xf32>
    %338 = vector.extract_strided_slice %337 {offsets = [0, 0], sizes = [2, 64], strides = [1, 1]} : vector<2x128xf32> to vector<2x64xf32>
    %339 = vector.extract_strided_slice %334 {offsets = [0, 0], sizes = [2, 64], strides = [1, 1]} : vector<2x128xf32> to vector<2x64xf32>
    %340 = arith.addf %338, %339 : vector<2x64xf32>
    %341 = arith.index_cast %332 : i32 to index
    %c0_92 = arith.constant 0 : index
    %c0_93 = arith.constant 0 : index
    %342 = vector.load %arg5[%341, %c0_92, %c0_93] : memref<8x2x128xf32, #tpu.memory_space<vmem>>, vector<1x2x128xf32>
    %343 = vector.shape_cast %342 : vector<1x2x128xf32> to vector<2x128xf32>
    %344 = vector.extract_strided_slice %343 {offsets = [0, 64], sizes = [2, 64], strides = [1, 1]} : vector<2x128xf32> to vector<2x64xf32>
    %345 = vector.extract_strided_slice %334 {offsets = [0, 64], sizes = [2, 64], strides = [1, 1]} : vector<2x128xf32> to vector<2x64xf32>
    %346 = arith.addf %344, %345 : vector<2x64xf32>
    %347 = vector.extract_strided_slice %340 {offsets = [0, 0], sizes = [2, 16], strides = [1, 1]} : vector<2x64xf32> to vector<2x16xf32>
    %348 = arith.negf %347 : vector<2x16xf32>
    %349 = math.exp %348 : vector<2x16xf32>
    %cst_94 = arith.constant 1.000000e+00 : f32
    %350 = vector.broadcast %cst_94 : f32 to vector<2x16xf32>
    %351 = arith.addf %350, %349 : vector<2x16xf32>
    %352 = arith.divf %350, %351 : vector<2x16xf32>
    %353 = vector.extract_strided_slice %340 {offsets = [0, 16], sizes = [2, 16], strides = [1, 1]} : vector<2x64xf32> to vector<2x16xf32>
    %354 = arith.negf %353 : vector<2x16xf32>
    %355 = math.exp %354 : vector<2x16xf32>
    %cst_95 = arith.constant 1.000000e+00 : f32
    %356 = vector.broadcast %cst_95 : f32 to vector<2x16xf32>
    %357 = arith.addf %356, %355 : vector<2x16xf32>
    %358 = arith.divf %356, %357 : vector<2x16xf32>
    %359 = vector.extract_strided_slice %340 {offsets = [0, 32], sizes = [2, 16], strides = [1, 1]} : vector<2x64xf32> to vector<2x16xf32>
    %360 = math.tanh %359 : vector<2x16xf32>
    %361 = vector.extract_strided_slice %340 {offsets = [0, 48], sizes = [2, 16], strides = [1, 1]} : vector<2x64xf32> to vector<2x16xf32>
    %362 = arith.negf %361 : vector<2x16xf32>
    %363 = math.exp %362 : vector<2x16xf32>
    %cst_96 = arith.constant 1.000000e+00 : f32
    %364 = vector.broadcast %cst_96 : f32 to vector<2x16xf32>
    %365 = arith.addf %364, %363 : vector<2x16xf32>
    %366 = arith.divf %364, %365 : vector<2x16xf32>
    %367 = arith.mulf %358, %296 : vector<2x16xf32>
    %368 = arith.mulf %352, %360 : vector<2x16xf32>
    %369 = arith.addf %367, %368 : vector<2x16xf32>
    %370 = math.tanh %369 : vector<2x16xf32>
    %371 = arith.mulf %366, %370 : vector<2x16xf32>
    %372 = vector.extract_strided_slice %346 {offsets = [0, 0], sizes = [2, 16], strides = [1, 1]} : vector<2x64xf32> to vector<2x16xf32>
    %373 = arith.negf %372 : vector<2x16xf32>
    %374 = math.exp %373 : vector<2x16xf32>
    %cst_97 = arith.constant 1.000000e+00 : f32
    %375 = vector.broadcast %cst_97 : f32 to vector<2x16xf32>
    %376 = arith.addf %375, %374 : vector<2x16xf32>
    %377 = arith.divf %375, %376 : vector<2x16xf32>
    %378 = vector.extract_strided_slice %346 {offsets = [0, 16], sizes = [2, 16], strides = [1, 1]} : vector<2x64xf32> to vector<2x16xf32>
    %379 = arith.negf %378 : vector<2x16xf32>
    %380 = math.exp %379 : vector<2x16xf32>
    %cst_98 = arith.constant 1.000000e+00 : f32
    %381 = vector.broadcast %cst_98 : f32 to vector<2x16xf32>
    %382 = arith.addf %381, %380 : vector<2x16xf32>
    %383 = arith.divf %381, %382 : vector<2x16xf32>
    %384 = vector.extract_strided_slice %346 {offsets = [0, 32], sizes = [2, 16], strides = [1, 1]} : vector<2x64xf32> to vector<2x16xf32>
    %385 = math.tanh %384 : vector<2x16xf32>
    %386 = vector.extract_strided_slice %346 {offsets = [0, 48], sizes = [2, 16], strides = [1, 1]} : vector<2x64xf32> to vector<2x16xf32>
    %387 = arith.negf %386 : vector<2x16xf32>
    %388 = math.exp %387 : vector<2x16xf32>
    %cst_99 = arith.constant 1.000000e+00 : f32
    %389 = vector.broadcast %cst_99 : f32 to vector<2x16xf32>
    %390 = arith.addf %389, %388 : vector<2x16xf32>
    %391 = arith.divf %389, %390 : vector<2x16xf32>
    %392 = arith.mulf %383, %321 : vector<2x16xf32>
    %393 = arith.mulf %377, %385 : vector<2x16xf32>
    %394 = arith.addf %392, %393 : vector<2x16xf32>
    %395 = math.tanh %394 : vector<2x16xf32>
    %396 = arith.mulf %391, %395 : vector<2x16xf32>
    %397 = arith.index_cast %c4_i32 : i32 to index
    %c0_100 = arith.constant 0 : index
    %c0_101 = arith.constant 0 : index
    %398 = vector.load %arg6[%397, %c0_100, %c0_101] : memref<8x2x16xf32, #tpu.memory_space<vmem>>, vector<1x2x16xf32>
    %399 = vector.shape_cast %398 : vector<1x2x16xf32> to vector<2x16xf32>
    %400 = vector.shape_cast %371 : vector<2x16xf32> to vector<1x2x16xf32>
    tpu.vector_store %arg6[%397, %c0_100, %c0_101], %400 {strides = array<i32>} : memref<8x2x16xf32, #tpu.memory_space<vmem>>, vector<1x2x16xf32>,
    %401 = arith.index_cast %332 : i32 to index
    %c0_102 = arith.constant 0 : index
    %c0_103 = arith.constant 0 : index
    %402 = vector.load %arg7[%401, %c0_102, %c0_103] : memref<8x2x16xf32, #tpu.memory_space<vmem>>, vector<1x2x16xf32>
    %403 = vector.shape_cast %402 : vector<1x2x16xf32> to vector<2x16xf32>
    %404 = vector.shape_cast %396 : vector<2x16xf32> to vector<1x2x16xf32>
    tpu.vector_store %arg7[%401, %c0_102, %c0_103], %404 {strides = array<i32>} : memref<8x2x16xf32, #tpu.memory_space<vmem>>, vector<1x2x16xf32>,
    %c5_i32 = arith.constant 5 : i32
    %c7_i32_104 = arith.constant 7 : i32
    %405 = arith.subi %c7_i32_104, %c5_i32 : i32
    %406 = tpu.concatenate %371, %396 in 1 : vector<2x16xf32>, vector<2x16xf32> -> vector<2x32xf32>
    %cst_105 = arith.constant dense<0.000000e+00> : vector<2x128xf32>
    %407 = tpu.matmul %406, %38, %cst_105 {dimension_numbers = #tpu.dot_dimension_numbers<[1], [0], [0], [1], [0, 0, 1, 1], [], []>} : vector<2x32xf32>, vector<32x128xf32>, vector<2x128xf32> -> vector<2x128xf32>
    %408 = arith.index_cast %c5_i32 : i32 to index
    %c0_106 = arith.constant 0 : index
    %c0_107 = arith.constant 0 : index
    %409 = vector.load %arg5[%408, %c0_106, %c0_107] : memref<8x2x128xf32, #tpu.memory_space<vmem>>, vector<1x2x128xf32>
    %410 = vector.shape_cast %409 : vector<1x2x128xf32> to vector<2x128xf32>
    %411 = vector.extract_strided_slice %410 {offsets = [0, 0], sizes = [2, 64], strides = [1, 1]} : vector<2x128xf32> to vector<2x64xf32>
    %412 = vector.extract_strided_slice %407 {offsets = [0, 0], sizes = [2, 64], strides = [1, 1]} : vector<2x128xf32> to vector<2x64xf32>
    %413 = arith.addf %411, %412 : vector<2x64xf32>
    %414 = arith.index_cast %405 : i32 to index
    %c0_108 = arith.constant 0 : index
    %c0_109 = arith.constant 0 : index
    %415 = vector.load %arg5[%414, %c0_108, %c0_109] : memref<8x2x128xf32, #tpu.memory_space<vmem>>, vector<1x2x128xf32>
    %416 = vector.shape_cast %415 : vector<1x2x128xf32> to vector<2x128xf32>
    %417 = vector.extract_strided_slice %416 {offsets = [0, 64], sizes = [2, 64], strides = [1, 1]} : vector<2x128xf32> to vector<2x64xf32>
    %418 = vector.extract_strided_slice %407 {offsets = [0, 64], sizes = [2, 64], strides = [1, 1]} : vector<2x128xf32> to vector<2x64xf32>
    %419 = arith.addf %417, %418 : vector<2x64xf32>
    %420 = vector.extract_strided_slice %413 {offsets = [0, 0], sizes = [2, 16], strides = [1, 1]} : vector<2x64xf32> to vector<2x16xf32>
    %421 = arith.negf %420 : vector<2x16xf32>
    %422 = math.exp %421 : vector<2x16xf32>
    %cst_110 = arith.constant 1.000000e+00 : f32
    %423 = vector.broadcast %cst_110 : f32 to vector<2x16xf32>
    %424 = arith.addf %423, %422 : vector<2x16xf32>
    %425 = arith.divf %423, %424 : vector<2x16xf32>
    %426 = vector.extract_strided_slice %413 {offsets = [0, 16], sizes = [2, 16], strides = [1, 1]} : vector<2x64xf32> to vector<2x16xf32>
    %427 = arith.negf %426 : vector<2x16xf32>
    %428 = math.exp %427 : vector<2x16xf32>
    %cst_111 = arith.constant 1.000000e+00 : f32
    %429 = vector.broadcast %cst_111 : f32 to vector<2x16xf32>
    %430 = arith.addf %429, %428 : vector<2x16xf32>
    %431 = arith.divf %429, %430 : vector<2x16xf32>
    %432 = vector.extract_strided_slice %413 {offsets = [0, 32], sizes = [2, 16], strides = [1, 1]} : vector<2x64xf32> to vector<2x16xf32>
    %433 = math.tanh %432 : vector<2x16xf32>
    %434 = vector.extract_strided_slice %413 {offsets = [0, 48], sizes = [2, 16], strides = [1, 1]} : vector<2x64xf32> to vector<2x16xf32>
    %435 = arith.negf %434 : vector<2x16xf32>
    %436 = math.exp %435 : vector<2x16xf32>
    %cst_112 = arith.constant 1.000000e+00 : f32
    %437 = vector.broadcast %cst_112 : f32 to vector<2x16xf32>
    %438 = arith.addf %437, %436 : vector<2x16xf32>
    %439 = arith.divf %437, %438 : vector<2x16xf32>
    %440 = arith.mulf %431, %369 : vector<2x16xf32>
    %441 = arith.mulf %425, %433 : vector<2x16xf32>
    %442 = arith.addf %440, %441 : vector<2x16xf32>
    %443 = math.tanh %442 : vector<2x16xf32>
    %444 = arith.mulf %439, %443 : vector<2x16xf32>
    %445 = vector.extract_strided_slice %419 {offsets = [0, 0], sizes = [2, 16], strides = [1, 1]} : vector<2x64xf32> to vector<2x16xf32>
    %446 = arith.negf %445 : vector<2x16xf32>
    %447 = math.exp %446 : vector<2x16xf32>
    %cst_113 = arith.constant 1.000000e+00 : f32
    %448 = vector.broadcast %cst_113 : f32 to vector<2x16xf32>
    %449 = arith.addf %448, %447 : vector<2x16xf32>
    %450 = arith.divf %448, %449 : vector<2x16xf32>
    %451 = vector.extract_strided_slice %419 {offsets = [0, 16], sizes = [2, 16], strides = [1, 1]} : vector<2x64xf32> to vector<2x16xf32>
    %452 = arith.negf %451 : vector<2x16xf32>
    %453 = math.exp %452 : vector<2x16xf32>
    %cst_114 = arith.constant 1.000000e+00 : f32
    %454 = vector.broadcast %cst_114 : f32 to vector<2x16xf32>
    %455 = arith.addf %454, %453 : vector<2x16xf32>
    %456 = arith.divf %454, %455 : vector<2x16xf32>
    %457 = vector.extract_strided_slice %419 {offsets = [0, 32], sizes = [2, 16], strides = [1, 1]} : vector<2x64xf32> to vector<2x16xf32>
    %458 = math.tanh %457 : vector<2x16xf32>
    %459 = vector.extract_strided_slice %419 {offsets = [0, 48], sizes = [2, 16], strides = [1, 1]} : vector<2x64xf32> to vector<2x16xf32>
    %460 = arith.negf %459 : vector<2x16xf32>
    %461 = math.exp %460 : vector<2x16xf32>
    %cst_115 = arith.constant 1.000000e+00 : f32
    %462 = vector.broadcast %cst_115 : f32 to vector<2x16xf32>
    %463 = arith.addf %462, %461 : vector<2x16xf32>
    %464 = arith.divf %462, %463 : vector<2x16xf32>
    %465 = arith.mulf %456, %394 : vector<2x16xf32>
    %466 = arith.mulf %450, %458 : vector<2x16xf32>
    %467 = arith.addf %465, %466 : vector<2x16xf32>
    %468 = math.tanh %467 : vector<2x16xf32>
    %469 = arith.mulf %464, %468 : vector<2x16xf32>
    %470 = arith.index_cast %c5_i32 : i32 to index
    %c0_116 = arith.constant 0 : index
    %c0_117 = arith.constant 0 : index
    %471 = vector.load %arg6[%470, %c0_116, %c0_117] : memref<8x2x16xf32, #tpu.memory_space<vmem>>, vector<1x2x16xf32>
    %472 = vector.shape_cast %471 : vector<1x2x16xf32> to vector<2x16xf32>
    %473 = vector.shape_cast %444 : vector<2x16xf32> to vector<1x2x16xf32>
    tpu.vector_store %arg6[%470, %c0_116, %c0_117], %473 {strides = array<i32>} : memref<8x2x16xf32, #tpu.memory_space<vmem>>, vector<1x2x16xf32>,
    %474 = arith.index_cast %405 : i32 to index
    %c0_118 = arith.constant 0 : index
    %c0_119 = arith.constant 0 : index
    %475 = vector.load %arg7[%474, %c0_118, %c0_119] : memref<8x2x16xf32, #tpu.memory_space<vmem>>, vector<1x2x16xf32>
    %476 = vector.shape_cast %475 : vector<1x2x16xf32> to vector<2x16xf32>
    %477 = vector.shape_cast %469 : vector<2x16xf32> to vector<1x2x16xf32>
    tpu.vector_store %arg7[%474, %c0_118, %c0_119], %477 {strides = array<i32>} : memref<8x2x16xf32, #tpu.memory_space<vmem>>, vector<1x2x16xf32>,
    %c6_i32 = arith.constant 6 : i32
    %c7_i32_120 = arith.constant 7 : i32
    %478 = arith.subi %c7_i32_120, %c6_i32 : i32
    %479 = tpu.concatenate %444, %469 in 1 : vector<2x16xf32>, vector<2x16xf32> -> vector<2x32xf32>
    %cst_121 = arith.constant dense<0.000000e+00> : vector<2x128xf32>
    %480 = tpu.matmul %479, %38, %cst_121 {dimension_numbers = #tpu.dot_dimension_numbers<[1], [0], [0], [1], [0, 0, 1, 1], [], []>} : vector<2x32xf32>, vector<32x128xf32>, vector<2x128xf32> -> vector<2x128xf32>
    %481 = arith.index_cast %c6_i32 : i32 to index
    %c0_122 = arith.constant 0 : index
    %c0_123 = arith.constant 0 : index
    %482 = vector.load %arg5[%481, %c0_122, %c0_123] : memref<8x2x128xf32, #tpu.memory_space<vmem>>, vector<1x2x128xf32>
    %483 = vector.shape_cast %482 : vector<1x2x128xf32> to vector<2x128xf32>
    %484 = vector.extract_strided_slice %483 {offsets = [0, 0], sizes = [2, 64], strides = [1, 1]} : vector<2x128xf32> to vector<2x64xf32>
    %485 = vector.extract_strided_slice %480 {offsets = [0, 0], sizes = [2, 64], strides = [1, 1]} : vector<2x128xf32> to vector<2x64xf32>
    %486 = arith.addf %484, %485 : vector<2x64xf32>
    %487 = arith.index_cast %478 : i32 to index
    %c0_124 = arith.constant 0 : index
    %c0_125 = arith.constant 0 : index
    %488 = vector.load %arg5[%487, %c0_124, %c0_125] : memref<8x2x128xf32, #tpu.memory_space<vmem>>, vector<1x2x128xf32>
    %489 = vector.shape_cast %488 : vector<1x2x128xf32> to vector<2x128xf32>
    %490 = vector.extract_strided_slice %489 {offsets = [0, 64], sizes = [2, 64], strides = [1, 1]} : vector<2x128xf32> to vector<2x64xf32>
    %491 = vector.extract_strided_slice %480 {offsets = [0, 64], sizes = [2, 64], strides = [1, 1]} : vector<2x128xf32> to vector<2x64xf32>
    %492 = arith.addf %490, %491 : vector<2x64xf32>
    %493 = vector.extract_strided_slice %486 {offsets = [0, 0], sizes = [2, 16], strides = [1, 1]} : vector<2x64xf32> to vector<2x16xf32>
    %494 = arith.negf %493 : vector<2x16xf32>
    %495 = math.exp %494 : vector<2x16xf32>
    %cst_126 = arith.constant 1.000000e+00 : f32
    %496 = vector.broadcast %cst_126 : f32 to vector<2x16xf32>
    %497 = arith.addf %496, %495 : vector<2x16xf32>
    %498 = arith.divf %496, %497 : vector<2x16xf32>
    %499 = vector.extract_strided_slice %486 {offsets = [0, 16], sizes = [2, 16], strides = [1, 1]} : vector<2x64xf32> to vector<2x16xf32>
    %500 = arith.negf %499 : vector<2x16xf32>
    %501 = math.exp %500 : vector<2x16xf32>
    %cst_127 = arith.constant 1.000000e+00 : f32
    %502 = vector.broadcast %cst_127 : f32 to vector<2x16xf32>
    %503 = arith.addf %502, %501 : vector<2x16xf32>
    %504 = arith.divf %502, %503 : vector<2x16xf32>
    %505 = vector.extract_strided_slice %486 {offsets = [0, 32], sizes = [2, 16], strides = [1, 1]} : vector<2x64xf32> to vector<2x16xf32>
    %506 = math.tanh %505 : vector<2x16xf32>
    %507 = vector.extract_strided_slice %486 {offsets = [0, 48], sizes = [2, 16], strides = [1, 1]} : vector<2x64xf32> to vector<2x16xf32>
    %508 = arith.negf %507 : vector<2x16xf32>
    %509 = math.exp %508 : vector<2x16xf32>
    %cst_128 = arith.constant 1.000000e+00 : f32
    %510 = vector.broadcast %cst_128 : f32 to vector<2x16xf32>
    %511 = arith.addf %510, %509 : vector<2x16xf32>
    %512 = arith.divf %510, %511 : vector<2x16xf32>
    %513 = arith.mulf %504, %442 : vector<2x16xf32>
    %514 = arith.mulf %498, %506 : vector<2x16xf32>
    %515 = arith.addf %513, %514 : vector<2x16xf32>
    %516 = math.tanh %515 : vector<2x16xf32>
    %517 = arith.mulf %512, %516 : vector<2x16xf32>
    %518 = vector.extract_strided_slice %492 {offsets = [0, 0], sizes = [2, 16], strides = [1, 1]} : vector<2x64xf32> to vector<2x16xf32>
    %519 = arith.negf %518 : vector<2x16xf32>
    %520 = math.exp %519 : vector<2x16xf32>
    %cst_129 = arith.constant 1.000000e+00 : f32
    %521 = vector.broadcast %cst_129 : f32 to vector<2x16xf32>
    %522 = arith.addf %521, %520 : vector<2x16xf32>
    %523 = arith.divf %521, %522 : vector<2x16xf32>
    %524 = vector.extract_strided_slice %492 {offsets = [0, 16], sizes = [2, 16], strides = [1, 1]} : vector<2x64xf32> to vector<2x16xf32>
    %525 = arith.negf %524 : vector<2x16xf32>
    %526 = math.exp %525 : vector<2x16xf32>
    %cst_130 = arith.constant 1.000000e+00 : f32
    %527 = vector.broadcast %cst_130 : f32 to vector<2x16xf32>
    %528 = arith.addf %527, %526 : vector<2x16xf32>
    %529 = arith.divf %527, %528 : vector<2x16xf32>
    %530 = vector.extract_strided_slice %492 {offsets = [0, 32], sizes = [2, 16], strides = [1, 1]} : vector<2x64xf32> to vector<2x16xf32>
    %531 = math.tanh %530 : vector<2x16xf32>
    %532 = vector.extract_strided_slice %492 {offsets = [0, 48], sizes = [2, 16], strides = [1, 1]} : vector<2x64xf32> to vector<2x16xf32>
    %533 = arith.negf %532 : vector<2x16xf32>
    %534 = math.exp %533 : vector<2x16xf32>
    %cst_131 = arith.constant 1.000000e+00 : f32
    %535 = vector.broadcast %cst_131 : f32 to vector<2x16xf32>
    %536 = arith.addf %535, %534 : vector<2x16xf32>
    %537 = arith.divf %535, %536 : vector<2x16xf32>
    %538 = arith.mulf %529, %467 : vector<2x16xf32>
    %539 = arith.mulf %523, %531 : vector<2x16xf32>
    %540 = arith.addf %538, %539 : vector<2x16xf32>
    %541 = math.tanh %540 : vector<2x16xf32>
    %542 = arith.mulf %537, %541 : vector<2x16xf32>
    %543 = arith.index_cast %c6_i32 : i32 to index
    %c0_132 = arith.constant 0 : index
    %c0_133 = arith.constant 0 : index
    %544 = vector.load %arg6[%543, %c0_132, %c0_133] : memref<8x2x16xf32, #tpu.memory_space<vmem>>, vector<1x2x16xf32>
    %545 = vector.shape_cast %544 : vector<1x2x16xf32> to vector<2x16xf32>
    %546 = vector.shape_cast %517 : vector<2x16xf32> to vector<1x2x16xf32>
    tpu.vector_store %arg6[%543, %c0_132, %c0_133], %546 {strides = array<i32>} : memref<8x2x16xf32, #tpu.memory_space<vmem>>, vector<1x2x16xf32>,
    %547 = arith.index_cast %478 : i32 to index
    %c0_134 = arith.constant 0 : index
    %c0_135 = arith.constant 0 : index
    %548 = vector.load %arg7[%547, %c0_134, %c0_135] : memref<8x2x16xf32, #tpu.memory_space<vmem>>, vector<1x2x16xf32>
    %549 = vector.shape_cast %548 : vector<1x2x16xf32> to vector<2x16xf32>
    %550 = vector.shape_cast %542 : vector<2x16xf32> to vector<1x2x16xf32>
    tpu.vector_store %arg7[%547, %c0_134, %c0_135], %550 {strides = array<i32>} : memref<8x2x16xf32, #tpu.memory_space<vmem>>, vector<1x2x16xf32>,
    %c7_i32_136 = arith.constant 7 : i32
    %c7_i32_137 = arith.constant 7 : i32
    %551 = arith.subi %c7_i32_137, %c7_i32_136 : i32
    %552 = tpu.concatenate %517, %542 in 1 : vector<2x16xf32>, vector<2x16xf32> -> vector<2x32xf32>
    %cst_138 = arith.constant dense<0.000000e+00> : vector<2x128xf32>
    %553 = tpu.matmul %552, %38, %cst_138 {dimension_numbers = #tpu.dot_dimension_numbers<[1], [0], [0], [1], [0, 0, 1, 1], [], []>} : vector<2x32xf32>, vector<32x128xf32>, vector<2x128xf32> -> vector<2x128xf32>
    %554 = arith.index_cast %c7_i32_136 : i32 to index
    %c0_139 = arith.constant 0 : index
    %c0_140 = arith.constant 0 : index
    %555 = vector.load %arg5[%554, %c0_139, %c0_140] : memref<8x2x128xf32, #tpu.memory_space<vmem>>, vector<1x2x128xf32>
    %556 = vector.shape_cast %555 : vector<1x2x128xf32> to vector<2x128xf32>
    %557 = vector.extract_strided_slice %556 {offsets = [0, 0], sizes = [2, 64], strides = [1, 1]} : vector<2x128xf32> to vector<2x64xf32>
    %558 = vector.extract_strided_slice %553 {offsets = [0, 0], sizes = [2, 64], strides = [1, 1]} : vector<2x128xf32> to vector<2x64xf32>
    %559 = arith.addf %557, %558 : vector<2x64xf32>
    %560 = arith.index_cast %551 : i32 to index
    %c0_141 = arith.constant 0 : index
    %c0_142 = arith.constant 0 : index
    %561 = vector.load %arg5[%560, %c0_141, %c0_142] : memref<8x2x128xf32, #tpu.memory_space<vmem>>, vector<1x2x128xf32>
    %562 = vector.shape_cast %561 : vector<1x2x128xf32> to vector<2x128xf32>
    %563 = vector.extract_strided_slice %562 {offsets = [0, 64], sizes = [2, 64], strides = [1, 1]} : vector<2x128xf32> to vector<2x64xf32>
    %564 = vector.extract_strided_slice %553 {offsets = [0, 64], sizes = [2, 64], strides = [1, 1]} : vector<2x128xf32> to vector<2x64xf32>
    %565 = arith.addf %563, %564 : vector<2x64xf32>
    %566 = vector.extract_strided_slice %559 {offsets = [0, 0], sizes = [2, 16], strides = [1, 1]} : vector<2x64xf32> to vector<2x16xf32>
    %567 = arith.negf %566 : vector<2x16xf32>
    %568 = math.exp %567 : vector<2x16xf32>
    %cst_143 = arith.constant 1.000000e+00 : f32
    %569 = vector.broadcast %cst_143 : f32 to vector<2x16xf32>
    %570 = arith.addf %569, %568 : vector<2x16xf32>
    %571 = arith.divf %569, %570 : vector<2x16xf32>
    %572 = vector.extract_strided_slice %559 {offsets = [0, 16], sizes = [2, 16], strides = [1, 1]} : vector<2x64xf32> to vector<2x16xf32>
    %573 = arith.negf %572 : vector<2x16xf32>
    %574 = math.exp %573 : vector<2x16xf32>
    %cst_144 = arith.constant 1.000000e+00 : f32
    %575 = vector.broadcast %cst_144 : f32 to vector<2x16xf32>
    %576 = arith.addf %575, %574 : vector<2x16xf32>
    %577 = arith.divf %575, %576 : vector<2x16xf32>
    %578 = vector.extract_strided_slice %559 {offsets = [0, 32], sizes = [2, 16], strides = [1, 1]} : vector<2x64xf32> to vector<2x16xf32>
    %579 = math.tanh %578 : vector<2x16xf32>
    %580 = vector.extract_strided_slice %559 {offsets = [0, 48], sizes = [2, 16], strides = [1, 1]} : vector<2x64xf32> to vector<2x16xf32>
    %581 = arith.negf %580 : vector<2x16xf32>
    %582 = math.exp %581 : vector<2x16xf32>
    %cst_145 = arith.constant 1.000000e+00 : f32
    %583 = vector.broadcast %cst_145 : f32 to vector<2x16xf32>
    %584 = arith.addf %583, %582 : vector<2x16xf32>
    %585 = arith.divf %583, %584 : vector<2x16xf32>
    %586 = arith.mulf %577, %515 : vector<2x16xf32>
    %587 = arith.mulf %571, %579 : vector<2x16xf32>
    %588 = arith.addf %586, %587 : vector<2x16xf32>
    %589 = math.tanh %588 : vector<2x16xf32>
    %590 = arith.mulf %585, %589 : vector<2x16xf32>
    %591 = vector.extract_strided_slice %565 {offsets = [0, 0], sizes = [2, 16], strides = [1, 1]} : vector<2x64xf32> to vector<2x16xf32>
    %592 = arith.negf %591 : vector<2x16xf32>
    %593 = math.exp %592 : vector<2x16xf32>
    %cst_146 = arith.constant 1.000000e+00 : f32
    %594 = vector.broadcast %cst_146 : f32 to vector<2x16xf32>
    %595 = arith.addf %594, %593 : vector<2x16xf32>
    %596 = arith.divf %594, %595 : vector<2x16xf32>
    %597 = vector.extract_strided_slice %565 {offsets = [0, 16], sizes = [2, 16], strides = [1, 1]} : vector<2x64xf32> to vector<2x16xf32>
    %598 = arith.negf %597 : vector<2x16xf32>
    %599 = math.exp %598 : vector<2x16xf32>
    %cst_147 = arith.constant 1.000000e+00 : f32
    %600 = vector.broadcast %cst_147 : f32 to vector<2x16xf32>
    %601 = arith.addf %600, %599 : vector<2x16xf32>
    %602 = arith.divf %600, %601 : vector<2x16xf32>
    %603 = vector.extract_strided_slice %565 {offsets = [0, 32], sizes = [2, 16], strides = [1, 1]} : vector<2x64xf32> to vector<2x16xf32>
    %604 = math.tanh %603 : vector<2x16xf32>
    %605 = vector.extract_strided_slice %565 {offsets = [0, 48], sizes = [2, 16], strides = [1, 1]} : vector<2x64xf32> to vector<2x16xf32>
    %606 = arith.negf %605 : vector<2x16xf32>
    %607 = math.exp %606 : vector<2x16xf32>
    %cst_148 = arith.constant 1.000000e+00 : f32
    %608 = vector.broadcast %cst_148 : f32 to vector<2x16xf32>
    %609 = arith.addf %608, %607 : vector<2x16xf32>
    %610 = arith.divf %608, %609 : vector<2x16xf32>
    %611 = arith.mulf %602, %540 : vector<2x16xf32>
    %612 = arith.mulf %596, %604 : vector<2x16xf32>
    %613 = arith.addf %611, %612 : vector<2x16xf32>
    %614 = math.tanh %613 : vector<2x16xf32>
    %615 = arith.mulf %610, %614 : vector<2x16xf32>
    %616 = arith.index_cast %c7_i32_136 : i32 to index
    %c0_149 = arith.constant 0 : index
    %c0_150 = arith.constant 0 : index
    %617 = vector.load %arg6[%616, %c0_149, %c0_150] : memref<8x2x16xf32, #tpu.memory_space<vmem>>, vector<1x2x16xf32>
    %618 = vector.shape_cast %617 : vector<1x2x16xf32> to vector<2x16xf32>
    %619 = vector.shape_cast %590 : vector<2x16xf32> to vector<1x2x16xf32>
    tpu.vector_store %arg6[%616, %c0_149, %c0_150], %619 {strides = array<i32>} : memref<8x2x16xf32, #tpu.memory_space<vmem>>, vector<1x2x16xf32>,
    %620 = arith.index_cast %551 : i32 to index
    %c0_151 = arith.constant 0 : index
    %c0_152 = arith.constant 0 : index
    %621 = vector.load %arg7[%620, %c0_151, %c0_152] : memref<8x2x16xf32, #tpu.memory_space<vmem>>, vector<1x2x16xf32>
    %622 = vector.shape_cast %621 : vector<1x2x16xf32> to vector<2x16xf32>
    %623 = vector.shape_cast %615 : vector<2x16xf32> to vector<1x2x16xf32>
    tpu.vector_store %arg7[%620, %c0_151, %c0_152], %623 {strides = array<i32>} : memref<8x2x16xf32, #tpu.memory_space<vmem>>, vector<1x2x16xf32>,
    %c8_i32 = arith.constant 8 : i32
    %c0_153 = arith.constant 0 : index
    %c0_154 = arith.constant 0 : index
    %c0_155 = arith.constant 0 : index
    %624 = vector.load %arg6[%c0_153, %c0_154, %c0_155] : memref<8x2x16xf32, #tpu.memory_space<vmem>>, vector<8x2x16xf32>
    %c0_156 = arith.constant 0 : index
    %c0_157 = arith.constant 0 : index
    %c0_158 = arith.constant 0 : index
    %625 = vector.load %arg4[%c0_156, %c0_157, %c0_158] : memref<8x2x32xf32, #tpu.memory_space<vmem>>, vector<8x2x16xf32>
    tpu.vector_store %arg4[%c0_156, %c0_157, %c0_158], %624 {strides = array<i32>} : memref<8x2x32xf32, #tpu.memory_space<vmem>>, vector<8x2x16xf32>,
    %c0_159 = arith.constant 0 : index
    %c0_160 = arith.constant 0 : index
    %c0_161 = arith.constant 0 : index
    %626 = vector.load %arg7[%c0_159, %c0_160, %c0_161] : memref<8x2x16xf32, #tpu.memory_space<vmem>>, vector<8x2x16xf32>
    %c0_162 = arith.constant 0 : index
    %c0_163 = arith.constant 0 : index
    %c16 = arith.constant 16 : index
    %627 = vector.load %arg4[%c0_162, %c0_163, %c16] : memref<8x2x32xf32, #tpu.memory_space<vmem>>, vector<8x2x16xf32>
    tpu.vector_store %arg4[%c0_162, %c0_163, %c16], %626 {strides = array<i32>} : memref<8x2x32xf32, #tpu.memory_space<vmem>>, vector<8x2x16xf32>,
    return
  }
}

module attributes {stable_mosaic.version = 11 : i64} {
  func.func @_fc_crf_kernel(%arg0: memref<16x32xf32, #tpu.memory_space<vmem>>, %arg1: memref<32x6xf32, #tpu.memory_space<vmem>>, %arg2: memref<1x6xf32, #tpu.memory_space<vmem>>, %arg3: memref<8x2x1xf32, #tpu.memory_space<vmem>>, %arg4: memref<9x2x1xi32, #tpu.memory_space<vmem>>, %arg5: memref<6x6xf32, #tpu.memory_space<vmem>>, %arg6: memref<2x1xf32, #tpu.memory_space<vmem>>, %arg7: memref<8x2x6xf32, #tpu.memory_space<vmem>>) attributes {dimension_semantics = [], scalar_prefetch = 0 : i64, scratch_operands = 1 : i64, tpu.core_type = #tpu.core_type<tc>} {
    %c0 = arith.constant 0 : index
    %c0_0 = arith.constant 0 : index
    %0 = vector.load %arg0[%c0, %c0_0] : memref<16x32xf32, #tpu.memory_space<vmem>>, vector<16x32xf32>
    %c0_1 = arith.constant 0 : index
    %c0_2 = arith.constant 0 : index
    %1 = vector.load %arg1[%c0_1, %c0_2] : memref<32x6xf32, #tpu.memory_space<vmem>>, vector<32x6xf32>
    %cst = arith.constant dense<0.000000e+00> : vector<16x6xf32>
    %2 = tpu.matmul %0, %1, %cst {dimension_numbers = #tpu.dot_dimension_numbers<[1], [0], [0], [1], [0, 0, 1, 1], [], []>} : vector<16x32xf32>, vector<32x6xf32>, vector<16x6xf32> -> vector<16x6xf32>
    %c0_3 = arith.constant 0 : index
    %c0_4 = arith.constant 0 : index
    %3 = vector.load %arg2[%c0_3, %c0_4] : memref<1x6xf32, #tpu.memory_space<vmem>>, vector<1x6xf32>
    %4 = vector.broadcast %3 : vector<1x6xf32> to vector<16x6xf32>
    %5 = arith.addf %2, %4 : vector<16x6xf32>
    %6 = vector.extract_strided_slice %5 {offsets = [0, 0], sizes = [2, 6], strides = [1, 1]} : vector<16x6xf32> to vector<2x6xf32>
    %c0_5 = arith.constant 0 : index
    %c0_6 = arith.constant 0 : index
    %c0_7 = arith.constant 0 : index
    %7 = vector.load %arg3[%c0_5, %c0_6, %c0_7] : memref<8x2x1xf32, #tpu.memory_space<vmem>>, vector<1x2x1xf32>
    %8 = vector.shape_cast %7 : vector<1x2x1xf32> to vector<2x1xf32>
    %9 = vector.broadcast %8 : vector<2x1xf32> to vector<2x6xf32>
    %10 = arith.mulf %6, %9 : vector<2x6xf32>
    %c0_8 = arith.constant 0 : index
    %c0_9 = arith.constant 0 : index
    %c0_10 = arith.constant 0 : index
    %11 = vector.load %arg7[%c0_8, %c0_9, %c0_10] : memref<8x2x6xf32, #tpu.memory_space<vmem>>, vector<1x2x6xf32>
    %12 = vector.shape_cast %11 : vector<1x2x6xf32> to vector<2x6xf32>
    %13 = vector.shape_cast %10 : vector<2x6xf32> to vector<1x2x6xf32>
    tpu.vector_store %arg7[%c0_8, %c0_9, %c0_10], %13 {strides = array<i32>} : memref<8x2x6xf32, #tpu.memory_space<vmem>>, vector<1x2x6xf32>,
    %14 = vector.extract_strided_slice %5 {offsets = [2, 0], sizes = [2, 6], strides = [1, 1]} : vector<16x6xf32> to vector<2x6xf32>
    %c1 = arith.constant 1 : index
    %c0_11 = arith.constant 0 : index
    %c0_12 = arith.constant 0 : index
    %15 = vector.load %arg3[%c1, %c0_11, %c0_12] : memref<8x2x1xf32, #tpu.memory_space<vmem>>, vector<1x2x1xf32>
    %16 = vector.shape_cast %15 : vector<1x2x1xf32> to vector<2x1xf32>
    %17 = vector.broadcast %16 : vector<2x1xf32> to vector<2x6xf32>
    %18 = arith.mulf %14, %17 : vector<2x6xf32>
    %c1_13 = arith.constant 1 : index
    %c0_14 = arith.constant 0 : index
    %c0_15 = arith.constant 0 : index
    %19 = vector.load %arg7[%c1_13, %c0_14, %c0_15] : memref<8x2x6xf32, #tpu.memory_space<vmem>>, vector<1x2x6xf32>
    %20 = vector.shape_cast %19 : vector<1x2x6xf32> to vector<2x6xf32>
    %21 = vector.shape_cast %18 : vector<2x6xf32> to vector<1x2x6xf32>
    tpu.vector_store %arg7[%c1_13, %c0_14, %c0_15], %21 {strides = array<i32>} : memref<8x2x6xf32, #tpu.memory_space<vmem>>, vector<1x2x6xf32>,
    %22 = vector.extract_strided_slice %5 {offsets = [4, 0], sizes = [2, 6], strides = [1, 1]} : vector<16x6xf32> to vector<2x6xf32>
    %c2 = arith.constant 2 : index
    %c0_16 = arith.constant 0 : index
    %c0_17 = arith.constant 0 : index
    %23 = vector.load %arg3[%c2, %c0_16, %c0_17] : memref<8x2x1xf32, #tpu.memory_space<vmem>>, vector<1x2x1xf32>
    %24 = vector.shape_cast %23 : vector<1x2x1xf32> to vector<2x1xf32>
    %25 = vector.broadcast %24 : vector<2x1xf32> to vector<2x6xf32>
    %26 = arith.mulf %22, %25 : vector<2x6xf32>
    %c2_18 = arith.constant 2 : index
    %c0_19 = arith.constant 0 : index
    %c0_20 = arith.constant 0 : index
    %27 = vector.load %arg7[%c2_18, %c0_19, %c0_20] : memref<8x2x6xf32, #tpu.memory_space<vmem>>, vector<1x2x6xf32>
    %28 = vector.shape_cast %27 : vector<1x2x6xf32> to vector<2x6xf32>
    %29 = vector.shape_cast %26 : vector<2x6xf32> to vector<1x2x6xf32>
    tpu.vector_store %arg7[%c2_18, %c0_19, %c0_20], %29 {strides = array<i32>} : memref<8x2x6xf32, #tpu.memory_space<vmem>>, vector<1x2x6xf32>,
    %30 = vector.extract_strided_slice %5 {offsets = [6, 0], sizes = [2, 6], strides = [1, 1]} : vector<16x6xf32> to vector<2x6xf32>
    %c3 = arith.constant 3 : index
    %c0_21 = arith.constant 0 : index
    %c0_22 = arith.constant 0 : index
    %31 = vector.load %arg3[%c3, %c0_21, %c0_22] : memref<8x2x1xf32, #tpu.memory_space<vmem>>, vector<1x2x1xf32>
    %32 = vector.shape_cast %31 : vector<1x2x1xf32> to vector<2x1xf32>
    %33 = vector.broadcast %32 : vector<2x1xf32> to vector<2x6xf32>
    %34 = arith.mulf %30, %33 : vector<2x6xf32>
    %c3_23 = arith.constant 3 : index
    %c0_24 = arith.constant 0 : index
    %c0_25 = arith.constant 0 : index
    %35 = vector.load %arg7[%c3_23, %c0_24, %c0_25] : memref<8x2x6xf32, #tpu.memory_space<vmem>>, vector<1x2x6xf32>
    %36 = vector.shape_cast %35 : vector<1x2x6xf32> to vector<2x6xf32>
    %37 = vector.shape_cast %34 : vector<2x6xf32> to vector<1x2x6xf32>
    tpu.vector_store %arg7[%c3_23, %c0_24, %c0_25], %37 {strides = array<i32>} : memref<8x2x6xf32, #tpu.memory_space<vmem>>, vector<1x2x6xf32>,
    %38 = vector.extract_strided_slice %5 {offsets = [8, 0], sizes = [2, 6], strides = [1, 1]} : vector<16x6xf32> to vector<2x6xf32>
    %c4 = arith.constant 4 : index
    %c0_26 = arith.constant 0 : index
    %c0_27 = arith.constant 0 : index
    %39 = vector.load %arg3[%c4, %c0_26, %c0_27] : memref<8x2x1xf32, #tpu.memory_space<vmem>>, vector<1x2x1xf32>
    %40 = vector.shape_cast %39 : vector<1x2x1xf32> to vector<2x1xf32>
    %41 = vector.broadcast %40 : vector<2x1xf32> to vector<2x6xf32>
    %42 = arith.mulf %38, %41 : vector<2x6xf32>
    %c4_28 = arith.constant 4 : index
    %c0_29 = arith.constant 0 : index
    %c0_30 = arith.constant 0 : index
    %43 = vector.load %arg7[%c4_28, %c0_29, %c0_30] : memref<8x2x6xf32, #tpu.memory_space<vmem>>, vector<1x2x6xf32>
    %44 = vector.shape_cast %43 : vector<1x2x6xf32> to vector<2x6xf32>
    %45 = vector.shape_cast %42 : vector<2x6xf32> to vector<1x2x6xf32>
    tpu.vector_store %arg7[%c4_28, %c0_29, %c0_30], %45 {strides = array<i32>} : memref<8x2x6xf32, #tpu.memory_space<vmem>>, vector<1x2x6xf32>,
    %46 = vector.extract_strided_slice %5 {offsets = [10, 0], sizes = [2, 6], strides = [1, 1]} : vector<16x6xf32> to vector<2x6xf32>
    %c5 = arith.constant 5 : index
    %c0_31 = arith.constant 0 : index
    %c0_32 = arith.constant 0 : index
    %47 = vector.load %arg3[%c5, %c0_31, %c0_32] : memref<8x2x1xf32, #tpu.memory_space<vmem>>, vector<1x2x1xf32>
    %48 = vector.shape_cast %47 : vector<1x2x1xf32> to vector<2x1xf32>
    %49 = vector.broadcast %48 : vector<2x1xf32> to vector<2x6xf32>
    %50 = arith.mulf %46, %49 : vector<2x6xf32>
    %c5_33 = arith.constant 5 : index
    %c0_34 = arith.constant 0 : index
    %c0_35 = arith.constant 0 : index
    %51 = vector.load %arg7[%c5_33, %c0_34, %c0_35] : memref<8x2x6xf32, #tpu.memory_space<vmem>>, vector<1x2x6xf32>
    %52 = vector.shape_cast %51 : vector<1x2x6xf32> to vector<2x6xf32>
    %53 = vector.shape_cast %50 : vector<2x6xf32> to vector<1x2x6xf32>
    tpu.vector_store %arg7[%c5_33, %c0_34, %c0_35], %53 {strides = array<i32>} : memref<8x2x6xf32, #tpu.memory_space<vmem>>, vector<1x2x6xf32>,
    %54 = vector.extract_strided_slice %5 {offsets = [12, 0], sizes = [2, 6], strides = [1, 1]} : vector<16x6xf32> to vector<2x6xf32>
    %c6 = arith.constant 6 : index
    %c0_36 = arith.constant 0 : index
    %c0_37 = arith.constant 0 : index
    %55 = vector.load %arg3[%c6, %c0_36, %c0_37] : memref<8x2x1xf32, #tpu.memory_space<vmem>>, vector<1x2x1xf32>
    %56 = vector.shape_cast %55 : vector<1x2x1xf32> to vector<2x1xf32>
    %57 = vector.broadcast %56 : vector<2x1xf32> to vector<2x6xf32>
    %58 = arith.mulf %54, %57 : vector<2x6xf32>
    %c6_38 = arith.constant 6 : index
    %c0_39 = arith.constant 0 : index
    %c0_40 = arith.constant 0 : index
    %59 = vector.load %arg7[%c6_38, %c0_39, %c0_40] : memref<8x2x6xf32, #tpu.memory_space<vmem>>, vector<1x2x6xf32>
    %60 = vector.shape_cast %59 : vector<1x2x6xf32> to vector<2x6xf32>
    %61 = vector.shape_cast %58 : vector<2x6xf32> to vector<1x2x6xf32>
    tpu.vector_store %arg7[%c6_38, %c0_39, %c0_40], %61 {strides = array<i32>} : memref<8x2x6xf32, #tpu.memory_space<vmem>>, vector<1x2x6xf32>,
    %62 = vector.extract_strided_slice %5 {offsets = [14, 0], sizes = [2, 6], strides = [1, 1]} : vector<16x6xf32> to vector<2x6xf32>
    %c7 = arith.constant 7 : index
    %c0_41 = arith.constant 0 : index
    %c0_42 = arith.constant 0 : index
    %63 = vector.load %arg3[%c7, %c0_41, %c0_42] : memref<8x2x1xf32, #tpu.memory_space<vmem>>, vector<1x2x1xf32>
    %64 = vector.shape_cast %63 : vector<1x2x1xf32> to vector<2x1xf32>
    %65 = vector.broadcast %64 : vector<2x1xf32> to vector<2x6xf32>
    %66 = arith.mulf %62, %65 : vector<2x6xf32>
    %c7_43 = arith.constant 7 : index
    %c0_44 = arith.constant 0 : index
    %c0_45 = arith.constant 0 : index
    %67 = vector.load %arg7[%c7_43, %c0_44, %c0_45] : memref<8x2x6xf32, #tpu.memory_space<vmem>>, vector<1x2x6xf32>
    %68 = vector.shape_cast %67 : vector<1x2x6xf32> to vector<2x6xf32>
    %69 = vector.shape_cast %66 : vector<2x6xf32> to vector<1x2x6xf32>
    tpu.vector_store %arg7[%c7_43, %c0_44, %c0_45], %69 {strides = array<i32>} : memref<8x2x6xf32, #tpu.memory_space<vmem>>, vector<1x2x6xf32>,
    %c0_46 = arith.constant 0 : index
    %c0_47 = arith.constant 0 : index
    %70 = vector.load %arg5[%c0_46, %c0_47] : memref<6x6xf32, #tpu.memory_space<vmem>>, vector<6x6xf32>
    %71 = tpu.iota {dimensions = array<i32: 1>} : vector<2x6xi32>
    %c4_i32 = arith.constant 4 : i32
    %72 = vector.broadcast %c4_i32 : i32 to vector<2x6xi32>
    %73 = arith.cmpi eq, %71, %72 : vector<2x6xi32>
    %cst_48 = arith.constant 0.000000e+00 : f32
    %cst_49 = arith.constant -1.000000e+04 : f32
    %74 = vector.broadcast %cst_48 : f32 to vector<2x6xf32>
    %75 = vector.broadcast %cst_49 : f32 to vector<2x6xf32>
    %76 = arith.select %73, %74, %75 : vector<2x6xi1>, vector<2x6xf32>
    %cst_50 = arith.constant 0.000000e+00 : f32
    %77 = vector.broadcast %cst_50 : f32 to vector<2x1xf32>
    %c0_i32 = arith.constant 0 : i32
    %78 = arith.index_cast %c0_i32 : i32 to index
    %c0_51 = arith.constant 0 : index
    %c0_52 = arith.constant 0 : index
    %79 = vector.load %arg7[%78, %c0_51, %c0_52] : memref<8x2x6xf32, #tpu.memory_space<vmem>>, vector<1x2x6xf32>
    %80 = vector.shape_cast %79 : vector<1x2x6xf32> to vector<2x6xf32>
    %81 = arith.index_cast %c0_i32 : i32 to index
    %c0_53 = arith.constant 0 : index
    %c0_54 = arith.constant 0 : index
    %82 = vector.load %arg3[%81, %c0_53, %c0_54] : memref<8x2x1xf32, #tpu.memory_space<vmem>>, vector<1x2x1xf32>
    %83 = vector.shape_cast %82 : vector<1x2x1xf32> to vector<2x1xf32>
    %84 = arith.index_cast %c0_i32 : i32 to index
    %c0_55 = arith.constant 0 : index
    %c0_56 = arith.constant 0 : index
    %85 = vector.load %arg4[%84, %c0_55, %c0_56] : memref<9x2x1xi32, #tpu.memory_space<vmem>>, vector<1x2x1xi32>
    %86 = vector.shape_cast %85 : vector<1x2x1xi32> to vector<2x1xi32>
    %c1_i32 = arith.constant 1 : i32
    %87 = arith.addi %c0_i32, %c1_i32 : i32
    %88 = arith.index_cast %87 : i32 to index
    %c0_57 = arith.constant 0 : index
    %c0_58 = arith.constant 0 : index
    %89 = vector.load %arg4[%88, %c0_57, %c0_58] : memref<9x2x1xi32, #tpu.memory_space<vmem>>, vector<1x2x1xi32>
    %90 = vector.shape_cast %89 : vector<1x2x1xi32> to vector<2x1xi32>
    %91 = vector.shape_cast %76 : vector<2x6xf32> to vector<2x1x6xf32>
    %92 = vector.shape_cast %70 : vector<6x6xf32> to vector<1x6x6xf32>
    %93 = vector.broadcast %91 : vector<2x1x6xf32> to vector<2x6x6xf32>
    %94 = vector.broadcast %92 : vector<1x6x6xf32> to vector<2x6x6xf32>
    %95 = arith.addf %93, %94 : vector<2x6x6xf32>
    %cst_59 = arith.constant dense<0xFF800000> : vector<2x6xf32>
    %96 = vector.multi_reduction <maximumf>, %95, %cst_59 [2] : vector<2x6x6xf32> to vector<2x6xf32>
    %97 = vector.shape_cast %96 : vector<2x6xf32> to vector<2x6x1xf32>
    %98 = vector.broadcast %97 : vector<2x6x1xf32> to vector<2x6x6xf32>
    %99 = arith.subf %95, %98 : vector<2x6x6xf32>
    %100 = math.exp %99 : vector<2x6x6xf32>
    %cst_60 = arith.constant dense<0.000000e+00> : vector<2x6xf32>
    %101 = vector.multi_reduction <add>, %100, %cst_60 [2] : vector<2x6x6xf32> to vector<2x6xf32>
    %102 = math.log %101 : vector<2x6xf32>
    %103 = arith.addf %96, %102 : vector<2x6xf32>
    %104 = arith.addf %103, %80 : vector<2x6xf32>
    %105 = vector.broadcast %83 : vector<2x1xf32> to vector<2x6xf32>
    %106 = arith.mulf %104, %105 : vector<2x6xf32>
    %cst_61 = arith.constant 1.000000e+00 : f32
    %107 = vector.broadcast %cst_61 : f32 to vector<2x1xf32>
    %108 = arith.subf %107, %83 : vector<2x1xf32>
    %109 = vector.broadcast %108 : vector<2x1xf32> to vector<2x6xf32>
    %110 = arith.mulf %76, %109 : vector<2x6xf32>
    %111 = arith.addf %106, %110 : vector<2x6xf32>
    %112 = vector.broadcast %90 : vector<2x1xi32> to vector<2x6xi32>
    %113 = arith.cmpi eq, %71, %112 : vector<2x6xi32>
    %114 = arith.extui %113 : vector<2x6xi1> to vector<2x6xi32>
    %115 = arith.sitofp %114 : vector<2x6xi32> to vector<2x6xf32>
    %116 = vector.broadcast %86 : vector<2x1xi32> to vector<2x6xi32>
    %117 = arith.cmpi eq, %71, %116 : vector<2x6xi32>
    %118 = arith.extui %117 : vector<2x6xi1> to vector<2x6xi32>
    %119 = arith.sitofp %118 : vector<2x6xi32> to vector<2x6xf32>
    %120 = arith.mulf %80, %115 : vector<2x6xf32>
    %cst_62 = arith.constant dense<0.000000e+00> : vector<2xf32>
    %121 = vector.multi_reduction <add>, %120, %cst_62 [1] : vector<2x6xf32> to vector<2xf32>
    %122 = vector.shape_cast %121 : vector<2xf32> to vector<2x1xf32>
    %cst_63 = arith.constant dense<0.000000e+00> : vector<2x6xf32>
    %123 = tpu.matmul %115, %70, %cst_63 {dimension_numbers = #tpu.dot_dimension_numbers<[1], [0], [0], [1], [0, 0, 1, 1], [], []>} : vector<2x6xf32>, vector<6x6xf32>, vector<2x6xf32> -> vector<2x6xf32>
    %124 = arith.mulf %123, %119 : vector<2x6xf32>
    %cst_64 = arith.constant dense<0.000000e+00> : vector<2xf32>
    %125 = vector.multi_reduction <add>, %124, %cst_64 [1] : vector<2x6xf32> to vector<2xf32>
    %126 = vector.shape_cast %125 : vector<2xf32> to vector<2x1xf32>
    %127 = arith.addf %122, %126 : vector<2x1xf32>
    %128 = arith.mulf %127, %83 : vector<2x1xf32>
    %129 = arith.addf %77, %128 : vector<2x1xf32>
    %c1_i32_65 = arith.constant 1 : i32
    %130 = arith.index_cast %c1_i32_65 : i32 to index
    %c0_66 = arith.constant 0 : index
    %c0_67 = arith.constant 0 : index
    %131 = vector.load %arg7[%130, %c0_66, %c0_67] : memref<8x2x6xf32, #tpu.memory_space<vmem>>, vector<1x2x6xf32>
    %132 = vector.shape_cast %131 : vector<1x2x6xf32> to vector<2x6xf32>
    %133 = arith.index_cast %c1_i32_65 : i32 to index
    %c0_68 = arith.constant 0 : index
    %c0_69 = arith.constant 0 : index
    %134 = vector.load %arg3[%133, %c0_68, %c0_69] : memref<8x2x1xf32, #tpu.memory_space<vmem>>, vector<1x2x1xf32>
    %135 = vector.shape_cast %134 : vector<1x2x1xf32> to vector<2x1xf32>
    %136 = arith.index_cast %c1_i32_65 : i32 to index
    %c0_70 = arith.constant 0 : index
    %c0_71 = arith.constant 0 : index
    %137 = vector.load %arg4[%136, %c0_70, %c0_71] : memref<9x2x1xi32, #tpu.memory_space<vmem>>, vector<1x2x1xi32>
    %138 = vector.shape_cast %137 : vector<1x2x1xi32> to vector<2x1xi32>
    %c1_i32_72 = arith.constant 1 : i32
    %139 = arith.addi %c1_i32_65, %c1_i32_72 : i32
    %140 = arith.index_cast %139 : i32 to index
    %c0_73 = arith.constant 0 : index
    %c0_74 = arith.constant 0 : index
    %141 = vector.load %arg4[%140, %c0_73, %c0_74] : memref<9x2x1xi32, #tpu.memory_space<vmem>>, vector<1x2x1xi32>
    %142 = vector.shape_cast %141 : vector<1x2x1xi32> to vector<2x1xi32>
    %143 = vector.shape_cast %111 : vector<2x6xf32> to vector<2x1x6xf32>
    %144 = vector.shape_cast %70 : vector<6x6xf32> to vector<1x6x6xf32>
    %145 = vector.broadcast %143 : vector<2x1x6xf32> to vector<2x6x6xf32>
    %146 = vector.broadcast %144 : vector<1x6x6xf32> to vector<2x6x6xf32>
    %147 = arith.addf %145, %146 : vector<2x6x6xf32>
    %cst_75 = arith.constant dense<0xFF800000> : vector<2x6xf32>
    %148 = vector.multi_reduction <maximumf>, %147, %cst_75 [2] : vector<2x6x6xf32> to vector<2x6xf32>
    %149 = vector.shape_cast %148 : vector<2x6xf32> to vector<2x6x1xf32>
    %150 = vector.broadcast %149 : vector<2x6x1xf32> to vector<2x6x6xf32>
    %151 = arith.subf %147, %150 : vector<2x6x6xf32>
    %152 = math.exp %151 : vector<2x6x6xf32>
    %cst_76 = arith.constant dense<0.000000e+00> : vector<2x6xf32>
    %153 = vector.multi_reduction <add>, %152, %cst_76 [2] : vector<2x6x6xf32> to vector<2x6xf32>
    %154 = math.log %153 : vector<2x6xf32>
    %155 = arith.addf %148, %154 : vector<2x6xf32>
    %156 = arith.addf %155, %132 : vector<2x6xf32>
    %157 = vector.broadcast %135 : vector<2x1xf32> to vector<2x6xf32>
    %158 = arith.mulf %156, %157 : vector<2x6xf32>
    %cst_77 = arith.constant 1.000000e+00 : f32
    %159 = vector.broadcast %cst_77 : f32 to vector<2x1xf32>
    %160 = arith.subf %159, %135 : vector<2x1xf32>
    %161 = vector.broadcast %160 : vector<2x1xf32> to vector<2x6xf32>
    %162 = arith.mulf %111, %161 : vector<2x6xf32>
    %163 = arith.addf %158, %162 : vector<2x6xf32>
    %164 = vector.broadcast %142 : vector<2x1xi32> to vector<2x6xi32>
    %165 = arith.cmpi eq, %71, %164 : vector<2x6xi32>
    %166 = arith.extui %165 : vector<2x6xi1> to vector<2x6xi32>
    %167 = arith.sitofp %166 : vector<2x6xi32> to vector<2x6xf32>
    %168 = vector.broadcast %138 : vector<2x1xi32> to vector<2x6xi32>
    %169 = arith.cmpi eq, %71, %168 : vector<2x6xi32>
    %170 = arith.extui %169 : vector<2x6xi1> to vector<2x6xi32>
    %171 = arith.sitofp %170 : vector<2x6xi32> to vector<2x6xf32>
    %172 = arith.mulf %132, %167 : vector<2x6xf32>
    %cst_78 = arith.constant dense<0.000000e+00> : vector<2xf32>
    %173 = vector.multi_reduction <add>, %172, %cst_78 [1] : vector<2x6xf32> to vector<2xf32>
    %174 = vector.shape_cast %173 : vector<2xf32> to vector<2x1xf32>
    %cst_79 = arith.constant dense<0.000000e+00> : vector<2x6xf32>
    %175 = tpu.matmul %167, %70, %cst_79 {dimension_numbers = #tpu.dot_dimension_numbers<[1], [0], [0], [1], [0, 0, 1, 1], [], []>} : vector<2x6xf32>, vector<6x6xf32>, vector<2x6xf32> -> vector<2x6xf32>
    %176 = arith.mulf %175, %171 : vector<2x6xf32>
    %cst_80 = arith.constant dense<0.000000e+00> : vector<2xf32>
    %177 = vector.multi_reduction <add>, %176, %cst_80 [1] : vector<2x6xf32> to vector<2xf32>
    %178 = vector.shape_cast %177 : vector<2xf32> to vector<2x1xf32>
    %179 = arith.addf %174, %178 : vector<2x1xf32>
    %180 = arith.mulf %179, %135 : vector<2x1xf32>
    %181 = arith.addf %129, %180 : vector<2x1xf32>
    %c2_i32 = arith.constant 2 : i32
    %182 = arith.index_cast %c2_i32 : i32 to index
    %c0_81 = arith.constant 0 : index
    %c0_82 = arith.constant 0 : index
    %183 = vector.load %arg7[%182, %c0_81, %c0_82] : memref<8x2x6xf32, #tpu.memory_space<vmem>>, vector<1x2x6xf32>
    %184 = vector.shape_cast %183 : vector<1x2x6xf32> to vector<2x6xf32>
    %185 = arith.index_cast %c2_i32 : i32 to index
    %c0_83 = arith.constant 0 : index
    %c0_84 = arith.constant 0 : index
    %186 = vector.load %arg3[%185, %c0_83, %c0_84] : memref<8x2x1xf32, #tpu.memory_space<vmem>>, vector<1x2x1xf32>
    %187 = vector.shape_cast %186 : vector<1x2x1xf32> to vector<2x1xf32>
    %188 = arith.index_cast %c2_i32 : i32 to index
    %c0_85 = arith.constant 0 : index
    %c0_86 = arith.constant 0 : index
    %189 = vector.load %arg4[%188, %c0_85, %c0_86] : memref<9x2x1xi32, #tpu.memory_space<vmem>>, vector<1x2x1xi32>
    %190 = vector.shape_cast %189 : vector<1x2x1xi32> to vector<2x1xi32>
    %c1_i32_87 = arith.constant 1 : i32
    %191 = arith.addi %c2_i32, %c1_i32_87 : i32
    %192 = arith.index_cast %191 : i32 to index
    %c0_88 = arith.constant 0 : index
    %c0_89 = arith.constant 0 : index
    %193 = vector.load %arg4[%192, %c0_88, %c0_89] : memref<9x2x1xi32, #tpu.memory_space<vmem>>, vector<1x2x1xi32>
    %194 = vector.shape_cast %193 : vector<1x2x1xi32> to vector<2x1xi32>
    %195 = vector.shape_cast %163 : vector<2x6xf32> to vector<2x1x6xf32>
    %196 = vector.shape_cast %70 : vector<6x6xf32> to vector<1x6x6xf32>
    %197 = vector.broadcast %195 : vector<2x1x6xf32> to vector<2x6x6xf32>
    %198 = vector.broadcast %196 : vector<1x6x6xf32> to vector<2x6x6xf32>
    %199 = arith.addf %197, %198 : vector<2x6x6xf32>
    %cst_90 = arith.constant dense<0xFF800000> : vector<2x6xf32>
    %200 = vector.multi_reduction <maximumf>, %199, %cst_90 [2] : vector<2x6x6xf32> to vector<2x6xf32>
    %201 = vector.shape_cast %200 : vector<2x6xf32> to vector<2x6x1xf32>
    %202 = vector.broadcast %201 : vector<2x6x1xf32> to vector<2x6x6xf32>
    %203 = arith.subf %199, %202 : vector<2x6x6xf32>
    %204 = math.exp %203 : vector<2x6x6xf32>
    %cst_91 = arith.constant dense<0.000000e+00> : vector<2x6xf32>
    %205 = vector.multi_reduction <add>, %204, %cst_91 [2] : vector<2x6x6xf32> to vector<2x6xf32>
    %206 = math.log %205 : vector<2x6xf32>
    %207 = arith.addf %200, %206 : vector<2x6xf32>
    %208 = arith.addf %207, %184 : vector<2x6xf32>
    %209 = vector.broadcast %187 : vector<2x1xf32> to vector<2x6xf32>
    %210 = arith.mulf %208, %209 : vector<2x6xf32>
    %cst_92 = arith.constant 1.000000e+00 : f32
    %211 = vector.broadcast %cst_92 : f32 to vector<2x1xf32>
    %212 = arith.subf %211, %187 : vector<2x1xf32>
    %213 = vector.broadcast %212 : vector<2x1xf32> to vector<2x6xf32>
    %214 = arith.mulf %163, %213 : vector<2x6xf32>
    %215 = arith.addf %210, %214 : vector<2x6xf32>
    %216 = vector.broadcast %194 : vector<2x1xi32> to vector<2x6xi32>
    %217 = arith.cmpi eq, %71, %216 : vector<2x6xi32>
    %218 = arith.extui %217 : vector<2x6xi1> to vector<2x6xi32>
    %219 = arith.sitofp %218 : vector<2x6xi32> to vector<2x6xf32>
    %220 = vector.broadcast %190 : vector<2x1xi32> to vector<2x6xi32>
    %221 = arith.cmpi eq, %71, %220 : vector<2x6xi32>
    %222 = arith.extui %221 : vector<2x6xi1> to vector<2x6xi32>
    %223 = arith.sitofp %222 : vector<2x6xi32> to vector<2x6xf32>
    %224 = arith.mulf %184, %219 : vector<2x6xf32>
    %cst_93 = arith.constant dense<0.000000e+00> : vector<2xf32>
    %225 = vector.multi_reduction <add>, %224, %cst_93 [1] : vector<2x6xf32> to vector<2xf32>
    %226 = vector.shape_cast %225 : vector<2xf32> to vector<2x1xf32>
    %cst_94 = arith.constant dense<0.000000e+00> : vector<2x6xf32>
    %227 = tpu.matmul %219, %70, %cst_94 {dimension_numbers = #tpu.dot_dimension_numbers<[1], [0], [0], [1], [0, 0, 1, 1], [], []>} : vector<2x6xf32>, vector<6x6xf32>, vector<2x6xf32> -> vector<2x6xf32>
    %228 = arith.mulf %227, %223 : vector<2x6xf32>
    %cst_95 = arith.constant dense<0.000000e+00> : vector<2xf32>
    %229 = vector.multi_reduction <add>, %228, %cst_95 [1] : vector<2x6xf32> to vector<2xf32>
    %230 = vector.shape_cast %229 : vector<2xf32> to vector<2x1xf32>
    %231 = arith.addf %226, %230 : vector<2x1xf32>
    %232 = arith.mulf %231, %187 : vector<2x1xf32>
    %233 = arith.addf %181, %232 : vector<2x1xf32>
    %c3_i32 = arith.constant 3 : i32
    %234 = arith.index_cast %c3_i32 : i32 to index
    %c0_96 = arith.constant 0 : index
    %c0_97 = arith.constant 0 : index
    %235 = vector.load %arg7[%234, %c0_96, %c0_97] : memref<8x2x6xf32, #tpu.memory_space<vmem>>, vector<1x2x6xf32>
    %236 = vector.shape_cast %235 : vector<1x2x6xf32> to vector<2x6xf32>
    %237 = arith.index_cast %c3_i32 : i32 to index
    %c0_98 = arith.constant 0 : index
    %c0_99 = arith.constant 0 : index
    %238 = vector.load %arg3[%237, %c0_98, %c0_99] : memref<8x2x1xf32, #tpu.memory_space<vmem>>, vector<1x2x1xf32>
    %239 = vector.shape_cast %238 : vector<1x2x1xf32> to vector<2x1xf32>
    %240 = arith.index_cast %c3_i32 : i32 to index
    %c0_100 = arith.constant 0 : index
    %c0_101 = arith.constant 0 : index
    %241 = vector.load %arg4[%240, %c0_100, %c0_101] : memref<9x2x1xi32, #tpu.memory_space<vmem>>, vector<1x2x1xi32>
    %242 = vector.shape_cast %241 : vector<1x2x1xi32> to vector<2x1xi32>
    %c1_i32_102 = arith.constant 1 : i32
    %243 = arith.addi %c3_i32, %c1_i32_102 : i32
    %244 = arith.index_cast %243 : i32 to index
    %c0_103 = arith.constant 0 : index
    %c0_104 = arith.constant 0 : index
    %245 = vector.load %arg4[%244, %c0_103, %c0_104] : memref<9x2x1xi32, #tpu.memory_space<vmem>>, vector<1x2x1xi32>
    %246 = vector.shape_cast %245 : vector<1x2x1xi32> to vector<2x1xi32>
    %247 = vector.shape_cast %215 : vector<2x6xf32> to vector<2x1x6xf32>
    %248 = vector.shape_cast %70 : vector<6x6xf32> to vector<1x6x6xf32>
    %249 = vector.broadcast %247 : vector<2x1x6xf32> to vector<2x6x6xf32>
    %250 = vector.broadcast %248 : vector<1x6x6xf32> to vector<2x6x6xf32>
    %251 = arith.addf %249, %250 : vector<2x6x6xf32>
    %cst_105 = arith.constant dense<0xFF800000> : vector<2x6xf32>
    %252 = vector.multi_reduction <maximumf>, %251, %cst_105 [2] : vector<2x6x6xf32> to vector<2x6xf32>
    %253 = vector.shape_cast %252 : vector<2x6xf32> to vector<2x6x1xf32>
    %254 = vector.broadcast %253 : vector<2x6x1xf32> to vector<2x6x6xf32>
    %255 = arith.subf %251, %254 : vector<2x6x6xf32>
    %256 = math.exp %255 : vector<2x6x6xf32>
    %cst_106 = arith.constant dense<0.000000e+00> : vector<2x6xf32>
    %257 = vector.multi_reduction <add>, %256, %cst_106 [2] : vector<2x6x6xf32> to vector<2x6xf32>
    %258 = math.log %257 : vector<2x6xf32>
    %259 = arith.addf %252, %258 : vector<2x6xf32>
    %260 = arith.addf %259, %236 : vector<2x6xf32>
    %261 = vector.broadcast %239 : vector<2x1xf32> to vector<2x6xf32>
    %262 = arith.mulf %260, %261 : vector<2x6xf32>
    %cst_107 = arith.constant 1.000000e+00 : f32
    %263 = vector.broadcast %cst_107 : f32 to vector<2x1xf32>
    %264 = arith.subf %263, %239 : vector<2x1xf32>
    %265 = vector.broadcast %264 : vector<2x1xf32> to vector<2x6xf32>
    %266 = arith.mulf %215, %265 : vector<2x6xf32>
    %267 = arith.addf %262, %266 : vector<2x6xf32>
    %268 = vector.broadcast %246 : vector<2x1xi32> to vector<2x6xi32>
    %269 = arith.cmpi eq, %71, %268 : vector<2x6xi32>
    %270 = arith.extui %269 : vector<2x6xi1> to vector<2x6xi32>
    %271 = arith.sitofp %270 : vector<2x6xi32> to vector<2x6xf32>
    %272 = vector.broadcast %242 : vector<2x1xi32> to vector<2x6xi32>
    %273 = arith.cmpi eq, %71, %272 : vector<2x6xi32>
    %274 = arith.extui %273 : vector<2x6xi1> to vector<2x6xi32>
    %275 = arith.sitofp %274 : vector<2x6xi32> to vector<2x6xf32>
    %276 = arith.mulf %236, %271 : vector<2x6xf32>
    %cst_108 = arith.constant dense<0.000000e+00> : vector<2xf32>
    %277 = vector.multi_reduction <add>, %276, %cst_108 [1] : vector<2x6xf32> to vector<2xf32>
    %278 = vector.shape_cast %277 : vector<2xf32> to vector<2x1xf32>
    %cst_109 = arith.constant dense<0.000000e+00> : vector<2x6xf32>
    %279 = tpu.matmul %271, %70, %cst_109 {dimension_numbers = #tpu.dot_dimension_numbers<[1], [0], [0], [1], [0, 0, 1, 1], [], []>} : vector<2x6xf32>, vector<6x6xf32>, vector<2x6xf32> -> vector<2x6xf32>
    %280 = arith.mulf %279, %275 : vector<2x6xf32>
    %cst_110 = arith.constant dense<0.000000e+00> : vector<2xf32>
    %281 = vector.multi_reduction <add>, %280, %cst_110 [1] : vector<2x6xf32> to vector<2xf32>
    %282 = vector.shape_cast %281 : vector<2xf32> to vector<2x1xf32>
    %283 = arith.addf %278, %282 : vector<2x1xf32>
    %284 = arith.mulf %283, %239 : vector<2x1xf32>
    %285 = arith.addf %233, %284 : vector<2x1xf32>
    %c4_i32_111 = arith.constant 4 : i32
    %286 = arith.index_cast %c4_i32_111 : i32 to index
    %c0_112 = arith.constant 0 : index
    %c0_113 = arith.constant 0 : index
    %287 = vector.load %arg7[%286, %c0_112, %c0_113] : memref<8x2x6xf32, #tpu.memory_space<vmem>>, vector<1x2x6xf32>
    %288 = vector.shape_cast %287 : vector<1x2x6xf32> to vector<2x6xf32>
    %289 = arith.index_cast %c4_i32_111 : i32 to index
    %c0_114 = arith.constant 0 : index
    %c0_115 = arith.constant 0 : index
    %290 = vector.load %arg3[%289, %c0_114, %c0_115] : memref<8x2x1xf32, #tpu.memory_space<vmem>>, vector<1x2x1xf32>
    %291 = vector.shape_cast %290 : vector<1x2x1xf32> to vector<2x1xf32>
    %292 = arith.index_cast %c4_i32_111 : i32 to index
    %c0_116 = arith.constant 0 : index
    %c0_117 = arith.constant 0 : index
    %293 = vector.load %arg4[%292, %c0_116, %c0_117] : memref<9x2x1xi32, #tpu.memory_space<vmem>>, vector<1x2x1xi32>
    %294 = vector.shape_cast %293 : vector<1x2x1xi32> to vector<2x1xi32>
    %c1_i32_118 = arith.constant 1 : i32
    %295 = arith.addi %c4_i32_111, %c1_i32_118 : i32
    %296 = arith.index_cast %295 : i32 to index
    %c0_119 = arith.constant 0 : index
    %c0_120 = arith.constant 0 : index
    %297 = vector.load %arg4[%296, %c0_119, %c0_120] : memref<9x2x1xi32, #tpu.memory_space<vmem>>, vector<1x2x1xi32>
    %298 = vector.shape_cast %297 : vector<1x2x1xi32> to vector<2x1xi32>
    %299 = vector.shape_cast %267 : vector<2x6xf32> to vector<2x1x6xf32>
    %300 = vector.shape_cast %70 : vector<6x6xf32> to vector<1x6x6xf32>
    %301 = vector.broadcast %299 : vector<2x1x6xf32> to vector<2x6x6xf32>
    %302 = vector.broadcast %300 : vector<1x6x6xf32> to vector<2x6x6xf32>
    %303 = arith.addf %301, %302 : vector<2x6x6xf32>
    %cst_121 = arith.constant dense<0xFF800000> : vector<2x6xf32>
    %304 = vector.multi_reduction <maximumf>, %303, %cst_121 [2] : vector<2x6x6xf32> to vector<2x6xf32>
    %305 = vector.shape_cast %304 : vector<2x6xf32> to vector<2x6x1xf32>
    %306 = vector.broadcast %305 : vector<2x6x1xf32> to vector<2x6x6xf32>
    %307 = arith.subf %303, %306 : vector<2x6x6xf32>
    %308 = math.exp %307 : vector<2x6x6xf32>
    %cst_122 = arith.constant dense<0.000000e+00> : vector<2x6xf32>
    %309 = vector.multi_reduction <add>, %308, %cst_122 [2] : vector<2x6x6xf32> to vector<2x6xf32>
    %310 = math.log %309 : vector<2x6xf32>
    %311 = arith.addf %304, %310 : vector<2x6xf32>
    %312 = arith.addf %311, %288 : vector<2x6xf32>
    %313 = vector.broadcast %291 : vector<2x1xf32> to vector<2x6xf32>
    %314 = arith.mulf %312, %313 : vector<2x6xf32>
    %cst_123 = arith.constant 1.000000e+00 : f32
    %315 = vector.broadcast %cst_123 : f32 to vector<2x1xf32>
    %316 = arith.subf %315, %291 : vector<2x1xf32>
    %317 = vector.broadcast %316 : vector<2x1xf32> to vector<2x6xf32>
    %318 = arith.mulf %267, %317 : vector<2x6xf32>
    %319 = arith.addf %314, %318 : vector<2x6xf32>
    %320 = vector.broadcast %298 : vector<2x1xi32> to vector<2x6xi32>
    %321 = arith.cmpi eq, %71, %320 : vector<2x6xi32>
    %322 = arith.extui %321 : vector<2x6xi1> to vector<2x6xi32>
    %323 = arith.sitofp %322 : vector<2x6xi32> to vector<2x6xf32>
    %324 = vector.broadcast %294 : vector<2x1xi32> to vector<2x6xi32>
    %325 = arith.cmpi eq, %71, %324 : vector<2x6xi32>
    %326 = arith.extui %325 : vector<2x6xi1> to vector<2x6xi32>
    %327 = arith.sitofp %326 : vector<2x6xi32> to vector<2x6xf32>
    %328 = arith.mulf %288, %323 : vector<2x6xf32>
    %cst_124 = arith.constant dense<0.000000e+00> : vector<2xf32>
    %329 = vector.multi_reduction <add>, %328, %cst_124 [1] : vector<2x6xf32> to vector<2xf32>
    %330 = vector.shape_cast %329 : vector<2xf32> to vector<2x1xf32>
    %cst_125 = arith.constant dense<0.000000e+00> : vector<2x6xf32>
    %331 = tpu.matmul %323, %70, %cst_125 {dimension_numbers = #tpu.dot_dimension_numbers<[1], [0], [0], [1], [0, 0, 1, 1], [], []>} : vector<2x6xf32>, vector<6x6xf32>, vector<2x6xf32> -> vector<2x6xf32>
    %332 = arith.mulf %331, %327 : vector<2x6xf32>
    %cst_126 = arith.constant dense<0.000000e+00> : vector<2xf32>
    %333 = vector.multi_reduction <add>, %332, %cst_126 [1] : vector<2x6xf32> to vector<2xf32>
    %334 = vector.shape_cast %333 : vector<2xf32> to vector<2x1xf32>
    %335 = arith.addf %330, %334 : vector<2x1xf32>
    %336 = arith.mulf %335, %291 : vector<2x1xf32>
    %337 = arith.addf %285, %336 : vector<2x1xf32>
    %c5_i32 = arith.constant 5 : i32
    %338 = arith.index_cast %c5_i32 : i32 to index
    %c0_127 = arith.constant 0 : index
    %c0_128 = arith.constant 0 : index
    %339 = vector.load %arg7[%338, %c0_127, %c0_128] : memref<8x2x6xf32, #tpu.memory_space<vmem>>, vector<1x2x6xf32>
    %340 = vector.shape_cast %339 : vector<1x2x6xf32> to vector<2x6xf32>
    %341 = arith.index_cast %c5_i32 : i32 to index
    %c0_129 = arith.constant 0 : index
    %c0_130 = arith.constant 0 : index
    %342 = vector.load %arg3[%341, %c0_129, %c0_130] : memref<8x2x1xf32, #tpu.memory_space<vmem>>, vector<1x2x1xf32>
    %343 = vector.shape_cast %342 : vector<1x2x1xf32> to vector<2x1xf32>
    %344 = arith.index_cast %c5_i32 : i32 to index
    %c0_131 = arith.constant 0 : index
    %c0_132 = arith.constant 0 : index
    %345 = vector.load %arg4[%344, %c0_131, %c0_132] : memref<9x2x1xi32, #tpu.memory_space<vmem>>, vector<1x2x1xi32>
    %346 = vector.shape_cast %345 : vector<1x2x1xi32> to vector<2x1xi32>
    %c1_i32_133 = arith.constant 1 : i32
    %347 = arith.addi %c5_i32, %c1_i32_133 : i32
    %348 = arith.index_cast %347 : i32 to index
    %c0_134 = arith.constant 0 : index
    %c0_135 = arith.constant 0 : index
    %349 = vector.load %arg4[%348, %c0_134, %c0_135] : memref<9x2x1xi32, #tpu.memory_space<vmem>>, vector<1x2x1xi32>
    %350 = vector.shape_cast %349 : vector<1x2x1xi32> to vector<2x1xi32>
    %351 = vector.shape_cast %319 : vector<2x6xf32> to vector<2x1x6xf32>
    %352 = vector.shape_cast %70 : vector<6x6xf32> to vector<1x6x6xf32>
    %353 = vector.broadcast %351 : vector<2x1x6xf32> to vector<2x6x6xf32>
    %354 = vector.broadcast %352 : vector<1x6x6xf32> to vector<2x6x6xf32>
    %355 = arith.addf %353, %354 : vector<2x6x6xf32>
    %cst_136 = arith.constant dense<0xFF800000> : vector<2x6xf32>
    %356 = vector.multi_reduction <maximumf>, %355, %cst_136 [2] : vector<2x6x6xf32> to vector<2x6xf32>
    %357 = vector.shape_cast %356 : vector<2x6xf32> to vector<2x6x1xf32>
    %358 = vector.broadcast %357 : vector<2x6x1xf32> to vector<2x6x6xf32>
    %359 = arith.subf %355, %358 : vector<2x6x6xf32>
    %360 = math.exp %359 : vector<2x6x6xf32>
    %cst_137 = arith.constant dense<0.000000e+00> : vector<2x6xf32>
    %361 = vector.multi_reduction <add>, %360, %cst_137 [2] : vector<2x6x6xf32> to vector<2x6xf32>
    %362 = math.log %361 : vector<2x6xf32>
    %363 = arith.addf %356, %362 : vector<2x6xf32>
    %364 = arith.addf %363, %340 : vector<2x6xf32>
    %365 = vector.broadcast %343 : vector<2x1xf32> to vector<2x6xf32>
    %366 = arith.mulf %364, %365 : vector<2x6xf32>
    %cst_138 = arith.constant 1.000000e+00 : f32
    %367 = vector.broadcast %cst_138 : f32 to vector<2x1xf32>
    %368 = arith.subf %367, %343 : vector<2x1xf32>
    %369 = vector.broadcast %368 : vector<2x1xf32> to vector<2x6xf32>
    %370 = arith.mulf %319, %369 : vector<2x6xf32>
    %371 = arith.addf %366, %370 : vector<2x6xf32>
    %372 = vector.broadcast %350 : vector<2x1xi32> to vector<2x6xi32>
    %373 = arith.cmpi eq, %71, %372 : vector<2x6xi32>
    %374 = arith.extui %373 : vector<2x6xi1> to vector<2x6xi32>
    %375 = arith.sitofp %374 : vector<2x6xi32> to vector<2x6xf32>
    %376 = vector.broadcast %346 : vector<2x1xi32> to vector<2x6xi32>
    %377 = arith.cmpi eq, %71, %376 : vector<2x6xi32>
    %378 = arith.extui %377 : vector<2x6xi1> to vector<2x6xi32>
    %379 = arith.sitofp %378 : vector<2x6xi32> to vector<2x6xf32>
    %380 = arith.mulf %340, %375 : vector<2x6xf32>
    %cst_139 = arith.constant dense<0.000000e+00> : vector<2xf32>
    %381 = vector.multi_reduction <add>, %380, %cst_139 [1] : vector<2x6xf32> to vector<2xf32>
    %382 = vector.shape_cast %381 : vector<2xf32> to vector<2x1xf32>
    %cst_140 = arith.constant dense<0.000000e+00> : vector<2x6xf32>
    %383 = tpu.matmul %375, %70, %cst_140 {dimension_numbers = #tpu.dot_dimension_numbers<[1], [0], [0], [1], [0, 0, 1, 1], [], []>} : vector<2x6xf32>, vector<6x6xf32>, vector<2x6xf32> -> vector<2x6xf32>
    %384 = arith.mulf %383, %379 : vector<2x6xf32>
    %cst_141 = arith.constant dense<0.000000e+00> : vector<2xf32>
    %385 = vector.multi_reduction <add>, %384, %cst_141 [1] : vector<2x6xf32> to vector<2xf32>
    %386 = vector.shape_cast %385 : vector<2xf32> to vector<2x1xf32>
    %387 = arith.addf %382, %386 : vector<2x1xf32>
    %388 = arith.mulf %387, %343 : vector<2x1xf32>
    %389 = arith.addf %337, %388 : vector<2x1xf32>
    %c6_i32 = arith.constant 6 : i32
    %390 = arith.index_cast %c6_i32 : i32 to index
    %c0_142 = arith.constant 0 : index
    %c0_143 = arith.constant 0 : index
    %391 = vector.load %arg7[%390, %c0_142, %c0_143] : memref<8x2x6xf32, #tpu.memory_space<vmem>>, vector<1x2x6xf32>
    %392 = vector.shape_cast %391 : vector<1x2x6xf32> to vector<2x6xf32>
    %393 = arith.index_cast %c6_i32 : i32 to index
    %c0_144 = arith.constant 0 : index
    %c0_145 = arith.constant 0 : index
    %394 = vector.load %arg3[%393, %c0_144, %c0_145] : memref<8x2x1xf32, #tpu.memory_space<vmem>>, vector<1x2x1xf32>
    %395 = vector.shape_cast %394 : vector<1x2x1xf32> to vector<2x1xf32>
    %396 = arith.index_cast %c6_i32 : i32 to index
    %c0_146 = arith.constant 0 : index
    %c0_147 = arith.constant 0 : index
    %397 = vector.load %arg4[%396, %c0_146, %c0_147] : memref<9x2x1xi32, #tpu.memory_space<vmem>>, vector<1x2x1xi32>
    %398 = vector.shape_cast %397 : vector<1x2x1xi32> to vector<2x1xi32>
    %c1_i32_148 = arith.constant 1 : i32
    %399 = arith.addi %c6_i32, %c1_i32_148 : i32
    %400 = arith.index_cast %399 : i32 to index
    %c0_149 = arith.constant 0 : index
    %c0_150 = arith.constant 0 : index
    %401 = vector.load %arg4[%400, %c0_149, %c0_150] : memref<9x2x1xi32, #tpu.memory_space<vmem>>, vector<1x2x1xi32>
    %402 = vector.shape_cast %401 : vector<1x2x1xi32> to vector<2x1xi32>
    %403 = vector.shape_cast %371 : vector<2x6xf32> to vector<2x1x6xf32>
    %404 = vector.shape_cast %70 : vector<6x6xf32> to vector<1x6x6xf32>
    %405 = vector.broadcast %403 : vector<2x1x6xf32> to vector<2x6x6xf32>
    %406 = vector.broadcast %404 : vector<1x6x6xf32> to vector<2x6x6xf32>
    %407 = arith.addf %405, %406 : vector<2x6x6xf32>
    %cst_151 = arith.constant dense<0xFF800000> : vector<2x6xf32>
    %408 = vector.multi_reduction <maximumf>, %407, %cst_151 [2] : vector<2x6x6xf32> to vector<2x6xf32>
    %409 = vector.shape_cast %408 : vector<2x6xf32> to vector<2x6x1xf32>
    %410 = vector.broadcast %409 : vector<2x6x1xf32> to vector<2x6x6xf32>
    %411 = arith.subf %407, %410 : vector<2x6x6xf32>
    %412 = math.exp %411 : vector<2x6x6xf32>
    %cst_152 = arith.constant dense<0.000000e+00> : vector<2x6xf32>
    %413 = vector.multi_reduction <add>, %412, %cst_152 [2] : vector<2x6x6xf32> to vector<2x6xf32>
    %414 = math.log %413 : vector<2x6xf32>
    %415 = arith.addf %408, %414 : vector<2x6xf32>
    %416 = arith.addf %415, %392 : vector<2x6xf32>
    %417 = vector.broadcast %395 : vector<2x1xf32> to vector<2x6xf32>
    %418 = arith.mulf %416, %417 : vector<2x6xf32>
    %cst_153 = arith.constant 1.000000e+00 : f32
    %419 = vector.broadcast %cst_153 : f32 to vector<2x1xf32>
    %420 = arith.subf %419, %395 : vector<2x1xf32>
    %421 = vector.broadcast %420 : vector<2x1xf32> to vector<2x6xf32>
    %422 = arith.mulf %371, %421 : vector<2x6xf32>
    %423 = arith.addf %418, %422 : vector<2x6xf32>
    %424 = vector.broadcast %402 : vector<2x1xi32> to vector<2x6xi32>
    %425 = arith.cmpi eq, %71, %424 : vector<2x6xi32>
    %426 = arith.extui %425 : vector<2x6xi1> to vector<2x6xi32>
    %427 = arith.sitofp %426 : vector<2x6xi32> to vector<2x6xf32>
    %428 = vector.broadcast %398 : vector<2x1xi32> to vector<2x6xi32>
    %429 = arith.cmpi eq, %71, %428 : vector<2x6xi32>
    %430 = arith.extui %429 : vector<2x6xi1> to vector<2x6xi32>
    %431 = arith.sitofp %430 : vector<2x6xi32> to vector<2x6xf32>
    %432 = arith.mulf %392, %427 : vector<2x6xf32>
    %cst_154 = arith.constant dense<0.000000e+00> : vector<2xf32>
    %433 = vector.multi_reduction <add>, %432, %cst_154 [1] : vector<2x6xf32> to vector<2xf32>
    %434 = vector.shape_cast %433 : vector<2xf32> to vector<2x1xf32>
    %cst_155 = arith.constant dense<0.000000e+00> : vector<2x6xf32>
    %435 = tpu.matmul %427, %70, %cst_155 {dimension_numbers = #tpu.dot_dimension_numbers<[1], [0], [0], [1], [0, 0, 1, 1], [], []>} : vector<2x6xf32>, vector<6x6xf32>, vector<2x6xf32> -> vector<2x6xf32>
    %436 = arith.mulf %435, %431 : vector<2x6xf32>
    %cst_156 = arith.constant dense<0.000000e+00> : vector<2xf32>
    %437 = vector.multi_reduction <add>, %436, %cst_156 [1] : vector<2x6xf32> to vector<2xf32>
    %438 = vector.shape_cast %437 : vector<2xf32> to vector<2x1xf32>
    %439 = arith.addf %434, %438 : vector<2x1xf32>
    %440 = arith.mulf %439, %395 : vector<2x1xf32>
    %441 = arith.addf %389, %440 : vector<2x1xf32>
    %c7_i32 = arith.constant 7 : i32
    %442 = arith.index_cast %c7_i32 : i32 to index
    %c0_157 = arith.constant 0 : index
    %c0_158 = arith.constant 0 : index
    %443 = vector.load %arg7[%442, %c0_157, %c0_158] : memref<8x2x6xf32, #tpu.memory_space<vmem>>, vector<1x2x6xf32>
    %444 = vector.shape_cast %443 : vector<1x2x6xf32> to vector<2x6xf32>
    %445 = arith.index_cast %c7_i32 : i32 to index
    %c0_159 = arith.constant 0 : index
    %c0_160 = arith.constant 0 : index
    %446 = vector.load %arg3[%445, %c0_159, %c0_160] : memref<8x2x1xf32, #tpu.memory_space<vmem>>, vector<1x2x1xf32>
    %447 = vector.shape_cast %446 : vector<1x2x1xf32> to vector<2x1xf32>
    %448 = arith.index_cast %c7_i32 : i32 to index
    %c0_161 = arith.constant 0 : index
    %c0_162 = arith.constant 0 : index
    %449 = vector.load %arg4[%448, %c0_161, %c0_162] : memref<9x2x1xi32, #tpu.memory_space<vmem>>, vector<1x2x1xi32>
    %450 = vector.shape_cast %449 : vector<1x2x1xi32> to vector<2x1xi32>
    %c1_i32_163 = arith.constant 1 : i32
    %451 = arith.addi %c7_i32, %c1_i32_163 : i32
    %452 = arith.index_cast %451 : i32 to index
    %c0_164 = arith.constant 0 : index
    %c0_165 = arith.constant 0 : index
    %453 = vector.load %arg4[%452, %c0_164, %c0_165] : memref<9x2x1xi32, #tpu.memory_space<vmem>>, vector<1x2x1xi32>
    %454 = vector.shape_cast %453 : vector<1x2x1xi32> to vector<2x1xi32>
    %455 = vector.shape_cast %423 : vector<2x6xf32> to vector<2x1x6xf32>
    %456 = vector.shape_cast %70 : vector<6x6xf32> to vector<1x6x6xf32>
    %457 = vector.broadcast %455 : vector<2x1x6xf32> to vector<2x6x6xf32>
    %458 = vector.broadcast %456 : vector<1x6x6xf32> to vector<2x6x6xf32>
    %459 = arith.addf %457, %458 : vector<2x6x6xf32>
    %cst_166 = arith.constant dense<0xFF800000> : vector<2x6xf32>
    %460 = vector.multi_reduction <maximumf>, %459, %cst_166 [2] : vector<2x6x6xf32> to vector<2x6xf32>
    %461 = vector.shape_cast %460 : vector<2x6xf32> to vector<2x6x1xf32>
    %462 = vector.broadcast %461 : vector<2x6x1xf32> to vector<2x6x6xf32>
    %463 = arith.subf %459, %462 : vector<2x6x6xf32>
    %464 = math.exp %463 : vector<2x6x6xf32>
    %cst_167 = arith.constant dense<0.000000e+00> : vector<2x6xf32>
    %465 = vector.multi_reduction <add>, %464, %cst_167 [2] : vector<2x6x6xf32> to vector<2x6xf32>
    %466 = math.log %465 : vector<2x6xf32>
    %467 = arith.addf %460, %466 : vector<2x6xf32>
    %468 = arith.addf %467, %444 : vector<2x6xf32>
    %469 = vector.broadcast %447 : vector<2x1xf32> to vector<2x6xf32>
    %470 = arith.mulf %468, %469 : vector<2x6xf32>
    %cst_168 = arith.constant 1.000000e+00 : f32
    %471 = vector.broadcast %cst_168 : f32 to vector<2x1xf32>
    %472 = arith.subf %471, %447 : vector<2x1xf32>
    %473 = vector.broadcast %472 : vector<2x1xf32> to vector<2x6xf32>
    %474 = arith.mulf %423, %473 : vector<2x6xf32>
    %475 = arith.addf %470, %474 : vector<2x6xf32>
    %476 = vector.broadcast %454 : vector<2x1xi32> to vector<2x6xi32>
    %477 = arith.cmpi eq, %71, %476 : vector<2x6xi32>
    %478 = arith.extui %477 : vector<2x6xi1> to vector<2x6xi32>
    %479 = arith.sitofp %478 : vector<2x6xi32> to vector<2x6xf32>
    %480 = vector.broadcast %450 : vector<2x1xi32> to vector<2x6xi32>
    %481 = arith.cmpi eq, %71, %480 : vector<2x6xi32>
    %482 = arith.extui %481 : vector<2x6xi1> to vector<2x6xi32>
    %483 = arith.sitofp %482 : vector<2x6xi32> to vector<2x6xf32>
    %484 = arith.mulf %444, %479 : vector<2x6xf32>
    %cst_169 = arith.constant dense<0.000000e+00> : vector<2xf32>
    %485 = vector.multi_reduction <add>, %484, %cst_169 [1] : vector<2x6xf32> to vector<2xf32>
    %486 = vector.shape_cast %485 : vector<2xf32> to vector<2x1xf32>
    %cst_170 = arith.constant dense<0.000000e+00> : vector<2x6xf32>
    %487 = tpu.matmul %479, %70, %cst_170 {dimension_numbers = #tpu.dot_dimension_numbers<[1], [0], [0], [1], [0, 0, 1, 1], [], []>} : vector<2x6xf32>, vector<6x6xf32>, vector<2x6xf32> -> vector<2x6xf32>
    %488 = arith.mulf %487, %483 : vector<2x6xf32>
    %cst_171 = arith.constant dense<0.000000e+00> : vector<2xf32>
    %489 = vector.multi_reduction <add>, %488, %cst_171 [1] : vector<2x6xf32> to vector<2xf32>
    %490 = vector.shape_cast %489 : vector<2xf32> to vector<2x1xf32>
    %491 = arith.addf %486, %490 : vector<2x1xf32>
    %492 = arith.mulf %491, %447 : vector<2x1xf32>
    %493 = arith.addf %441, %492 : vector<2x1xf32>
    %c8_i32 = arith.constant 8 : i32
    %494 = vector.extract_strided_slice %70 {offsets = [5, 0], sizes = [1, 6], strides = [1, 1]} : vector<6x6xf32> to vector<1x6xf32>
    %495 = vector.shape_cast %494 : vector<1x6xf32> to vector<6xf32>
    %496 = vector.shape_cast %495 : vector<6xf32> to vector<1x6xf32>
    %497 = vector.broadcast %496 : vector<1x6xf32> to vector<2x6xf32>
    %498 = arith.addf %475, %497 : vector<2x6xf32>
    %cst_172 = arith.constant dense<0xFF800000> : vector<2xf32>
    %499 = vector.multi_reduction <maximumf>, %498, %cst_172 [1] : vector<2x6xf32> to vector<2xf32>
    %500 = vector.shape_cast %499 : vector<2xf32> to vector<2x1xf32>
    %501 = vector.broadcast %500 : vector<2x1xf32> to vector<2x6xf32>
    %502 = arith.subf %498, %501 : vector<2x6xf32>
    %503 = math.exp %502 : vector<2x6xf32>
    %cst_173 = arith.constant dense<0.000000e+00> : vector<2xf32>
    %504 = vector.multi_reduction <add>, %503, %cst_173 [1] : vector<2x6xf32> to vector<2xf32>
    %505 = vector.shape_cast %504 : vector<2xf32> to vector<2x1xf32>
    %506 = math.log %505 : vector<2x1xf32>
    %507 = arith.addf %500, %506 : vector<2x1xf32>
    %c0_174 = arith.constant 0 : index
    %c0_175 = arith.constant 0 : index
    %c0_176 = arith.constant 0 : index
    %508 = vector.load %arg3[%c0_174, %c0_175, %c0_176] : memref<8x2x1xf32, #tpu.memory_space<vmem>>, vector<8x2x1xf32>
    %cst_177 = arith.constant dense<0.000000e+00> : vector<2x1xf32>
    %509 = vector.multi_reduction <add>, %508, %cst_177 [0] : vector<8x2x1xf32> to vector<2x1xf32>
    %510 = arith.fptosi %509 : vector<2x1xf32> to vector<2x1xi32>
    %511 = tpu.iota {dimensions = array<i32: 0>} : vector<9x2x1xi32>
    %512 = vector.shape_cast %510 : vector<2x1xi32> to vector<1x2x1xi32>
    %513 = vector.broadcast %512 : vector<1x2x1xi32> to vector<9x2x1xi32>
    %514 = arith.cmpi eq, %511, %513 : vector<9x2x1xi32>
    %515 = arith.extui %514 : vector<9x2x1xi1> to vector<9x2x1xi32>
    %c0_178 = arith.constant 0 : index
    %c0_179 = arith.constant 0 : index
    %c0_180 = arith.constant 0 : index
    %516 = vector.load %arg4[%c0_178, %c0_179, %c0_180] : memref<9x2x1xi32, #tpu.memory_space<vmem>>, vector<9x2x1xi32>
    %517 = arith.muli %516, %515 : vector<9x2x1xi32>
    %cst_181 = arith.constant dense<0> : vector<2x1xi32>
    %518 = vector.multi_reduction <add>, %517, %cst_181 [0] : vector<9x2x1xi32> to vector<2x1xi32>
    %519 = vector.broadcast %518 : vector<2x1xi32> to vector<2x6xi32>
    %520 = arith.cmpi eq, %71, %519 : vector<2x6xi32>
    %521 = arith.extui %520 : vector<2x6xi1> to vector<2x6xi32>
    %522 = arith.sitofp %521 : vector<2x6xi32> to vector<2x6xf32>
    %523 = vector.extract_strided_slice %70 {offsets = [5, 0], sizes = [1, 6], strides = [1, 1]} : vector<6x6xf32> to vector<1x6xf32>
    %524 = vector.shape_cast %523 : vector<1x6xf32> to vector<6xf32>
    %525 = vector.shape_cast %524 : vector<6xf32> to vector<1x6xf32>
    %526 = vector.broadcast %525 : vector<1x6xf32> to vector<2x6xf32>
    %527 = arith.mulf %526, %522 : vector<2x6xf32>
    %cst_182 = arith.constant dense<0.000000e+00> : vector<2xf32>
    %528 = vector.multi_reduction <add>, %527, %cst_182 [1] : vector<2x6xf32> to vector<2xf32>
    %529 = vector.shape_cast %528 : vector<2xf32> to vector<2x1xf32>
    %530 = arith.addf %493, %529 : vector<2x1xf32>
    %531 = arith.subf %507, %530 : vector<2x1xf32>
    %c0_183 = arith.constant 0 : index
    %c0_184 = arith.constant 0 : index
    %532 = vector.load %arg6[%c0_183, %c0_184] : memref<2x1xf32, #tpu.memory_space<vmem>>, vector<2x1xf32>
    tpu.vector_store %arg6[%c0_183, %c0_184], %531 {strides = array<i32>} : memref<2x1xf32, #tpu.memory_space<vmem>>, vector<2x1xf32>,
    return
  }
}

</mosaic_0001>

<bundles_post_ra>
// kernel: bilstm_crf_forward.4
= control target key start
LH: loop header
LB: loop body
LE: loop exit
PB: predicated region body
PF: predicated region fallthrough
CT: control target
= control target key end

     0   :  { %vm30_vm0 = vcmask 261120   ;;  %v1629_v2 = vmov 0.0   ;;  %vm1630_vm1 = vmmov 0   ;;  %s1633_s9 = smov 32   ;;  %s1634_s10 = smov 80   ;;  %vm260_vm2 = vcmask 123904   ;;  %s1993_s1 = inlined_call_operand.vmem [shape: f32[32,128], index: 1, kind: input, shape index: {}]   ;;  %s1994_s0 = inlined_call_operand.vmem [shape: f32[16,32], index: 0, kind: input, shape index: {}]   ;;  %s1995_s2 = inlined_call_operand.vmem [shape: f32[32,128], index: 2, kind: input, shape index: {}]   ;;  %s1996_s3 = inlined_call_operand.vmem [shape: f32[1,128], index: 3, kind: input, shape index: {}]   ;;  %s1997_s4 = inlined_call_operand.vmem [shape: f32[8,2,32], index: 4, kind: output, shape index: {}]  }
   0x1   :  { %v22_v0 = vld [vmem:[%s1993_s1 + $0x18] sm:$0xff]  ;;  %v21_v1 = vld [vmem:[%s1993_s1 + $0x10] sm:$0xff]  ;;  %1407 = vmatprep.subr.mxu1 %v1629_v2  ;;  %1415 = vmatprep.mubr.msk.f32.mxu1 %vm1630_vm1, %v1629_v2  ;;  %v17_v3 = vld [vmem:[%s1994_s0] sm:$0xff]  ;;  %vm271_vm3 = vcmask 130048   ;;  %vm1311_vm4 = vcmask 255104  }
   0x2   :  { %1396 = vmatprep.subr.mxu0 %v22_v0  ;;  %v20_v4 = vld [vmem:[%s1993_s1 + $0x8] sm:$0xff]  ;;  %1404 = vmatprep.mubr.msk.f32.mxu0 %vm30_vm0, %v17_v3  ;;  %v1679_v5 = vld [vmem:[%s1995_s2 + $0x18] sm:$0xff]  ;;  %v1684_v6 = vld [vmem:[%s1995_s2 + $0x10] sm:$0xff] }
   0x3   :  { %1397 = vmatpush3.msra.mxu0 %v22_v0  ;;  %1408 = vmatpush3.msra.mxu1 %v1679_v5  ;;  %v19_v7 = vld [vmem:[%s1993_s1] sm:$0xff]  ;;  %v1694_v8 = vld [vmem:[%s1995_s2 + $0x8] sm:$0xff] }
   0x4   :  { %1398 = vmatprep.subr.mxu0 %v21_v1  ;;  %1409 = vmatprep.subr.mxu1 %v1629_v2  ;;  %v18_v9 = vld [vmem:[%s1994_s0 + $0x8] sm:$0xff]  ;;  %v1704_v10 = vld [vmem:[%s1995_s2] sm:$0xff]  ;;  %s1631_s2 = smov 96  }
   0x5   :  { %1399 = vmatpush3.msra.mxu0 %v21_v1  ;;  %1410 = vmatpush3.msra.mxu1 %v1684_v6  ;;  %v1324_v11 = vld [vmem:[%s1996_s3] ss:$0 sm:$0xff]  ;;  %s1632_s3 = smov 16  }
   0x6   :  { %1400 = vmatprep.subr.mxu0 %v20_v4  ;;  %1411 = vmatprep.subr.mxu1 %v1629_v2 }
   0x7   :  { %1401 = vmatpush3.msra.mxu0 %v20_v4  ;;  %1412 = vmatpush3.msra.mxu1 %v1694_v8 }
   0x8   :  { %1402 = vmatprep.subr.mxu0 %v19_v7  ;;  %1413 = vmatprep.subr.mxu1 %v1629_v2 }
   0x9   :  { %1403 = vmatpush3.msra.mxu0 %v19_v7  ;;  %1414 = vmatpush3.msra.mxu1 %v1704_v10 }
   0xa   :  { %1405 = vmatmul.mubr.msk.f32.vlgmr.msra.gmra.mxu0 %vm30_vm0, %v18_v9  ;;  %1416 = vmatmul.mubr.f32.vlgmr.msra.gmra.mxu1 %v1629_v2 }
   0xb   :  { %1418 = vmatprep.subr.mxu0 %v1629_v2  ;;  %1426 = vmatprep.mubr.msk.f32.mxu0 %vm1630_vm1, %v1629_v2 }
   0xc   :  { %1419 = vmatpush3.msra.mxu0 %v1679_v5  ;;  %1429 = vmatprep.subr.mxu1 %v1629_v2 }
   0xd   :  { %1420 = vmatprep.subr.mxu0 %v1629_v2  ;;  %1430 = vmatpush3.msra.mxu1 %v1679_v5 }
   0xe   :  { %1421 = vmatpush3.msra.mxu0 %v1684_v6  ;;  %1431 = vmatprep.subr.mxu1 %v1629_v2 }
   0xf   :  { %1422 = vmatprep.subr.mxu0 %v1629_v2  ;;  %1432 = vmatpush3.msra.mxu1 %v1684_v6 }
  0x10   :  { %1423 = vmatpush3.msra.mxu0 %v1694_v8  ;;  %1433 = vmatprep.subr.mxu1 %v1629_v2 }
  0x11   :  { %1424 = vmatprep.subr.mxu0 %v1629_v2  ;;  %1434 = vmatpush3.msra.mxu1 %v1694_v8 }
  0x12   :  { %1425 = vmatpush3.msra.mxu0 %v1704_v10  ;;  %1435 = vmatprep.subr.mxu1 %v1629_v2 }
  0x13   :  { %1437 = vmatprep.mubr.msk.f32.mxu1 %vm1630_vm1, %v1629_v2  ;;  %1436 = vmatpush3.msra.mxu1 %v1704_v10 }
  0x14   :  { %1440 = vmatprep.subr.mxu0 %v1629_v2  ;;  %1451 = vmatprep.subr.mxu1 %v1629_v2 }
  0xca   :  { %v1406_v12 = vpop.f32.mrf.mxu0  ;;  %v200_v14 = vpop.f32.mrf.mxu1 }
  0xcb   :  { %v109_v13 = vadd.f32 %v1406_v12, %v1324_v11 }
  0xcc   :  { %v103_v15 = vpop.f32.mrf.mxu0  ;;  %v1417_v17 = vpop.f32.mrf.mxu1 }
  0xcd   :  { %120 = vst [vmem:[#allocation2 + $0x8] ss:$4 sps:$4 sm:$0xff] %v109_v13   ;;  %v104_v16 = vadd.f32 %v1324_v11, %v103_v15 }
  0xcf   :  { %112 = vst [vmem:[#allocation2] ss:$4 sps:$4 sm:$0xff] %v104_v16  }
  0xd4   :  { %v206_v19 = vld [vmem:[#allocation2 + $0xe] sm:$0x3]  ;;  %v348_v54 = vld [vmem:[#allocation2 + $0xc] sm:$0x3] }
  0xd5   :  { %v207_v21 = vadd.f32 %v206_v19, %v200_v14 }
  0xd6   :  { %v204_v18 = vld [vmem:[#allocation2] sm:$0x3]  ;;  %v346_v53 = vld [vmem:[#allocation2 + $0x2] sm:$0x3] }
  0xd7   :  { %v205_v20 = vadd.f32 %v204_v18, %v200_v14  ;;  %v1328_v25 = vmul.f32 -1.442695, %v207_v21 }
  0xd9   :  { %1501 = vtanh.f32 %v205_v20  ;;  %v1327_v24 = vmul.f32 -1.442695, %v205_v20 }
  0xda   :  { %1503 = vtanh.f32 %v207_v21 }
  0xdb   :  { %1505 = vpow2.f32 %v1327_v24 }
  0xdc   :  { %1507 = vpow2.f32 %v1328_v25 }
  0xe6   :  { %v1502_v22 = vpop.eup %1501 }
  0xe7   :  { %217 = vrot.lane.b32.xlu0 %v1502_v22, %s1631_s2  ;;  %v1504_v23 = vpop.eup %1503 }
  0xe8   :  { %v1506_v26 = vpop.eup %1505 }
  0xe9   :  { %v211_v27 = vadd.f32 1.0, %v1506_v26  ;;  %v1508_v28 = vpop.eup %1507 }
  0xea   :  { %v235_v29 = vadd.f32 1.0, %v1508_v28 }
  0xeb   :  { %241 = vrot.lane.b32.xlu0 %v1504_v23, %s1631_s2  ;;  %1509 = vrcp.f32 %v211_v27 }
  0xec   :  { %1511 = vrcp.f32 %v235_v29 }
  0xf8   :  { %v1510_v30 = vpop.eup %1509 }
  0xf9   :  { %v1512_v33 = vpop.eup %1511  ;;  %v215_v36 = vmul.f32 0.0, %v1510_v30 }
  0xfa   :  { %v239_v39 = vmul.f32 0.0, %v1512_v33 }
 0x159   :  { %v218_v31 = vpop.permute.xlu0 %217 }
 0x15a   :  { %v220_v32 = vmul.f32 %v1510_v30, %v218_v31  ;;  %v489_v31 = vld [vmem:[#allocation2 + $0xa] sm:$0x3] }
 0x15c   :  { %222 = vrot.lane.b32.xlu1 %v220_v32, %s1632_s3 }
 0x15d   :  { %v242_v34 = vpop.permute.xlu0 %241 }
 0x15e   :  { %v244_v35 = vmul.f32 %v1512_v33, %v242_v34 }
 0x160   :  { %246 = vrot.lane.b32.xlu1 %v244_v35, %s1632_s3 }
 0x1ce   :  { %v223_v37 = vpop.permute.xlu1 %222 }
 0x1cf   :  { %v1740_v38 = vadd.f32 %v223_v37, %v215_v36 }
 0x1d1   :  { %1513 = vtanh.f32 %v1740_v38 }
 0x1d2   :  { %v247_v40 = vpop.permute.xlu1 %246 }
 0x1d3   :  { %v1743_v41 = vadd.f32 %v247_v40, %v239_v39 }
 0x1d5   :  { %1515 = vtanh.f32 %v1743_v41 }
 0x1de   :  { %v1514_v42 = vpop.eup %1513 }
 0x1df   :  { %228 = vrot.lane.b32.xlu0 %v1514_v42, %s1633_s9 }
 0x1e2   :  { %v1516_v43 = vpop.eup %1515 }
 0x1e3   :  { %252 = vrot.lane.b32.xlu1 %v1516_v43, %s1633_s9 }
 0x251   :  { %v229_v44 = vpop.permute.xlu0 %228 }
 0x252   :  { %v231_v45 = vmul.f32 %v1510_v30, %v229_v44  ;;  %v487_v30 = vld [vmem:[#allocation2 + $0x4] sm:$0x3] }
 0x254   :  { %257 = vrot.lane.b32.xlu0 %v231_v45, %s1634_s10 }
 0x255   :  { %v253_v46 = vpop.permute.xlu1 %252 }
 0x256   :  { %v1749_v47 = vmul.f32 %v1512_v33, %v253_v46 }
 0x258   :  { %268 = vrot.lane.b32.xlu1 %v1749_v47, %s1633_s9 }
 0x2c6   :  { %v258_v48 = vpop.permute.xlu0 %257 }
 0x2c7   :  { %261 = vst.msk [vmem:[#allocation3] sm:$0x3] %vm260_vm2, %v258_v48 }
 0x2ca   :  { %v269_v49 = vpop.permute.xlu1 %268 }
 0x2cb   :  { %v272_v50 = vsel %vm271_vm3, %v258_v48, %v269_v49 }
 0x2cc   :  { %1427 = vmatmul.mubr.msk.f32.vlgmr.msra.gmra.mxu0 %vm30_vm0, %v272_v50 }
 0x2cd   :  { %1441 = vmatpush3.msra.mxu0 %v1679_v5  ;;  %1448 = vmatprep.mubr.msk.f32.mxu0 %vm1630_vm1, %v1629_v2 }
 0x2ce   :  { %1442 = vmatprep.subr.mxu0 %v1629_v2  ;;  %v1255_v51 = vld [vmem:[#allocation3] sm:$0x3] }
 0x2cf   :  { %1443 = vmatpush3.msra.mxu0 %v1684_v6  ;;  %1263 = vst.msk [vmem:[%s1997_s4] sm:$0x3] %vm260_vm2, %v1255_v51 }
 0x2d0   :  { %1444 = vmatprep.subr.mxu0 %v1629_v2 }
 0x2d1   :  { %1445 = vmatpush3.msra.mxu0 %v1694_v8 }
 0x2d2   :  { %1446 = vmatprep.subr.mxu0 %v1629_v2 }
 0x2d3   :  { %1447 = vmatpush3.msra.mxu0 %v1704_v10 }
 0x2d4   :  { %1462 = vmatprep.subr.mxu0 %v1629_v2 }
 0x38c   :  { %v342_v52 = vpop.f32.mrf.mxu0 }
 0x38d   :  { %v347_v55 = vadd.f32 %v346_v53, %v342_v52  ;;  %v349_v56 = vadd.f32 %v348_v54, %v342_v52 }
 0x38e   :  { %v1428_v57 = vpop.f32.mrf.mxu0 }
 0x38f   :  { %1517 = vtanh.f32 %v347_v55  ;;  %v1330_v60 = vmul.f32 -1.442695, %v347_v55  ;;  %v1331_v61 = vmul.f32 -1.442695, %v349_v56 }
 0x390   :  { %1519 = vtanh.f32 %v349_v56 }
 0x391   :  { %1521 = vpow2.f32 %v1330_v60 }
 0x392   :  { %1523 = vpow2.f32 %v1331_v61 }
 0x39c   :  { %v1518_v58 = vpop.eup %1517 }
 0x39d   :  { %v1520_v59 = vpop.eup %1519  ;;  %359 = vrot.lane.b32.xlu0 %v1518_v58, %s1631_s2 }
 0x39e   :  { %383 = vrot.lane.b32.xlu1 %v1520_v59, %s1631_s2  ;;  %v1522_v62 = vpop.eup %1521 }
 0x39f   :  { %v1524_v63 = vpop.eup %1523  ;;  %v353_v0 = vadd.f32 1.0, %v1522_v62 }
 0x3a0   :  { %v377_v1 = vadd.f32 1.0, %v1524_v63 }
 0x3a1   :  { %1525 = vrcp.f32 %v353_v0 }
 0x3a2   :  { %1527 = vrcp.f32 %v377_v1 }
 0x3ae   :  { %v1526_v3 = vpop.eup %1525 }
 0x3af   :  { %v1528_v7 = vpop.eup %1527  ;;  %v357_v13 = vmul.f32 %v1526_v3, %v1740_v38 }
 0x3b0   :  { %v381_v14 = vmul.f32 %v1528_v7, %v1743_v41 }
 0x40f   :  { %v360_v4 = vpop.permute.xlu0 %359 }
 0x410   :  { %v384_v9 = vpop.permute.xlu1 %383  ;;  %v362_v11 = vmul.f32 %v1526_v3, %v360_v4  ;;  %v628_v4 = vld [vmem:[#allocation2 + $0x6] sm:$0x3] }
 0x411   :  { %v386_v12 = vmul.f32 %v1528_v7, %v384_v9 }
 0x412   :  { %364 = vrot.lane.b32.xlu0 %v362_v11, %s1632_s3 }
 0x413   :  { %388 = vrot.lane.b32.xlu1 %v386_v12, %s1632_s3 }
 0x484   :  { %v365_v15 = vpop.permute.xlu0 %364 }
 0x485   :  { %v389_v16 = vpop.permute.xlu1 %388  ;;  %v367_v17 = vadd.f32 %v365_v15, %v357_v13 }
 0x486   :  { %v391_v18 = vadd.f32 %v389_v16, %v381_v14 }
 0x487   :  { %1529 = vtanh.f32 %v367_v17 }
 0x488   :  { %1531 = vtanh.f32 %v391_v18 }
 0x494   :  { %v1530_v19 = vpop.eup %1529 }
 0x495   :  { %v1532_v20 = vpop.eup %1531  ;;  %370 = vrot.lane.b32.xlu0 %v1530_v19, %s1633_s9 }
 0x496   :  { %394 = vrot.lane.b32.xlu1 %v1532_v20, %s1633_s9 }
 0x507   :  { %v371_v21 = vpop.permute.xlu0 %370 }
 0x508   :  { %v395_v22 = vpop.permute.xlu1 %394  ;;  %v373_v23 = vmul.f32 %v1526_v3, %v371_v21 }
 0x509   :  { %v1778_v24 = vmul.f32 %v1528_v7, %v395_v22  ;;  %v630_v7 = vld [vmem:[#allocation2 + $0x8] sm:$0x3] }
 0x50a   :  { %399 = vrot.lane.b32.xlu0 %v373_v23, %s1634_s10 }
 0x50b   :  { %410 = vrot.lane.b32.xlu1 %v1778_v24, %s1633_s9 }
 0x57c   :  { %v400_v25 = vpop.permute.xlu0 %399 }
 0x57d   :  { %v411_v26 = vpop.permute.xlu1 %410  ;;  %403 = vst.msk [vmem:[#allocation3 + $0x2] sm:$0x3] %vm260_vm2, %v400_v25 }
 0x57e   :  { %v413_v27 = vsel %vm271_vm3, %v400_v25, %v411_v26 }
 0x57f   :  { %1438 = vmatmul.mubr.msk.f32.vlgmr.msra.gmra.mxu1 %vm30_vm0, %v413_v27 }
 0x580   :  { %1452 = vmatpush3.msra.mxu1 %v1679_v5  ;;  %1459 = vmatprep.mubr.msk.f32.mxu1 %vm1630_vm1, %v1629_v2 }
 0x581   :  { %1453 = vmatprep.subr.mxu1 %v1629_v2 }
 0x582   :  { %1454 = vmatpush3.msra.mxu1 %v1684_v6 }
 0x583   :  { %1455 = vmatprep.subr.mxu1 %v1629_v2 }
 0x584   :  { %1456 = vmatpush3.msra.mxu1 %v1694_v8  ;;  %v1256_v28 = vld [vmem:[#allocation3 + $0x2] sm:$0x3] }
 0x585   :  { %1457 = vmatprep.subr.mxu1 %v1629_v2  ;;  %1264 = vst.msk [vmem:[%s1997_s4 + $0x2] sm:$0x3] %vm260_vm2, %v1256_v28 }
 0x586   :  { %1458 = vmatpush3.msra.mxu1 %v1704_v10 }
 0x587   :  { %1473 = vmatprep.subr.mxu1 %v1629_v2 }
 0x63f   :  { %v483_v29 = vpop.f32.mrf.mxu1 }
 0x640   :  { %v488_v32 = vadd.f32 %v487_v30, %v483_v29  ;;  %v490_v33 = vadd.f32 %v489_v31, %v483_v29 }
 0x641   :  { %v1439_v34 = vpop.f32.mrf.mxu1 }
 0x642   :  { %1533 = vtanh.f32 %v488_v32  ;;  %v1333_v37 = vmul.f32 -1.442695, %v488_v32  ;;  %v1334_v38 = vmul.f32 -1.442695, %v490_v33 }
 0x643   :  { %1535 = vtanh.f32 %v490_v33 }
 0x644   :  { %1537 = vpow2.f32 %v1333_v37 }
 0x645   :  { %1539 = vpow2.f32 %v1334_v38 }
 0x64f   :  { %v1534_v35 = vpop.eup %1533 }
 0x650   :  { %v1536_v36 = vpop.eup %1535  ;;  %500 = vrot.lane.b32.xlu0 %v1534_v35, %s1631_s2 }
 0x651   :  { %524 = vrot.lane.b32.xlu1 %v1536_v36, %s1631_s2  ;;  %v1538_v39 = vpop.eup %1537 }
 0x652   :  { %v1540_v40 = vpop.eup %1539  ;;  %v494_v41 = vadd.f32 1.0, %v1538_v39 }
 0x653   :  { %v518_v42 = vadd.f32 1.0, %v1540_v40 }
 0x654   :  { %1541 = vrcp.f32 %v494_v41 }
 0x655   :  { %1543 = vrcp.f32 %v518_v42 }
 0x661   :  { %v1542_v43 = vpop.eup %1541 }
 0x662   :  { %v1544_v45 = vpop.eup %1543  ;;  %v498_v50 = vmul.f32 %v1542_v43, %v367_v17 }
 0x663   :  { %v522_v51 = vmul.f32 %v1544_v45, %v391_v18 }
 0x6c2   :  { %v501_v44 = vpop.permute.xlu0 %500 }
 0x6c3   :  { %v525_v46 = vpop.permute.xlu1 %524  ;;  %v503_v48 = vmul.f32 %v1542_v43, %v501_v44 }
 0x6c4   :  { %v527_v49 = vmul.f32 %v1544_v45, %v525_v46  ;;  %v771_v46 = vld [vmem:[#allocation2 + $0x6] sm:$0x3] }
 0x6c5   :  { %505 = vrot.lane.b32.xlu0 %v503_v48, %s1632_s3 }
 0x6c6   :  { %529 = vrot.lane.b32.xlu1 %v527_v49, %s1632_s3 }
 0x737   :  { %v506_v52 = vpop.permute.xlu0 %505 }
 0x738   :  { %v530_v53 = vpop.permute.xlu1 %529  ;;  %v508_v54 = vadd.f32 %v506_v52, %v498_v50 }
 0x739   :  { %v532_v55 = vadd.f32 %v530_v53, %v522_v51 }
 0x73a   :  { %1545 = vtanh.f32 %v508_v54 }
 0x73b   :  { %1547 = vtanh.f32 %v532_v55 }
 0x747   :  { %v1546_v56 = vpop.eup %1545 }
 0x748   :  { %v1548_v57 = vpop.eup %1547  ;;  %511 = vrot.lane.b32.xlu0 %v1546_v56, %s1633_s9 }
 0x749   :  { %535 = vrot.lane.b32.xlu1 %v1548_v57, %s1633_s9 }
 0x7ba   :  { %v512_v58 = vpop.permute.xlu0 %511 }
 0x7bb   :  { %v536_v59 = vpop.permute.xlu1 %535  ;;  %v514_v60 = vmul.f32 %v1542_v43, %v512_v58 }
 0x7bc   :  { %v1806_v61 = vmul.f32 %v1544_v45, %v536_v59  ;;  %v769_v45 = vld [vmem:[#allocation2 + $0x8] sm:$0x3] }
 0x7bd   :  { %540 = vrot.lane.b32.xlu0 %v514_v60, %s1634_s10 }
 0x7be   :  { %551 = vrot.lane.b32.xlu1 %v1806_v61, %s1633_s9 }
 0x82f   :  { %v541_v62 = vpop.permute.xlu0 %540 }
 0x830   :  { %v552_v63 = vpop.permute.xlu1 %551  ;;  %544 = vst.msk [vmem:[#allocation3 + $0x4] sm:$0x3] %vm260_vm2, %v541_v62 }
 0x831   :  { %v554_v0 = vsel %vm271_vm3, %v541_v62, %v552_v63 }
 0x832   :  { %1449 = vmatmul.mubr.msk.f32.vlgmr.msra.gmra.mxu0 %vm30_vm0, %v554_v0 }
 0x833   :  { %1463 = vmatpush3.msra.mxu0 %v1679_v5  ;;  %1470 = vmatprep.mubr.msk.f32.mxu0 %vm1630_vm1, %v1629_v2 }
 0x834   :  { %1464 = vmatprep.subr.mxu0 %v1629_v2 }
 0x835   :  { %1465 = vmatpush3.msra.mxu0 %v1684_v6 }
 0x836   :  { %1466 = vmatprep.subr.mxu0 %v1629_v2 }
 0x837   :  { %1467 = vmatpush3.msra.mxu0 %v1694_v8  ;;  %v1257_v1 = vld [vmem:[#allocation3 + $0x4] sm:$0x3] }
 0x838   :  { %1468 = vmatprep.subr.mxu0 %v1629_v2  ;;  %1265 = vst.msk [vmem:[%s1997_s4 + $0x4] sm:$0x3] %vm260_vm2, %v1257_v1 }
 0x839   :  { %1469 = vmatpush3.msra.mxu0 %v1704_v10 }
 0x83a   :  { %1484 = vmatprep.subr.mxu0 %v1629_v2 }
 0x8f2   :  { %v624_v3 = vpop.f32.mrf.mxu0 }
 0x8f3   :  { %v629_v9 = vadd.f32 %v628_v4, %v624_v3  ;;  %v631_v11 = vadd.f32 %v630_v7, %v624_v3 }
 0x8f4   :  { %v1450_v12 = vpop.f32.mrf.mxu0 }
 0x8f5   :  { %1549 = vtanh.f32 %v629_v9  ;;  %v1336_v15 = vmul.f32 -1.442695, %v629_v9  ;;  %v1337_v16 = vmul.f32 -1.442695, %v631_v11 }
 0x8f6   :  { %1551 = vtanh.f32 %v631_v11 }
 0x8f7   :  { %1553 = vpow2.f32 %v1336_v15 }
 0x8f8   :  { %1555 = vpow2.f32 %v1337_v16 }
 0x902   :  { %v1550_v13 = vpop.eup %1549 }
 0x903   :  { %v1552_v14 = vpop.eup %1551  ;;  %641 = vrot.lane.b32.xlu0 %v1550_v13, %s1631_s2 }
 0x904   :  { %665 = vrot.lane.b32.xlu1 %v1552_v14, %s1631_s2  ;;  %v1554_v17 = vpop.eup %1553 }
 0x905   :  { %v1556_v18 = vpop.eup %1555  ;;  %v635_v19 = vadd.f32 1.0, %v1554_v17 }
 0x906   :  { %v659_v20 = vadd.f32 1.0, %v1556_v18 }
 0x907   :  { %1557 = vrcp.f32 %v635_v19 }
 0x908   :  { %1559 = vrcp.f32 %v659_v20 }
 0x914   :  { %v1558_v21 = vpop.eup %1557 }
 0x915   :  { %v1560_v23 = vpop.eup %1559  ;;  %v639_v28 = vmul.f32 %v1558_v21, %v508_v54 }
 0x916   :  { %v663_v29 = vmul.f32 %v1560_v23, %v532_v55 }
 0x975   :  { %v642_v22 = vpop.permute.xlu0 %641 }
 0x976   :  { %v666_v25 = vpop.permute.xlu1 %665  ;;  %v644_v26 = vmul.f32 %v1558_v21, %v642_v22 }
 0x977   :  { %v668_v27 = vmul.f32 %v1560_v23, %v666_v25  ;;  %v912_v25 = vld [vmem:[#allocation2 + $0x4] sm:$0x3] }
 0x978   :  { %646 = vrot.lane.b32.xlu0 %v644_v26, %s1632_s3 }
 0x979   :  { %670 = vrot.lane.b32.xlu1 %v668_v27, %s1632_s3 }
 0x9ea   :  { %v647_v30 = vpop.permute.xlu0 %646 }
 0x9eb   :  { %v671_v31 = vpop.permute.xlu1 %670  ;;  %v649_v32 = vadd.f32 %v647_v30, %v639_v28 }
 0x9ec   :  { %v673_v33 = vadd.f32 %v671_v31, %v663_v29 }
 0x9ed   :  { %1561 = vtanh.f32 %v649_v32 }
 0x9ee   :  { %1563 = vtanh.f32 %v673_v33 }
 0x9fa   :  { %v1562_v34 = vpop.eup %1561 }
 0x9fb   :  { %v1564_v35 = vpop.eup %1563  ;;  %652 = vrot.lane.b32.xlu0 %v1562_v34, %s1633_s9 }
 0x9fc   :  { %676 = vrot.lane.b32.xlu1 %v1564_v35, %s1633_s9 }
 0xa6d   :  { %v653_v36 = vpop.permute.xlu0 %652 }
 0xa6e   :  { %v677_v37 = vpop.permute.xlu1 %676  ;;  %v655_v38 = vmul.f32 %v1558_v21, %v653_v36 }
 0xa6f   :  { %v1834_v39 = vmul.f32 %v1560_v23, %v677_v37  ;;  %v910_v23 = vld [vmem:[#allocation2 + $0xa] sm:$0x3] }
 0xa70   :  { %681 = vrot.lane.b32.xlu0 %v655_v38, %s1634_s10 }
 0xa71   :  { %692 = vrot.lane.b32.xlu1 %v1834_v39, %s1633_s9 }
 0xae2   :  { %v682_v40 = vpop.permute.xlu0 %681 }
 0xae3   :  { %v693_v41 = vpop.permute.xlu1 %692  ;;  %685 = vst.msk [vmem:[#allocation3 + $0x6] sm:$0x3] %vm260_vm2, %v682_v40 }
 0xae4   :  { %v695_v42 = vsel %vm271_vm3, %v682_v40, %v693_v41 }
 0xae5   :  { %1460 = vmatmul.mubr.msk.f32.vlgmr.msra.gmra.mxu1 %vm30_vm0, %v695_v42 }
 0xae6   :  { %1474 = vmatpush3.msra.mxu1 %v1679_v5  ;;  %1481 = vmatprep.mubr.msk.f32.mxu1 %vm1630_vm1, %v1629_v2 }
 0xae7   :  { %1475 = vmatprep.subr.mxu1 %v1629_v2 }
 0xae8   :  { %1476 = vmatpush3.msra.mxu1 %v1684_v6 }
 0xae9   :  { %1477 = vmatprep.subr.mxu1 %v1629_v2 }
 0xaea   :  { %1478 = vmatpush3.msra.mxu1 %v1694_v8  ;;  %v1258_v43 = vld [vmem:[#allocation3 + $0x6] sm:$0x3] }
 0xaeb   :  { %1479 = vmatprep.subr.mxu1 %v1629_v2  ;;  %1266 = vst.msk [vmem:[%s1997_s4 + $0x6] sm:$0x3] %vm260_vm2, %v1258_v43 }
 0xaec   :  { %1480 = vmatpush3.msra.mxu1 %v1704_v10 }
 0xba5   :  { %v765_v44 = vpop.f32.mrf.mxu1 }
 0xba6   :  { %v770_v48 = vadd.f32 %v769_v45, %v765_v44  ;;  %v772_v49 = vadd.f32 %v771_v46, %v765_v44 }
 0xba7   :  { %v1461_v50 = vpop.f32.mrf.mxu1 }
 0xba8   :  { %1565 = vtanh.f32 %v770_v48  ;;  %v1339_v53 = vmul.f32 -1.442695, %v770_v48  ;;  %v1340_v54 = vmul.f32 -1.442695, %v772_v49 }
 0xba9   :  { %1567 = vtanh.f32 %v772_v49 }
 0xbaa   :  { %1569 = vpow2.f32 %v1339_v53 }
 0xbab   :  { %1571 = vpow2.f32 %v1340_v54 }
 0xbb5   :  { %v1566_v51 = vpop.eup %1565 }
 0xbb6   :  { %v1568_v52 = vpop.eup %1567  ;;  %782 = vrot.lane.b32.xlu0 %v1566_v51, %s1631_s2 }
 0xbb7   :  { %806 = vrot.lane.b32.xlu1 %v1568_v52, %s1631_s2  ;;  %v1570_v55 = vpop.eup %1569 }
 0xbb8   :  { %v1572_v56 = vpop.eup %1571  ;;  %v776_v57 = vadd.f32 1.0, %v1570_v55 }
 0xbb9   :  { %v800_v58 = vadd.f32 1.0, %v1572_v56 }
 0xbba   :  { %1573 = vrcp.f32 %v776_v57 }
 0xbbb   :  { %1575 = vrcp.f32 %v800_v58  ;;  %v1051_v58 = vld [vmem:[#allocation2 + $0xc] sm:$0x3] }
 0xbc7   :  { %v1574_v59 = vpop.eup %1573 }
 0xbc8   :  { %v1576_v62 = vpop.eup %1575  ;;  %v780_v3 = vmul.f32 %v1574_v59, %v649_v32 }
 0xbc9   :  { %v804_v4 = vmul.f32 %v1576_v62, %v673_v33 }
 0xc28   :  { %v783_v60 = vpop.permute.xlu0 %782 }
 0xc29   :  { %v807_v63 = vpop.permute.xlu1 %806  ;;  %v785_v0 = vmul.f32 %v1574_v59, %v783_v60 }
 0xc2a   :  { %v809_v1 = vmul.f32 %v1576_v62, %v807_v63 }
 0xc2b   :  { %787 = vrot.lane.b32.xlu0 %v785_v0, %s1632_s3 }
 0xc2c   :  { %811 = vrot.lane.b32.xlu1 %v809_v1, %s1632_s3 }
 0xc9d   :  { %v788_v7 = vpop.permute.xlu0 %787 }
 0xc9e   :  { %v812_v9 = vpop.permute.xlu1 %811  ;;  %v790_v11 = vadd.f32 %v788_v7, %v780_v3 }
 0xc9f   :  { %v814_v12 = vadd.f32 %v812_v9, %v804_v4 }
 0xca0   :  { %1577 = vtanh.f32 %v790_v11 }
 0xca1   :  { %1579 = vtanh.f32 %v814_v12 }
 0xcad   :  { %v1578_v13 = vpop.eup %1577 }
 0xcae   :  { %v1580_v14 = vpop.eup %1579  ;;  %793 = vrot.lane.b32.xlu0 %v1578_v13, %s1633_s9 }
 0xcaf   :  { %817 = vrot.lane.b32.xlu1 %v1580_v14, %s1633_s9 }
 0xd20   :  { %v794_v15 = vpop.permute.xlu0 %793 }
 0xd21   :  { %v818_v16 = vpop.permute.xlu1 %817  ;;  %v796_v17 = vmul.f32 %v1574_v59, %v794_v15  ;;  %v1053_v59 = vld [vmem:[#allocation2 + $0x2] sm:$0x3] }
 0xd22   :  { %v1861_v18 = vmul.f32 %v1576_v62, %v818_v16 }
 0xd23   :  { %822 = vrot.lane.b32.xlu0 %v796_v17, %s1634_s10 }
 0xd24   :  { %833 = vrot.lane.b32.xlu1 %v1861_v18, %s1633_s9 }
 0xd95   :  { %v823_v19 = vpop.permute.xlu0 %822 }
 0xd96   :  { %v834_v20 = vpop.permute.xlu1 %833  ;;  %826 = vst.msk [vmem:[#allocation3 + $0x8] sm:$0x3] %vm260_vm2, %v823_v19 }
 0xd97   :  { %v836_v21 = vsel %vm271_vm3, %v823_v19, %v834_v20 }
 0xd98   :  { %1471 = vmatmul.mubr.msk.f32.vlgmr.msra.gmra.mxu0 %vm30_vm0, %v836_v21 }
 0xd99   :  { %1485 = vmatpush3.msra.mxu0 %v1679_v5  ;;  %1492 = vmatprep.mubr.msk.f32.mxu0 %vm1630_vm1, %v1629_v2 }
 0xd9a   :  { %1486 = vmatprep.subr.mxu0 %v1629_v2 }
 0xd9b   :  { %1487 = vmatpush3.msra.mxu0 %v1684_v6 }
 0xd9c   :  { %1488 = vmatprep.subr.mxu0 %v1629_v2 }
 0xd9d   :  { %1489 = vmatpush3.msra.mxu0 %v1694_v8  ;;  %v1259_v22 = vld [vmem:[#allocation3 + $0x8] sm:$0x3] }
 0xd9e   :  { %1490 = vmatprep.subr.mxu0 %v1629_v2  ;;  %1267 = vst.msk [vmem:[%s1997_s4 + $0x8] sm:$0x3] %vm260_vm2, %v1259_v22 }
 0xd9f   :  { %1491 = vmatpush3.msra.mxu0 %v1704_v10 }
 0xe58   :  { %v906_v5 = vpop.f32.mrf.mxu0 }
 0xe59   :  { %v911_v26 = vadd.f32 %v910_v23, %v906_v5  ;;  %v913_v27 = vadd.f32 %v912_v25, %v906_v5 }
 0xe5a   :  { %v1472_v6 = vpop.f32.mrf.mxu0 }
 0xe5b   :  { %1581 = vtanh.f32 %v911_v26  ;;  %v1342_v2 = vmul.f32 -1.442695, %v911_v26  ;;  %v1343_v29 = vmul.f32 -1.442695, %v913_v27 }
 0xe5c   :  { %1583 = vtanh.f32 %v913_v27 }
 0xe5d   :  { %1585 = vpow2.f32 %v1342_v2 }
 0xe5e   :  { %1587 = vpow2.f32 %v1343_v29 }
 0xe68   :  { %v1582_v28 = vpop.eup %1581 }
 0xe69   :  { %v1584_v8 = vpop.eup %1583  ;;  %923 = vrot.lane.b32.xlu0 %v1582_v28, %s1631_s2 }
 0xe6a   :  { %947 = vrot.lane.b32.xlu1 %v1584_v8, %s1631_s2  ;;  %v1586_v30 = vpop.eup %1585 }
 0xe6b   :  { %v1588_v10 = vpop.eup %1587  ;;  %v917_v31 = vadd.f32 1.0, %v1586_v30 }
 0xe6c   :  { %v941_v32 = vadd.f32 1.0, %v1588_v10 }
 0xe6d   :  { %1589 = vrcp.f32 %v917_v31 }
 0xe6e   :  { %1591 = vrcp.f32 %v941_v32 }
 0xe7a   :  { %v1590_v33 = vpop.eup %1589 }
 0xe7b   :  { %v1592_v35 = vpop.eup %1591  ;;  %v921_v40 = vmul.f32 %v1590_v33, %v790_v11 }
 0xe7c   :  { %v945_v41 = vmul.f32 %v1592_v35, %v814_v12 }
 0xedb   :  { %v924_v34 = vpop.permute.xlu0 %923 }
 0xedc   :  { %v948_v36 = vpop.permute.xlu1 %947  ;;  %v926_v37 = vmul.f32 %v1590_v33, %v924_v34  ;;  %v1194_v34 = vld [vmem:[#allocation2] sm:$0x3] }
 0xedd   :  { %v950_v38 = vmul.f32 %v1592_v35, %v948_v36 }
 0xede   :  { %928 = vrot.lane.b32.xlu0 %v926_v37, %s1632_s3 }
 0xedf   :  { %952 = vrot.lane.b32.xlu1 %v950_v38, %s1632_s3 }
 0xf50   :  { %v929_v42 = vpop.permute.xlu0 %928 }
 0xf51   :  { %v953_v43 = vpop.permute.xlu1 %952  ;;  %v931_v44 = vadd.f32 %v929_v42, %v921_v40 }
 0xf52   :  { %v955_v45 = vadd.f32 %v953_v43, %v945_v41 }
 0xf53   :  { %1593 = vtanh.f32 %v931_v44 }
 0xf54   :  { %1595 = vtanh.f32 %v955_v45 }
 0xf60   :  { %v1594_v46 = vpop.eup %1593 }
 0xf61   :  { %v1596_v48 = vpop.eup %1595  ;;  %934 = vrot.lane.b32.xlu0 %v1594_v46, %s1633_s9 }
 0xf62   :  { %958 = vrot.lane.b32.xlu1 %v1596_v48, %s1633_s9 }
 0xfd3   :  { %v935_v49 = vpop.permute.xlu0 %934 }
 0xfd4   :  { %v959_v50 = vpop.permute.xlu1 %958  ;;  %v937_v51 = vmul.f32 %v1590_v33, %v935_v49  ;;  %v1192_v33 = vld [vmem:[#allocation2 + $0xe] sm:$0x3] }
 0xfd5   :  { %v1888_v52 = vmul.f32 %v1592_v35, %v959_v50 }
 0xfd6   :  { %963 = vrot.lane.b32.xlu0 %v937_v51, %s1634_s10 }
 0xfd7   :  { %974 = vrot.lane.b32.xlu1 %v1888_v52, %s1633_s9 }
0x1048   :  { %v964_v53 = vpop.permute.xlu0 %963 }
0x1049   :  { %v975_v54 = vpop.permute.xlu1 %974  ;;  %967 = vst.msk [vmem:[#allocation3 + $0xa] sm:$0x3] %vm260_vm2, %v964_v53 }
0x104a   :  { %v977_v55 = vsel %vm271_vm3, %v964_v53, %v975_v54 }
0x104b   :  { %1482 = vmatmul.mubr.msk.f32.vlgmr.msra.gmra.mxu1 %vm30_vm0, %v977_v55 }
0x1050   :  { %v1260_v56 = vld [vmem:[#allocation3 + $0xa] sm:$0x3] }
0x1051   :  { %1268 = vst.msk [vmem:[%s1997_s4 + $0xa] sm:$0x3] %vm260_vm2, %v1260_v56 }
0x110b   :  { %v1047_v57 = vpop.f32.mrf.mxu1 }
0x110c   :  { %v1052_v60 = vadd.f32 %v1051_v58, %v1047_v57  ;;  %v1054_v62 = vadd.f32 %v1053_v59, %v1047_v57 }
0x110d   :  { %v1483_v63 = vpop.f32.mrf.mxu1 }
0x110e   :  { %1597 = vtanh.f32 %v1052_v60  ;;  %v1345_v3 = vmul.f32 -1.442695, %v1052_v60  ;;  %v1346_v4 = vmul.f32 -1.442695, %v1054_v62 }
0x110f   :  { %1599 = vtanh.f32 %v1054_v62 }
0x1110   :  { %1601 = vpow2.f32 %v1345_v3 }
0x1111   :  { %1603 = vpow2.f32 %v1346_v4 }
0x111b   :  { %v1598_v0 = vpop.eup %1597 }
0x111c   :  { %v1600_v1 = vpop.eup %1599  ;;  %1064 = vrot.lane.b32.xlu0 %v1598_v0, %s1631_s2 }
0x111d   :  { %1088 = vrot.lane.b32.xlu1 %v1600_v1, %s1631_s2  ;;  %v1602_v7 = vpop.eup %1601 }
0x111e   :  { %v1604_v9 = vpop.eup %1603  ;;  %v1058_v11 = vadd.f32 1.0, %v1602_v7 }
0x111f   :  { %v1082_v12 = vadd.f32 1.0, %v1604_v9 }
0x1120   :  { %1605 = vrcp.f32 %v1058_v11 }
0x1121   :  { %1607 = vrcp.f32 %v1082_v12 }
0x112d   :  { %v1606_v13 = vpop.eup %1605 }
0x112e   :  { %v1608_v15 = vpop.eup %1607  ;;  %v1062_v20 = vmul.f32 %v1606_v13, %v931_v44 }
0x112f   :  { %v1086_v21 = vmul.f32 %v1608_v15, %v955_v45 }
0x118e   :  { %v1065_v14 = vpop.permute.xlu0 %1064 }
0x118f   :  { %v1089_v16 = vpop.permute.xlu1 %1088  ;;  %v1067_v17 = vmul.f32 %v1606_v13, %v1065_v14 }
0x1190   :  { %v1091_v19 = vmul.f32 %v1608_v15, %v1089_v16 }
0x1191   :  { %1069 = vrot.lane.b32.xlu0 %v1067_v17, %s1632_s3 }
0x1192   :  { %1093 = vrot.lane.b32.xlu1 %v1091_v19, %s1632_s3 }
0x1203   :  { %v1070_v22 = vpop.permute.xlu0 %1069 }
0x1204   :  { %v1094_v5 = vpop.permute.xlu1 %1093  ;;  %v1072_v23 = vadd.f32 %v1070_v22, %v1062_v20 }
0x1205   :  { %v1096_v25 = vadd.f32 %v1094_v5, %v1086_v21 }
0x1206   :  { %1609 = vtanh.f32 %v1072_v23 }
0x1207   :  { %1611 = vtanh.f32 %v1096_v25 }
0x1213   :  { %v1610_v26 = vpop.eup %1609 }
0x1214   :  { %v1612_v27 = vpop.eup %1611  ;;  %1075 = vrot.lane.b32.xlu0 %v1610_v26, %s1633_s9 }
0x1215   :  { %1099 = vrot.lane.b32.xlu1 %v1612_v27, %s1633_s9 }
0x1286   :  { %v1076_v6 = vpop.permute.xlu0 %1075 }
0x1287   :  { %v1100_v28 = vpop.permute.xlu1 %1099  ;;  %v1078_v8 = vmul.f32 %v1606_v13, %v1076_v6 }
0x1288   :  { %v1906_v2 = vmul.f32 %v1608_v15, %v1100_v28 }
0x1289   :  { %1104 = vrot.lane.b32.xlu0 %v1078_v8, %s1634_s10 }
0x128a   :  { %1115 = vrot.lane.b32.xlu1 %v1906_v2, %s1633_s9 }
0x12fb   :  { %v1105_v29 = vpop.permute.xlu0 %1104 }
0x12fc   :  { %v1116_v30 = vpop.permute.xlu1 %1115  ;;  %1108 = vst.msk [vmem:[#allocation3 + $0xc] sm:$0x3] %vm260_vm2, %v1105_v29 }
0x12fd   :  { %v1118_v10 = vsel %vm271_vm3, %v1105_v29, %v1116_v30 }
0x12fe   :  { %1493 = vmatmul.mubr.msk.f32.vlgmr.msra.gmra.mxu0 %vm30_vm0, %v1118_v10 }
0x1303   :  { %v1261_v31 = vld [vmem:[#allocation3 + $0xc] sm:$0x3] }
0x1304   :  { %1269 = vst.msk [vmem:[%s1997_s4 + $0xc] sm:$0x3] %vm260_vm2, %v1261_v31 }
0x13be   :  { %v1188_v32 = vpop.f32.mrf.mxu0 }
0x13bf   :  { %v1193_v35 = vadd.f32 %v1192_v33, %v1188_v32  ;;  %v1195_v36 = vadd.f32 %v1194_v34, %v1188_v32 }
0x13c0   :  { %v1494_v37 = vpop.f32.mrf.mxu0 }
0x13c1   :  { %1613 = vtanh.f32 %v1193_v35  ;;  %v1348_v41 = vmul.f32 -1.442695, %v1193_v35  ;;  %v1349_v42 = vmul.f32 -1.442695, %v1195_v36 }
0x13c2   :  { %1615 = vtanh.f32 %v1195_v36 }
0x13c3   :  { %1617 = vpow2.f32 %v1348_v41 }
0x13c4   :  { %1619 = vpow2.f32 %v1349_v42 }
0x13ce   :  { %v1614_v38 = vpop.eup %1613 }
0x13cf   :  { %v1616_v40 = vpop.eup %1615  ;;  %1205 = vrot.lane.b32.xlu1 %v1614_v38, %s1631_s2 }
0x13d0   :  { %1229 = vrot.lane.b32.xlu0 %v1616_v40, %s1631_s2  ;;  %v1618_v43 = vpop.eup %1617 }
0x13d1   :  { %v1620_v44 = vpop.eup %1619  ;;  %v1199_v45 = vadd.f32 1.0, %v1618_v43 }
0x13d2   :  { %v1223_v46 = vadd.f32 1.0, %v1620_v44 }
0x13d3   :  { %1621 = vrcp.f32 %v1199_v45 }
0x13d4   :  { %1623 = vrcp.f32 %v1223_v46 }
0x13e0   :  { %v1622_v48 = vpop.eup %1621 }
0x13e1   :  { %v1624_v50 = vpop.eup %1623  ;;  %v1203_v55 = vmul.f32 %v1622_v48, %v1072_v23 }
0x13e2   :  { %v1227_v56 = vmul.f32 %v1624_v50, %v1096_v25 }
0x1441   :  { %v1206_v49 = vpop.permute.xlu1 %1205 }
0x1442   :  { %v1230_v51 = vpop.permute.xlu0 %1229  ;;  %v1208_v53 = vmul.f32 %v1622_v48, %v1206_v49 }
0x1443   :  { %v1232_v54 = vmul.f32 %v1624_v50, %v1230_v51 }
0x1444   :  { %1210 = vrot.lane.b32.xlu1 %v1208_v53, %s1632_s3 }
0x1445   :  { %1234 = vrot.lane.b32.xlu0 %v1232_v54, %s1632_s3 }
0x1448   :  { %405 = vrot.lane.b32.xlu1 %v1778_v24, %s1632_s3 }
0x144c   :  { %687 = vrot.lane.b32.xlu1 %v1834_v39, %s1632_s3 }
0x1450   :  { %969 = vrot.lane.b32.xlu1 %v1888_v52, %s1632_s3 }
0x14b6   :  { %v1211_v57 = vpop.permute.xlu1 %1210 }
0x14b7   :  { %v1235_v58 = vpop.permute.xlu0 %1234  ;;  %v1213_v59 = vadd.f32 %v1211_v57, %v1203_v55 }
0x14b8   :  { %v1237_v60 = vadd.f32 %v1235_v58, %v1227_v56 }
0x14b9   :  { %1625 = vtanh.f32 %v1213_v59 }
0x14ba   :  { %1627 = vtanh.f32 %v1237_v60  ;;  %v406_v62 = vpop.permute.xlu1 %405 }
0x14bb   :  { %409 = vst.msk [vmem:[#allocation4 + $0xc] sm:$0x3] %vm260_vm2, %v406_v62 }
0x14be   :  { %v688_v63 = vpop.permute.xlu1 %687 }
0x14bf   :  { %691 = vst.msk [vmem:[#allocation4 + $0x8] sm:$0x3] %vm260_vm2, %v688_v63 }
0x14c2   :  { %v970_v24 = vpop.permute.xlu1 %969  ;;  %v1277_v21 = vld [vmem:[#allocation4 + $0xc] sm:$0x3] }
0x14c3   :  { %973 = vst.msk [vmem:[#allocation4 + $0x4] sm:$0x3] %vm260_vm2, %v970_v24 }
0x14c6   :  { %v1626_v39 = vpop.eup %1625 }
0x14c7   :  { %v1628_v0 = vpop.eup %1627  ;;  %1216 = vrot.lane.b32.xlu1 %v1626_v39, %s1633_s9 }
0x14c8   :  { %1240 = vrot.lane.b32.xlu0 %v1628_v0, %s1633_s9 }
0x14ca   :  { %v1273_v4 = vld [vmem:[#allocation4 + $0x4] sm:$0x3] }
0x14cc   :  { %263 = vrot.lane.b32.xlu0 %v1749_v47, %s1632_s3 }
0x14d0   :  { %546 = vrot.lane.b32.xlu0 %v1806_v61, %s1632_s3  ;;  %v1275_v61 = vld [vmem:[#allocation4 + $0x8] sm:$0x3] }
0x14d4   :  { %828 = vrot.lane.b32.xlu0 %v1861_v18, %s1632_s3 }
0x14d8   :  { %1110 = vrot.lane.b32.xlu0 %v1906_v2, %s1632_s3 }
0x1539   :  { %v1217_v9 = vpop.permute.xlu1 %1216 }
0x153a   :  { %v1241_v52 = vpop.permute.xlu0 %1240  ;;  %v1219_v12 = vmul.f32 %v1622_v48, %v1217_v9 }
0x153b   :  { %v1243_v1 = vmul.f32 %v1624_v50, %v1241_v52 }
0x153d   :  { %1251 = vrot.lane.b32.xlu1 %v1243_v1, %s1632_s3 }
0x153e   :  { %v264_v3 = vpop.permute.xlu0 %263 }
0x153f   :  { %267 = vst.msk [vmem:[#allocation4 + $0xe] sm:$0x3] %vm260_vm2, %v264_v3 }
0x1541   :  { %1291 = vrot.lane.b32.xlu1 %v1273_v4, %s1632_s3 }
0x1542   :  { %v547_v47 = vpop.permute.xlu0 %546 }
0x1543   :  { %550 = vst.msk [vmem:[#allocation4 + $0xa] sm:$0x3] %vm260_vm2, %v547_v47 }
0x1545   :  { %1295 = vrot.lane.b32.xlu1 %v1275_v61, %s1632_s3 }
0x1546   :  { %v829_v18 = vpop.permute.xlu0 %828  ;;  %v1278_v15 = vld [vmem:[#allocation4 + $0xe] sm:$0x3] }
0x1547   :  { %832 = vst.msk [vmem:[#allocation4 + $0x6] sm:$0x3] %vm260_vm2, %v829_v18 }
0x154a   :  { %v1111_v7 = vpop.permute.xlu0 %1110  ;;  %v1276_v14 = vld [vmem:[#allocation4 + $0xa] sm:$0x3] }
0x154b   :  { %1114 = vst.msk [vmem:[#allocation4 + $0x2] sm:$0x3] %vm260_vm2, %v1111_v7 }
0x154e   :  { %v1274_v13 = vld [vmem:[#allocation4 + $0x6] sm:$0x3] }
0x1552   :  { %v1272_v11 = vld [vmem:[#allocation4 + $0x2] sm:$0x3] }
0x1553   :  { %1289 = vrot.lane.b32.xlu0 %v1272_v11, %s1632_s3 }
0x1557   :  { %1245 = vrot.lane.b32.xlu0 %v1219_v12, %s1634_s10 }
0x155b   :  { %1293 = vrot.lane.b32.xlu0 %v1274_v13, %s1632_s3 }
0x155f   :  { %1297 = vrot.lane.b32.xlu0 %v1276_v14, %s1632_s3 }
0x1563   :  { %1301 = vrot.lane.b32.xlu0 %v1278_v15, %s1632_s3 }
0x15af   :  { %v1252_v16 = vpop.permute.xlu1 %1251 }
0x15b0   :  { %1254 = vst.msk [vmem:[#allocation4] sm:$0x3] %vm260_vm2, %v1252_v16 }
0x15b3   :  { %v1292_v17 = vpop.permute.xlu1 %1291 }
0x15b4   :  { %1314 = vst.msk [vmem:[%s1997_s4 + $0x4] sm:$0x3] %vm1311_vm4, %v1292_v17 }
0x15b7   :  { %v1296_v19 = vpop.permute.xlu1 %1295  ;;  %v1271_v20 = vld [vmem:[#allocation4] sm:$0x3] }
0x15b8   :  { %1316 = vst.msk [vmem:[%s1997_s4 + $0x8] sm:$0x3] %vm1311_vm4, %v1296_v19  ;;  %1287 = vrot.lane.b32.xlu1 %v1271_v20, %s1632_s3 }
0x15bc   :  { %1299 = vrot.lane.b32.xlu1 %v1277_v21, %s1632_s3 }
0x15c5   :  { %v1290_v22 = vpop.permute.xlu0 %1289 }
0x15c6   :  { %1313 = vst.msk [vmem:[%s1997_s4 + $0x2] sm:$0x3] %vm1311_vm4, %v1290_v22 }
0x15c9   :  { %v1246_v5 = vpop.permute.xlu0 %1245 }
0x15ca   :  { %1249 = vst.msk [vmem:[#allocation3 + $0xe] sm:$0x3] %vm260_vm2, %v1246_v5 }
0x15cd   :  { %v1294_v23 = vpop.permute.xlu0 %1293 }
0x15ce   :  { %1315 = vst.msk [vmem:[%s1997_s4 + $0x6] sm:$0x3] %vm1311_vm4, %v1294_v23 }
0x15d1   :  { %v1298_v25 = vpop.permute.xlu0 %1297  ;;  %v1262_v26 = vld [vmem:[#allocation3 + $0xe] sm:$0x3] }
0x15d2   :  { %1317 = vst.msk [vmem:[%s1997_s4 + $0xa] sm:$0x3] %vm1311_vm4, %v1298_v25 }
0x15d3   :  { %1270 = vst.msk [vmem:[%s1997_s4 + $0xe] sm:$0x3] %vm260_vm2, %v1262_v26 }
0x15d5   :  { %v1302_v27 = vpop.permute.xlu0 %1301 }
0x15d6   :  { %1319 = vst.msk [vmem:[%s1997_s4 + $0xe] sm:$0x3] %vm1311_vm4, %v1302_v27 }
0x162a   :  { %v1288_v6 = vpop.permute.xlu1 %1287 }
0x162b   :  { %1312 = vst.msk [vmem:[%s1997_s4] sm:$0x3] %vm1311_vm4, %v1288_v6 }
0x162e   :  { %v1300_v28 = vpop.permute.xlu1 %1299 }
0x162f   :  { %1318 = vst.msk [vmem:[%s1997_s4 + $0xc] sm:$0x3] %vm1311_vm4, %v1300_v28 }

// kernel: bilstm_crf_forward.3
= control target key start
LH: loop header
LB: loop body
LE: loop exit
PB: predicated region body
PF: predicated region fallthrough
CT: control target
= control target key end

     0   :  { %vm28_vm0 = vcmask 130048   ;;  %v1621_v3 = vmov 0.0   ;;  %vm1622_vm1 = vmmov 0   ;;  %s1623_s30 = smov 96   ;;  %s1625_s5 = smov 32   ;;  %vm259_vm2 = vcmask 123904   ;;  %s1979_s1 = inlined_call_operand.vmem [shape: f32[16,128], index: 1, kind: input, shape index: {}]   ;;  %s1980_s0 = inlined_call_operand.vmem [shape: f32[16,16], index: 0, kind: input, shape index: {}]   ;;  %s1981_s2 = inlined_call_operand.vmem [shape: f32[32,128], index: 2, kind: input, shape index: {}]   ;;  %s1982_s3 = inlined_call_operand.vmem [shape: f32[1,128], index: 3, kind: input, shape index: {}]   ;;  %s1983_s4 = inlined_call_operand.vmem [shape: f32[8,2,32], index: 4, kind: output, shape index: {}]  }
   0x1   :  { %v20_v0 = vld [vmem:[%s1979_s1 + $0x8] sm:$0xff]  ;;  %v19_v1 = vld [vmem:[%s1979_s1] sm:$0xff]  ;;  %1399 = vmatprep.subr.mxu1 %v1621_v3  ;;  %1407 = vmatprep.mubr.msk.f32.mxu1 %vm1622_vm1, %v1621_v3  ;;  %v1668_v4 = vld [vmem:[%s1981_s2 + $0x18] sm:$0xff]  ;;  %s1626_s6 = smov 80   ;;  %vm129_vm3 = vcmask 261120   ;;  %vm1309_vm4 = vcmask 255104  }
   0x2   :  { %v17_v2 = vld [vmem:[%s1980_s0] sm:$0xff]  ;;  %1392 = vmatprep.subr.mxu0 %v20_v0  ;;  %v1673_v5 = vld [vmem:[%s1981_s2 + $0x10] sm:$0xff]  ;;  %v18_v6 = vld [vmem:[%s1980_s0 + $0x8] sm:$0xff]  ;;  %1400 = vmatpush3.msra.mxu1 %v1668_v4 }
   0x3   :  { %1396 = vmatprep.mubr.msk.f32.mxu0 %vm28_vm0, %v17_v2  ;;  %1393 = vmatpush3.msra.mxu0 %v20_v0  ;;  %v1683_v7 = vld [vmem:[%s1981_s2 + $0x8] sm:$0xff]  ;;  %v1691_v8 = vld [vmem:[%s1981_s2] sm:$0xff] }
   0x4   :  { %1394 = vmatprep.subr.mxu0 %v19_v1  ;;  %1401 = vmatprep.subr.mxu1 %v1621_v3  ;;  %v1322_v9 = vld [vmem:[%s1982_s3] ss:$0 sm:$0xff]  ;;  %s1624_s3 = smov 16  }
   0x5   :  { %1395 = vmatpush3.msra.mxu0 %v19_v1  ;;  %1402 = vmatpush3.msra.mxu1 %v1673_v5 }
   0x6   :  { %1397 = vmatmul.mubr.msk.f32.vlgmr.msra.gmra.mxu0 %vm28_vm0, %v18_v6  ;;  %1403 = vmatprep.subr.mxu1 %v1621_v3 }
   0x7   :  { %1404 = vmatpush3.msra.mxu1 %v1683_v7  ;;  %1410 = vmatprep.subr.mxu0 %v1621_v3 }
   0x8   :  { %1405 = vmatprep.subr.mxu1 %v1621_v3  ;;  %1411 = vmatpush3.msra.mxu0 %v1668_v4 }
   0x9   :  { %1406 = vmatpush3.msra.mxu1 %v1691_v8  ;;  %1412 = vmatprep.subr.mxu0 %v1621_v3 }
   0xa   :  { %1408 = vmatmul.mubr.f32.vlgmr.msra.gmra.mxu1 %v1621_v3  ;;  %1413 = vmatpush3.msra.mxu0 %v1673_v5 }
   0xb   :  { %1414 = vmatprep.subr.mxu0 %v1621_v3  ;;  %1418 = vmatprep.mubr.msk.f32.mxu0 %vm1622_vm1, %v1621_v3 }
   0xc   :  { %1415 = vmatpush3.msra.mxu0 %v1683_v7  ;;  %1421 = vmatprep.subr.mxu1 %v1621_v3 }
   0xd   :  { %1416 = vmatprep.subr.mxu0 %v1621_v3  ;;  %1422 = vmatpush3.msra.mxu1 %v1668_v4 }
   0xe   :  { %1417 = vmatpush3.msra.mxu0 %v1691_v8  ;;  %1423 = vmatprep.subr.mxu1 %v1621_v3 }
   0xf   :  { %1424 = vmatpush3.msra.mxu1 %v1673_v5  ;;  %1429 = vmatprep.mubr.msk.f32.mxu1 %vm1622_vm1, %v1621_v3 }
  0x10   :  { %1425 = vmatprep.subr.mxu1 %v1621_v3  ;;  %1432 = vmatprep.subr.mxu0 %v1621_v3 }
  0x11   :  { %1426 = vmatpush3.msra.mxu1 %v1683_v7 }
  0x12   :  { %1427 = vmatprep.subr.mxu1 %v1621_v3 }
  0x13   :  { %1428 = vmatpush3.msra.mxu1 %v1691_v8 }
  0x14   :  { %1443 = vmatprep.subr.mxu1 %v1621_v3 }
  0xc6   :  { %v1398_v10 = vpop.f32.mrf.mxu0 }
  0xc7   :  { %v107_v11 = vadd.f32 %v1398_v10, %v1322_v9 }
  0xc8   :  { %v101_v12 = vpop.f32.mrf.mxu0 }
  0xc9   :  { %118 = vst [vmem:[#allocation2 + $0x8] ss:$4 sps:$4 sm:$0xff] %v107_v11   ;;  %v102_v13 = vadd.f32 %v1322_v9, %v101_v12 }
  0xca   :  { %v199_v14 = vpop.f32.mrf.mxu1 }
  0xcb   :  { %110 = vst [vmem:[#allocation2] ss:$4 sps:$4 sm:$0xff] %v102_v13  }
  0xcc   :  { %v1409_v15 = vpop.f32.mrf.mxu1 }
  0xd0   :  { %v205_v17 = vld [vmem:[#allocation2 + $0xe] sm:$0x3]  ;;  %v346_v52 = vld [vmem:[#allocation2 + $0xc] sm:$0x3] }
  0xd1   :  { %v206_v19 = vadd.f32 %v205_v17, %v199_v14 }
  0xd2   :  { %v203_v16 = vld [vmem:[#allocation2] sm:$0x3]  ;;  %v344_v51 = vld [vmem:[#allocation2 + $0x2] sm:$0x3] }
  0xd3   :  { %v204_v18 = vadd.f32 %v203_v16, %v199_v14  ;;  %v1326_v23 = vmul.f32 -1.442695, %v206_v19 }
  0xd5   :  { %1493 = vtanh.f32 %v204_v18  ;;  %v1325_v22 = vmul.f32 -1.442695, %v204_v18 }
  0xd6   :  { %1495 = vtanh.f32 %v206_v19 }
  0xd7   :  { %1497 = vpow2.f32 %v1325_v22 }
  0xd8   :  { %1499 = vpow2.f32 %v1326_v23 }
  0xe2   :  { %v1494_v20 = vpop.eup %1493 }
  0xe3   :  { %216 = vrot.lane.b32.xlu0 %v1494_v20, %s1623_s30  ;;  %v1496_v21 = vpop.eup %1495 }
  0xe4   :  { %v1498_v24 = vpop.eup %1497 }
  0xe5   :  { %v210_v25 = vadd.f32 1.0, %v1498_v24  ;;  %v1500_v26 = vpop.eup %1499 }
  0xe6   :  { %v234_v27 = vadd.f32 1.0, %v1500_v26 }
  0xe7   :  { %240 = vrot.lane.b32.xlu0 %v1496_v21, %s1623_s30  ;;  %1501 = vrcp.f32 %v210_v25 }
  0xe8   :  { %1503 = vrcp.f32 %v234_v27 }
  0xf4   :  { %v1502_v28 = vpop.eup %1501 }
  0xf5   :  { %v1504_v31 = vpop.eup %1503  ;;  %v214_v34 = vmul.f32 0.0, %v1502_v28 }
  0xf6   :  { %v238_v37 = vmul.f32 0.0, %v1504_v31 }
 0x155   :  { %v217_v29 = vpop.permute.xlu0 %216 }
 0x156   :  { %v219_v30 = vmul.f32 %v1502_v28, %v217_v29  ;;  %v487_v29 = vld [vmem:[#allocation2 + $0xa] sm:$0x3] }
 0x158   :  { %221 = vrot.lane.b32.xlu1 %v219_v30, %s1624_s3 }
 0x159   :  { %v241_v32 = vpop.permute.xlu0 %240 }
 0x15a   :  { %v243_v33 = vmul.f32 %v1504_v31, %v241_v32 }
 0x15c   :  { %245 = vrot.lane.b32.xlu1 %v243_v33, %s1624_s3 }
 0x1ca   :  { %v222_v35 = vpop.permute.xlu1 %221 }
 0x1cb   :  { %v1726_v36 = vadd.f32 %v222_v35, %v214_v34 }
 0x1cd   :  { %1505 = vtanh.f32 %v1726_v36 }
 0x1ce   :  { %v246_v38 = vpop.permute.xlu1 %245 }
 0x1cf   :  { %v1729_v39 = vadd.f32 %v246_v38, %v238_v37 }
 0x1d1   :  { %1507 = vtanh.f32 %v1729_v39 }
 0x1da   :  { %v1506_v40 = vpop.eup %1505 }
 0x1db   :  { %227 = vrot.lane.b32.xlu0 %v1506_v40, %s1625_s5 }
 0x1de   :  { %v1508_v41 = vpop.eup %1507 }
 0x1df   :  { %251 = vrot.lane.b32.xlu1 %v1508_v41, %s1625_s5 }
 0x24d   :  { %v228_v42 = vpop.permute.xlu0 %227 }
 0x24e   :  { %v230_v43 = vmul.f32 %v1502_v28, %v228_v42  ;;  %v485_v28 = vld [vmem:[#allocation2 + $0x4] sm:$0x3] }
 0x250   :  { %256 = vrot.lane.b32.xlu0 %v230_v43, %s1626_s6 }
 0x251   :  { %v252_v44 = vpop.permute.xlu1 %251 }
 0x252   :  { %v1735_v45 = vmul.f32 %v1504_v31, %v252_v44 }
 0x254   :  { %267 = vrot.lane.b32.xlu1 %v1735_v45, %s1625_s5 }
 0x2c2   :  { %v257_v46 = vpop.permute.xlu0 %256 }
 0x2c3   :  { %260 = vst.msk [vmem:[#allocation3] sm:$0x3] %vm259_vm2, %v257_v46 }
 0x2c6   :  { %v268_v47 = vpop.permute.xlu1 %267 }
 0x2c7   :  { %v270_v48 = vsel %vm28_vm0, %v257_v46, %v268_v47 }
 0x2c8   :  { %1419 = vmatmul.mubr.msk.f32.vlgmr.msra.gmra.mxu0 %vm129_vm3, %v270_v48 }
 0x2c9   :  { %1433 = vmatpush3.msra.mxu0 %v1668_v4  ;;  %1440 = vmatprep.mubr.msk.f32.mxu0 %vm1622_vm1, %v1621_v3 }
 0x2ca   :  { %1434 = vmatprep.subr.mxu0 %v1621_v3  ;;  %v1253_v49 = vld [vmem:[#allocation3] sm:$0x3] }
 0x2cb   :  { %1435 = vmatpush3.msra.mxu0 %v1673_v5  ;;  %1261 = vst.msk [vmem:[%s1983_s4] sm:$0x3] %vm259_vm2, %v1253_v49 }
 0x2cc   :  { %1436 = vmatprep.subr.mxu0 %v1621_v3 }
 0x2cd   :  { %1437 = vmatpush3.msra.mxu0 %v1683_v7 }
 0x2ce   :  { %1438 = vmatprep.subr.mxu0 %v1621_v3 }
 0x2cf   :  { %1439 = vmatpush3.msra.mxu0 %v1691_v8 }
 0x2d0   :  { %1454 = vmatprep.subr.mxu0 %v1621_v3 }
 0x388   :  { %v340_v50 = vpop.f32.mrf.mxu0 }
 0x389   :  { %v345_v53 = vadd.f32 %v344_v51, %v340_v50  ;;  %v347_v54 = vadd.f32 %v346_v52, %v340_v50 }
 0x38a   :  { %v1420_v55 = vpop.f32.mrf.mxu0 }
 0x38b   :  { %1509 = vtanh.f32 %v345_v53  ;;  %v1328_v58 = vmul.f32 -1.442695, %v345_v53  ;;  %v1329_v59 = vmul.f32 -1.442695, %v347_v54 }
 0x38c   :  { %1511 = vtanh.f32 %v347_v54 }
 0x38d   :  { %1513 = vpow2.f32 %v1328_v58 }
 0x38e   :  { %1515 = vpow2.f32 %v1329_v59 }
 0x398   :  { %v1510_v56 = vpop.eup %1509 }
 0x399   :  { %v1512_v57 = vpop.eup %1511  ;;  %357 = vrot.lane.b32.xlu0 %v1510_v56, %s1623_s30 }
 0x39a   :  { %381 = vrot.lane.b32.xlu1 %v1512_v57, %s1623_s30  ;;  %v1514_v60 = vpop.eup %1513 }
 0x39b   :  { %v1516_v61 = vpop.eup %1515  ;;  %v351_v62 = vadd.f32 1.0, %v1514_v60 }
 0x39c   :  { %v375_v63 = vadd.f32 1.0, %v1516_v61 }
 0x39d   :  { %1517 = vrcp.f32 %v351_v62 }
 0x39e   :  { %1519 = vrcp.f32 %v375_v63 }
 0x3aa   :  { %v1518_v0 = vpop.eup %1517 }
 0x3ab   :  { %v1520_v2 = vpop.eup %1519  ;;  %v355_v11 = vmul.f32 %v1518_v0, %v1726_v36 }
 0x3ac   :  { %v379_v12 = vmul.f32 %v1520_v2, %v1729_v39 }
 0x40b   :  { %v358_v1 = vpop.permute.xlu0 %357 }
 0x40c   :  { %v382_v6 = vpop.permute.xlu1 %381  ;;  %v360_v9 = vmul.f32 %v1518_v0, %v358_v1  ;;  %v626_v1 = vld [vmem:[#allocation2 + $0x6] sm:$0x3] }
 0x40d   :  { %v384_v10 = vmul.f32 %v1520_v2, %v382_v6 }
 0x40e   :  { %362 = vrot.lane.b32.xlu0 %v360_v9, %s1624_s3 }
 0x40f   :  { %386 = vrot.lane.b32.xlu1 %v384_v10, %s1624_s3 }
 0x480   :  { %v363_v13 = vpop.permute.xlu0 %362 }
 0x481   :  { %v387_v14 = vpop.permute.xlu1 %386  ;;  %v365_v15 = vadd.f32 %v363_v13, %v355_v11 }
 0x482   :  { %v389_v16 = vadd.f32 %v387_v14, %v379_v12 }
 0x483   :  { %1521 = vtanh.f32 %v365_v15 }
 0x484   :  { %1523 = vtanh.f32 %v389_v16 }
 0x490   :  { %v1522_v17 = vpop.eup %1521 }
 0x491   :  { %v1524_v18 = vpop.eup %1523  ;;  %368 = vrot.lane.b32.xlu0 %v1522_v17, %s1625_s5 }
 0x492   :  { %392 = vrot.lane.b32.xlu1 %v1524_v18, %s1625_s5 }
 0x503   :  { %v369_v19 = vpop.permute.xlu0 %368 }
 0x504   :  { %v393_v20 = vpop.permute.xlu1 %392  ;;  %v371_v21 = vmul.f32 %v1518_v0, %v369_v19 }
 0x505   :  { %v1764_v22 = vmul.f32 %v1520_v2, %v393_v20  ;;  %v628_v2 = vld [vmem:[#allocation2 + $0x8] sm:$0x3] }
 0x506   :  { %397 = vrot.lane.b32.xlu0 %v371_v21, %s1626_s6 }
 0x507   :  { %408 = vrot.lane.b32.xlu1 %v1764_v22, %s1625_s5 }
 0x578   :  { %v398_v23 = vpop.permute.xlu0 %397 }
 0x579   :  { %v409_v24 = vpop.permute.xlu1 %408  ;;  %401 = vst.msk [vmem:[#allocation3 + $0x2] sm:$0x3] %vm259_vm2, %v398_v23 }
 0x57a   :  { %v411_v25 = vsel %vm28_vm0, %v398_v23, %v409_v24 }
 0x57b   :  { %1430 = vmatmul.mubr.msk.f32.vlgmr.msra.gmra.mxu1 %vm129_vm3, %v411_v25 }
 0x57c   :  { %1444 = vmatpush3.msra.mxu1 %v1668_v4  ;;  %1451 = vmatprep.mubr.msk.f32.mxu1 %vm1622_vm1, %v1621_v3 }
 0x57d   :  { %1445 = vmatprep.subr.mxu1 %v1621_v3 }
 0x57e   :  { %1446 = vmatpush3.msra.mxu1 %v1673_v5 }
 0x57f   :  { %1447 = vmatprep.subr.mxu1 %v1621_v3 }
 0x580   :  { %1448 = vmatpush3.msra.mxu1 %v1683_v7  ;;  %v1254_v26 = vld [vmem:[#allocation3 + $0x2] sm:$0x3] }
 0x581   :  { %1449 = vmatprep.subr.mxu1 %v1621_v3  ;;  %1262 = vst.msk [vmem:[%s1983_s4 + $0x2] sm:$0x3] %vm259_vm2, %v1254_v26 }
 0x582   :  { %1450 = vmatpush3.msra.mxu1 %v1691_v8 }
 0x583   :  { %1465 = vmatprep.subr.mxu1 %v1621_v3 }
 0x63b   :  { %v481_v27 = vpop.f32.mrf.mxu1 }
 0x63c   :  { %v486_v30 = vadd.f32 %v485_v28, %v481_v27  ;;  %v488_v31 = vadd.f32 %v487_v29, %v481_v27 }
 0x63d   :  { %v1431_v32 = vpop.f32.mrf.mxu1 }
 0x63e   :  { %1525 = vtanh.f32 %v486_v30  ;;  %v1331_v35 = vmul.f32 -1.442695, %v486_v30  ;;  %v1332_v36 = vmul.f32 -1.442695, %v488_v31 }
 0x63f   :  { %1527 = vtanh.f32 %v488_v31 }
 0x640   :  { %1529 = vpow2.f32 %v1331_v35 }
 0x641   :  { %1531 = vpow2.f32 %v1332_v36 }
 0x64b   :  { %v1526_v33 = vpop.eup %1525 }
 0x64c   :  { %v1528_v34 = vpop.eup %1527  ;;  %498 = vrot.lane.b32.xlu0 %v1526_v33, %s1623_s30 }
 0x64d   :  { %522 = vrot.lane.b32.xlu1 %v1528_v34, %s1623_s30  ;;  %v1530_v37 = vpop.eup %1529 }
 0x64e   :  { %v1532_v38 = vpop.eup %1531  ;;  %v492_v39 = vadd.f32 1.0, %v1530_v37 }
 0x64f   :  { %v516_v40 = vadd.f32 1.0, %v1532_v38 }
 0x650   :  { %1533 = vrcp.f32 %v492_v39 }
 0x651   :  { %1535 = vrcp.f32 %v516_v40 }
 0x65d   :  { %v1534_v41 = vpop.eup %1533 }
 0x65e   :  { %v1536_v43 = vpop.eup %1535  ;;  %v496_v48 = vmul.f32 %v1534_v41, %v365_v15 }
 0x65f   :  { %v520_v49 = vmul.f32 %v1536_v43, %v389_v16 }
 0x6be   :  { %v499_v42 = vpop.permute.xlu0 %498 }
 0x6bf   :  { %v523_v44 = vpop.permute.xlu1 %522  ;;  %v501_v46 = vmul.f32 %v1534_v41, %v499_v42 }
 0x6c0   :  { %v525_v47 = vmul.f32 %v1536_v43, %v523_v44  ;;  %v769_v44 = vld [vmem:[#allocation2 + $0x6] sm:$0x3] }
 0x6c1   :  { %503 = vrot.lane.b32.xlu0 %v501_v46, %s1624_s3 }
 0x6c2   :  { %527 = vrot.lane.b32.xlu1 %v525_v47, %s1624_s3 }
 0x733   :  { %v504_v50 = vpop.permute.xlu0 %503 }
 0x734   :  { %v528_v51 = vpop.permute.xlu1 %527  ;;  %v506_v52 = vadd.f32 %v504_v50, %v496_v48 }
 0x735   :  { %v530_v53 = vadd.f32 %v528_v51, %v520_v49 }
 0x736   :  { %1537 = vtanh.f32 %v506_v52 }
 0x737   :  { %1539 = vtanh.f32 %v530_v53 }
 0x743   :  { %v1538_v54 = vpop.eup %1537 }
 0x744   :  { %v1540_v55 = vpop.eup %1539  ;;  %509 = vrot.lane.b32.xlu0 %v1538_v54, %s1625_s5 }
 0x745   :  { %533 = vrot.lane.b32.xlu1 %v1540_v55, %s1625_s5 }
 0x7b6   :  { %v510_v56 = vpop.permute.xlu0 %509 }
 0x7b7   :  { %v534_v57 = vpop.permute.xlu1 %533  ;;  %v512_v58 = vmul.f32 %v1534_v41, %v510_v56 }
 0x7b8   :  { %v1792_v59 = vmul.f32 %v1536_v43, %v534_v57  ;;  %v767_v43 = vld [vmem:[#allocation2 + $0x8] sm:$0x3] }
 0x7b9   :  { %538 = vrot.lane.b32.xlu0 %v512_v58, %s1626_s6 }
 0x7ba   :  { %549 = vrot.lane.b32.xlu1 %v1792_v59, %s1625_s5 }
 0x82b   :  { %v539_v60 = vpop.permute.xlu0 %538 }
 0x82c   :  { %v550_v61 = vpop.permute.xlu1 %549  ;;  %542 = vst.msk [vmem:[#allocation3 + $0x4] sm:$0x3] %vm259_vm2, %v539_v60 }
 0x82d   :  { %v552_v62 = vsel %vm28_vm0, %v539_v60, %v550_v61 }
 0x82e   :  { %1441 = vmatmul.mubr.msk.f32.vlgmr.msra.gmra.mxu0 %vm129_vm3, %v552_v62 }
 0x82f   :  { %1455 = vmatpush3.msra.mxu0 %v1668_v4  ;;  %1462 = vmatprep.mubr.msk.f32.mxu0 %vm1622_vm1, %v1621_v3 }
 0x830   :  { %1456 = vmatprep.subr.mxu0 %v1621_v3 }
 0x831   :  { %1457 = vmatpush3.msra.mxu0 %v1673_v5 }
 0x832   :  { %1458 = vmatprep.subr.mxu0 %v1621_v3 }
 0x833   :  { %1459 = vmatpush3.msra.mxu0 %v1683_v7  ;;  %v1255_v63 = vld [vmem:[#allocation3 + $0x4] sm:$0x3] }
 0x834   :  { %1460 = vmatprep.subr.mxu0 %v1621_v3  ;;  %1263 = vst.msk [vmem:[%s1983_s4 + $0x4] sm:$0x3] %vm259_vm2, %v1255_v63 }
 0x835   :  { %1461 = vmatpush3.msra.mxu0 %v1691_v8 }
 0x836   :  { %1476 = vmatprep.subr.mxu0 %v1621_v3 }
 0x8ee   :  { %v622_v0 = vpop.f32.mrf.mxu0 }
 0x8ef   :  { %v627_v6 = vadd.f32 %v626_v1, %v622_v0  ;;  %v629_v9 = vadd.f32 %v628_v2, %v622_v0 }
 0x8f0   :  { %v1442_v10 = vpop.f32.mrf.mxu0 }
 0x8f1   :  { %1541 = vtanh.f32 %v627_v6  ;;  %v1334_v13 = vmul.f32 -1.442695, %v627_v6  ;;  %v1335_v14 = vmul.f32 -1.442695, %v629_v9 }
 0x8f2   :  { %1543 = vtanh.f32 %v629_v9 }
 0x8f3   :  { %1545 = vpow2.f32 %v1334_v13 }
 0x8f4   :  { %1547 = vpow2.f32 %v1335_v14 }
 0x8fe   :  { %v1542_v11 = vpop.eup %1541 }
 0x8ff   :  { %v1544_v12 = vpop.eup %1543  ;;  %639 = vrot.lane.b32.xlu0 %v1542_v11, %s1623_s30 }
 0x900   :  { %663 = vrot.lane.b32.xlu1 %v1544_v12, %s1623_s30  ;;  %v1546_v15 = vpop.eup %1545 }
 0x901   :  { %v1548_v16 = vpop.eup %1547  ;;  %v633_v17 = vadd.f32 1.0, %v1546_v15 }
 0x902   :  { %v657_v18 = vadd.f32 1.0, %v1548_v16 }
 0x903   :  { %1549 = vrcp.f32 %v633_v17 }
 0x904   :  { %1551 = vrcp.f32 %v657_v18 }
 0x910   :  { %v1550_v19 = vpop.eup %1549 }
 0x911   :  { %v1552_v21 = vpop.eup %1551  ;;  %v637_v26 = vmul.f32 %v1550_v19, %v506_v52 }
 0x912   :  { %v661_v27 = vmul.f32 %v1552_v21, %v530_v53 }
 0x971   :  { %v640_v20 = vpop.permute.xlu0 %639 }
 0x972   :  { %v664_v23 = vpop.permute.xlu1 %663  ;;  %v642_v24 = vmul.f32 %v1550_v19, %v640_v20 }
 0x973   :  { %v666_v25 = vmul.f32 %v1552_v21, %v664_v23  ;;  %v910_v23 = vld [vmem:[#allocation2 + $0x4] sm:$0x3] }
 0x974   :  { %644 = vrot.lane.b32.xlu0 %v642_v24, %s1624_s3 }
 0x975   :  { %668 = vrot.lane.b32.xlu1 %v666_v25, %s1624_s3 }
 0x9e6   :  { %v645_v28 = vpop.permute.xlu0 %644 }
 0x9e7   :  { %v669_v29 = vpop.permute.xlu1 %668  ;;  %v647_v30 = vadd.f32 %v645_v28, %v637_v26 }
 0x9e8   :  { %v671_v31 = vadd.f32 %v669_v29, %v661_v27 }
 0x9e9   :  { %1553 = vtanh.f32 %v647_v30 }
 0x9ea   :  { %1555 = vtanh.f32 %v671_v31 }
 0x9f6   :  { %v1554_v32 = vpop.eup %1553 }
 0x9f7   :  { %v1556_v33 = vpop.eup %1555  ;;  %650 = vrot.lane.b32.xlu0 %v1554_v32, %s1625_s5 }
 0x9f8   :  { %674 = vrot.lane.b32.xlu1 %v1556_v33, %s1625_s5 }
 0xa69   :  { %v651_v34 = vpop.permute.xlu0 %650 }
 0xa6a   :  { %v675_v35 = vpop.permute.xlu1 %674  ;;  %v653_v36 = vmul.f32 %v1550_v19, %v651_v34 }
 0xa6b   :  { %v1820_v37 = vmul.f32 %v1552_v21, %v675_v35  ;;  %v908_v21 = vld [vmem:[#allocation2 + $0xa] sm:$0x3] }
 0xa6c   :  { %679 = vrot.lane.b32.xlu0 %v653_v36, %s1626_s6 }
 0xa6d   :  { %690 = vrot.lane.b32.xlu1 %v1820_v37, %s1625_s5 }
 0xade   :  { %v680_v38 = vpop.permute.xlu0 %679 }
 0xadf   :  { %v691_v39 = vpop.permute.xlu1 %690  ;;  %683 = vst.msk [vmem:[#allocation3 + $0x6] sm:$0x3] %vm259_vm2, %v680_v38 }
 0xae0   :  { %v693_v40 = vsel %vm28_vm0, %v680_v38, %v691_v39 }
 0xae1   :  { %1452 = vmatmul.mubr.msk.f32.vlgmr.msra.gmra.mxu1 %vm129_vm3, %v693_v40 }
 0xae2   :  { %1466 = vmatpush3.msra.mxu1 %v1668_v4  ;;  %1473 = vmatprep.mubr.msk.f32.mxu1 %vm1622_vm1, %v1621_v3 }
 0xae3   :  { %1467 = vmatprep.subr.mxu1 %v1621_v3 }
 0xae4   :  { %1468 = vmatpush3.msra.mxu1 %v1673_v5 }
 0xae5   :  { %1469 = vmatprep.subr.mxu1 %v1621_v3 }
 0xae6   :  { %1470 = vmatpush3.msra.mxu1 %v1683_v7  ;;  %v1256_v41 = vld [vmem:[#allocation3 + $0x6] sm:$0x3] }
 0xae7   :  { %1471 = vmatprep.subr.mxu1 %v1621_v3  ;;  %1264 = vst.msk [vmem:[%s1983_s4 + $0x6] sm:$0x3] %vm259_vm2, %v1256_v41 }
 0xae8   :  { %1472 = vmatpush3.msra.mxu1 %v1691_v8 }
 0xba1   :  { %v763_v42 = vpop.f32.mrf.mxu1 }
 0xba2   :  { %v768_v46 = vadd.f32 %v767_v43, %v763_v42  ;;  %v770_v47 = vadd.f32 %v769_v44, %v763_v42 }
 0xba3   :  { %v1453_v48 = vpop.f32.mrf.mxu1 }
 0xba4   :  { %1557 = vtanh.f32 %v768_v46  ;;  %v1337_v51 = vmul.f32 -1.442695, %v768_v46  ;;  %v1338_v52 = vmul.f32 -1.442695, %v770_v47 }
 0xba5   :  { %1559 = vtanh.f32 %v770_v47 }
 0xba6   :  { %1561 = vpow2.f32 %v1337_v51 }
 0xba7   :  { %1563 = vpow2.f32 %v1338_v52 }
 0xbb1   :  { %v1558_v49 = vpop.eup %1557 }
 0xbb2   :  { %v1560_v50 = vpop.eup %1559  ;;  %780 = vrot.lane.b32.xlu0 %v1558_v49, %s1623_s30 }
 0xbb3   :  { %804 = vrot.lane.b32.xlu1 %v1560_v50, %s1623_s30  ;;  %v1562_v53 = vpop.eup %1561 }
 0xbb4   :  { %v1564_v54 = vpop.eup %1563  ;;  %v774_v55 = vadd.f32 1.0, %v1562_v53 }
 0xbb5   :  { %v798_v56 = vadd.f32 1.0, %v1564_v54 }
 0xbb6   :  { %1565 = vrcp.f32 %v774_v55 }
 0xbb7   :  { %1567 = vrcp.f32 %v798_v56  ;;  %v1049_v56 = vld [vmem:[#allocation2 + $0xc] sm:$0x3] }
 0xbc3   :  { %v1566_v57 = vpop.eup %1565 }
 0xbc4   :  { %v1568_v60 = vpop.eup %1567  ;;  %v778_v0 = vmul.f32 %v1566_v57, %v647_v30 }
 0xbc5   :  { %v802_v1 = vmul.f32 %v1568_v60, %v671_v31 }
 0xc24   :  { %v781_v58 = vpop.permute.xlu0 %780 }
 0xc25   :  { %v805_v61 = vpop.permute.xlu1 %804  ;;  %v783_v62 = vmul.f32 %v1566_v57, %v781_v58 }
 0xc26   :  { %v807_v63 = vmul.f32 %v1568_v60, %v805_v61 }
 0xc27   :  { %785 = vrot.lane.b32.xlu0 %v783_v62, %s1624_s3 }
 0xc28   :  { %809 = vrot.lane.b32.xlu1 %v807_v63, %s1624_s3 }
 0xc99   :  { %v786_v2 = vpop.permute.xlu0 %785 }
 0xc9a   :  { %v810_v6 = vpop.permute.xlu1 %809  ;;  %v788_v9 = vadd.f32 %v786_v2, %v778_v0 }
 0xc9b   :  { %v812_v10 = vadd.f32 %v810_v6, %v802_v1 }
 0xc9c   :  { %1569 = vtanh.f32 %v788_v9 }
 0xc9d   :  { %1571 = vtanh.f32 %v812_v10 }
 0xca9   :  { %v1570_v11 = vpop.eup %1569 }
 0xcaa   :  { %v1572_v12 = vpop.eup %1571  ;;  %791 = vrot.lane.b32.xlu0 %v1570_v11, %s1625_s5 }
 0xcab   :  { %815 = vrot.lane.b32.xlu1 %v1572_v12, %s1625_s5 }
 0xd1c   :  { %v792_v13 = vpop.permute.xlu0 %791 }
 0xd1d   :  { %v816_v14 = vpop.permute.xlu1 %815  ;;  %v794_v15 = vmul.f32 %v1566_v57, %v792_v13  ;;  %v1051_v57 = vld [vmem:[#allocation2 + $0x2] sm:$0x3] }
 0xd1e   :  { %v1847_v16 = vmul.f32 %v1568_v60, %v816_v14 }
 0xd1f   :  { %820 = vrot.lane.b32.xlu0 %v794_v15, %s1626_s6 }
 0xd20   :  { %831 = vrot.lane.b32.xlu1 %v1847_v16, %s1625_s5 }
 0xd91   :  { %v821_v17 = vpop.permute.xlu0 %820 }
 0xd92   :  { %v832_v18 = vpop.permute.xlu1 %831  ;;  %824 = vst.msk [vmem:[#allocation3 + $0x8] sm:$0x3] %vm259_vm2, %v821_v17 }
 0xd93   :  { %v834_v19 = vsel %vm28_vm0, %v821_v17, %v832_v18 }
 0xd94   :  { %1463 = vmatmul.mubr.msk.f32.vlgmr.msra.gmra.mxu0 %vm129_vm3, %v834_v19 }
 0xd95   :  { %1477 = vmatpush3.msra.mxu0 %v1668_v4  ;;  %1484 = vmatprep.mubr.msk.f32.mxu0 %vm1622_vm1, %v1621_v3 }
 0xd96   :  { %1478 = vmatprep.subr.mxu0 %v1621_v3 }
 0xd97   :  { %1479 = vmatpush3.msra.mxu0 %v1673_v5 }
 0xd98   :  { %1480 = vmatprep.subr.mxu0 %v1621_v3 }
 0xd99   :  { %1481 = vmatpush3.msra.mxu0 %v1683_v7  ;;  %v1257_v20 = vld [vmem:[#allocation3 + $0x8] sm:$0x3] }
 0xd9a   :  { %1482 = vmatprep.subr.mxu0 %v1621_v3  ;;  %1265 = vst.msk [vmem:[%s1983_s4 + $0x8] sm:$0x3] %vm259_vm2, %v1257_v20 }
 0xd9b   :  { %1483 = vmatpush3.msra.mxu0 %v1691_v8 }
 0xe54   :  { %v904_v4 = vpop.f32.mrf.mxu0 }
 0xe55   :  { %v909_v24 = vadd.f32 %v908_v21, %v904_v4  ;;  %v911_v25 = vadd.f32 %v910_v23, %v904_v4 }
 0xe56   :  { %v1464_v5 = vpop.f32.mrf.mxu0 }
 0xe57   :  { %1573 = vtanh.f32 %v909_v24  ;;  %v1340_v3 = vmul.f32 -1.442695, %v909_v24  ;;  %v1341_v27 = vmul.f32 -1.442695, %v911_v25 }
 0xe58   :  { %1575 = vtanh.f32 %v911_v25 }
 0xe59   :  { %1577 = vpow2.f32 %v1340_v3 }
 0xe5a   :  { %1579 = vpow2.f32 %v1341_v27 }
 0xe64   :  { %v1574_v26 = vpop.eup %1573 }
 0xe65   :  { %v1576_v7 = vpop.eup %1575  ;;  %921 = vrot.lane.b32.xlu0 %v1574_v26, %s1623_s30 }
 0xe66   :  { %945 = vrot.lane.b32.xlu1 %v1576_v7, %s1623_s30  ;;  %v1578_v28 = vpop.eup %1577 }
 0xe67   :  { %v1580_v8 = vpop.eup %1579  ;;  %v915_v29 = vadd.f32 1.0, %v1578_v28 }
 0xe68   :  { %v939_v30 = vadd.f32 1.0, %v1580_v8 }
 0xe69   :  { %1581 = vrcp.f32 %v915_v29 }
 0xe6a   :  { %1583 = vrcp.f32 %v939_v30 }
 0xe76   :  { %v1582_v31 = vpop.eup %1581 }
 0xe77   :  { %v1584_v33 = vpop.eup %1583  ;;  %v919_v38 = vmul.f32 %v1582_v31, %v788_v9 }
 0xe78   :  { %v943_v39 = vmul.f32 %v1584_v33, %v812_v10 }
 0xed7   :  { %v922_v32 = vpop.permute.xlu0 %921 }
 0xed8   :  { %v946_v34 = vpop.permute.xlu1 %945  ;;  %v924_v35 = vmul.f32 %v1582_v31, %v922_v32  ;;  %v1192_v32 = vld [vmem:[#allocation2] sm:$0x3] }
 0xed9   :  { %v948_v36 = vmul.f32 %v1584_v33, %v946_v34 }
 0xeda   :  { %926 = vrot.lane.b32.xlu0 %v924_v35, %s1624_s3 }
 0xedb   :  { %950 = vrot.lane.b32.xlu1 %v948_v36, %s1624_s3 }
 0xf4c   :  { %v927_v40 = vpop.permute.xlu0 %926 }
 0xf4d   :  { %v951_v41 = vpop.permute.xlu1 %950  ;;  %v929_v42 = vadd.f32 %v927_v40, %v919_v38 }
 0xf4e   :  { %v953_v43 = vadd.f32 %v951_v41, %v943_v39 }
 0xf4f   :  { %1585 = vtanh.f32 %v929_v42 }
 0xf50   :  { %1587 = vtanh.f32 %v953_v43 }
 0xf5c   :  { %v1586_v44 = vpop.eup %1585 }
 0xf5d   :  { %v1588_v46 = vpop.eup %1587  ;;  %932 = vrot.lane.b32.xlu0 %v1586_v44, %s1625_s5 }
 0xf5e   :  { %956 = vrot.lane.b32.xlu1 %v1588_v46, %s1625_s5 }
 0xfcf   :  { %v933_v47 = vpop.permute.xlu0 %932 }
 0xfd0   :  { %v957_v48 = vpop.permute.xlu1 %956  ;;  %v935_v49 = vmul.f32 %v1582_v31, %v933_v47  ;;  %v1190_v31 = vld [vmem:[#allocation2 + $0xe] sm:$0x3] }
 0xfd1   :  { %v1874_v50 = vmul.f32 %v1584_v33, %v957_v48 }
 0xfd2   :  { %961 = vrot.lane.b32.xlu0 %v935_v49, %s1626_s6 }
 0xfd3   :  { %972 = vrot.lane.b32.xlu1 %v1874_v50, %s1625_s5 }
0x1044   :  { %v962_v51 = vpop.permute.xlu0 %961 }
0x1045   :  { %v973_v52 = vpop.permute.xlu1 %972  ;;  %965 = vst.msk [vmem:[#allocation3 + $0xa] sm:$0x3] %vm259_vm2, %v962_v51 }
0x1046   :  { %v975_v53 = vsel %vm28_vm0, %v962_v51, %v973_v52 }
0x1047   :  { %1474 = vmatmul.mubr.msk.f32.vlgmr.msra.gmra.mxu1 %vm129_vm3, %v975_v53 }
0x104c   :  { %v1258_v54 = vld [vmem:[#allocation3 + $0xa] sm:$0x3] }
0x104d   :  { %1266 = vst.msk [vmem:[%s1983_s4 + $0xa] sm:$0x3] %vm259_vm2, %v1258_v54 }
0x1107   :  { %v1045_v55 = vpop.f32.mrf.mxu1 }
0x1108   :  { %v1050_v58 = vadd.f32 %v1049_v56, %v1045_v55  ;;  %v1052_v60 = vadd.f32 %v1051_v57, %v1045_v55 }
0x1109   :  { %v1475_v61 = vpop.f32.mrf.mxu1 }
0x110a   :  { %1589 = vtanh.f32 %v1050_v58  ;;  %v1343_v0 = vmul.f32 -1.442695, %v1050_v58  ;;  %v1344_v1 = vmul.f32 -1.442695, %v1052_v60 }
0x110b   :  { %1591 = vtanh.f32 %v1052_v60 }
0x110c   :  { %1593 = vpow2.f32 %v1343_v0 }
0x110d   :  { %1595 = vpow2.f32 %v1344_v1 }
0x1117   :  { %v1590_v62 = vpop.eup %1589 }
0x1118   :  { %v1592_v63 = vpop.eup %1591  ;;  %1062 = vrot.lane.b32.xlu0 %v1590_v62, %s1623_s30 }
0x1119   :  { %1086 = vrot.lane.b32.xlu1 %v1592_v63, %s1623_s30  ;;  %v1594_v2 = vpop.eup %1593 }
0x111a   :  { %v1596_v6 = vpop.eup %1595  ;;  %v1056_v9 = vadd.f32 1.0, %v1594_v2 }
0x111b   :  { %v1080_v10 = vadd.f32 1.0, %v1596_v6 }
0x111c   :  { %1597 = vrcp.f32 %v1056_v9 }
0x111d   :  { %1599 = vrcp.f32 %v1080_v10 }
0x1129   :  { %v1598_v11 = vpop.eup %1597 }
0x112a   :  { %v1600_v13 = vpop.eup %1599  ;;  %v1060_v18 = vmul.f32 %v1598_v11, %v929_v42 }
0x112b   :  { %v1084_v19 = vmul.f32 %v1600_v13, %v953_v43 }
0x118a   :  { %v1063_v12 = vpop.permute.xlu0 %1062 }
0x118b   :  { %v1087_v14 = vpop.permute.xlu1 %1086  ;;  %v1065_v15 = vmul.f32 %v1598_v11, %v1063_v12 }
0x118c   :  { %v1089_v17 = vmul.f32 %v1600_v13, %v1087_v14 }
0x118d   :  { %1067 = vrot.lane.b32.xlu0 %v1065_v15, %s1624_s3 }
0x118e   :  { %1091 = vrot.lane.b32.xlu1 %v1089_v17, %s1624_s3 }
0x11ff   :  { %v1068_v20 = vpop.permute.xlu0 %1067 }
0x1200   :  { %v1092_v4 = vpop.permute.xlu1 %1091  ;;  %v1070_v21 = vadd.f32 %v1068_v20, %v1060_v18 }
0x1201   :  { %v1094_v23 = vadd.f32 %v1092_v4, %v1084_v19 }
0x1202   :  { %1601 = vtanh.f32 %v1070_v21 }
0x1203   :  { %1603 = vtanh.f32 %v1094_v23 }
0x120f   :  { %v1602_v24 = vpop.eup %1601 }
0x1210   :  { %v1604_v25 = vpop.eup %1603  ;;  %1073 = vrot.lane.b32.xlu0 %v1602_v24, %s1625_s5 }
0x1211   :  { %1097 = vrot.lane.b32.xlu1 %v1604_v25, %s1625_s5 }
0x1282   :  { %v1074_v5 = vpop.permute.xlu0 %1073 }
0x1283   :  { %v1098_v26 = vpop.permute.xlu1 %1097  ;;  %v1076_v7 = vmul.f32 %v1598_v11, %v1074_v5 }
0x1284   :  { %v1892_v3 = vmul.f32 %v1600_v13, %v1098_v26 }
0x1285   :  { %1102 = vrot.lane.b32.xlu0 %v1076_v7, %s1626_s6 }
0x1286   :  { %1113 = vrot.lane.b32.xlu1 %v1892_v3, %s1625_s5 }
0x12f7   :  { %v1103_v27 = vpop.permute.xlu0 %1102 }
0x12f8   :  { %v1114_v28 = vpop.permute.xlu1 %1113  ;;  %1106 = vst.msk [vmem:[#allocation3 + $0xc] sm:$0x3] %vm259_vm2, %v1103_v27 }
0x12f9   :  { %v1116_v8 = vsel %vm28_vm0, %v1103_v27, %v1114_v28 }
0x12fa   :  { %1485 = vmatmul.mubr.msk.f32.vlgmr.msra.gmra.mxu0 %vm129_vm3, %v1116_v8 }
0x12ff   :  { %v1259_v29 = vld [vmem:[#allocation3 + $0xc] sm:$0x3] }
0x1300   :  { %1267 = vst.msk [vmem:[%s1983_s4 + $0xc] sm:$0x3] %vm259_vm2, %v1259_v29 }
0x13ba   :  { %v1186_v30 = vpop.f32.mrf.mxu0 }
0x13bb   :  { %v1191_v33 = vadd.f32 %v1190_v31, %v1186_v30  ;;  %v1193_v34 = vadd.f32 %v1192_v32, %v1186_v30 }
0x13bc   :  { %v1486_v35 = vpop.f32.mrf.mxu0 }
0x13bd   :  { %1605 = vtanh.f32 %v1191_v33  ;;  %v1346_v39 = vmul.f32 -1.442695, %v1191_v33  ;;  %v1347_v40 = vmul.f32 -1.442695, %v1193_v34 }
0x13be   :  { %1607 = vtanh.f32 %v1193_v34 }
0x13bf   :  { %1609 = vpow2.f32 %v1346_v39 }
0x13c0   :  { %1611 = vpow2.f32 %v1347_v40 }
0x13ca   :  { %v1606_v36 = vpop.eup %1605 }
0x13cb   :  { %v1608_v38 = vpop.eup %1607  ;;  %1203 = vrot.lane.b32.xlu1 %v1606_v36, %s1623_s30 }
0x13cc   :  { %1227 = vrot.lane.b32.xlu0 %v1608_v38, %s1623_s30  ;;  %v1610_v41 = vpop.eup %1609 }
0x13cd   :  { %v1612_v42 = vpop.eup %1611  ;;  %v1197_v43 = vadd.f32 1.0, %v1610_v41 }
0x13ce   :  { %v1221_v44 = vadd.f32 1.0, %v1612_v42 }
0x13cf   :  { %1613 = vrcp.f32 %v1197_v43 }
0x13d0   :  { %1615 = vrcp.f32 %v1221_v44 }
0x13dc   :  { %v1614_v46 = vpop.eup %1613 }
0x13dd   :  { %v1616_v48 = vpop.eup %1615  ;;  %v1201_v53 = vmul.f32 %v1614_v46, %v1070_v21 }
0x13de   :  { %v1225_v54 = vmul.f32 %v1616_v48, %v1094_v23 }
0x143d   :  { %v1204_v47 = vpop.permute.xlu1 %1203 }
0x143e   :  { %v1228_v49 = vpop.permute.xlu0 %1227  ;;  %v1206_v51 = vmul.f32 %v1614_v46, %v1204_v47 }
0x143f   :  { %v1230_v52 = vmul.f32 %v1616_v48, %v1228_v49 }
0x1440   :  { %1208 = vrot.lane.b32.xlu1 %v1206_v51, %s1624_s3 }
0x1441   :  { %1232 = vrot.lane.b32.xlu0 %v1230_v52, %s1624_s3 }
0x1444   :  { %403 = vrot.lane.b32.xlu1 %v1764_v22, %s1624_s3 }
0x1448   :  { %685 = vrot.lane.b32.xlu1 %v1820_v37, %s1624_s3 }
0x144c   :  { %967 = vrot.lane.b32.xlu1 %v1874_v50, %s1624_s3 }
0x14b2   :  { %v1209_v55 = vpop.permute.xlu1 %1208 }
0x14b3   :  { %v1233_v56 = vpop.permute.xlu0 %1232  ;;  %v1211_v57 = vadd.f32 %v1209_v55, %v1201_v53 }
0x14b4   :  { %v1235_v58 = vadd.f32 %v1233_v56, %v1225_v54 }
0x14b5   :  { %1617 = vtanh.f32 %v1211_v57 }
0x14b6   :  { %1619 = vtanh.f32 %v1235_v58  ;;  %v404_v60 = vpop.permute.xlu1 %403 }
0x14b7   :  { %407 = vst.msk [vmem:[#allocation4 + $0xc] sm:$0x3] %vm259_vm2, %v404_v60 }
0x14ba   :  { %v686_v61 = vpop.permute.xlu1 %685 }
0x14bb   :  { %689 = vst.msk [vmem:[#allocation4 + $0x8] sm:$0x3] %vm259_vm2, %v686_v61 }
0x14be   :  { %v968_v22 = vpop.permute.xlu1 %967  ;;  %v1275_v19 = vld [vmem:[#allocation4 + $0xc] sm:$0x3] }
0x14bf   :  { %971 = vst.msk [vmem:[#allocation4 + $0x4] sm:$0x3] %vm259_vm2, %v968_v22 }
0x14c2   :  { %v1618_v37 = vpop.eup %1617 }
0x14c3   :  { %v1620_v62 = vpop.eup %1619  ;;  %1214 = vrot.lane.b32.xlu1 %v1618_v37, %s1625_s5 }
0x14c4   :  { %1238 = vrot.lane.b32.xlu0 %v1620_v62, %s1625_s5 }
0x14c6   :  { %v1271_v1 = vld [vmem:[#allocation4 + $0x4] sm:$0x3] }
0x14c8   :  { %262 = vrot.lane.b32.xlu0 %v1735_v45, %s1624_s3 }
0x14cc   :  { %544 = vrot.lane.b32.xlu0 %v1792_v59, %s1624_s3  ;;  %v1273_v59 = vld [vmem:[#allocation4 + $0x8] sm:$0x3] }
0x14d0   :  { %826 = vrot.lane.b32.xlu0 %v1847_v16, %s1624_s3 }
0x14d4   :  { %1108 = vrot.lane.b32.xlu0 %v1892_v3, %s1624_s3 }
0x1535   :  { %v1215_v6 = vpop.permute.xlu1 %1214 }
0x1536   :  { %v1239_v50 = vpop.permute.xlu0 %1238  ;;  %v1217_v10 = vmul.f32 %v1614_v46, %v1215_v6 }
0x1537   :  { %v1241_v63 = vmul.f32 %v1616_v48, %v1239_v50 }
0x1539   :  { %1249 = vrot.lane.b32.xlu1 %v1241_v63, %s1624_s3 }
0x153a   :  { %v263_v0 = vpop.permute.xlu0 %262 }
0x153b   :  { %266 = vst.msk [vmem:[#allocation4 + $0xe] sm:$0x3] %vm259_vm2, %v263_v0 }
0x153d   :  { %1289 = vrot.lane.b32.xlu1 %v1271_v1, %s1624_s3 }
0x153e   :  { %v545_v45 = vpop.permute.xlu0 %544 }
0x153f   :  { %548 = vst.msk [vmem:[#allocation4 + $0xa] sm:$0x3] %vm259_vm2, %v545_v45 }
0x1541   :  { %1293 = vrot.lane.b32.xlu1 %v1273_v59, %s1624_s3 }
0x1542   :  { %v827_v16 = vpop.permute.xlu0 %826  ;;  %v1276_v13 = vld [vmem:[#allocation4 + $0xe] sm:$0x3] }
0x1543   :  { %830 = vst.msk [vmem:[#allocation4 + $0x6] sm:$0x3] %vm259_vm2, %v827_v16 }
0x1546   :  { %v1109_v2 = vpop.permute.xlu0 %1108  ;;  %v1274_v12 = vld [vmem:[#allocation4 + $0xa] sm:$0x3] }
0x1547   :  { %1112 = vst.msk [vmem:[#allocation4 + $0x2] sm:$0x3] %vm259_vm2, %v1109_v2 }
0x154a   :  { %v1272_v11 = vld [vmem:[#allocation4 + $0x6] sm:$0x3] }
0x154e   :  { %v1270_v9 = vld [vmem:[#allocation4 + $0x2] sm:$0x3] }
0x154f   :  { %1287 = vrot.lane.b32.xlu0 %v1270_v9, %s1624_s3 }
0x1553   :  { %1243 = vrot.lane.b32.xlu0 %v1217_v10, %s1626_s6 }
0x1557   :  { %1291 = vrot.lane.b32.xlu0 %v1272_v11, %s1624_s3 }
0x155b   :  { %1295 = vrot.lane.b32.xlu0 %v1274_v12, %s1624_s3 }
0x155f   :  { %1299 = vrot.lane.b32.xlu0 %v1276_v13, %s1624_s3 }
0x15ab   :  { %v1250_v14 = vpop.permute.xlu1 %1249 }
0x15ac   :  { %1252 = vst.msk [vmem:[#allocation4] sm:$0x3] %vm259_vm2, %v1250_v14 }
0x15af   :  { %v1290_v15 = vpop.permute.xlu1 %1289 }
0x15b0   :  { %1312 = vst.msk [vmem:[%s1983_s4 + $0x4] sm:$0x3] %vm1309_vm4, %v1290_v15 }
0x15b3   :  { %v1294_v17 = vpop.permute.xlu1 %1293  ;;  %v1269_v18 = vld [vmem:[#allocation4] sm:$0x3] }
0x15b4   :  { %1314 = vst.msk [vmem:[%s1983_s4 + $0x8] sm:$0x3] %vm1309_vm4, %v1294_v17  ;;  %1285 = vrot.lane.b32.xlu1 %v1269_v18, %s1624_s3 }
0x15b8   :  { %1297 = vrot.lane.b32.xlu1 %v1275_v19, %s1624_s3 }
0x15c1   :  { %v1288_v20 = vpop.permute.xlu0 %1287 }
0x15c2   :  { %1311 = vst.msk [vmem:[%s1983_s4 + $0x2] sm:$0x3] %vm1309_vm4, %v1288_v20 }
0x15c5   :  { %v1244_v4 = vpop.permute.xlu0 %1243 }
0x15c6   :  { %1247 = vst.msk [vmem:[#allocation3 + $0xe] sm:$0x3] %vm259_vm2, %v1244_v4 }
0x15c9   :  { %v1292_v21 = vpop.permute.xlu0 %1291 }
0x15ca   :  { %1313 = vst.msk [vmem:[%s1983_s4 + $0x6] sm:$0x3] %vm1309_vm4, %v1292_v21 }
0x15cd   :  { %v1296_v23 = vpop.permute.xlu0 %1295  ;;  %v1260_v24 = vld [vmem:[#allocation3 + $0xe] sm:$0x3] }
0x15ce   :  { %1315 = vst.msk [vmem:[%s1983_s4 + $0xa] sm:$0x3] %vm1309_vm4, %v1296_v23 }
0x15cf   :  { %1268 = vst.msk [vmem:[%s1983_s4 + $0xe] sm:$0x3] %vm259_vm2, %v1260_v24 }
0x15d1   :  { %v1300_v25 = vpop.permute.xlu0 %1299 }
0x15d2   :  { %1317 = vst.msk [vmem:[%s1983_s4 + $0xe] sm:$0x3] %vm1309_vm4, %v1300_v25 }
0x1626   :  { %v1286_v5 = vpop.permute.xlu1 %1285 }
0x1627   :  { %1310 = vst.msk [vmem:[%s1983_s4] sm:$0x3] %vm1309_vm4, %v1286_v5 }
0x162a   :  { %v1298_v26 = vpop.permute.xlu1 %1297 }
0x162b   :  { %1316 = vst.msk [vmem:[%s1983_s4 + $0xc] sm:$0x3] %vm1309_vm4, %v1298_v26 }

// kernel: bilstm_crf_forward.5
= control target key start
LH: loop header
LB: loop body
LE: loop exit
PB: predicated region body
PF: predicated region fallthrough
CT: control target
= control target key end

     0   :  { %v207_v0 = vlaneseq  ;;  %v4460_v3 = vmov 0   ;;  %vm36_vm0 = vcmask 261120   ;;  %v4461_v7 = vmov 1966171168   ;;  %s6098_s1 = inlined_call_operand.vmem [shape: f32[32,6], index: 1, kind: input, shape index: {}]   ;;  %s6099_s3 = inlined_call_operand.vmem [shape: f32[8,2,1], index: 3, kind: input, shape index: {}]   ;;  %s6100_s0 = inlined_call_operand.vmem [shape: f32[16,32], index: 0, kind: input, shape index: {}]   ;;  %s6101_s5 = inlined_call_operand.vmem [shape: f32[6,6], index: 5, kind: input, shape index: {}]   ;;  %s6102_s2 = inlined_call_operand.vmem [shape: f32[1,6], index: 2, kind: input, shape index: {}]   ;;  %s6103_s4 = inlined_call_operand.vmem [shape: s32[9,2,1], index: 4, kind: input, shape index: {}]   ;;  %s6104_s6 = inlined_call_operand.vmem [shape: f32[2,1], index: 6, kind: output, shape index: {}]  }
   0x1   :  { %v28_v1 = vld [vmem:[%s6098_s1 + $0x18] sm:$0xff]  ;;  %v27_v2 = vld [vmem:[%s6098_s1 + $0x10] sm:$0xff]  ;;  %4234 = vset.pattern.permute.xlu1 %v4460_v3  ;;  %4235 = vset.pattern.permute.xlu0 %v4460_v3  ;;  %v118_v4 = vld [vmem:[%s6099_s3] sm:$0x3]  ;;  %v218_v8 = vunpack.c.l.s4 %v4461_v7  ;;  %v4462_v15 = vmov -10000.0   ;;  %vm251_vm2 = vcmask 46080  }
   0x2   :  { %4176 = vmatprep.subr.mxu0 %v28_v1  ;;  %v23_v5 = vld [vmem:[%s6100_s0] sm:$0xff]  ;;  %v4514_v6 = vand.u32 127, %v207_v0  ;;  %v4516_v9 = vshrl.u32 %v207_v0, 7  ;;  %v26_v10 = vld [vmem:[%s6098_s1 + $0x8] sm:$0xff]  ;;  %121 = vperm.xlu1 %4234, %v118_v4   ;;  %vm125_vm3 = vcmask 41984   ;;  %vm598_vm4 = vcmask 1041409  }
   0x3   :  { %4177 = vmatpush3.msra.mxu0 %v28_v1  ;;  %v212_v11 = vld [vmem:[%s6099_s3] sm:$0x3]  ;;  %4184 = vmatprep.mubr.msk.f32.mxu0 %vm36_vm0, %v23_v5  ;;  %v219_v13 = vunpack.c.0.s8 %v218_v8  ;;  %v24_v18 = vld [vmem:[%s6100_s0 + $0x8] sm:$0xff]  ;;  %vm600_vm5 = vcmask 1042434   ;;  %vm602_vm6 = vcmask 1043459   ;;  %vm604_vm7 = vcmask 1044484  }
   0x4   :  { %4178 = vmatprep.subr.mxu0 %v27_v2  ;;  %v311_v12 = vsub.f32 1.0, %v212_v11  ;;  %vm209_vm1 = vcmp.eq.s32.totalorder %v4514_v6, 4  ;;  %v25_v14 = vld [vmem:[%s6098_s1] sm:$0xff]  ;;  %v4534_v20 = vsub.s32 0, %v4516_v9  ;;  %v4545_v32 = vsub.s32 1, %v4516_v9 }
   0x5   :  { %4179 = vmatpush3.msra.mxu0 %v27_v2  ;;  %v210_v16 = vsel %vm209_vm1, 0.0, %v4462_v15  ;;  %v222_v17 = vsub.s32 %v219_v13, %v4516_v9  ;;  %v206_v23 = vld [vmem:[%s6101_s5] sm:$0x3f]  ;;  %v4563_v56 = vsub.s32 2, %v4516_v9  ;;  %v4566_v57 = vsub.s32 3, %v4516_v9 }
   0x6   :  { %4180 = vmatprep.subr.mxu0 %v26_v10  ;;  %314 = vperm.xlu1 %4234, %v311_v12   ;;  %v4103_v47 = vld [vmem:[%s6102_s2] ss:$0 sm:$0xff]  ;;  %v445_v58 = vrot.slane %v206_v23, %v4534_v20  ;;  %v452_v59 = vrot.slane %v206_v23, %v4545_v32  ;;  %v4571_v60 = vsub.s32 4, %v4516_v9  ;;  %v4574_v61 = vsub.s32 5, %v4516_v9 }
   0x7   :  { %4181 = vmatpush3.msra.mxu0 %v26_v10  ;;  %v223_v19 = vrot.slane %v210_v16, %v222_v17  ;;  %v459_v62 = vrot.slane %v206_v23, %v4563_v56  ;;  %v466_v63 = vrot.slane %v206_v23, %v4566_v57  ;;  %vm606_vm8 = vcmask 1045509  }
   0x8   :  { %4182 = vmatprep.subr.mxu0 %v25_v14  ;;  %v473_v0 = vrot.slane %v206_v23, %v4571_v60  ;;  %v4580_v1 = vrot.slane %v206_v23, %v4574_v61  ;;  %vm137_vm9 = vcmask 44034   ;;  %vm149_vm10 = vcmask 46084  }
   0x9   :  { %4183 = vmatpush3.msra.mxu0 %v25_v14  ;;  %v231_v21 = vrot.slane %v223_v19, %v222_v17  ;;  %v224_v22 = vcombine.high %v223_v19, %v223_v19  ;;  %vm161_vm11 = vcmask 48134   ;;  %vm357_vm12 = vcmask 1045504  }
   0xa   :  { %4185 = vmatmul.mubr.msk.f32.vlgmr.msra.gmra.mxu0 %vm36_vm0, %v24_v18  ;;  %vm4464_vm13 = vmmov 0   ;;  %vm353_vm14 = vcmask 48128  }
   0xb   :  { %v242_v24 = vrot.slane %v231_v21, %v4534_v20  ;;  %v238_v25 = vrot.slane %v224_v22, %v222_v17 }
   0xd   :  { %v249_v26 = vadd.f32 %v242_v24, %v206_v23  ;;  %v246_v27 = vrot.slane %v238_v25, %v4534_v20 }
   0xf   :  { %v252_v28 = vsel %vm251_vm2, %v249_v26, -inf  ;;  %v250_v29 = vadd.f32 %v246_v27, %v206_v23 }
  0x10   :  { %253 = vmax.xlane.f32.xlu0 %v252_v28 }
  0x11   :  { %v255_v30 = vsel %vm251_vm2, %v250_v29, -inf }
  0x14   :  { %256 = vmax.xlane.f32.xlu0 %v255_v30 }
  0x2a   :  { %297 = vperm.xlu0 %4235, %v212_v11  }
  0x7d   :  { %v122_v31 = vpop.permute.xlu1 %121 }
  0x81   :  { %v315_v33 = vpop.permute.xlu1 %314 }
  0x82   :  { %v317_v34 = vmul.f32 %v315_v33, %v210_v16 }
  0x84   :  { %v329_v35 = vrot.slane %v317_v34, %v4545_v32  ;;  %v322_v36 = vrot.slane %v317_v34, %v4534_v20 }
  0x86   :  { %331 = vbcast.lane.b32.xlu1 %v329_v35, 256  ;;  %324 = vbcast.lane.b32.xlu0 %v322_v36, 256 }
  0x99   :  { %v254_v37 = vpop.xlane.xlu0 %253 }
  0x9a   :  { %v258_v38 = vsub.f32 %v249_v26, %v254_v37 }
  0x9c   :  { %v260_v39 = vmul.f32 1.442695, %v258_v38 }
  0x9d   :  { %v257_v40 = vpop.xlane.xlu0 %256 }
  0x9e   :  { %4236 = vpow2.f32 %v260_v39  ;;  %v259_v41 = vsub.f32 %v250_v29, %v257_v40 }
  0xa0   :  { %v262_v42 = vmul.f32 1.442695, %v259_v41 }
  0xa2   :  { %4238 = vpow2.f32 %v262_v42 }
  0xa5   :  { %v298_v2 = vpop.permute.xlu0 %297 }
  0xa6   :  { %v302_v18 = vrot.slane %v298_v2, %v4534_v20  ;;  %v306_v19 = vrot.slane %v298_v2, %v4545_v32 }
  0xab   :  { %v4237_v43 = vpop.eup %4236 }
  0xac   :  { %v264_v44 = vsel %vm251_vm2, %v4237_v43, 0.0 }
  0xad   :  { %265 = vadd.xlane.f32.xlu0 %v264_v44 }
  0xaf   :  { %v4239_v45 = vpop.eup %4238 }
  0xb0   :  { %v267_v46 = vsel %vm251_vm2, %v4239_v45, 0.0 }
  0xb1   :  { %268 = vadd.xlane.f32.xlu1 %v267_v46 }
  0xca   :  { %v4186_v48 = vpop.f32.mrf.mxu0 }
  0xcb   :  { %v4554_v49 = vadd.f32 %v4186_v48, %v4103_v47 }
  0xcc   :  { %v109_v50 = vpop.f32.mrf.mxu0 }
  0xcd   :  { %v4556_v51 = vadd.f32 %v4103_v47, %v109_v50 }
  0xcf   :  { %v124_v52 = vmul.f32 %v122_v31, %v4556_v51 }
  0xd1   :  { %126 = vst.msk [vmem:[#allocation2] sm:$0x3] %vm125_vm3, %v124_v52 }
  0xd8   :  { %v211_v53 = vld [vmem:[#allocation2] sm:$0x3] }
  0xd9   :  { %v287_v54 = vrot.slane %v211_v53, %v4545_v32  ;;  %v280_v55 = vrot.slane %v211_v53, %v4534_v20 }
  0xdb   :  { %289 = vbcast.lane.b32.xlu0 %v287_v54, 256  ;;  %282 = vbcast.lane.b32.xlu1 %v280_v55, 256  ;;  %v4663_v54 = vsub.s32 %v4514_v6, %v4516_v9 }
  0xdf   :  { %447 = vbcast.lane.b32.xlu0 %v445_v58, 256  ;;  %454 = vbcast.lane.b32.xlu1 %v452_v59, 256 }
  0xe3   :  { %461 = vbcast.lane.b32.xlu0 %v459_v62, 256  ;;  %468 = vbcast.lane.b32.xlu1 %v466_v63, 256 }
  0xe7   :  { %475 = vbcast.lane.b32.xlu0 %v473_v0, 256  ;;  %482 = vbcast.lane.b32.xlu1 %v4580_v1, 256 }
  0xf8   :  { %v325_v4 = vpop.permute.xlu0 %324  ;;  %v332_v5 = vpop.permute.xlu1 %331 }
 0x136   :  { %v266_v7 = vpop.xlane.xlu0 %265 }
 0x137   :  { %4240 = vlog2.f32 %v266_v7 }
 0x13a   :  { %v269_v8 = vpop.xlane.xlu1 %268 }
 0x13b   :  { %4242 = vlog2.f32 %v269_v8 }
 0x144   :  { %v4241_v10 = vpop.eup %4240 }
 0x145   :  { %v271_v11 = vmul.f32 0.6931472, %v4241_v10 }
 0x147   :  { %v274_v15 = vadd.f32 %v271_v11, %v254_v37 }
 0x148   :  { %v4243_v12 = vpop.eup %4242 }
 0x149   :  { %v273_v13 = vmul.f32 0.6931472, %v4243_v12 }
 0x14b   :  { %v275_v14 = vadd.f32 %v273_v13, %v257_v40 }
 0x14d   :  { %v290_v16 = vpop.permute.xlu0 %289  ;;  %v283_v17 = vpop.permute.xlu1 %282 }
 0x14e   :  { %v294_v21 = vadd.f32 %v290_v16, %v275_v14  ;;  %v293_v22 = vadd.f32 %v283_v17, %v274_v15 }
 0x150   :  { %v310_v23 = vmul.f32 %v306_v19, %v294_v21  ;;  %v309_v24 = vmul.f32 %v302_v18, %v293_v22 }
 0x151   :  { %v4587_v26 = vpop.permute.xlu0 %447  ;;  %v4589_v27 = vpop.permute.xlu1 %454 }
 0x152   :  { %v4585_v25 = vadd.f32 %v325_v4, %v309_v24  ;;  %v4591_v28 = vadd.f32 %v332_v5, %v310_v23 }
 0x154   :  { %v4595_v29 = vadd.f32 %v4587_v26, %v4585_v25  ;;  %v4599_v30 = vadd.f32 %v4589_v27, %v4585_v25  ;;  %v4605_v31 = vadd.f32 %v4587_v26, %v4591_v28  ;;  %v4609_v33 = vadd.f32 %v4589_v27, %v4591_v28 }
 0x155   :  { %v4611_v34 = vpop.permute.xlu0 %461  ;;  %v4623_v37 = vpop.permute.xlu1 %468 }
 0x156   :  { %515 = vperm.xlu0 %4235, %v4595_v29   ;;  %518 = vperm.xlu1 %4234, %v4599_v30   ;;  %v4617_v35 = vadd.f32 %v4611_v34, %v4585_v25  ;;  %v4621_v36 = vadd.f32 %v4611_v34, %v4591_v28  ;;  %v4629_v38 = vadd.f32 %v4623_v37, %v4591_v28 }
 0x157   :  { %v4633_v39 = vadd.f32 %v4623_v37, %v4585_v25 }
 0x159   :  { %v4635_v40 = vpop.permute.xlu0 %475  ;;  %v4647_v43 = vpop.permute.xlu1 %482 }
 0x15a   :  { %533 = vperm.xlu0 %4235, %v4605_v31   ;;  %536 = vperm.xlu1 %4234, %v4609_v33   ;;  %v4641_v41 = vadd.f32 %v4635_v40, %v4591_v28  ;;  %v4645_v42 = vadd.f32 %v4635_v40, %v4585_v25  ;;  %v4653_v44 = vadd.f32 %v4647_v43, %v4591_v28 }
 0x15b   :  { %v4657_v45 = vadd.f32 %v4647_v43, %v4585_v25 }
 0x15e   :  { %521 = vperm.xlu0 %4235, %v4617_v35   ;;  %539 = vperm.xlu1 %4234, %v4621_v36  }
 0x162   :  { %542 = vperm.xlu1 %4234, %v4629_v38   ;;  %524 = vperm.xlu0 %4235, %v4633_v39  }
 0x166   :  { %545 = vperm.xlu1 %4234, %v4641_v41   ;;  %527 = vperm.xlu0 %4235, %v4645_v42  }
 0x16a   :  { %548 = vperm.xlu1 %4234, %v4653_v44   ;;  %530 = vperm.xlu0 %4235, %v4657_v45  }
 0x1d1   :  { %v516_v46 = vpop.permute.xlu0 %515  ;;  %v519_v47 = vpop.permute.xlu1 %518 }
 0x1d2   :  { %v553_v59 = vrot.slane %v516_v46, %v4663_v54  ;;  %v557_v62 = vrot.slane %v519_v47, %v4663_v54 }
 0x1d4   :  { %v599_v12 = vsel %vm598_vm4, %v557_v62, %v553_v59 }
 0x1d5   :  { %v534_v48 = vpop.permute.xlu0 %533  ;;  %v537_v50 = vpop.permute.xlu1 %536 }
 0x1d6   :  { %v577_v63 = vrot.slane %v534_v48, %v4663_v54  ;;  %v581_v0 = vrot.slane %v537_v50, %v4663_v54 }
 0x1d8   :  { %v608_v13 = vsel %vm598_vm4, %v581_v0, %v577_v63 }
 0x1d9   :  { %v522_v52 = vpop.permute.xlu0 %521  ;;  %v540_v53 = vpop.permute.xlu1 %539 }
 0x1da   :  { %v561_v2 = vrot.slane %v522_v52, %v4663_v54  ;;  %v585_v4 = vrot.slane %v540_v53, %v4663_v54 }
 0x1dc   :  { %v601_v14 = vsel %vm600_vm5, %v561_v2, %v599_v12  ;;  %v609_v15 = vsel %vm600_vm5, %v585_v4, %v608_v13 }
 0x1dd   :  { %v525_v55 = vpop.permute.xlu0 %524  ;;  %v543_v58 = vpop.permute.xlu1 %542 }
 0x1de   :  { %v565_v9 = vrot.slane %v525_v55, %v4663_v54  ;;  %v589_v8 = vrot.slane %v543_v58, %v4663_v54 }
 0x1e0   :  { %v603_v21 = vsel %vm602_vm6, %v565_v9, %v601_v14  ;;  %v610_v22 = vsel %vm602_vm6, %v589_v8, %v609_v15 }
 0x1e1   :  { %v528_v5 = vpop.permute.xlu0 %527  ;;  %v546_v7 = vpop.permute.xlu1 %545 }
 0x1e2   :  { %v569_v10 = vrot.slane %v528_v5, %v4663_v54  ;;  %v593_v11 = vrot.slane %v546_v7, %v4663_v54 }
 0x1e4   :  { %v605_v23 = vsel %vm604_vm7, %v569_v10, %v603_v21  ;;  %v611_v24 = vsel %vm604_vm7, %v593_v11, %v610_v22 }
 0x1e5   :  { %v531_v16 = vpop.permute.xlu0 %530  ;;  %v549_v17 = vpop.permute.xlu1 %548 }
 0x1e6   :  { %v573_v18 = vrot.slane %v531_v16, %v4663_v54  ;;  %v597_v19 = vrot.slane %v549_v17, %v4663_v54 }
 0x1e8   :  { %v607_v46 = vsel %vm606_vm8, %v573_v18, %v605_v23  ;;  %v612_v47 = vsel %vm606_vm8, %v597_v19, %v611_v24 }
 0x1e9   :  { %v615_v48 = vsel %vm251_vm2, %v607_v46, -inf  ;;  %v618_v50 = vsel %vm251_vm2, %v612_v47, -inf }
 0x1ea   :  { %616 = vmax.xlane.f32.xlu0 %v615_v48  ;;  %619 = vmax.xlane.f32.xlu1 %v618_v50 }
 0x273   :  { %v4689_v52 = vpop.xlane.xlu0 %616  ;;  %v4691_v53 = vpop.xlane.xlu1 %619 }
 0x274   :  { %v626_v55 = vrot.slane %v4689_v52, %v4534_v20  ;;  %v630_v58 = vrot.slane %v4689_v52, %v4545_v32  ;;  %v650_v63 = vrot.slane %v4691_v53, %v4534_v20  ;;  %v654_v0 = vrot.slane %v4691_v53, %v4545_v32 }
 0x275   :  { %v634_v2 = vrot.slane %v4689_v52, %v4563_v56  ;;  %v658_v7 = vrot.slane %v4691_v53, %v4563_v56  ;;  %v662_v11 = vrot.slane %v4691_v53, %v4566_v57  ;;  %v642_v14 = vrot.slane %v4689_v52, %v4571_v60 }
 0x276   :  { %v683_v59 = vsub.f32 %v4595_v29, %v626_v55  ;;  %v684_v62 = vsub.f32 %v4599_v30, %v630_v58  ;;  %v689_v9 = vsub.f32 %v4605_v31, %v650_v63  ;;  %v690_v29 = vsub.f32 %v4609_v33, %v654_v0  ;;  %v4118_v63 = vld [vmem:[%s6099_s3 + $0x2] sm:$0x3] }
 0x277   :  { %v638_v30 = vrot.slane %v4689_v52, %v4566_v57  ;;  %v685_v8 = vsub.f32 %v4617_v35, %v634_v2  ;;  %v691_v12 = vsub.f32 %v4621_v36, %v658_v7  ;;  %v666_v33 = vrot.slane %v4691_v53, %v4571_v60 }
 0x278   :  { %v695_v4 = vmul.f32 1.442695, %v683_v59  ;;  %v697_v5 = vmul.f32 1.442695, %v684_v62  ;;  %v707_v10 = vmul.f32 1.442695, %v689_v9  ;;  %v692_v16 = vsub.f32 %v4629_v38, %v662_v11 }
 0x279   :  { %v709_v13 = vmul.f32 1.442695, %v690_v29  ;;  %v686_v31 = vsub.f32 %v4633_v39, %v638_v30  ;;  %v699_v15 = vmul.f32 1.442695, %v685_v8  ;;  %v711_v35 = vmul.f32 1.442695, %v691_v12 }
 0x27a   :  { %4244 = vpow2.f32 %v695_v4  ;;  %v646_v17 = vrot.slane %v4689_v52, %v4574_v61  ;;  %v687_v36 = vsub.f32 %v4645_v42, %v642_v14  ;;  %v670_v19 = vrot.slane %v4691_v53, %v4574_v61 }
 0x27b   :  { %4246 = vpow2.f32 %v697_v5  ;;  %v701_v18 = vmul.f32 1.442695, %v686_v31  ;;  %v693_v39 = vsub.f32 %v4641_v41, %v666_v33  ;;  %v713_v21 = vmul.f32 1.442695, %v692_v16  ;;  %v4106_v5 = vld [vmem:[%s6099_s3 + $0x2] sm:$0x3] }
 0x27c   :  { %4248 = vpow2.f32 %v707_v10  ;;  %v688_v38 = vsub.f32 %v4657_v45, %v646_v17  ;;  %v703_v24 = vmul.f32 1.442695, %v687_v36  ;;  %v694_v46 = vsub.f32 %v4653_v44, %v670_v19 }
 0x27d   :  { %4250 = vpow2.f32 %v709_v13  ;;  %v715_v42 = vmul.f32 1.442695, %v693_v39  ;;  %v874_v4 = vsub.f32 1.0, %v4118_v63 }
 0x27e   :  { %4252 = vpow2.f32 %v699_v15  ;;  %v705_v47 = vmul.f32 1.442695, %v688_v38  ;;  %v717_v50 = vmul.f32 1.442695, %v694_v46 }
 0x27f   :  { %4254 = vpow2.f32 %v711_v35 }
 0x280   :  { %4256 = vpow2.f32 %v701_v18 }
 0x281   :  { %4258 = vpow2.f32 %v713_v21 }
 0x282   :  { %4260 = vpow2.f32 %v703_v24 }
 0x283   :  { %4262 = vpow2.f32 %v715_v42 }
 0x284   :  { %4264 = vpow2.f32 %v705_v47 }
 0x285   :  { %4266 = vpow2.f32 %v717_v50 }
 0x287   :  { %v4245_v22 = vpop.eup %4244 }
 0x288   :  { %v4247_v23 = vpop.eup %4246  ;;  %732 = vperm.xlu0 %4235, %v4245_v22  }
 0x289   :  { %735 = vperm.xlu1 %4234, %v4247_v23   ;;  %v4249_v48 = vpop.eup %4248 }
 0x28a   :  { %v4251_v41 = vpop.eup %4250 }
 0x28b   :  { %v4253_v55 = vpop.eup %4252 }
 0x28c   :  { %750 = vperm.xlu0 %4235, %v4249_v48   ;;  %v4255_v45 = vpop.eup %4254 }
 0x28d   :  { %753 = vperm.xlu1 %4234, %v4251_v41   ;;  %v4257_v58 = vpop.eup %4256 }
 0x28e   :  { %v4259_v59 = vpop.eup %4258 }
 0x28f   :  { %v4261_v44 = vpop.eup %4260 }
 0x290   :  { %738 = vperm.xlu0 %4235, %v4253_v55   ;;  %v4263_v62 = vpop.eup %4262 }
 0x291   :  { %756 = vperm.xlu1 %4234, %v4255_v45   ;;  %v4265_v0 = vpop.eup %4264 }
 0x292   :  { %v4267_v2 = vpop.eup %4266 }
 0x294   :  { %741 = vperm.xlu0 %4235, %v4257_v58  }
 0x295   :  { %759 = vperm.xlu1 %4234, %v4259_v59  }
 0x298   :  { %744 = vperm.xlu0 %4235, %v4261_v44  }
 0x299   :  { %762 = vperm.xlu1 %4234, %v4263_v62  }
 0x29c   :  { %747 = vperm.xlu0 %4235, %v4265_v0  }
 0x29d   :  { %765 = vperm.xlu1 %4234, %v4267_v2  }
 0x2a0   :  { %131 = vperm.xlu0 %4235, %v4106_v5  }
 0x2a1   :  { %877 = vperm.xlu1 %4234, %v874_v4  }
 0x2a4   :  { %860 = vperm.xlu0 %4235, %v4118_v63  }
 0x303   :  { %v733_v7 = vpop.permute.xlu0 %732 }
 0x304   :  { %v736_v9 = vpop.permute.xlu1 %735  ;;  %v770_v13 = vrot.slane %v733_v7, %v4663_v54 }
 0x305   :  { %v774_v14 = vrot.slane %v736_v9, %v4663_v54 }
 0x307   :  { %v751_v29 = vpop.permute.xlu0 %750  ;;  %v815_v39 = vsel %vm598_vm4, %v774_v14, %v770_v13 }
 0x308   :  { %v754_v30 = vpop.permute.xlu1 %753  ;;  %v794_v31 = vrot.slane %v751_v29, %v4663_v54 }
 0x309   :  { %v798_v15 = vrot.slane %v754_v30, %v4663_v54 }
 0x30b   :  { %v739_v8 = vpop.permute.xlu0 %738  ;;  %v820_v22 = vsel %vm598_vm4, %v798_v15, %v794_v31 }
 0x30c   :  { %v757_v10 = vpop.permute.xlu1 %756  ;;  %v778_v33 = vrot.slane %v739_v8, %v4663_v54 }
 0x30d   :  { %v802_v35 = vrot.slane %v757_v10, %v4663_v54 }
 0x30e   :  { %v816_v23 = vsel %vm600_vm5, %v778_v33, %v815_v39 }
 0x30f   :  { %v742_v11 = vpop.permute.xlu0 %741  ;;  %v821_v24 = vsel %vm600_vm5, %v802_v35, %v820_v22 }
 0x310   :  { %v760_v12 = vpop.permute.xlu1 %759  ;;  %v782_v17 = vrot.slane %v742_v11, %v4663_v54 }
 0x311   :  { %v806_v18 = vrot.slane %v760_v12, %v4663_v54 }
 0x312   :  { %v817_v47 = vsel %vm602_vm6, %v782_v17, %v816_v23 }
 0x313   :  { %v745_v16 = vpop.permute.xlu0 %744  ;;  %v822_v41 = vsel %vm602_vm6, %v806_v18, %v821_v24 }
 0x314   :  { %v763_v36 = vpop.permute.xlu1 %762  ;;  %v786_v19 = vrot.slane %v745_v16, %v4663_v54 }
 0x315   :  { %v810_v21 = vrot.slane %v763_v36, %v4663_v54 }
 0x316   :  { %v818_v50 = vsel %vm604_vm7, %v786_v19, %v817_v47 }
 0x317   :  { %v748_v38 = vpop.permute.xlu0 %747  ;;  %v823_v45 = vsel %vm604_vm7, %v810_v21, %v822_v41 }
 0x318   :  { %v790_v46 = vrot.slane %v748_v38, %v4663_v54  ;;  %v766_v42 = vpop.permute.xlu1 %765 }
 0x319   :  { %v814_v48 = vrot.slane %v766_v42, %v4663_v54 }
 0x31a   :  { %v819_v55 = vsel %vm606_vm8, %v790_v46, %v818_v50 }
 0x31b   :  { %v132_v58 = vpop.permute.xlu0 %131  ;;  %v827_v59 = vsel %vm251_vm2, %v819_v55, 0.0  ;;  %v824_v44 = vsel %vm606_vm8, %v814_v48, %v823_v45 }
 0x31c   :  { %v133_v62 = vrot.slane %v132_v58, 6  ;;  %828 = vadd.xlane.f32.xlu1 %v827_v59  ;;  %v830_v63 = vsel %vm251_vm2, %v824_v44, 0.0  ;;  %v878_v7 = vpop.permute.xlu1 %877 }
 0x31d   :  { %831 = vadd.xlane.f32.xlu0 %v830_v63  ;;  %v882_v13 = vrot.slane %v878_v7, %v4534_v20  ;;  %v886_v33 = vrot.slane %v878_v7, %v4545_v32 }
 0x31e   :  { %v135_v0 = vmul.f32 %v133_v62, %v4556_v51 }
 0x31f   :  { %v861_v9 = vpop.permute.xlu0 %860  ;;  %v889_v19 = vmul.f32 %v882_v13, %v4585_v25  ;;  %v890_v22 = vmul.f32 %v886_v33, %v4591_v28 }
 0x320   :  { %138 = vst.msk [vmem:[#allocation2] sm:$0xc] %vm137_vm9, %v135_v0  ;;  %v865_v16 = vrot.slane %v861_v9, %v4534_v20  ;;  %v869_v36 = vrot.slane %v861_v9, %v4545_v32 }
 0x327   :  { %v438_v2 = vld [vmem:[#allocation2 + $0x2] sm:$0x3] }
 0x328   :  { %v843_v4 = vrot.slane %v438_v2, %v4534_v20  ;;  %v850_v5 = vrot.slane %v438_v2, %v4545_v32 }
 0x32d   :  { %845 = vbcast.lane.b32.xlu1 %v843_v4, 256 }
 0x333   :  { %852 = vbcast.lane.b32.xlu0 %v850_v5, 256 }
 0x3a5   :  { %v829_v29 = vpop.xlane.xlu1 %828 }
 0x3a6   :  { %v832_v30 = vpop.xlane.xlu0 %831  ;;  %4268 = vlog2.f32 %v829_v29 }
 0x3a7   :  { %4270 = vlog2.f32 %v832_v30 }
 0x3a9   :  { %v846_v15 = vpop.permute.xlu1 %845 }
 0x3aa   :  { %v853_v35 = vpop.permute.xlu0 %852 }
 0x3b3   :  { %v4269_v8 = vpop.eup %4268 }
 0x3b4   :  { %v4271_v10 = vpop.eup %4270  ;;  %v834_v11 = vmul.f32 0.6931472, %v4269_v8 }
 0x3b5   :  { %v836_v12 = vmul.f32 0.6931472, %v4271_v10 }
 0x3b6   :  { %v837_v14 = vadd.f32 %v834_v11, %v4689_v52 }
 0x3b7   :  { %v838_v31 = vadd.f32 %v836_v12, %v4691_v53 }
 0x3b8   :  { %v856_v17 = vadd.f32 %v846_v15, %v837_v14 }
 0x3b9   :  { %v857_v18 = vadd.f32 %v853_v35, %v838_v31 }
 0x3ba   :  { %v872_v39 = vmul.f32 %v865_v16, %v856_v17 }
 0x3bb   :  { %v873_v21 = vmul.f32 %v869_v36, %v857_v18 }
 0x3bc   :  { %v4771_v23 = vadd.f32 %v889_v19, %v872_v39 }
 0x3bd   :  { %v4773_v52 = vadd.f32 %v890_v22, %v873_v21 }
 0x3be   :  { %v4777_v53 = vadd.f32 %v4771_v23, %v4589_v27  ;;  %v4781_v38 = vadd.f32 %v4771_v23, %v4587_v26  ;;  %v4801_v46 = vadd.f32 %v4771_v23, %v4611_v34  ;;  %v4811_v47 = vadd.f32 %v4771_v23, %v4623_v37 }
 0x3bf   :  { %v4787_v25 = vadd.f32 %v4773_v52, %v4589_v27  ;;  %v4791_v28 = vadd.f32 %v4773_v52, %v4587_v26  ;;  %v4797_v24 = vadd.f32 %v4773_v52, %v4611_v34  ;;  %v4807_v42 = vadd.f32 %v4773_v52, %v4623_v37 }
 0x3c0   :  { %1015 = vperm.xlu0 %4235, %v4777_v53   ;;  %1012 = vperm.xlu1 %4234, %v4781_v38   ;;  %v4817_v48 = vadd.f32 %v4773_v52, %v4635_v40  ;;  %v4821_v50 = vadd.f32 %v4771_v23, %v4635_v40  ;;  %v4827_v41 = vadd.f32 %v4773_v52, %v4647_v43 }
 0x3c1   :  { %v4831_v55 = vadd.f32 %v4771_v23, %v4647_v43 }
 0x3c4   :  { %1033 = vperm.xlu0 %4235, %v4787_v25   ;;  %1030 = vperm.xlu1 %4234, %v4791_v28  }
 0x3c8   :  { %1036 = vperm.xlu0 %4235, %v4797_v24   ;;  %1018 = vperm.xlu1 %4234, %v4801_v46  }
 0x3cc   :  { %1039 = vperm.xlu0 %4235, %v4807_v42   ;;  %1021 = vperm.xlu1 %4234, %v4811_v47  }
 0x3d0   :  { %1042 = vperm.xlu0 %4235, %v4817_v48   ;;  %1024 = vperm.xlu1 %4234, %v4821_v50  }
 0x3d4   :  { %1045 = vperm.xlu0 %4235, %v4827_v41   ;;  %1027 = vperm.xlu1 %4234, %v4831_v55  }
 0x43b   :  { %v1016_v45 = vpop.permute.xlu0 %1015  ;;  %v1013_v58 = vpop.permute.xlu1 %1012 }
 0x43c   :  { %v1054_v4 = vrot.slane %v1016_v45, %v4663_v54  ;;  %v1050_v5 = vrot.slane %v1013_v58, %v4663_v54 }
 0x43e   :  { %v1095_v31 = vsel %vm598_vm4, %v1054_v4, %v1050_v5 }
 0x43f   :  { %v1034_v59 = vpop.permute.xlu0 %1033  ;;  %v1031_v44 = vpop.permute.xlu1 %1030 }
 0x440   :  { %v1078_v7 = vrot.slane %v1034_v59, %v4663_v54  ;;  %v1074_v9 = vrot.slane %v1031_v44, %v4663_v54 }
 0x442   :  { %v1100_v15 = vsel %vm598_vm4, %v1078_v7, %v1074_v9 }
 0x443   :  { %v1037_v62 = vpop.permute.xlu0 %1036  ;;  %v1019_v63 = vpop.permute.xlu1 %1018 }
 0x444   :  { %v1082_v29 = vrot.slane %v1037_v62, %v4663_v54  ;;  %v1058_v30 = vrot.slane %v1019_v63, %v4663_v54 }
 0x446   :  { %v1101_v33 = vsel %vm600_vm5, %v1082_v29, %v1100_v15  ;;  %v1096_v16 = vsel %vm600_vm5, %v1058_v30, %v1095_v31 }
 0x447   :  { %v1040_v0 = vpop.permute.xlu0 %1039  ;;  %v1022_v2 = vpop.permute.xlu1 %1021 }
 0x448   :  { %v1086_v11 = vrot.slane %v1040_v0, %v4663_v54  ;;  %v1062_v12 = vrot.slane %v1022_v2, %v4663_v54 }
 0x44a   :  { %v1102_v19 = vsel %vm602_vm6, %v1086_v11, %v1101_v33  ;;  %v1097_v39 = vsel %vm602_vm6, %v1062_v12, %v1096_v16 }
 0x44b   :  { %v1043_v8 = vpop.permute.xlu0 %1042  ;;  %v1025_v10 = vpop.permute.xlu1 %1024 }
 0x44c   :  { %v1090_v13 = vrot.slane %v1043_v8, %v4663_v54  ;;  %v1066_v14 = vrot.slane %v1025_v10, %v4663_v54 }
 0x44e   :  { %v1103_v21 = vsel %vm604_vm7, %v1090_v13, %v1102_v19  ;;  %v1098_v22 = vsel %vm604_vm7, %v1066_v14, %v1097_v39 }
 0x44f   :  { %v1046_v35 = vpop.permute.xlu0 %1045  ;;  %v1028_v17 = vpop.permute.xlu1 %1027 }
 0x450   :  { %v1094_v36 = vrot.slane %v1046_v35, %v4663_v54  ;;  %v1070_v18 = vrot.slane %v1028_v17, %v4663_v54 }
 0x452   :  { %v1104_v45 = vsel %vm606_vm8, %v1094_v36, %v1103_v21  ;;  %v1099_v58 = vsel %vm606_vm8, %v1070_v18, %v1098_v22 }
 0x453   :  { %v1110_v59 = vsel %vm251_vm2, %v1104_v45, -inf  ;;  %v1107_v44 = vsel %vm251_vm2, %v1099_v58, -inf }
 0x454   :  { %1111 = vmax.xlane.f32.xlu0 %v1110_v59  ;;  %1108 = vmax.xlane.f32.xlu1 %v1107_v44 }
 0x4dd   :  { %v4859_v62 = vpop.xlane.xlu1 %1108  ;;  %v4861_v63 = vpop.xlane.xlu0 %1111 }
 0x4de   :  { %v1118_v0 = vrot.slane %v4859_v62, %v4534_v20  ;;  %v1122_v2 = vrot.slane %v4859_v62, %v4545_v32  ;;  %v1146_v4 = vrot.slane %v4861_v63, %v4545_v32  ;;  %v1142_v5 = vrot.slane %v4861_v63, %v4534_v20 }
 0x4df   :  { %v1150_v29 = vrot.slane %v4861_v63, %v4563_v56  ;;  %v1126_v11 = vrot.slane %v4859_v62, %v4563_v56  ;;  %v1154_v13 = vrot.slane %v4861_v63, %v4566_v57  ;;  %v1130_v31 = vrot.slane %v4859_v62, %v4566_v57 }
 0x4e0   :  { %v1175_v7 = vsub.f32 %v4781_v38, %v1118_v0  ;;  %v1176_v9 = vsub.f32 %v4777_v53, %v1122_v2  ;;  %v1182_v30 = vsub.f32 %v4787_v25, %v1146_v4  ;;  %v1181_v10 = vsub.f32 %v4791_v28, %v1142_v5 }
 0x4e1   :  { %v1183_v14 = vsub.f32 %v4797_v24, %v1150_v29  ;;  %v1177_v25 = vsub.f32 %v4801_v46, %v1126_v11  ;;  %v1158_v28 = vrot.slane %v4861_v63, %v4571_v60  ;;  %v1184_v15 = vsub.f32 %v4807_v42, %v1154_v13  ;;  %v4123_v29 = vld [vmem:[%s6099_s3 + $0x4] sm:$0x3] }
 0x4e2   :  { %v1187_v8 = vmul.f32 1.442695, %v1175_v7  ;;  %v1189_v12 = vmul.f32 1.442695, %v1176_v9  ;;  %v1201_v38 = vmul.f32 1.442695, %v1182_v30  ;;  %v1134_v24 = vrot.slane %v4859_v62, %v4571_v60 }
 0x4e3   :  { %v1199_v53 = vmul.f32 1.442695, %v1181_v10  ;;  %v1203_v33 = vmul.f32 1.442695, %v1183_v14  ;;  %v1178_v16 = vsub.f32 %v4811_v47, %v1130_v31  ;;  %v1191_v35 = vmul.f32 1.442695, %v1177_v25 }
 0x4e4   :  { %4272 = vpow2.f32 %v1187_v8  ;;  %v1162_v17 = vrot.slane %v4861_v63, %v4574_v61  ;;  %v1185_v46 = vsub.f32 %v4817_v48, %v1158_v28  ;;  %v1205_v36 = vmul.f32 1.442695, %v1184_v15  ;;  %v4107_v30 = vld [vmem:[%s6099_s3 + $0x4] sm:$0x3] }
 0x4e5   :  { %4274 = vpow2.f32 %v1189_v12  ;;  %v1138_v18 = vrot.slane %v4859_v62, %v4574_v61  ;;  %v1179_v42 = vsub.f32 %v4821_v50, %v1134_v24  ;;  %v1193_v19 = vmul.f32 1.442695, %v1178_v16 }
 0x4e6   :  { %4276 = vpow2.f32 %v1201_v38  ;;  %v1186_v39 = vsub.f32 %v4827_v41, %v1162_v17  ;;  %v1207_v21 = vmul.f32 1.442695, %v1185_v46  ;;  %v1366_v8 = vsub.f32 1.0, %v4123_v29 }
 0x4e7   :  { %4278 = vpow2.f32 %v1199_v53  ;;  %v1180_v22 = vsub.f32 %v4831_v55, %v1138_v18  ;;  %v1195_v45 = vmul.f32 1.442695, %v1179_v42 }
 0x4e8   :  { %4280 = vpow2.f32 %v1203_v33  ;;  %v1209_v48 = vmul.f32 1.442695, %v1186_v39 }
 0x4e9   :  { %4282 = vpow2.f32 %v1191_v35  ;;  %v1197_v44 = vmul.f32 1.442695, %v1180_v22 }
 0x4ea   :  { %4284 = vpow2.f32 %v1205_v36 }
 0x4eb   :  { %4286 = vpow2.f32 %v1193_v19 }
 0x4ec   :  { %4288 = vpow2.f32 %v1207_v21 }
 0x4ed   :  { %4290 = vpow2.f32 %v1195_v45 }
 0x4ee   :  { %4292 = vpow2.f32 %v1209_v48 }
 0x4ef   :  { %4294 = vpow2.f32 %v1197_v44 }
 0x4f1   :  { %v4273_v47 = vpop.eup %4272 }
 0x4f2   :  { %v4275_v58 = vpop.eup %4274  ;;  %1224 = vperm.xlu0 %4235, %v4273_v47  }
 0x4f3   :  { %1227 = vperm.xlu1 %4234, %v4275_v58   ;;  %v4277_v59 = vpop.eup %4276 }
 0x4f4   :  { %v4279_v50 = vpop.eup %4278 }
 0x4f5   :  { %v4281_v41 = vpop.eup %4280 }
 0x4f6   :  { %1245 = vperm.xlu0 %4235, %v4277_v59   ;;  %v4283_v0 = vpop.eup %4282 }
 0x4f7   :  { %1242 = vperm.xlu1 %4234, %v4279_v50   ;;  %v4285_v55 = vpop.eup %4284 }
 0x4f8   :  { %v4287_v2 = vpop.eup %4286 }
 0x4f9   :  { %v4289_v4 = vpop.eup %4288 }
 0x4fa   :  { %1248 = vperm.xlu0 %4235, %v4281_v41   ;;  %v4291_v5 = vpop.eup %4290 }
 0x4fb   :  { %1230 = vperm.xlu1 %4234, %v4283_v0   ;;  %v4293_v7 = vpop.eup %4292 }
 0x4fc   :  { %v4295_v9 = vpop.eup %4294 }
 0x4fe   :  { %1251 = vperm.xlu0 %4235, %v4285_v55  }
 0x4ff   :  { %1233 = vperm.xlu1 %4234, %v4287_v2  }
 0x502   :  { %1254 = vperm.xlu0 %4235, %v4289_v4  }
 0x503   :  { %1236 = vperm.xlu1 %4234, %v4291_v5  }
 0x506   :  { %1257 = vperm.xlu0 %4235, %v4293_v7  }
 0x507   :  { %1239 = vperm.xlu1 %4234, %v4295_v9  }
 0x50a   :  { %1352 = vperm.xlu0 %4235, %v4123_v29  }
 0x50b   :  { %143 = vperm.xlu1 %4234, %v4107_v30  }
 0x50f   :  { %1369 = vperm.xlu1 %4234, %v1366_v8  }
 0x56d   :  { %v1225_v10 = vpop.permute.xlu0 %1224 }
 0x56e   :  { %v1228_v11 = vpop.permute.xlu1 %1227  ;;  %v1262_v33 = vrot.slane %v1225_v10, %v4663_v54 }
 0x56f   :  { %v1266_v15 = vrot.slane %v1228_v11, %v4663_v54 }
 0x571   :  { %v1246_v12 = vpop.permute.xlu0 %1245  ;;  %v1307_v39 = vsel %vm598_vm4, %v1266_v15, %v1262_v33 }
 0x572   :  { %v1243_v13 = vpop.permute.xlu1 %1242  ;;  %v1290_v28 = vrot.slane %v1246_v12, %v4663_v54 }
 0x573   :  { %v1286_v25 = vrot.slane %v1243_v13, %v4663_v54 }
 0x575   :  { %v1249_v14 = vpop.permute.xlu0 %1248  ;;  %v1312_v42 = vsel %vm598_vm4, %v1290_v28, %v1286_v25 }
 0x576   :  { %v1231_v38 = vpop.permute.xlu1 %1230  ;;  %v1294_v24 = vrot.slane %v1249_v14, %v4663_v54 }
 0x577   :  { %v1270_v35 = vrot.slane %v1231_v38, %v4663_v54 }
 0x578   :  { %v1313_v21 = vsel %vm600_vm5, %v1294_v24, %v1312_v42 }
 0x579   :  { %v1252_v53 = vpop.permute.xlu0 %1251  ;;  %v1308_v22 = vsel %vm600_vm5, %v1270_v35, %v1307_v39 }
 0x57a   :  { %v1234_v31 = vpop.permute.xlu1 %1233  ;;  %v1298_v17 = vrot.slane %v1252_v53, %v4663_v54 }
 0x57b   :  { %v1274_v36 = vrot.slane %v1234_v31, %v4663_v54 }
 0x57c   :  { %v1314_v48 = vsel %vm602_vm6, %v1298_v17, %v1313_v21 }
 0x57d   :  { %v1255_v16 = vpop.permute.xlu0 %1254  ;;  %v1309_v44 = vsel %vm602_vm6, %v1274_v36, %v1308_v22 }
 0x57e   :  { %v1237_v46 = vpop.permute.xlu1 %1236  ;;  %v1302_v18 = vrot.slane %v1255_v16, %v4663_v54 }
 0x57f   :  { %v1278_v19 = vrot.slane %v1237_v46, %v4663_v54 }
 0x580   :  { %v1315_v50 = vsel %vm604_vm7, %v1302_v18, %v1314_v48 }
 0x581   :  { %v1258_v47 = vpop.permute.xlu0 %1257  ;;  %v1310_v41 = vsel %vm604_vm7, %v1278_v19, %v1309_v44 }
 0x582   :  { %v1240_v45 = vpop.permute.xlu1 %1239  ;;  %v1306_v58 = vrot.slane %v1258_v47, %v4663_v54 }
 0x583   :  { %v1282_v59 = vrot.slane %v1240_v45, %v4663_v54 }
 0x584   :  { %v1316_v0 = vsel %vm606_vm8, %v1306_v58, %v1315_v50 }
 0x585   :  { %v1311_v55 = vsel %vm606_vm8, %v1282_v59, %v1310_v41  ;;  %v1322_v2 = vsel %vm251_vm2, %v1316_v0, 0.0  ;;  %v1353_v11 = vpop.permute.xlu0 %1352 }
 0x586   :  { %v144_v4 = vpop.permute.xlu1 %143  ;;  %v1319_v5 = vsel %vm251_vm2, %v1311_v55, 0.0  ;;  %1323 = vadd.xlane.f32.xlu1 %v1322_v2  ;;  %v1357_v35 = vrot.slane %v1353_v11, %v4534_v20  ;;  %v1361_v17 = vrot.slane %v1353_v11, %v4545_v32 }
 0x587   :  { %v145_v7 = vrot.slane %v144_v4, 4  ;;  %1320 = vadd.xlane.f32.xlu0 %v1319_v5 }
 0x589   :  { %v147_v9 = vmul.f32 %v145_v7, %v4556_v51 }
 0x58a   :  { %v1370_v10 = vpop.permute.xlu1 %1369 }
 0x58b   :  { %150 = vst.msk [vmem:[#allocation2] sm:$0x30] %vm149_vm10, %v147_v9  ;;  %v1374_v28 = vrot.slane %v1370_v10, %v4534_v20  ;;  %v1378_v46 = vrot.slane %v1370_v10, %v4545_v32 }
 0x58d   :  { %v1381_v18 = vmul.f32 %v1374_v28, %v4771_v23 }
 0x592   :  { %v983_v29 = vld [vmem:[#allocation2 + $0x4] sm:$0x3] }
 0x593   :  { %v1342_v30 = vrot.slane %v983_v29, %v4545_v32  ;;  %v1335_v8 = vrot.slane %v983_v29, %v4534_v20 }
 0x597   :  { %1344 = vbcast.lane.b32.xlu1 %v1342_v30, 256 }
 0x59d   :  { %1337 = vbcast.lane.b32.xlu0 %v1335_v8, 256 }
 0x60f   :  { %v1324_v12 = vpop.xlane.xlu1 %1323 }
 0x610   :  { %4296 = vlog2.f32 %v1324_v12  ;;  %v1321_v13 = vpop.xlane.xlu0 %1320 }
 0x611   :  { %4298 = vlog2.f32 %v1321_v13 }
 0x613   :  { %v1345_v15 = vpop.permute.xlu1 %1344 }
 0x614   :  { %v1338_v16 = vpop.permute.xlu0 %1337 }
 0x61d   :  { %v4297_v14 = vpop.eup %4296 }
 0x61e   :  { %v4299_v38 = vpop.eup %4298  ;;  %v1328_v53 = vmul.f32 0.6931472, %v4297_v14 }
 0x61f   :  { %v1326_v31 = vmul.f32 0.6931472, %v4299_v38 }
 0x620   :  { %v1330_v25 = vadd.f32 %v1328_v53, %v4861_v63  ;;  %v1382_v63 = vmul.f32 %v1378_v46, %v4773_v52 }
 0x621   :  { %v1329_v33 = vadd.f32 %v1326_v31, %v4859_v62 }
 0x622   :  { %v1349_v24 = vadd.f32 %v1345_v15, %v1330_v25 }
 0x623   :  { %v1348_v36 = vadd.f32 %v1338_v16, %v1329_v33 }
 0x624   :  { %v1365_v42 = vmul.f32 %v1361_v17, %v1349_v24 }
 0x625   :  { %v1364_v19 = vmul.f32 %v1357_v35, %v1348_v36 }
 0x626   :  { %v4943_v21 = vadd.f32 %v1382_v63, %v1365_v42 }
 0x627   :  { %v4941_v39 = vadd.f32 %v1381_v18, %v1364_v19 }
 0x628   :  { %v4957_v23 = vadd.f32 %v4943_v21, %v4589_v27  ;;  %v4961_v52 = vadd.f32 %v4943_v21, %v4587_v26  ;;  %v4967_v22 = vadd.f32 %v4943_v21, %v4611_v34  ;;  %v4977_v58 = vadd.f32 %v4943_v21, %v4623_v37 }
 0x629   :  { %v4947_v62 = vadd.f32 %v4941_v39, %v4589_v27  ;;  %v4951_v47 = vadd.f32 %v4941_v39, %v4587_v26  ;;  %v4971_v45 = vadd.f32 %v4941_v39, %v4611_v34  ;;  %v4981_v48 = vadd.f32 %v4941_v39, %v4623_v37 }
 0x62a   :  { %v4987_v59 = vadd.f32 %v4943_v21, %v4635_v40  ;;  %v4991_v44 = vadd.f32 %v4941_v39, %v4635_v40  ;;  %v4997_v50 = vadd.f32 %v4943_v21, %v4647_v43  ;;  %v5001_v41 = vadd.f32 %v4941_v39, %v4647_v43 }
 0x62b   :  { %1507 = vperm.xlu1 %4234, %v4947_v62   ;;  %1504 = vperm.xlu0 %4235, %v4951_v47  }
 0x62f   :  { %1525 = vperm.xlu1 %4234, %v4957_v23   ;;  %1522 = vperm.xlu0 %4235, %v4961_v52  }
 0x633   :  { %1528 = vperm.xlu1 %4234, %v4967_v22   ;;  %1510 = vperm.xlu0 %4235, %v4971_v45  }
 0x637   :  { %1531 = vperm.xlu1 %4234, %v4977_v58   ;;  %1513 = vperm.xlu0 %4235, %v4981_v48  }
 0x63b   :  { %1534 = vperm.xlu1 %4234, %v4987_v59   ;;  %1516 = vperm.xlu0 %4235, %v4991_v44  }
 0x63f   :  { %1537 = vperm.xlu1 %4234, %v4997_v50   ;;  %1519 = vperm.xlu0 %4235, %v5001_v41  }
 0x6a6   :  { %v1508_v0 = vpop.permute.xlu1 %1507  ;;  %v1505_v55 = vpop.permute.xlu0 %1504 }
 0x6a7   :  { %v1546_v30 = vrot.slane %v1508_v0, %v4663_v54  ;;  %v1542_v8 = vrot.slane %v1505_v55, %v4663_v54 }
 0x6a9   :  { %v1587_v15 = vsel %vm598_vm4, %v1546_v30, %v1542_v8 }
 0x6aa   :  { %v1526_v2 = vpop.permute.xlu1 %1525  ;;  %v1523_v4 = vpop.permute.xlu0 %1522 }
 0x6ab   :  { %v1570_v10 = vrot.slane %v1526_v2, %v4663_v54  ;;  %v1566_v11 = vrot.slane %v1523_v4, %v4663_v54 }
 0x6ad   :  { %v1592_v33 = vsel %vm598_vm4, %v1570_v10, %v1566_v11 }
 0x6ae   :  { %v1529_v5 = vpop.permute.xlu1 %1528  ;;  %v1511_v7 = vpop.permute.xlu0 %1510 }
 0x6af   :  { %v1574_v12 = vrot.slane %v1529_v5, %v4663_v54  ;;  %v1550_v13 = vrot.slane %v1511_v7, %v4663_v54 }
 0x6b1   :  { %v1593_v24 = vsel %vm600_vm5, %v1574_v12, %v1592_v33  ;;  %v1588_v16 = vsel %vm600_vm5, %v1550_v13, %v1587_v15 }
 0x6b2   :  { %v1532_v9 = vpop.permute.xlu1 %1531  ;;  %v1514_v29 = vpop.permute.xlu0 %1513 }
 0x6b3   :  { %v1578_v53 = vrot.slane %v1532_v9, %v4663_v54  ;;  %v1554_v31 = vrot.slane %v1514_v29, %v4663_v54 }
 0x6b5   :  { %v1594_v18 = vsel %vm602_vm6, %v1578_v53, %v1593_v24  ;;  %v1589_v42 = vsel %vm602_vm6, %v1554_v31, %v1588_v16 }
 0x6b6   :  { %v1535_v14 = vpop.permute.xlu1 %1534  ;;  %v1517_v38 = vpop.permute.xlu0 %1516 }
 0x6b7   :  { %v1582_v25 = vrot.slane %v1535_v14, %v4663_v54  ;;  %v1558_v28 = vrot.slane %v1517_v38, %v4663_v54 }
 0x6b9   :  { %v1595_v19 = vsel %vm604_vm7, %v1582_v25, %v1594_v18  ;;  %v1590_v63 = vsel %vm604_vm7, %v1558_v28, %v1589_v42 }
 0x6ba   :  { %v1538_v35 = vpop.permute.xlu1 %1537  ;;  %v1520_v17 = vpop.permute.xlu0 %1519 }
 0x6bb   :  { %v1586_v46 = vrot.slane %v1538_v35, %v4663_v54  ;;  %v1562_v36 = vrot.slane %v1520_v17, %v4663_v54 }
 0x6bd   :  { %v1596_v0 = vsel %vm606_vm8, %v1586_v46, %v1595_v19  ;;  %v1591_v55 = vsel %vm606_vm8, %v1562_v36, %v1590_v63 }
 0x6be   :  { %v1602_v2 = vsel %vm251_vm2, %v1596_v0, -inf  ;;  %v1599_v4 = vsel %vm251_vm2, %v1591_v55, -inf }
 0x6bf   :  { %1603 = vmax.xlane.f32.xlu1 %v1602_v2  ;;  %1600 = vmax.xlane.f32.xlu0 %v1599_v4 }
 0x748   :  { %v5029_v5 = vpop.xlane.xlu0 %1600  ;;  %v5031_v7 = vpop.xlane.xlu1 %1603 }
 0x749   :  { %v1610_v9 = vrot.slane %v5029_v5, %v4534_v20  ;;  %v1614_v29 = vrot.slane %v5029_v5, %v4545_v32  ;;  %v1634_v30 = vrot.slane %v5031_v7, %v4534_v20  ;;  %v1638_v8 = vrot.slane %v5031_v7, %v4545_v32 }
 0x74a   :  { %v1618_v13 = vrot.slane %v5029_v5, %v4563_v56  ;;  %v1642_v38 = vrot.slane %v5031_v7, %v4563_v56  ;;  %v1622_v28 = vrot.slane %v5029_v5, %v4566_v57  ;;  %v1626_v33 = vrot.slane %v5029_v5, %v4571_v60 }
 0x74b   :  { %v1667_v10 = vsub.f32 %v4951_v47, %v1610_v9  ;;  %v1668_v11 = vsub.f32 %v4947_v62, %v1614_v29  ;;  %v1673_v12 = vsub.f32 %v4961_v52, %v1634_v30  ;;  %v1674_v53 = vsub.f32 %v4957_v23, %v1638_v8 }
 0x74c   :  { %v1669_v47 = vsub.f32 %v4971_v45, %v1618_v13  ;;  %v1646_v62 = vrot.slane %v5031_v7, %v4566_v57  ;;  %v1675_v52 = vsub.f32 %v4967_v22, %v1642_v38  ;;  %v1670_v23 = vsub.f32 %v4981_v48, %v1622_v28 }
 0x74d   :  { %v1679_v14 = vmul.f32 1.442695, %v1667_v10  ;;  %v1681_v31 = vmul.f32 1.442695, %v1668_v11  ;;  %v1691_v25 = vmul.f32 1.442695, %v1673_v12  ;;  %v1650_v16 = vrot.slane %v5031_v7, %v4571_v60 }
 0x74e   :  { %v1693_v15 = vmul.f32 1.442695, %v1674_v53  ;;  %v1683_v24 = vmul.f32 1.442695, %v1669_v47  ;;  %v1676_v45 = vsub.f32 %v4977_v58, %v1646_v62  ;;  %v1695_v35 = vmul.f32 1.442695, %v1675_v52 }
 0x74f   :  { %4300 = vpow2.f32 %v1679_v14  ;;  %v1630_v17 = vrot.slane %v5029_v5, %v4574_v61  ;;  %v1671_v22 = vsub.f32 %v4991_v44, %v1626_v33  ;;  %v1685_v46 = vmul.f32 1.442695, %v1670_v23  ;;  %v4128_v10 = vld [vmem:[%s6099_s3 + $0x6] sm:$0x3] }
 0x750   :  { %4302 = vpow2.f32 %v1681_v31  ;;  %v1654_v36 = vrot.slane %v5031_v7, %v4574_v61  ;;  %v1677_v48 = vsub.f32 %v4987_v59, %v1650_v16  ;;  %v1697_v18 = vmul.f32 1.442695, %v1676_v45  ;;  %v4108_v14 = vld [vmem:[%s6099_s3 + $0x6] sm:$0x3] }
 0x751   :  { %4304 = vpow2.f32 %v1691_v25  ;;  %v1672_v42 = vsub.f32 %v5001_v41, %v1630_v17  ;;  %v1687_v58 = vmul.f32 1.442695, %v1671_v22  ;;  %v1858_v13 = vsub.f32 1.0, %v4128_v10 }
 0x752   :  { %4306 = vpow2.f32 %v1693_v15  ;;  %v1678_v63 = vsub.f32 %v4997_v50, %v1654_v36  ;;  %v1699_v0 = vmul.f32 1.442695, %v1677_v48 }
 0x753   :  { %4308 = vpow2.f32 %v1683_v24  ;;  %v1689_v44 = vmul.f32 1.442695, %v1672_v42 }
 0x754   :  { %4310 = vpow2.f32 %v1695_v35  ;;  %v1701_v4 = vmul.f32 1.442695, %v1678_v63 }
 0x755   :  { %4312 = vpow2.f32 %v1685_v46 }
 0x756   :  { %4314 = vpow2.f32 %v1697_v18 }
 0x757   :  { %4316 = vpow2.f32 %v1687_v58 }
 0x758   :  { %4318 = vpow2.f32 %v1699_v0 }
 0x759   :  { %4320 = vpow2.f32 %v1689_v44 }
 0x75a   :  { %4322 = vpow2.f32 %v1701_v4 }
 0x75c   :  { %v4301_v19 = vpop.eup %4300 }
 0x75d   :  { %v4303_v55 = vpop.eup %4302  ;;  %1716 = vperm.xlu0 %4235, %v4301_v19  }
 0x75e   :  { %1719 = vperm.xlu1 %4234, %v4303_v55   ;;  %v4305_v2 = vpop.eup %4304 }
 0x75f   :  { %v4307_v59 = vpop.eup %4306 }
 0x760   :  { %v4309_v41 = vpop.eup %4308 }
 0x761   :  { %1734 = vperm.xlu0 %4235, %v4305_v2   ;;  %v4311_v9 = vpop.eup %4310 }
 0x762   :  { %1737 = vperm.xlu1 %4234, %v4307_v59   ;;  %v4313_v50 = vpop.eup %4312 }
 0x763   :  { %v4315_v29 = vpop.eup %4314 }
 0x764   :  { %v4317_v30 = vpop.eup %4316 }
 0x765   :  { %1722 = vperm.xlu0 %4235, %v4309_v41   ;;  %v4319_v8 = vpop.eup %4318 }
 0x766   :  { %1740 = vperm.xlu1 %4234, %v4311_v9   ;;  %v4321_v11 = vpop.eup %4320 }
 0x767   :  { %v4323_v12 = vpop.eup %4322 }
 0x769   :  { %1725 = vperm.xlu0 %4235, %v4313_v50  }
 0x76a   :  { %1743 = vperm.xlu1 %4234, %v4315_v29  }
 0x76d   :  { %1728 = vperm.xlu0 %4235, %v4317_v30  }
 0x76e   :  { %1746 = vperm.xlu1 %4234, %v4319_v8  }
 0x771   :  { %1731 = vperm.xlu0 %4235, %v4321_v11  }
 0x772   :  { %1749 = vperm.xlu1 %4234, %v4323_v12  }
 0x775   :  { %155 = vperm.xlu0 %4235, %v4108_v14  }
 0x776   :  { %1861 = vperm.xlu1 %4234, %v1858_v13  }
 0x779   :  { %1844 = vperm.xlu0 %4235, %v4128_v10  }
 0x7d8   :  { %v1717_v38 = vpop.permute.xlu0 %1716 }
 0x7d9   :  { %v1720_v53 = vpop.permute.xlu1 %1719  ;;  %v1754_v33 = vrot.slane %v1717_v38, %v4663_v54 }
 0x7da   :  { %v1758_v15 = vrot.slane %v1720_v53, %v4663_v54 }
 0x7dc   :  { %v1735_v31 = vpop.permute.xlu0 %1734  ;;  %v1799_v48 = vsel %vm598_vm4, %v1758_v15, %v1754_v33 }
 0x7dd   :  { %v1738_v25 = vpop.permute.xlu1 %1737  ;;  %v1778_v24 = vrot.slane %v1735_v31, %v4663_v54 }
 0x7de   :  { %v1782_v23 = vrot.slane %v1738_v25, %v4663_v54 }
 0x7e0   :  { %v1723_v28 = vpop.permute.xlu0 %1722  ;;  %v1804_v42 = vsel %vm598_vm4, %v1782_v23, %v1778_v24 }
 0x7e1   :  { %v1741_v47 = vpop.permute.xlu1 %1740  ;;  %v1762_v16 = vrot.slane %v1723_v28, %v4663_v54 }
 0x7e2   :  { %v1786_v35 = vrot.slane %v1741_v47, %v4663_v54 }
 0x7e3   :  { %v1800_v58 = vsel %vm600_vm5, %v1762_v16, %v1799_v48 }
 0x7e4   :  { %v1726_v62 = vpop.permute.xlu0 %1725  ;;  %v1805_v63 = vsel %vm600_vm5, %v1786_v35, %v1804_v42 }
 0x7e5   :  { %v1744_v52 = vpop.permute.xlu1 %1743  ;;  %v1766_v17 = vrot.slane %v1726_v62, %v4663_v54 }
 0x7e6   :  { %v1790_v46 = vrot.slane %v1744_v52, %v4663_v54 }
 0x7e7   :  { %v1801_v0 = vsel %vm602_vm6, %v1766_v17, %v1800_v58 }
 0x7e8   :  { %v1729_v45 = vpop.permute.xlu0 %1728  ;;  %v1806_v2 = vsel %vm602_vm6, %v1790_v46, %v1805_v63 }
 0x7e9   :  { %v1747_v22 = vpop.permute.xlu1 %1746  ;;  %v1770_v36 = vrot.slane %v1729_v45, %v4663_v54 }
 0x7ea   :  { %v1794_v18 = vrot.slane %v1747_v22, %v4663_v54 }
 0x7eb   :  { %v1802_v59 = vsel %vm604_vm7, %v1770_v36, %v1801_v0 }
 0x7ec   :  { %v1732_v19 = vpop.permute.xlu0 %1731  ;;  %v1807_v41 = vsel %vm604_vm7, %v1794_v18, %v1806_v2 }
 0x7ed   :  { %v1750_v55 = vpop.permute.xlu1 %1749  ;;  %v1774_v44 = vrot.slane %v1732_v19, %v4663_v54 }
 0x7ee   :  { %v1798_v4 = vrot.slane %v1750_v55, %v4663_v54 }
 0x7ef   :  { %v1803_v9 = vsel %vm606_vm8, %v1774_v44, %v1802_v59 }
 0x7f0   :  { %v156_v50 = vpop.permute.xlu0 %155  ;;  %v1808_v29 = vsel %vm606_vm8, %v1798_v4, %v1807_v41  ;;  %v1811_v30 = vsel %vm251_vm2, %v1803_v9, 0.0 }
 0x7f1   :  { %v157_v8 = vrot.slane %v156_v50, 2  ;;  %v1814_v10 = vsel %vm251_vm2, %v1808_v29, 0.0  ;;  %1812 = vadd.xlane.f32.xlu1 %v1811_v30  ;;  %v1862_v38 = vpop.permute.xlu1 %1861 }
 0x7f2   :  { %1815 = vadd.xlane.f32.xlu0 %v1814_v10  ;;  %v1870_v24 = vrot.slane %v1862_v38, %v4545_v32 }
 0x7f3   :  { %v159_v11 = vmul.f32 %v157_v8, %v4556_v51  ;;  %v1866_v51 = vrot.slane %v1862_v38, %v4534_v20 }
 0x7f4   :  { %v1845_v53 = vpop.permute.xlu0 %1844  ;;  %v1874_v18 = vmul.f32 %v1870_v24, %v4943_v21 }
 0x7f5   :  { %162 = vst.msk [vmem:[#allocation2] sm:$0xc0] %vm161_vm11, %v159_v11  ;;  %v1849_v16 = vrot.slane %v1845_v53, %v4534_v20  ;;  %v1853_v17 = vrot.slane %v1845_v53, %v4545_v32  ;;  %v1873_v46 = vmul.f32 %v1866_v51, %v4941_v39 }
 0x7fc   :  { %v1475_v12 = vld [vmem:[#allocation2 + $0x6] sm:$0x3] }
 0x7fd   :  { %v1827_v13 = vrot.slane %v1475_v12, %v4534_v20  ;;  %v1834_v14 = vrot.slane %v1475_v12, %v4545_v32 }
 0x802   :  { %1829 = vbcast.lane.b32.xlu1 %v1827_v13, 256 }
 0x808   :  { %1836 = vbcast.lane.b32.xlu0 %v1834_v14, 256 }
 0x87a   :  { %v1813_v31 = vpop.xlane.xlu1 %1812 }
 0x87b   :  { %4324 = vlog2.f32 %v1813_v31  ;;  %v1816_v25 = vpop.xlane.xlu0 %1815 }
 0x87c   :  { %4326 = vlog2.f32 %v1816_v25 }
 0x87e   :  { %v1830_v33 = vpop.permute.xlu1 %1829 }
 0x87f   :  { %v1837_v35 = vpop.permute.xlu0 %1836 }
 0x888   :  { %v4325_v28 = vpop.eup %4324 }
 0x889   :  { %v4327_v47 = vpop.eup %4326  ;;  %v1818_v62 = vmul.f32 0.6931472, %v4325_v28 }
 0x88a   :  { %v1820_v52 = vmul.f32 0.6931472, %v4327_v47 }
 0x88b   :  { %v1821_v15 = vadd.f32 %v1818_v62, %v5029_v5 }
 0x88c   :  { %v1822_v23 = vadd.f32 %v1820_v52, %v5031_v7 }
 0x88d   :  { %v1840_v45 = vadd.f32 %v1830_v33, %v1821_v15 }
 0x88e   :  { %v1841_v22 = vadd.f32 %v1837_v35, %v1822_v23 }
 0x88f   :  { %v1856_v36 = vmul.f32 %v1849_v16, %v1840_v45 }
 0x890   :  { %v1857_v48 = vmul.f32 %v1853_v17, %v1841_v22 }
 0x891   :  { %v5111_v42 = vadd.f32 %v1873_v46, %v1856_v36 }
 0x892   :  { %v5113_v5 = vadd.f32 %v1874_v18, %v1857_v48 }
 0x893   :  { %v5117_v7 = vadd.f32 %v5111_v42, %v4589_v27  ;;  %v5121_v58 = vadd.f32 %v5111_v42, %v4587_v26  ;;  %v5141_v63 = vadd.f32 %v5111_v42, %v4611_v34  ;;  %v5151_v55 = vadd.f32 %v5111_v42, %v4623_v37 }
 0x894   :  { %v5127_v39 = vadd.f32 %v5113_v5, %v4589_v27  ;;  %v5131_v21 = vadd.f32 %v5113_v5, %v4587_v26  ;;  %v5137_v19 = vadd.f32 %v5113_v5, %v4611_v34  ;;  %v5147_v0 = vadd.f32 %v5113_v5, %v4623_v37 }
 0x895   :  { %1999 = vperm.xlu0 %4235, %v5117_v7   ;;  %1996 = vperm.xlu1 %4234, %v5121_v58   ;;  %v5157_v44 = vadd.f32 %v5113_v5, %v4635_v40  ;;  %v5161_v2 = vadd.f32 %v5111_v42, %v4635_v40  ;;  %v5167_v4 = vadd.f32 %v5113_v5, %v4647_v43 }
 0x896   :  { %v5171_v59 = vadd.f32 %v5111_v42, %v4647_v43 }
 0x899   :  { %2017 = vperm.xlu0 %4235, %v5127_v39   ;;  %2014 = vperm.xlu1 %4234, %v5131_v21  }
 0x89d   :  { %2020 = vperm.xlu0 %4235, %v5137_v19   ;;  %2002 = vperm.xlu1 %4234, %v5141_v63  }
 0x8a1   :  { %2023 = vperm.xlu0 %4235, %v5147_v0   ;;  %2005 = vperm.xlu1 %4234, %v5151_v55  }
 0x8a5   :  { %2026 = vperm.xlu0 %4235, %v5157_v44   ;;  %2008 = vperm.xlu1 %4234, %v5161_v2  }
 0x8a9   :  { %2029 = vperm.xlu0 %4235, %v5167_v4   ;;  %2011 = vperm.xlu1 %4234, %v5171_v59  }
 0x910   :  { %v1997_v41 = vpop.permute.xlu1 %1996  ;;  %v2000_v9 = vpop.permute.xlu0 %1999 }
 0x911   :  { %v2034_v12 = vrot.slane %v1997_v41, %v4663_v54  ;;  %v2038_v13 = vrot.slane %v2000_v9, %v4663_v54 }
 0x913   :  { %v2079_v15 = vsel %vm598_vm4, %v2038_v13, %v2034_v12 }
 0x914   :  { %v2015_v50 = vpop.permute.xlu1 %2014  ;;  %v2018_v29 = vpop.permute.xlu0 %2017 }
 0x915   :  { %v2058_v14 = vrot.slane %v2015_v50, %v4663_v54  ;;  %v2062_v38 = vrot.slane %v2018_v29, %v4663_v54 }
 0x917   :  { %v2084_v33 = vsel %vm598_vm4, %v2062_v38, %v2058_v14 }
 0x918   :  { %v2003_v30 = vpop.permute.xlu1 %2002  ;;  %v2021_v8 = vpop.permute.xlu0 %2020 }
 0x919   :  { %v2042_v53 = vrot.slane %v2003_v30, %v4663_v54  ;;  %v2066_v31 = vrot.slane %v2021_v8, %v4663_v54 }
 0x91b   :  { %v2080_v23 = vsel %vm600_vm5, %v2042_v53, %v2079_v15  ;;  %v2085_v24 = vsel %vm600_vm5, %v2066_v31, %v2084_v33 }
 0x91c   :  { %v2006_v10 = vpop.permute.xlu1 %2005  ;;  %v2024_v11 = vpop.permute.xlu0 %2023 }
 0x91d   :  { %v2046_v47 = vrot.slane %v2006_v10, %v4663_v54  ;;  %v2070_v62 = vrot.slane %v2024_v11, %v4663_v54 }
 0x91f   :  { %v2081_v35 = vsel %vm602_vm6, %v2046_v47, %v2080_v23  ;;  %v2086_v17 = vsel %vm602_vm6, %v2070_v62, %v2085_v24 }
 0x920   :  { %v2009_v25 = vpop.permute.xlu1 %2008  ;;  %v2027_v28 = vpop.permute.xlu0 %2026 }
 0x921   :  { %v2050_v52 = vrot.slane %v2009_v25, %v4663_v54  ;;  %v2074_v51 = vrot.slane %v2027_v28, %v4663_v54 }
 0x923   :  { %v2082_v36 = vsel %vm604_vm7, %v2050_v52, %v2081_v35  ;;  %v2087_v48 = vsel %vm604_vm7, %v2074_v51, %v2086_v17 }
 0x924   :  { %v2012_v16 = vpop.permute.xlu1 %2011  ;;  %v2030_v45 = vpop.permute.xlu0 %2029 }
 0x925   :  { %v2054_v22 = vrot.slane %v2012_v16, %v4663_v54  ;;  %v2078_v46 = vrot.slane %v2030_v45, %v4663_v54 }
 0x927   :  { %v2083_v18 = vsel %vm606_vm8, %v2054_v22, %v2082_v36  ;;  %v2088_v41 = vsel %vm606_vm8, %v2078_v46, %v2087_v48 }
 0x928   :  { %v2091_v9 = vsel %vm251_vm2, %v2083_v18, -inf  ;;  %v2094_v50 = vsel %vm251_vm2, %v2088_v41, -inf }
 0x929   :  { %2092 = vmax.xlane.f32.xlu1 %v2091_v9  ;;  %2095 = vmax.xlane.f32.xlu0 %v2094_v50 }
 0x9b2   :  { %v5199_v29 = vpop.xlane.xlu1 %2092  ;;  %v5201_v30 = vpop.xlane.xlu0 %2095 }
 0x9b3   :  { %v2102_v8 = vrot.slane %v5199_v29, %v4534_v20  ;;  %v2106_v10 = vrot.slane %v5199_v29, %v4545_v32  ;;  %v2126_v13 = vrot.slane %v5201_v30, %v4534_v20  ;;  %v2130_v14 = vrot.slane %v5201_v30, %v4545_v32 }
 0x9b4   :  { %v2110_v38 = vrot.slane %v5199_v29, %v4563_v56  ;;  %v2134_v25 = vrot.slane %v5201_v30, %v4563_v56  ;;  %v2138_v52 = vrot.slane %v5201_v30, %v4566_v57  ;;  %v2118_v33 = vrot.slane %v5199_v29, %v4571_v60 }
 0x9b5   :  { %v2159_v11 = vsub.f32 %v5121_v58, %v2102_v8  ;;  %v2160_v12 = vsub.f32 %v5117_v7, %v2106_v10  ;;  %v2165_v28 = vsub.f32 %v5131_v21, %v2126_v13  ;;  %v2166_v58 = vsub.f32 %v5127_v39, %v2130_v14  ;;  %v4109_v14 = vld [vmem:[%s6099_s3 + $0x8] sm:$0x3] }
 0x9b6   :  { %v2114_v7 = vrot.slane %v5199_v29, %v4566_v57  ;;  %v2161_v47 = vsub.f32 %v5141_v63, %v2110_v38  ;;  %v2167_v51 = vsub.f32 %v5137_v19, %v2134_v25  ;;  %v2142_v39 = vrot.slane %v5201_v30, %v4571_v60  ;;  %v4133_v38 = vld [vmem:[%s6099_s3 + $0x8] sm:$0x3] }
 0x9b7   :  { %v2171_v53 = vmul.f32 1.442695, %v2159_v11  ;;  %v2173_v31 = vmul.f32 1.442695, %v2160_v12  ;;  %v2183_v62 = vmul.f32 1.442695, %v2165_v28  ;;  %v2168_v24 = vsub.f32 %v5147_v0, %v2138_v52 }
 0x9b8   :  { %v2185_v15 = vmul.f32 1.442695, %v2166_v58  ;;  %v2162_v21 = vsub.f32 %v5151_v55, %v2114_v7  ;;  %v2175_v23 = vmul.f32 1.442695, %v2161_v47  ;;  %v2187_v63 = vmul.f32 1.442695, %v2167_v51 }
 0x9b9   :  { %4328 = vpow2.f32 %v2171_v53  ;;  %v2122_v16 = vrot.slane %v5199_v29, %v4574_v61  ;;  %v2163_v19 = vsub.f32 %v5161_v2, %v2118_v33  ;;  %v2146_v35 = vrot.slane %v5201_v30, %v4574_v61 }
 0x9ba   :  { %4330 = vpow2.f32 %v2173_v31  ;;  %v2177_v45 = vmul.f32 1.442695, %v2162_v21  ;;  %v2169_v55 = vsub.f32 %v5157_v44, %v2142_v39  ;;  %v2189_v17 = vmul.f32 1.442695, %v2168_v24 }
 0x9bb   :  { %4332 = vpow2.f32 %v2183_v62  ;;  %v2164_v0 = vsub.f32 %v5171_v59, %v2122_v16  ;;  %v2179_v36 = vmul.f32 1.442695, %v2163_v19  ;;  %v2170_v48 = vsub.f32 %v5167_v4, %v2146_v35 }
 0x9bc   :  { %4334 = vpow2.f32 %v2185_v15  ;;  %v2191_v2 = vmul.f32 1.442695, %v2169_v55  ;;  %v2350_v53 = vsub.f32 1.0, %v4133_v38 }
 0x9bd   :  { %4336 = vpow2.f32 %v2175_v23  ;;  %v2181_v18 = vmul.f32 1.442695, %v2164_v0  ;;  %v2193_v9 = vmul.f32 1.442695, %v2170_v48 }
 0x9be   :  { %4338 = vpow2.f32 %v2187_v63 }
 0x9bf   :  { %4340 = vpow2.f32 %v2177_v45 }
 0x9c0   :  { %4342 = vpow2.f32 %v2189_v17 }
 0x9c1   :  { %4344 = vpow2.f32 %v2179_v36 }
 0x9c2   :  { %4346 = vpow2.f32 %v2191_v2 }
 0x9c3   :  { %4348 = vpow2.f32 %v2181_v18 }
 0x9c4   :  { %4350 = vpow2.f32 %v2193_v9 }
 0x9c6   :  { %v4329_v22 = vpop.eup %4328 }
 0x9c7   :  { %v4331_v46 = vpop.eup %4330  ;;  %2208 = vperm.xlu0 %4235, %v4329_v22  }
 0x9c8   :  { %2211 = vperm.xlu1 %4234, %v4331_v46   ;;  %v4333_v41 = vpop.eup %4332 }
 0x9c9   :  { %v4335_v44 = vpop.eup %4334 }
 0x9ca   :  { %v4337_v50 = vpop.eup %4336 }
 0x9cb   :  { %2229 = vperm.xlu0 %4235, %v4335_v44   ;;  %v4339_v59 = vpop.eup %4338 }
 0x9cc   :  { %2226 = vperm.xlu1 %4234, %v4333_v41   ;;  %v4341_v8 = vpop.eup %4340 }
 0x9cd   :  { %v4343_v10 = vpop.eup %4342 }
 0x9ce   :  { %v4345_v4 = vpop.eup %4344 }
 0x9cf   :  { %2232 = vperm.xlu0 %4235, %v4339_v59   ;;  %v4347_v11 = vpop.eup %4346 }
 0x9d0   :  { %2214 = vperm.xlu1 %4234, %v4337_v50   ;;  %v4349_v12 = vpop.eup %4348 }
 0x9d1   :  { %v4351_v13 = vpop.eup %4350 }
 0x9d3   :  { %2235 = vperm.xlu0 %4235, %v4343_v10  }
 0x9d4   :  { %2217 = vperm.xlu1 %4234, %v4341_v8  }
 0x9d7   :  { %2238 = vperm.xlu0 %4235, %v4347_v11  }
 0x9d8   :  { %2220 = vperm.xlu1 %4234, %v4345_v4  }
 0x9db   :  { %2241 = vperm.xlu0 %4235, %v4351_v13  }
 0x9dc   :  { %2223 = vperm.xlu1 %4234, %v4349_v12  }
 0x9df   :  { %2336 = vperm.xlu0 %4235, %v4133_v38  }
 0x9e0   :  { %167 = vperm.xlu1 %4234, %v4109_v14  }
 0x9e4   :  { %2353 = vperm.xlu1 %4234, %v2350_v53  }
 0xa42   :  { %v2209_v25 = vpop.permute.xlu0 %2208 }
 0xa43   :  { %v2212_v31 = vpop.permute.xlu1 %2211  ;;  %v2246_v15 = vrot.slane %v2209_v25, %v4663_v54 }
 0xa44   :  { %v2250_v51 = vrot.slane %v2212_v31, %v4663_v54 }
 0xa46   :  { %v2230_v58 = vpop.permute.xlu0 %2229  ;;  %v2291_v35 = vsel %vm598_vm4, %v2250_v51, %v2246_v15 }
 0xa47   :  { %v2227_v28 = vpop.permute.xlu1 %2226  ;;  %v2274_v21 = vrot.slane %v2230_v58, %v4663_v54 }
 0xa48   :  { %v2270_v33 = vrot.slane %v2227_v28, %v4663_v54 }
 0xa4a   :  { %v2233_v47 = vpop.permute.xlu0 %2232  ;;  %v2296_v17 = vsel %vm598_vm4, %v2274_v21, %v2270_v33 }
 0xa4b   :  { %v2215_v7 = vpop.permute.xlu1 %2214  ;;  %v2278_v24 = vrot.slane %v2233_v47, %v4663_v54 }
 0xa4c   :  { %v2254_v23 = vrot.slane %v2215_v7, %v4663_v54 }
 0xa4d   :  { %v2297_v0 = vsel %vm600_vm5, %v2278_v24, %v2296_v17 }
 0xa4e   :  { %v2236_v52 = vpop.permute.xlu0 %2235  ;;  %v2292_v22 = vsel %vm600_vm5, %v2254_v23, %v2291_v35 }
 0xa4f   :  { %v2218_v62 = vpop.permute.xlu1 %2217  ;;  %v2282_v19 = vrot.slane %v2236_v52, %v4663_v54 }
 0xa50   :  { %v2258_v63 = vrot.slane %v2218_v62, %v4663_v54 }
 0xa51   :  { %v2298_v18 = vsel %vm602_vm6, %v2282_v19, %v2297_v0 }
 0xa52   :  { %v2239_v16 = vpop.permute.xlu0 %2238  ;;  %v2293_v36 = vsel %vm602_vm6, %v2258_v63, %v2292_v22 }
 0xa53   :  { %v2221_v39 = vpop.permute.xlu1 %2220  ;;  %v2286_v55 = vrot.slane %v2239_v16, %v4663_v54 }
 0xa54   :  { %v2262_v45 = vrot.slane %v2221_v39, %v4663_v54 }
 0xa55   :  { %v2299_v50 = vsel %vm604_vm7, %v2286_v55, %v2298_v18 }
 0xa56   :  { %v2242_v2 = vpop.permute.xlu0 %2241  ;;  %v2294_v9 = vsel %vm604_vm7, %v2262_v45, %v2293_v36 }
 0xa57   :  { %v2224_v46 = vpop.permute.xlu1 %2223  ;;  %v2290_v41 = vrot.slane %v2242_v2, %v4663_v54 }
 0xa58   :  { %v2266_v48 = vrot.slane %v2224_v46, %v4663_v54 }
 0xa59   :  { %v2300_v10 = vsel %vm606_vm8, %v2290_v41, %v2299_v50 }
 0xa5a   :  { %v2295_v44 = vsel %vm606_vm8, %v2266_v48, %v2294_v9  ;;  %v2306_v11 = vsel %vm251_vm2, %v2300_v10, 0.0  ;;  %v2337_v38 = vpop.permute.xlu0 %2336 }
 0xa5b   :  { %v168_v59 = vpop.permute.xlu1 %167  ;;  %v2303_v8 = vsel %vm251_vm2, %v2295_v44, 0.0  ;;  %2307 = vadd.xlane.f32.xlu1 %v2306_v11  ;;  %v2341_v33 = vrot.slane %v2337_v38, %v4534_v20  ;;  %v2345_v24 = vrot.slane %v2337_v38, %v4545_v32 }
 0xa5c   :  { %v170_v4 = vmul.f32 %v168_v59, %v4554_v49  ;;  %2304 = vadd.xlane.f32.xlu0 %v2303_v8 }
 0xa5e   :  { %172 = vst.msk [vmem:[#allocation2 + $0x8] sm:$0x3] %vm125_vm3, %v170_v4 }
 0xa5f   :  { %v2354_v53 = vpop.permute.xlu1 %2353 }
 0xa60   :  { %v2358_v62 = vrot.slane %v2354_v53, %v4534_v20  ;;  %v2362_v21 = vrot.slane %v2354_v53, %v4545_v32 }
 0xa62   :  { %v2365_v16 = vmul.f32 %v2358_v62, %v5111_v42  ;;  %v2366_v35 = vmul.f32 %v2362_v21, %v5113_v5 }
 0xa65   :  { %v1967_v12 = vld [vmem:[#allocation2 + $0x8] sm:$0x3] }
 0xa66   :  { %v2326_v13 = vrot.slane %v1967_v12, %v4545_v32  ;;  %v2319_v14 = vrot.slane %v1967_v12, %v4534_v20 }
 0xa6c   :  { %2328 = vbcast.lane.b32.xlu1 %v2326_v13, 256 }
 0xa72   :  { %2321 = vbcast.lane.b32.xlu0 %v2319_v14, 256 }
 0xae4   :  { %v2308_v25 = vpop.xlane.xlu1 %2307 }
 0xae5   :  { %v2305_v31 = vpop.xlane.xlu0 %2304 }
 0xae6   :  { %4352 = vlog2.f32 %v2305_v31 }
 0xae7   :  { %4354 = vlog2.f32 %v2308_v25 }
 0xae8   :  { %v2329_v23 = vpop.permute.xlu1 %2328 }
 0xae9   :  { %v2322_v15 = vpop.permute.xlu0 %2321 }
 0xaf3   :  { %v4353_v28 = vpop.eup %4352 }
 0xaf4   :  { %v4355_v58 = vpop.eup %4354  ;;  %v2310_v7 = vmul.f32 0.6931472, %v4353_v28 }
 0xaf5   :  { %v2312_v47 = vmul.f32 0.6931472, %v4355_v58 }
 0xaf6   :  { %v2313_v52 = vadd.f32 %v2310_v7, %v5199_v29 }
 0xaf7   :  { %v2314_v51 = vadd.f32 %v2312_v47, %v5201_v30 }
 0xaf8   :  { %v2332_v39 = vadd.f32 %v2322_v15, %v2313_v52 }
 0xaf9   :  { %v2333_v63 = vadd.f32 %v2329_v23, %v2314_v51 }
 0xafa   :  { %v2348_v19 = vmul.f32 %v2341_v33, %v2332_v39 }
 0xafb   :  { %v2349_v45 = vmul.f32 %v2345_v24, %v2333_v63 }
 0xafc   :  { %v5281_v55 = vadd.f32 %v2365_v16, %v2348_v19 }
 0xafd   :  { %v5283_v29 = vadd.f32 %v2366_v35, %v2349_v45 }
 0xafe   :  { %v5287_v30 = vadd.f32 %v5281_v55, %v4589_v27  ;;  %v5291_v17 = vadd.f32 %v5281_v55, %v4587_v26  ;;  %v5311_v46 = vadd.f32 %v5281_v55, %v4611_v34  ;;  %v5321_v36 = vadd.f32 %v5281_v55, %v4623_v37 }
 0xaff   :  { %v5297_v42 = vadd.f32 %v5283_v29, %v4589_v27  ;;  %v5301_v5 = vadd.f32 %v5283_v29, %v4587_v26  ;;  %v5307_v22 = vadd.f32 %v5283_v29, %v4611_v34  ;;  %v5317_v0 = vadd.f32 %v5283_v29, %v4623_v37 }
 0xb00   :  { %2491 = vperm.xlu1 %4234, %v5287_v30   ;;  %2488 = vperm.xlu0 %4235, %v5291_v17   ;;  %v5327_v48 = vadd.f32 %v5283_v29, %v4635_v40  ;;  %v5331_v2 = vadd.f32 %v5281_v55, %v4635_v40  ;;  %v5337_v18 = vadd.f32 %v5283_v29, %v4647_v43 }
 0xb01   :  { %v5341_v41 = vadd.f32 %v5281_v55, %v4647_v43 }
 0xb04   :  { %2509 = vperm.xlu1 %4234, %v5297_v42   ;;  %2506 = vperm.xlu0 %4235, %v5301_v5  }
 0xb08   :  { %2512 = vperm.xlu1 %4234, %v5307_v22   ;;  %2494 = vperm.xlu0 %4235, %v5311_v46  }
 0xb0c   :  { %2515 = vperm.xlu1 %4234, %v5317_v0   ;;  %2497 = vperm.xlu0 %4235, %v5321_v36  }
 0xb10   :  { %2518 = vperm.xlu1 %4234, %v5327_v48   ;;  %2500 = vperm.xlu0 %4235, %v5331_v2  }
 0xb14   :  { %2521 = vperm.xlu1 %4234, %v5337_v18   ;;  %2503 = vperm.xlu0 %4235, %v5341_v41  }
 0xb7b   :  { %v2492_v9 = vpop.permute.xlu1 %2491  ;;  %v2489_v44 = vpop.permute.xlu0 %2488 }
 0xb7c   :  { %v2530_v12 = vrot.slane %v2492_v9, %v4663_v54  ;;  %v2526_v13 = vrot.slane %v2489_v44, %v4663_v54 }
 0xb7e   :  { %v2571_v52 = vsel %vm598_vm4, %v2530_v12, %v2526_v13 }
 0xb7f   :  { %v2510_v50 = vpop.permute.xlu1 %2509  ;;  %v2507_v59 = vpop.permute.xlu0 %2506 }
 0xb80   :  { %v2554_v14 = vrot.slane %v2510_v50, %v4663_v54  ;;  %v2550_v38 = vrot.slane %v2507_v59, %v4663_v54 }
 0xb82   :  { %v2576_v51 = vsel %vm598_vm4, %v2554_v14, %v2550_v38 }
 0xb83   :  { %v2513_v8 = vpop.permute.xlu1 %2512  ;;  %v2495_v10 = vpop.permute.xlu0 %2494 }
 0xb84   :  { %v2558_v53 = vrot.slane %v2513_v8, %v4663_v54  ;;  %v2534_v31 = vrot.slane %v2495_v10, %v4663_v54 }
 0xb86   :  { %v2577_v15 = vsel %vm600_vm5, %v2558_v53, %v2576_v51  ;;  %v2572_v33 = vsel %vm600_vm5, %v2534_v31, %v2571_v52 }
 0xb87   :  { %v2516_v4 = vpop.permute.xlu1 %2515  ;;  %v2498_v11 = vpop.permute.xlu0 %2497 }
 0xb88   :  { %v2562_v58 = vrot.slane %v2516_v4, %v4663_v54  ;;  %v2538_v7 = vrot.slane %v2498_v11, %v4663_v54 }
 0xb8a   :  { %v2578_v39 = vsel %vm602_vm6, %v2562_v58, %v2577_v15  ;;  %v2573_v24 = vsel %vm602_vm6, %v2538_v7, %v2572_v33 }
 0xb8b   :  { %v2519_v25 = vpop.permute.xlu1 %2518  ;;  %v2501_v28 = vpop.permute.xlu0 %2500 }
 0xb8c   :  { %v2566_v47 = vrot.slane %v2519_v25, %v4663_v54  ;;  %v2542_v62 = vrot.slane %v2501_v28, %v4663_v54 }
 0xb8e   :  { %v2579_v19 = vsel %vm604_vm7, %v2566_v47, %v2578_v39  ;;  %v2574_v45 = vsel %vm604_vm7, %v2542_v62, %v2573_v24 }
 0xb8f   :  { %v2522_v21 = vpop.permute.xlu1 %2521  ;;  %v2504_v23 = vpop.permute.xlu0 %2503 }
 0xb90   :  { %v2570_v63 = vrot.slane %v2522_v21, %v4663_v54  ;;  %v2546_v16 = vrot.slane %v2504_v23, %v4663_v54 }
 0xb92   :  { %v2580_v35 = vsel %vm606_vm8, %v2570_v63, %v2579_v19  ;;  %v2575_v9 = vsel %vm606_vm8, %v2546_v16, %v2574_v45 }
 0xb93   :  { %v2586_v44 = vsel %vm251_vm2, %v2580_v35, -inf  ;;  %v2583_v50 = vsel %vm251_vm2, %v2575_v9, -inf }
 0xb94   :  { %2587 = vmax.xlane.f32.xlu1 %v2586_v44  ;;  %2584 = vmax.xlane.f32.xlu0 %v2583_v50 }
 0xc1d   :  { %v5369_v59 = vpop.xlane.xlu0 %2584  ;;  %v5371_v8 = vpop.xlane.xlu1 %2587 }
 0xc1e   :  { %v2594_v10 = vrot.slane %v5369_v59, %v4534_v20  ;;  %v2598_v4 = vrot.slane %v5369_v59, %v4545_v32  ;;  %v2618_v11 = vrot.slane %v5371_v8, %v4534_v20  ;;  %v2622_v12 = vrot.slane %v5371_v8, %v4545_v32 }
 0xc1f   :  { %v2602_v53 = vrot.slane %v5369_v59, %v4563_v56  ;;  %v2626_v25 = vrot.slane %v5371_v8, %v4563_v56  ;;  %v2606_v47 = vrot.slane %v5369_v59, %v4566_v57  ;;  %v2610_v52 = vrot.slane %v5369_v59, %v4571_v60 }
 0xc20   :  { %v2651_v13 = vsub.f32 %v5291_v17, %v2594_v10  ;;  %v2652_v14 = vsub.f32 %v5287_v30, %v2598_v4  ;;  %v2657_v38 = vsub.f32 %v5301_v5, %v2618_v11  ;;  %v2658_v28 = vsub.f32 %v5297_v42, %v2622_v12  ;;  %v4138_v12 = vld [vmem:[%s6099_s3 + $0xa] sm:$0x3] }
 0xc21   :  { %v2653_v17 = vsub.f32 %v5311_v46, %v2602_v53  ;;  %v2630_v30 = vrot.slane %v5371_v8, %v4566_v57  ;;  %v2659_v5 = vsub.f32 %v5307_v22, %v2626_v25  ;;  %v2654_v42 = vsub.f32 %v5321_v36, %v2606_v47  ;;  %v4110_v53 = vld [vmem:[%s6099_s3 + $0xa] sm:$0x3] }
 0xc22   :  { %v2663_v31 = vmul.f32 1.442695, %v2651_v13  ;;  %v2665_v58 = vmul.f32 1.442695, %v2652_v14  ;;  %v2675_v7 = vmul.f32 1.442695, %v2657_v38  ;;  %v2634_v15 = vrot.slane %v5371_v8, %v4571_v60 }
 0xc23   :  { %v2677_v62 = vmul.f32 1.442695, %v2658_v28  ;;  %v2667_v51 = vmul.f32 1.442695, %v2653_v17  ;;  %v2660_v46 = vsub.f32 %v5317_v0, %v2630_v30  ;;  %v2679_v33 = vmul.f32 1.442695, %v2659_v5 }
 0xc24   :  { %4356 = vpow2.f32 %v2663_v31  ;;  %v2614_v21 = vrot.slane %v5369_v59, %v4574_v61  ;;  %v2655_v22 = vsub.f32 %v5331_v2, %v2610_v52  ;;  %v2669_v23 = vmul.f32 1.442695, %v2654_v42 }
 0xc25   :  { %4358 = vpow2.f32 %v2665_v58  ;;  %v2638_v39 = vrot.slane %v5371_v8, %v4574_v61  ;;  %v2661_v36 = vsub.f32 %v5327_v48, %v2634_v15  ;;  %v2681_v24 = vmul.f32 1.442695, %v2660_v46 }
 0xc26   :  { %4360 = vpow2.f32 %v2675_v7  ;;  %v2656_v63 = vsub.f32 %v5341_v41, %v2614_v21  ;;  %v2671_v0 = vmul.f32 1.442695, %v2655_v22  ;;  %v2842_v38 = vsub.f32 1.0, %v4138_v12 }
 0xc27   :  { %4362 = vpow2.f32 %v2677_v62  ;;  %v2662_v19 = vsub.f32 %v5337_v18, %v2638_v39  ;;  %v2683_v45 = vmul.f32 1.442695, %v2661_v36 }
 0xc28   :  { %4364 = vpow2.f32 %v2667_v51  ;;  %v2673_v2 = vmul.f32 1.442695, %v2656_v63 }
 0xc29   :  { %4366 = vpow2.f32 %v2679_v33  ;;  %v2685_v44 = vmul.f32 1.442695, %v2662_v19 }
 0xc2a   :  { %4368 = vpow2.f32 %v2669_v23 }
 0xc2b   :  { %4370 = vpow2.f32 %v2681_v24 }
 0xc2c   :  { %4372 = vpow2.f32 %v2671_v0 }
 0xc2d   :  { %4374 = vpow2.f32 %v2683_v45 }
 0xc2e   :  { %4376 = vpow2.f32 %v2673_v2 }
 0xc2f   :  { %4378 = vpow2.f32 %v2685_v44 }
 0xc31   :  { %v4357_v16 = vpop.eup %4356 }
 0xc32   :  { %v4359_v35 = vpop.eup %4358  ;;  %2700 = vperm.xlu0 %4235, %v4357_v16  }
 0xc33   :  { %2703 = vperm.xlu1 %4234, %v4359_v35   ;;  %v4361_v9 = vpop.eup %4360 }
 0xc34   :  { %v4363_v48 = vpop.eup %4362 }
 0xc35   :  { %v4365_v41 = vpop.eup %4364 }
 0xc36   :  { %2718 = vperm.xlu0 %4235, %v4361_v9   ;;  %v4367_v50 = vpop.eup %4366 }
 0xc37   :  { %2721 = vperm.xlu1 %4234, %v4363_v48   ;;  %v4369_v18 = vpop.eup %4368 }
 0xc38   :  { %v4371_v10 = vpop.eup %4370 }
 0xc39   :  { %v4373_v4 = vpop.eup %4372 }
 0xc3a   :  { %2706 = vperm.xlu0 %4235, %v4365_v41   ;;  %v4375_v11 = vpop.eup %4374 }
 0xc3b   :  { %2724 = vperm.xlu1 %4234, %v4367_v50   ;;  %v4377_v13 = vpop.eup %4376 }
 0xc3c   :  { %v4379_v14 = vpop.eup %4378 }
 0xc3e   :  { %2709 = vperm.xlu0 %4235, %v4369_v18  }
 0xc3f   :  { %2727 = vperm.xlu1 %4234, %v4371_v10  }
 0xc42   :  { %2712 = vperm.xlu0 %4235, %v4373_v4  }
 0xc43   :  { %2730 = vperm.xlu1 %4234, %v4375_v11  }
 0xc46   :  { %2715 = vperm.xlu0 %4235, %v4377_v13  }
 0xc47   :  { %2733 = vperm.xlu1 %4234, %v4379_v14  }
 0xc4a   :  { %177 = vperm.xlu0 %4235, %v4110_v53  }
 0xc4b   :  { %2845 = vperm.xlu1 %4234, %v2842_v38  }
 0xc4e   :  { %2828 = vperm.xlu0 %4235, %v4138_v12  }
 0xcad   :  { %v2701_v31 = vpop.permute.xlu0 %2700 }
 0xcae   :  { %v2704_v25 = vpop.permute.xlu1 %2703  ;;  %v2738_v62 = vrot.slane %v2701_v31, %v4663_v54 }
 0xcaf   :  { %v2742_v5 = vrot.slane %v2704_v25, %v4663_v54 }
 0xcb1   :  { %v2719_v28 = vpop.permute.xlu0 %2718  ;;  %v2783_v39 = vsel %vm598_vm4, %v2742_v5, %v2738_v62 }
 0xcb2   :  { %v2722_v58 = vpop.permute.xlu1 %2721  ;;  %v2762_v42 = vrot.slane %v2719_v28, %v4663_v54 }
 0xcb3   :  { %v2766_v52 = vrot.slane %v2722_v58, %v4663_v54 }
 0xcb5   :  { %v2707_v7 = vpop.permute.xlu0 %2706  ;;  %v2788_v24 = vsel %vm598_vm4, %v2766_v52, %v2762_v42 }
 0xcb6   :  { %v2725_v47 = vpop.permute.xlu1 %2724  ;;  %v2746_v51 = vrot.slane %v2707_v7, %v4663_v54 }
 0xcb7   :  { %v2770_v46 = vrot.slane %v2725_v47, %v4663_v54 }
 0xcb8   :  { %v2784_v63 = vsel %vm600_vm5, %v2746_v51, %v2783_v39 }
 0xcb9   :  { %v2710_v17 = vpop.permute.xlu0 %2709  ;;  %v2789_v16 = vsel %vm600_vm5, %v2770_v46, %v2788_v24 }
 0xcba   :  { %v2728_v30 = vpop.permute.xlu1 %2727  ;;  %v2750_v33 = vrot.slane %v2710_v17, %v4663_v54 }
 0xcbb   :  { %v2774_v22 = vrot.slane %v2728_v30, %v4663_v54 }
 0xcbc   :  { %v2785_v19 = vsel %vm602_vm6, %v2750_v33, %v2784_v63 }
 0xcbd   :  { %v2713_v15 = vpop.permute.xlu0 %2712  ;;  %v2790_v2 = vsel %vm602_vm6, %v2774_v22, %v2789_v16 }
 0xcbe   :  { %v2731_v21 = vpop.permute.xlu1 %2730  ;;  %v2754_v23 = vrot.slane %v2713_v15, %v4663_v54 }
 0xcbf   :  { %v2778_v36 = vrot.slane %v2731_v21, %v4663_v54 }
 0xcc0   :  { %v2786_v44 = vsel %vm604_vm7, %v2754_v23, %v2785_v19 }
 0xcc1   :  { %v2716_v0 = vpop.permute.xlu0 %2715  ;;  %v2791_v48 = vsel %vm604_vm7, %v2778_v36, %v2790_v2 }
 0xcc2   :  { %v2734_v45 = vpop.permute.xlu1 %2733  ;;  %v2758_v35 = vrot.slane %v2716_v0, %v4663_v54 }
 0xcc3   :  { %v2782_v9 = vrot.slane %v2734_v45, %v4663_v54 }
 0xcc4   :  { %v2787_v41 = vsel %vm606_vm8, %v2758_v35, %v2786_v44 }
 0xcc5   :  { %v178_v50 = vpop.permute.xlu0 %177  ;;  %v2792_v18 = vsel %vm606_vm8, %v2782_v9, %v2791_v48  ;;  %v2795_v10 = vsel %vm251_vm2, %v2787_v41, 0.0 }
 0xcc6   :  { %v179_v4 = vrot.slane %v178_v50, 6  ;;  %v2798_v11 = vsel %vm251_vm2, %v2792_v18, 0.0  ;;  %2796 = vadd.xlane.f32.xlu1 %v2795_v10  ;;  %v2846_v53 = vpop.permute.xlu1 %2845 }
 0xcc7   :  { %2799 = vadd.xlane.f32.xlu0 %v2798_v11  ;;  %v2850_v30 = vrot.slane %v2846_v53, %v4534_v20  ;;  %v2854_v42 = vrot.slane %v2846_v53, %v4545_v32 }
 0xcc8   :  { %v181_v12 = vmul.f32 %v179_v4, %v4554_v49 }
 0xcc9   :  { %v2829_v31 = vpop.permute.xlu0 %2828  ;;  %v2857_v22 = vmul.f32 %v2850_v30, %v5281_v55  ;;  %v2858_v36 = vmul.f32 %v2854_v42, %v5283_v29 }
 0xcca   :  { %183 = vst.msk [vmem:[#allocation2 + $0x8] sm:$0xc] %vm137_vm9, %v181_v12  ;;  %v2833_v51 = vrot.slane %v2829_v31, %v4534_v20  ;;  %v2837_v33 = vrot.slane %v2829_v31, %v4545_v32 }
 0xcd1   :  { %v2459_v13 = vld [vmem:[#allocation2 + $0xa] sm:$0x3] }
 0xcd2   :  { %v2811_v14 = vrot.slane %v2459_v13, %v4534_v20  ;;  %v2818_v38 = vrot.slane %v2459_v13, %v4545_v32 }
 0xcd7   :  { %2813 = vbcast.lane.b32.xlu1 %v2811_v14, 256 }
 0xcdd   :  { %2820 = vbcast.lane.b32.xlu0 %v2818_v38, 256 }
 0xd4f   :  { %v2797_v25 = vpop.xlane.xlu1 %2796 }
 0xd50   :  { %4380 = vlog2.f32 %v2797_v25  ;;  %v2800_v28 = vpop.xlane.xlu0 %2799 }
 0xd51   :  { %4382 = vlog2.f32 %v2800_v28 }
 0xd53   :  { %v2814_v62 = vpop.permute.xlu1 %2813 }
 0xd54   :  { %v2821_v46 = vpop.permute.xlu0 %2820 }
 0xd5d   :  { %v4381_v58 = vpop.eup %4380 }
 0xd5e   :  { %v4383_v7 = vpop.eup %4382  ;;  %v2802_v47 = vmul.f32 0.6931472, %v4381_v58 }
 0xd5f   :  { %v2804_v17 = vmul.f32 0.6931472, %v4383_v7 }
 0xd60   :  { %v2805_v5 = vadd.f32 %v2802_v47, %v5369_v59 }
 0xd61   :  { %v2806_v52 = vadd.f32 %v2804_v17, %v5371_v8 }
 0xd62   :  { %v2824_v15 = vadd.f32 %v2814_v62, %v2805_v5 }
 0xd63   :  { %v2825_v21 = vadd.f32 %v2821_v46, %v2806_v52 }
 0xd64   :  { %v2840_v23 = vmul.f32 %v2833_v51, %v2824_v15 }
 0xd65   :  { %v2841_v39 = vmul.f32 %v2837_v33, %v2825_v21 }
 0xd66   :  { %v5451_v24 = vadd.f32 %v2857_v22, %v2840_v23 }
 0xd67   :  { %v5453_v59 = vadd.f32 %v2858_v36, %v2841_v39 }
 0xd68   :  { %v5457_v8 = vadd.f32 %v5451_v24, %v4589_v27  ;;  %v5461_v63 = vadd.f32 %v5451_v24, %v4587_v26  ;;  %v5481_v16 = vadd.f32 %v5451_v24, %v4611_v34  ;;  %v5491_v45 = vadd.f32 %v5451_v24, %v4623_v37 }
 0xd69   :  { %v5467_v55 = vadd.f32 %v5453_v59, %v4589_v27  ;;  %v5471_v29 = vadd.f32 %v5453_v59, %v4587_v26  ;;  %v5477_v0 = vadd.f32 %v5453_v59, %v4611_v34  ;;  %v5487_v19 = vadd.f32 %v5453_v59, %v4623_v37 }
 0xd6a   :  { %2983 = vperm.xlu0 %4235, %v5457_v8   ;;  %2980 = vperm.xlu1 %4234, %v5461_v63   ;;  %v5497_v35 = vadd.f32 %v5453_v59, %v4635_v40  ;;  %v5501_v2 = vadd.f32 %v5451_v24, %v4635_v40  ;;  %v5507_v9 = vadd.f32 %v5453_v59, %v4647_v43 }
 0xd6b   :  { %v5511_v44 = vadd.f32 %v5451_v24, %v4647_v43 }
 0xd6e   :  { %3001 = vperm.xlu0 %4235, %v5467_v55   ;;  %2998 = vperm.xlu1 %4234, %v5471_v29  }
 0xd72   :  { %3004 = vperm.xlu0 %4235, %v5477_v0   ;;  %2986 = vperm.xlu1 %4234, %v5481_v16  }
 0xd76   :  { %3007 = vperm.xlu0 %4235, %v5487_v19   ;;  %2989 = vperm.xlu1 %4234, %v5491_v45  }
 0xd7a   :  { %3010 = vperm.xlu0 %4235, %v5497_v35   ;;  %2992 = vperm.xlu1 %4234, %v5501_v2  }
 0xd7e   :  { %3013 = vperm.xlu0 %4235, %v5507_v9   ;;  %2995 = vperm.xlu1 %4234, %v5511_v44  }
 0xde5   :  { %v2981_v48 = vpop.permute.xlu1 %2980  ;;  %v2984_v41 = vpop.permute.xlu0 %2983 }
 0xde6   :  { %v3018_v13 = vrot.slane %v2981_v48, %v4663_v54  ;;  %v3022_v14 = vrot.slane %v2984_v41, %v4663_v54 }
 0xde8   :  { %v3063_v5 = vsel %vm598_vm4, %v3022_v14, %v3018_v13 }
 0xde9   :  { %v2999_v50 = vpop.permute.xlu1 %2998  ;;  %v3002_v18 = vpop.permute.xlu0 %3001 }
 0xdea   :  { %v3042_v38 = vrot.slane %v2999_v50, %v4663_v54  ;;  %v3046_v53 = vrot.slane %v3002_v18, %v4663_v54 }
 0xdec   :  { %v3068_v62 = vsel %vm598_vm4, %v3046_v53, %v3042_v38 }
 0xded   :  { %v2987_v10 = vpop.permute.xlu1 %2986  ;;  %v3005_v4 = vpop.permute.xlu0 %3004 }
 0xdee   :  { %v3026_v31 = vrot.slane %v2987_v10, %v4663_v54  ;;  %v3050_v25 = vrot.slane %v3005_v4, %v4663_v54 }
 0xdf0   :  { %v3064_v52 = vsel %vm600_vm5, %v3026_v31, %v3063_v5  ;;  %v3069_v42 = vsel %vm600_vm5, %v3050_v25, %v3068_v62 }
 0xdf1   :  { %v2990_v11 = vpop.permute.xlu1 %2989  ;;  %v3008_v12 = vpop.permute.xlu0 %3007 }
 0xdf2   :  { %v3030_v7 = vrot.slane %v2990_v11, %v4663_v54  ;;  %v3054_v47 = vrot.slane %v3008_v12, %v4663_v54 }
 0xdf4   :  { %v3065_v46 = vsel %vm602_vm6, %v3030_v7, %v3064_v52  ;;  %v3070_v33 = vsel %vm602_vm6, %v3054_v47, %v3069_v42 }
 0xdf5   :  { %v2993_v28 = vpop.permute.xlu1 %2992  ;;  %v3011_v58 = vpop.permute.xlu0 %3010 }
 0xdf6   :  { %v3034_v17 = vrot.slane %v2993_v28, %v4663_v54  ;;  %v3058_v30 = vrot.slane %v3011_v58, %v4663_v54 }
 0xdf8   :  { %v3066_v23 = vsel %vm604_vm7, %v3034_v17, %v3065_v46  ;;  %v3071_v39 = vsel %vm604_vm7, %v3058_v30, %v3070_v33 }
 0xdf9   :  { %v2996_v51 = vpop.permute.xlu1 %2995  ;;  %v3014_v15 = vpop.permute.xlu0 %3013 }
 0xdfa   :  { %v3038_v21 = vrot.slane %v2996_v51, %v4663_v54  ;;  %v3062_v22 = vrot.slane %v3014_v15, %v4663_v54 }
 0xdfc   :  { %v3067_v36 = vsel %vm606_vm8, %v3038_v21, %v3066_v23  ;;  %v3072_v48 = vsel %vm606_vm8, %v3062_v22, %v3071_v39 }
 0xdfd   :  { %v3075_v41 = vsel %vm251_vm2, %v3067_v36, -inf  ;;  %v3078_v50 = vsel %vm251_vm2, %v3072_v48, -inf }
 0xdfe   :  { %3076 = vmax.xlane.f32.xlu1 %v3075_v41  ;;  %3079 = vmax.xlane.f32.xlu0 %v3078_v50 }
 0xe87   :  { %v5539_v18 = vpop.xlane.xlu1 %3076  ;;  %v5541_v10 = vpop.xlane.xlu0 %3079 }
 0xe88   :  { %v3086_v4 = vrot.slane %v5539_v18, %v4534_v20  ;;  %v3090_v11 = vrot.slane %v5539_v18, %v4545_v32  ;;  %v3110_v14 = vrot.slane %v5541_v10, %v4534_v20  ;;  %v3114_v38 = vrot.slane %v5541_v10, %v4545_v32 }
 0xe89   :  { %v3094_v53 = vrot.slane %v5539_v18, %v4563_v56  ;;  %v3118_v28 = vrot.slane %v5541_v10, %v4563_v56  ;;  %v3122_v17 = vrot.slane %v5541_v10, %v4566_v57  ;;  %v3102_v62 = vrot.slane %v5539_v18, %v4571_v60 }
 0xe8a   :  { %v3143_v12 = vsub.f32 %v5461_v63, %v3086_v4  ;;  %v3144_v13 = vsub.f32 %v5457_v8, %v3090_v11  ;;  %v3149_v58 = vsub.f32 %v5471_v29, %v3110_v14  ;;  %v3150_v63 = vsub.f32 %v5467_v55, %v3114_v38  ;;  %v4111_v38 = vld [vmem:[%s6099_s3 + $0xc] sm:$0x3] }
 0xe8b   :  { %v3098_v8 = vrot.slane %v5539_v18, %v4566_v57  ;;  %v3145_v7 = vsub.f32 %v5481_v16, %v3094_v53  ;;  %v3151_v30 = vsub.f32 %v5477_v0, %v3118_v28  ;;  %v3126_v55 = vrot.slane %v5541_v10, %v4571_v60  ;;  %v4143_v53 = vld [vmem:[%s6099_s3 + $0xc] sm:$0x3] }
 0xe8c   :  { %v3155_v31 = vmul.f32 1.442695, %v3143_v12  ;;  %v3157_v25 = vmul.f32 1.442695, %v3144_v13  ;;  %v3167_v47 = vmul.f32 1.442695, %v3149_v58  ;;  %v3152_v42 = vsub.f32 %v5487_v19, %v3122_v17 }
 0xe8d   :  { %v3169_v5 = vmul.f32 1.442695, %v3150_v63  ;;  %v3146_v29 = vsub.f32 %v5491_v45, %v3098_v8  ;;  %v3159_v52 = vmul.f32 1.442695, %v3145_v7  ;;  %v3171_v16 = vmul.f32 1.442695, %v3151_v30 }
 0xe8e   :  { %4384 = vpow2.f32 %v3155_v31  ;;  %v3106_v51 = vrot.slane %v5539_v18, %v4574_v61  ;;  %v3147_v0 = vsub.f32 %v5501_v2, %v3102_v62  ;;  %v3130_v46 = vrot.slane %v5541_v10, %v4574_v61 }
 0xe8f   :  { %4386 = vpow2.f32 %v3157_v25  ;;  %v3161_v15 = vmul.f32 1.442695, %v3146_v29  ;;  %v3153_v45 = vsub.f32 %v5497_v35, %v3126_v55  ;;  %v3173_v33 = vmul.f32 1.442695, %v3152_v42 }
 0xe90   :  { %4388 = vpow2.f32 %v3167_v47  ;;  %v3148_v19 = vsub.f32 %v5511_v44, %v3106_v51  ;;  %v3163_v23 = vmul.f32 1.442695, %v3147_v0  ;;  %v3154_v39 = vsub.f32 %v5507_v9, %v3130_v46 }
 0xe91   :  { %4390 = vpow2.f32 %v3169_v5  ;;  %v3175_v2 = vmul.f32 1.442695, %v3153_v45  ;;  %v3334_v31 = vsub.f32 1.0, %v4143_v53 }
 0xe92   :  { %4392 = vpow2.f32 %v3159_v52  ;;  %v3165_v36 = vmul.f32 1.442695, %v3148_v19  ;;  %v3177_v41 = vmul.f32 1.442695, %v3154_v39 }
 0xe93   :  { %4394 = vpow2.f32 %v3171_v16 }
 0xe94   :  { %4396 = vpow2.f32 %v3161_v15 }
 0xe95   :  { %4398 = vpow2.f32 %v3173_v33 }
 0xe96   :  { %4400 = vpow2.f32 %v3163_v23 }
 0xe97   :  { %4402 = vpow2.f32 %v3175_v2 }
 0xe98   :  { %4404 = vpow2.f32 %v3165_v36 }
 0xe99   :  { %4406 = vpow2.f32 %v3177_v41 }
 0xe9b   :  { %v4385_v21 = vpop.eup %4384 }
 0xe9c   :  { %v4387_v22 = vpop.eup %4386  ;;  %3192 = vperm.xlu0 %4235, %v4385_v21  }
 0xe9d   :  { %3195 = vperm.xlu1 %4234, %v4387_v22   ;;  %v4389_v48 = vpop.eup %4388 }
 0xe9e   :  { %v4391_v35 = vpop.eup %4390 }
 0xe9f   :  { %v4393_v50 = vpop.eup %4392 }
 0xea0   :  { %3213 = vperm.xlu0 %4235, %v4391_v35   ;;  %v4395_v44 = vpop.eup %4394 }
 0xea1   :  { %3210 = vperm.xlu1 %4234, %v4389_v48   ;;  %v4397_v4 = vpop.eup %4396 }
 0xea2   :  { %v4399_v11 = vpop.eup %4398 }
 0xea3   :  { %v4401_v9 = vpop.eup %4400 }
 0xea4   :  { %3216 = vperm.xlu0 %4235, %v4395_v44   ;;  %v4403_v12 = vpop.eup %4402 }
 0xea5   :  { %3198 = vperm.xlu1 %4234, %v4393_v50   ;;  %v4405_v13 = vpop.eup %4404 }
 0xea6   :  { %v4407_v14 = vpop.eup %4406 }
 0xea8   :  { %3219 = vperm.xlu0 %4235, %v4399_v11  }
 0xea9   :  { %3201 = vperm.xlu1 %4234, %v4397_v4  }
 0xeac   :  { %3222 = vperm.xlu0 %4235, %v4403_v12  }
 0xead   :  { %3204 = vperm.xlu1 %4234, %v4401_v9  }
 0xeb0   :  { %3225 = vperm.xlu0 %4235, %v4407_v14  }
 0xeb1   :  { %3207 = vperm.xlu1 %4234, %v4405_v13  }
 0xeb4   :  { %3320 = vperm.xlu0 %4235, %v4143_v53  }
 0xeb5   :  { %188 = vperm.xlu1 %4234, %v4111_v38  }
 0xeb9   :  { %3337 = vperm.xlu1 %4234, %v3334_v31  }
 0xf17   :  { %v3193_v28 = vpop.permute.xlu0 %3192 }
 0xf18   :  { %v3196_v25 = vpop.permute.xlu1 %3195  ;;  %v3230_v5 = vrot.slane %v3193_v28, %v4663_v54 }
 0xf19   :  { %v3234_v30 = vrot.slane %v3196_v25, %v4663_v54 }
 0xf1b   :  { %v3214_v63 = vpop.permute.xlu0 %3213  ;;  %v3275_v46 = vsel %vm598_vm4, %v3234_v30, %v3230_v5 }
 0xf1c   :  { %v3211_v58 = vpop.permute.xlu1 %3210  ;;  %v3258_v29 = vrot.slane %v3214_v63, %v4663_v54 }
 0xf1d   :  { %v3254_v62 = vrot.slane %v3211_v58, %v4663_v54 }
 0xf1f   :  { %v3217_v7 = vpop.permute.xlu0 %3216  ;;  %v3280_v33 = vsel %vm598_vm4, %v3258_v29, %v3254_v62 }
 0xf20   :  { %v3199_v8 = vpop.permute.xlu1 %3198  ;;  %v3262_v42 = vrot.slane %v3217_v7, %v4663_v54 }
 0xf21   :  { %v3238_v52 = vrot.slane %v3199_v8, %v4663_v54 }
 0xf22   :  { %v3281_v19 = vsel %vm600_vm5, %v3262_v42, %v3280_v33 }
 0xf23   :  { %v3220_v17 = vpop.permute.xlu0 %3219  ;;  %v3276_v21 = vsel %vm600_vm5, %v3238_v52, %v3275_v46 }
 0xf24   :  { %v3202_v47 = vpop.permute.xlu1 %3201  ;;  %v3266_v0 = vrot.slane %v3220_v17, %v4663_v54 }
 0xf25   :  { %v3242_v16 = vrot.slane %v3202_v47, %v4663_v54 }
 0xf26   :  { %v3282_v36 = vsel %vm602_vm6, %v3266_v0, %v3281_v19 }
 0xf27   :  { %v3223_v51 = vpop.permute.xlu0 %3222  ;;  %v3277_v23 = vsel %vm602_vm6, %v3242_v16, %v3276_v21 }
 0xf28   :  { %v3205_v55 = vpop.permute.xlu1 %3204  ;;  %v3270_v45 = vrot.slane %v3223_v51, %v4663_v54 }
 0xf29   :  { %v3246_v15 = vrot.slane %v3205_v55, %v4663_v54 }
 0xf2a   :  { %v3283_v50 = vsel %vm604_vm7, %v3270_v45, %v3282_v36 }
 0xf2b   :  { %v3226_v2 = vpop.permute.xlu0 %3225  ;;  %v3278_v41 = vsel %vm604_vm7, %v3246_v15, %v3277_v23 }
 0xf2c   :  { %v3208_v22 = vpop.permute.xlu1 %3207  ;;  %v3274_v48 = vrot.slane %v3226_v2, %v4663_v54 }
 0xf2d   :  { %v3250_v39 = vrot.slane %v3208_v22, %v4663_v54 }
 0xf2e   :  { %v3284_v11 = vsel %vm606_vm8, %v3274_v48, %v3283_v50 }
 0xf2f   :  { %v3279_v35 = vsel %vm606_vm8, %v3250_v39, %v3278_v41  ;;  %v3290_v12 = vsel %vm251_vm2, %v3284_v11, 0.0  ;;  %v3321_v31 = vpop.permute.xlu0 %3320 }
 0xf30   :  { %v189_v44 = vpop.permute.xlu1 %188  ;;  %v3287_v4 = vsel %vm251_vm2, %v3279_v35, 0.0  ;;  %3291 = vadd.xlane.f32.xlu1 %v3290_v12  ;;  %v3325_v29 = vrot.slane %v3321_v31, %v4534_v20  ;;  %v3329_v16 = vrot.slane %v3321_v31, %v4545_v32 }
 0xf31   :  { %v190_v9 = vrot.slane %v189_v44, 4  ;;  %3288 = vadd.xlane.f32.xlu0 %v3287_v4 }
 0xf33   :  { %v192_v13 = vmul.f32 %v190_v9, %v4554_v49 }
 0xf34   :  { %v3338_v25 = vpop.permute.xlu1 %3337 }
 0xf35   :  { %194 = vst.msk [vmem:[#allocation2 + $0x8] sm:$0x30] %vm149_vm10, %v192_v13  ;;  %v3342_v17 = vrot.slane %v3338_v25, %v4534_v20  ;;  %v3346_v52 = vrot.slane %v3338_v25, %v4545_v32  ;;  %vm4016_vm10 = vcmask 1024  }
 0xf37   :  { %v3349_v0 = vmul.f32 %v3342_v17, %v5451_v24  ;;  %v3350_v45 = vmul.f32 %v3346_v52, %v5453_v59 }
 0xf3c   :  { %v5611_v14 = vld [vmem:[#allocation2 + $0xc] sm:$0x3] }
 0xf3d   :  { %v3310_v38 = vrot.slane %v5611_v14, %v4545_v32  ;;  %v3303_v53 = vrot.slane %v5611_v14, %v4534_v20 }
 0xf41   :  { %3312 = vbcast.lane.b32.xlu1 %v3310_v38, 256 }
 0xf47   :  { %3305 = vbcast.lane.b32.xlu0 %v3303_v53, 256 }
 0xfb9   :  { %v3292_v58 = vpop.xlane.xlu1 %3291 }
 0xfba   :  { %v3289_v28 = vpop.xlane.xlu0 %3288 }
 0xfbb   :  { %4408 = vlog2.f32 %v3289_v28 }
 0xfbc   :  { %4410 = vlog2.f32 %v3292_v58 }
 0xfbd   :  { %v3313_v55 = vpop.permute.xlu1 %3312 }
 0xfbe   :  { %v3306_v62 = vpop.permute.xlu0 %3305 }
 0xfc8   :  { %v4409_v63 = vpop.eup %4408 }
 0xfc9   :  { %v4411_v8 = vpop.eup %4410  ;;  %v3294_v7 = vmul.f32 0.6931472, %v4409_v63 }
 0xfca   :  { %v3296_v47 = vmul.f32 0.6931472, %v4411_v8 }
 0xfcb   :  { %v3297_v30 = vadd.f32 %v3294_v7, %v5539_v18 }
 0xfcc   :  { %v3298_v5 = vadd.f32 %v3296_v47, %v5541_v10 }
 0xfcd   :  { %v3316_v42 = vadd.f32 %v3306_v62, %v3297_v30 }
 0xfce   :  { %v3317_v51 = vadd.f32 %v3313_v55, %v3298_v5 }
 0xfcf   :  { %v3332_v15 = vmul.f32 %v3325_v29, %v3316_v42 }
 0xfd0   :  { %v3333_v46 = vmul.f32 %v3329_v16, %v3317_v51 }
 0xfd1   :  { %v5625_v33 = vadd.f32 %v3349_v0, %v3332_v15 }
 0xfd2   :  { %v5627_v18 = vadd.f32 %v3350_v45, %v3333_v46 }
 0xfd3   :  { %v5631_v10 = vadd.f32 %v5625_v33, %v4589_v27  ;;  %v5635_v21 = vadd.f32 %v5625_v33, %v4587_v26  ;;  %v5655_v19 = vadd.f32 %v5625_v33, %v4611_v34  ;;  %v5675_v23 = vadd.f32 %v5625_v33, %v4635_v40 }
 0xfd4   :  { %v5641_v24 = vadd.f32 %v5627_v18, %v4589_v27  ;;  %v5645_v59 = vadd.f32 %v5627_v18, %v4587_v26  ;;  %v5651_v22 = vadd.f32 %v5627_v18, %v4611_v34  ;;  %v5661_v26 = vadd.f32 %v5627_v18, %v4623_v37 }
 0xfd5   :  { %3475 = vperm.xlu1 %4234, %v5631_v10   ;;  %3472 = vperm.xlu0 %4235, %v5635_v21   ;;  %v5665_v27 = vadd.f32 %v5625_v33, %v4623_v37  ;;  %v5671_v34 = vadd.f32 %v5627_v18, %v4635_v40  ;;  %v5681_v37 = vadd.f32 %v5627_v18, %v4647_v43 }
 0xfd6   :  { %v5685_v39 = vadd.f32 %v5625_v33, %v4647_v43 }
 0xfd9   :  { %3493 = vperm.xlu1 %4234, %v5641_v24   ;;  %3490 = vperm.xlu0 %4235, %v5645_v59  }
 0xfdd   :  { %3496 = vperm.xlu1 %4234, %v5651_v22   ;;  %3478 = vperm.xlu0 %4235, %v5655_v19  }
 0xfe1   :  { %3499 = vperm.xlu1 %4234, %v5661_v26   ;;  %3481 = vperm.xlu0 %4235, %v5665_v27  }
 0xfe5   :  { %3502 = vperm.xlu1 %4234, %v5671_v34   ;;  %3484 = vperm.xlu0 %4235, %v5675_v23  }
 0xfe9   :  { %3505 = vperm.xlu1 %4234, %v5681_v37   ;;  %3487 = vperm.xlu0 %4235, %v5685_v39  }
0x1050   :  { %v3476_v2 = vpop.permute.xlu1 %3475  ;;  %v3473_v36 = vpop.permute.xlu0 %3472 }
0x1051   :  { %v3514_v4 = vrot.slane %v3476_v2, %v4663_v54  ;;  %v3510_v11 = vrot.slane %v3473_v36, %v4663_v54 }
0x1053   :  { %v3555_v63 = vsel %vm598_vm4, %v3514_v4, %v3510_v11 }
0x1054   :  { %v3494_v40 = vpop.permute.xlu1 %3493  ;;  %v3491_v48 = vpop.permute.xlu0 %3490 }
0x1055   :  { %v3538_v9 = vrot.slane %v3494_v40, %v4663_v54  ;;  %v3534_v43 = vrot.slane %v3491_v48, %v4663_v54 }
0x1057   :  { %v3560_v8 = vsel %vm598_vm4, %v3538_v9, %v3534_v43 }
0x1058   :  { %v3497_v41 = vpop.permute.xlu1 %3496  ;;  %v3479_v35 = vpop.permute.xlu0 %3478 }
0x1059   :  { %v3542_v12 = vrot.slane %v3497_v41, %v4663_v54  ;;  %v3518_v13 = vrot.slane %v3479_v35, %v4663_v54 }
0x105b   :  { %v3561_v7 = vsel %vm600_vm5, %v3542_v12, %v3560_v8  ;;  %v3556_v47 = vsel %vm600_vm5, %v3518_v13, %v3555_v63 }
0x105c   :  { %v3500_v50 = vpop.permute.xlu1 %3499  ;;  %v3482_v44 = vpop.permute.xlu0 %3481 }
0x105d   :  { %v3546_v31 = vrot.slane %v3500_v50, %v4663_v54  ;;  %v3522_v25 = vrot.slane %v3482_v44, %v4663_v54 }
0x105f   :  { %v3562_v5 = vsel %vm602_vm6, %v3546_v31, %v3561_v7  ;;  %v3557_v62 = vsel %vm602_vm6, %v3522_v25, %v3556_v47 }
0x1060   :  { %v3503_v38 = vpop.permute.xlu1 %3502  ;;  %v3485_v53 = vpop.permute.xlu0 %3484 }
0x1061   :  { %v3550_v28 = vrot.slane %v3503_v38, %v4663_v54  ;;  %v3526_v58 = vrot.slane %v3485_v53, %v4663_v54 }
0x1063   :  { %v3563_v55 = vsel %vm604_vm7, %v3550_v28, %v3562_v5  ;;  %v3558_v42 = vsel %vm604_vm7, %v3526_v58, %v3557_v62 }
0x1064   :  { %v3506_v17 = vpop.permute.xlu1 %3505  ;;  %v3488_v30 = vpop.permute.xlu0 %3487 }
0x1065   :  { %v3554_v29 = vrot.slane %v3506_v17, %v4663_v54  ;;  %v3530_v52 = vrot.slane %v3488_v30, %v4663_v54 }
0x1067   :  { %v3564_v16 = vsel %vm606_vm8, %v3554_v29, %v3563_v55  ;;  %v3559_v51 = vsel %vm606_vm8, %v3530_v52, %v3558_v42  ;;  %v5756_v55 = vld [vmem:[%s6099_s3 + $0xe] sm:$0x3] }
0x1068   :  { %v3570_v0 = vsel %vm251_vm2, %v3564_v16, -inf  ;;  %v3567_v15 = vsel %vm251_vm2, %v3559_v51, -inf  ;;  %v3826_v51 = vsub.f32 1.0, %v5756_v55 }
0x1069   :  { %3571 = vmax.xlane.f32.xlu1 %v3570_v0  ;;  %3568 = vmax.xlane.f32.xlu0 %v3567_v15  ;;  %v4112_v0 = vld [vmem:[%s6099_s3 + $0xe] sm:$0x3] }
0x10f2   :  { %v5713_v46 = vpop.xlane.xlu0 %3568  ;;  %v5715_v45 = vpop.xlane.xlu1 %3571 }
0x10f3   :  { %v3578_v2 = vrot.slane %v5713_v46, %v4534_v20  ;;  %v3582_v36 = vrot.slane %v5713_v46, %v4545_v32  ;;  %v3602_v40 = vrot.slane %v5715_v45, %v4534_v20  ;;  %v3606_v48 = vrot.slane %v5715_v45, %v4545_v32 }
0x10f4   :  { %v3586_v44 = vrot.slane %v5713_v46, %v4563_v56  ;;  %v3610_v11 = vrot.slane %v5715_v45, %v4563_v56  ;;  %v3590_v13 = vrot.slane %v5713_v46, %v4566_v57  ;;  %v3594_v56 = vrot.slane %v5713_v46, %v4571_v60 }
0x10f5   :  { %v3635_v41 = vsub.f32 %v5635_v21, %v3578_v2  ;;  %v3636_v35 = vsub.f32 %v5631_v10, %v3582_v36  ;;  %v3641_v50 = vsub.f32 %v5645_v59, %v3602_v40  ;;  %v3642_v9 = vsub.f32 %v5641_v24, %v3606_v48 }
0x10f6   :  { %v3637_v21 = vsub.f32 %v5655_v19, %v3586_v44  ;;  %v3614_v10 = vrot.slane %v5715_v45, %v4566_v57  ;;  %v3643_v59 = vsub.f32 %v5651_v22, %v3610_v11  ;;  %v3638_v24 = vsub.f32 %v5665_v27, %v3590_v13 }
0x10f7   :  { %v3647_v4 = vmul.f32 1.442695, %v3635_v41  ;;  %v3649_v43 = vmul.f32 1.442695, %v3636_v35  ;;  %v3659_v12 = vmul.f32 1.442695, %v3641_v50  ;;  %v3618_v31 = vrot.slane %v5715_v45, %v4571_v60 }
0x10f8   :  { %v3661_v38 = vmul.f32 1.442695, %v3642_v9  ;;  %v3651_v53 = vmul.f32 1.442695, %v3637_v21  ;;  %v3644_v19 = vsub.f32 %v5661_v26, %v3614_v10  ;;  %v3663_v25 = vmul.f32 1.442695, %v3643_v59 }
0x10f9   :  { %4412 = vpow2.f32 %v3647_v4  ;;  %v3598_v57 = vrot.slane %v5713_v46, %v4574_v61  ;;  %v3639_v22 = vsub.f32 %v5675_v23, %v3594_v56  ;;  %v3653_v28 = vmul.f32 1.442695, %v3638_v24 }
0x10fa   :  { %4414 = vpow2.f32 %v3649_v43  ;;  %v3622_v58 = vrot.slane %v5715_v45, %v4574_v61  ;;  %v3645_v27 = vsub.f32 %v5671_v34, %v3618_v31  ;;  %v3665_v63 = vmul.f32 1.442695, %v3644_v19 }
0x10fb   :  { %4416 = vpow2.f32 %v3659_v12  ;;  %v3640_v60 = vsub.f32 %v5685_v39, %v3598_v57  ;;  %v3655_v26 = vmul.f32 1.442695, %v3639_v22 }
0x10fc   :  { %4418 = vpow2.f32 %v3661_v38  ;;  %v3646_v7 = vsub.f32 %v5681_v37, %v3622_v58  ;;  %v3667_v47 = vmul.f32 1.442695, %v3645_v27 }
0x10fd   :  { %4420 = vpow2.f32 %v3651_v53  ;;  %v3657_v23 = vmul.f32 1.442695, %v3640_v60 }
0x10fe   :  { %4422 = vpow2.f32 %v3663_v25  ;;  %v3669_v61 = vmul.f32 1.442695, %v3646_v7  ;;  %v4463_v7 = vmov 0.0  }
0x10ff   :  { %4424 = vpow2.f32 %v3653_v28  ;;  %4187 = vmatprep.subr.mxu1 %v4463_v7  ;;  %4189 = vmatprep.mubr.msk.f32.mxu1 %vm4464_vm13, %v4463_v7 }
0x1100   :  { %4426 = vpow2.f32 %v3665_v63  ;;  %4202 = vmatprep.subr.mxu0 %v4463_v7  ;;  %4204 = vmatprep.mubr.msk.f32.mxu0 %vm4464_vm13, %v4463_v7 }
0x1101   :  { %4428 = vpow2.f32 %v3655_v26 }
0x1102   :  { %4430 = vpow2.f32 %v3667_v47  ;;  %v5796_v47 = vld [vmem:[%s6101_s5] sm:$0x3f] }
0x1103   :  { %4432 = vpow2.f32 %v3657_v23  ;;  %4188 = vmatpush3.msk.msra.mxu1 %vm357_vm12, %v5796_v47  ;;  %4203 = vmatpush3.msk.msra.mxu0 %vm357_vm12, %v5796_v47  ;;  %v4144_v23 = vld [vmem:[%s6103_s4 + $0xe] sm:$0x3] }
0x1104   :  { %4434 = vpow2.f32 %v3669_v61  ;;  %4192 = vmatprep.subr.mxu1 %v4463_v7  ;;  %4212 = vmatprep.subr.mxu0 %v4463_v7 }
0x1106   :  { %v4413_v8 = vpop.eup %4412 }
0x1107   :  { %v4415_v17 = vpop.eup %4414  ;;  %3684 = vperm.xlu0 %4235, %v4413_v8   ;;  %v4113_v8 = vld [vmem:[%s6103_s4 + $0x2] sm:$0x3] }
0x1108   :  { %3687 = vperm.xlu1 %4234, %v4415_v17   ;;  %v4417_v30 = vpop.eup %4416  ;;  %v4134_v17 = vld [vmem:[%s6103_s4 + $0xa] sm:$0x3] }
0x1109   :  { %v4419_v34 = vpop.eup %4418 }
0x110a   :  { %v4421_v39 = vpop.eup %4420 }
0x110b   :  { %3702 = vperm.xlu0 %4235, %v4417_v30   ;;  %v4423_v5 = vpop.eup %4422 }
0x110c   :  { %3705 = vperm.xlu1 %4234, %v4419_v34   ;;  %v4425_v37 = vpop.eup %4424 }
0x110d   :  { %v4427_v62 = vpop.eup %4426 }
0x110e   :  { %v4429_v29 = vpop.eup %4428 }
0x110f   :  { %3690 = vperm.xlu0 %4235, %v4421_v39   ;;  %v4431_v52 = vpop.eup %4430 }
0x1110   :  { %3708 = vperm.xlu1 %4234, %v4423_v5   ;;  %v4433_v42 = vpop.eup %4432 }
0x1111   :  { %v4435_v16 = vpop.eup %4434 }
0x1113   :  { %3693 = vperm.xlu0 %4235, %v4425_v37  }
0x1114   :  { %3711 = vperm.xlu1 %4234, %v4427_v62  }
0x1117   :  { %3696 = vperm.xlu0 %4235, %v4429_v29  }
0x1118   :  { %3714 = vperm.xlu1 %4234, %v4431_v52  }
0x111b   :  { %3699 = vperm.xlu0 %4235, %v4433_v42   ;;  %v4119_v42 = vld [vmem:[%s6103_s4 + $0x4] sm:$0x3] }
0x111c   :  { %3717 = vperm.xlu1 %4234, %v4435_v16   ;;  %v4129_v16 = vld [vmem:[%s6103_s4 + $0x8] sm:$0x3] }
0x111f   :  { %199 = vperm.xlu0 %4235, %v4112_v0   ;;  %v4149_v0 = vld [vmem:[%s6103_s4 + $0x10] sm:$0x3] }
0x1120   :  { %3829 = vperm.xlu1 %4234, %v3826_v51   ;;  %v4139_v51 = vld [vmem:[%s6103_s4 + $0xc] sm:$0x3] }
0x1123   :  { %3812 = vperm.xlu0 %4235, %v5756_v55  }
0x1182   :  { %v3685_v15 = vpop.permute.xlu0 %3684 }
0x1183   :  { %v3688_v2 = vpop.permute.xlu1 %3687  ;;  %v3722_v36 = vrot.slane %v3685_v15, %v4663_v54 }
0x1184   :  { %v3726_v40 = vrot.slane %v3688_v2, %v4663_v54 }
0x1186   :  { %v3767_v48 = vsel %vm598_vm4, %v3726_v40, %v3722_v36  ;;  %v3703_v41 = vpop.permute.xlu0 %3702 }
0x1187   :  { %v3706_v35 = vpop.permute.xlu1 %3705  ;;  %v3746_v43 = vrot.slane %v3703_v41, %v4663_v54 }
0x1188   :  { %v3750_v9 = vrot.slane %v3706_v35, %v4663_v54 }
0x118a   :  { %v3691_v50 = vpop.permute.xlu0 %3690  ;;  %v3772_v38 = vsel %vm598_vm4, %v3750_v9, %v3746_v43 }
0x118b   :  { %v3709_v44 = vpop.permute.xlu1 %3708  ;;  %v3730_v30 = vrot.slane %v3691_v50, %v4663_v54 }
0x118c   :  { %v3754_v13 = vrot.slane %v3709_v44, %v4663_v54 }
0x118d   :  { %v3768_v5 = vsel %vm600_vm5, %v3730_v30, %v3767_v48 }
0x118e   :  { %v3694_v4 = vpop.permute.xlu0 %3693  ;;  %v3773_v24 = vsel %vm600_vm5, %v3754_v13, %v3772_v38 }
0x118f   :  { %v3712_v11 = vpop.permute.xlu1 %3711  ;;  %v3734_v61 = vrot.slane %v3694_v4, %v4663_v54 }
0x1190   :  { %v3758_v10 = vrot.slane %v3712_v11, %v4663_v54 }
0x1191   :  { %v3769_v37 = vsel %vm602_vm6, %v3734_v61, %v3768_v5 }
0x1192   :  { %v3697_v12 = vpop.permute.xlu0 %3696  ;;  %v3774_v31 = vsel %vm602_vm6, %v3758_v10, %v3773_v24 }
0x1193   :  { %v3715_v21 = vpop.permute.xlu1 %3714  ;;  %v3738_v34 = vrot.slane %v3697_v12, %v4663_v54 }
0x1194   :  { %v3762_v59 = vrot.slane %v3715_v21, %v4663_v54 }
0x1195   :  { %v3770_v62 = vsel %vm604_vm7, %v3738_v34, %v3769_v37 }
0x1196   :  { %v3700_v56 = vpop.permute.xlu0 %3699  ;;  %v3775_v25 = vsel %vm604_vm7, %v3762_v59, %v3774_v31 }
0x1197   :  { %v3718_v53 = vpop.permute.xlu1 %3717  ;;  %v3742_v39 = vrot.slane %v3700_v56, %v4663_v54 }
0x1198   :  { %v3766_v19 = vrot.slane %v3718_v53, %v4663_v54 }
0x1199   :  { %v3771_v29 = vsel %vm606_vm8, %v3742_v39, %v3770_v62  ;;  %v4447_v39 = vld [vmem:[#allocation2] sm:$0x3] }
0x119a   :  { %v200_v57 = vpop.permute.xlu0 %199  ;;  %v3776_v22 = vsel %vm606_vm8, %v3766_v19, %v3775_v25  ;;  %v3779_v52 = vsel %vm251_vm2, %v3771_v29, 0.0 }
0x119b   :  { %v201_v28 = vrot.slane %v200_v57, 2  ;;  %v3782_v58 = vsel %vm251_vm2, %v3776_v22, 0.0  ;;  %v3830_v44 = vpop.permute.xlu1 %3829 }
0x119c   :  { %3783 = vadd.xlane.f32.xlu0 %v3782_v58  ;;  %v3838_v9 = vrot.slane %v3830_v44, %v4545_v32  ;;  %v3834_v58 = vrot.slane %v3830_v44, %v4534_v20 }
0x119d   :  { %v203_v27 = vmul.f32 %v201_v28, %v4554_v49  ;;  %v4124_v49 = vld [vmem:[%s6103_s4 + $0x6] sm:$0x3] }
0x119e   :  { %v5837_v15 = vpop.permute.xlu0 %3812  ;;  %v3842_v21 = vmul.f32 %v3838_v9, %v5627_v18 }
0x119f   :  { %205 = vst.msk [vmem:[#allocation2 + $0x8] sm:$0xc0] %vm161_vm11, %v203_v27  ;;  %v3821_v43 = vrot.slane %v5837_v15, %v4545_v32 }
0x11a6   :  { %v5780_v63 = vld [vmem:[#allocation2 + $0xe] sm:$0x3] }
0x11a7   :  { %v3795_v60 = vrot.slane %v5780_v63, %v4534_v20  ;;  %v3802_v26 = vrot.slane %v5780_v63, %v4545_v32 }
0x11a9   :  { %3797 = vbcast.lane.b32.xlu1 %v3795_v60, 256 }
0x11b2   :  { %3804 = vbcast.lane.b32.xlu0 %v3802_v26, 256 }
0x11b6   :  { %338 = vperm.xlu0 %4235, %v4113_v8  }
0x11ba   :  { %1386 = vperm.xlu0 %4235, %v4124_v49  }
0x11be   :  { %2370 = vperm.xlu0 %4235, %v4134_v17   ;;  %v3841_v17 = vmul.f32 %v3834_v58, %v5625_v33 }
0x11c2   :  { %3354 = vperm.xlu0 %4235, %v4144_v23  }
0x11cd   :  { %3780 = vadd.xlane.f32.xlu1 %v3779_v52 }
0x11de   :  { %3941 = vbcast.lane.b32.xlu1 %v4580_v1, 256 }
0x11e2   :  { %894 = vperm.xlu1 %4234, %v4119_v42  }
0x11e6   :  { %1878 = vperm.xlu1 %4234, %v4129_v16  }
0x11ea   :  { %2862 = vperm.xlu1 %4234, %v4139_v51  }
0x11ee   :  { %3846 = vperm.xlu1 %4234, %v4149_v0  }
0x121b   :  { %v3798_v11 = vpop.permute.xlu1 %3797 }
0x1225   :  { %v3784_v2 = vpop.xlane.xlu0 %3783 }
0x1226   :  { %4436 = vlog2.f32 %v3784_v2 }
0x1229   :  { %v3805_v36 = vpop.permute.xlu0 %3804 }
0x1231   :  { %v339_v40 = vpop.permute.xlu0 %338 }
0x1232   :  { %vm340_vm15 = vcmp.eq.s32.totalorder %v4514_v6, %v339_v40  ;;  %v4449_v40 = vld [vmem:[#allocation2 + $0x4] sm:$0x3] }
0x1233   :  { %v5841_v48 = vsel %vm340_vm15, 1.0, %v4463_v7  ;;  %v4437_v41 = vpop.eup %4436 }
0x1234   :  { %4190 = vmatmul.mubr.msk.f32.vlgmr.msra.gmra.mxu1 %vm353_vm14, %v5841_v48  ;;  %v3788_v35 = vmul.f32 0.6931472, %v4437_v41  ;;  %v349_v5 = vmul.f32 %v4447_v39, %v5841_v48 }
0x1235   :  { %4193 = vmatpush3.msk.msra.mxu1 %vm357_vm12, %v5796_v47  ;;  %4194 = vmatprep.mubr.msk.f32.mxu1 %vm4464_vm13, %v4463_v7  ;;  %v1387_v59 = vpop.permute.xlu0 %1386 }
0x1236   :  { %4197 = vmatprep.subr.mxu1 %v4463_v7  ;;  %v3790_v50 = vadd.f32 %v3788_v35, %v5715_v45  ;;  %vm1388_vm1 = vcmp.eq.s32.totalorder %v4514_v6, %v1387_v59  ;;  %v350_v37 = vsel %vm125_vm3, %v349_v5, 0.0 }
0x1237   :  { %v5872_v19 = vsel %vm1388_vm1, 1.0, %v4463_v7 }
0x1238   :  { %v3809_v4 = vadd.f32 %v3805_v36, %v3790_v50  ;;  %v1391_v41 = vmul.f32 %v4449_v40, %v5872_v19  ;;  %v4450_v50 = vld [vmem:[#allocation2 + $0x6] sm:$0x3] }
0x1239   :  { %v2371_v24 = vpop.permute.xlu0 %2370 }
0x123a   :  { %v3825_v12 = vmul.f32 %v3821_v43, %v3809_v4  ;;  %vm2372_vm5 = vcmp.eq.s32.totalorder %v4514_v6, %v2371_v24  ;;  %v1392_v35 = vsel %vm125_vm3, %v1391_v41, 0.0 }
0x123b   :  { %v5894_v60 = vsel %vm2372_vm5, 1.0, %v4463_v7 }
0x123c   :  { %v3844_v10 = vadd.f32 %v3842_v21, %v3825_v12 }
0x123d   :  { %v3355_v22 = vpop.permute.xlu0 %3354 }
0x123e   :  { %vm3356_vm7 = vcmp.eq.s32.totalorder %v4514_v6, %v3355_v22 }
0x123f   :  { %v5919_v30 = vsel %vm3356_vm7, 1.0, %v4463_v7 }
0x1256   :  { %v3781_v13 = vpop.xlane.xlu1 %3780 }
0x1257   :  { %4438 = vlog2.f32 %v3781_v13 }
0x125a   :  { %v3942_v38 = vpop.permute.xlu1 %3941 }
0x125b   :  { %v5855_v56 = vadd.f32 %v3942_v38, %v3844_v10 }
0x125d   :  { %3952 = vperm.xlu1 %4234, %v5855_v56  }
0x125e   :  { %v895_v45 = vpop.permute.xlu1 %894 }
0x125f   :  { %vm896_vm0 = vcmp.eq.s32.totalorder %v4514_v6, %v895_v45 }
0x1260   :  { %v5860_v53 = vsel %vm896_vm0, 1.0, %v4463_v7 }
0x1261   :  { %4195 = vmatmul.mubr.msk.f32.vlgmr.msra.gmra.mxu1 %vm353_vm14, %v5860_v53 }
0x1262   :  { %4198 = vmatpush3.msk.msra.mxu1 %vm357_vm12, %v5796_v47  ;;  %v1879_v18 = vpop.permute.xlu1 %1878  ;;  %4199 = vmatprep.mubr.msk.f32.mxu1 %vm4464_vm13, %v4463_v7 }
0x1263   :  { %vm1880_vm2 = vcmp.eq.s32.totalorder %v4514_v6, %v1879_v18  ;;  %4207 = vmatprep.subr.mxu1 %v4463_v7 }
0x1264   :  { %v4439_v31 = vpop.eup %4438  ;;  %v5875_v25 = vsel %vm1880_vm2, 1.0, %v4463_v7 }
0x1265   :  { %v3786_v57 = vmul.f32 0.6931472, %v4439_v31  ;;  %4200 = vmatmul.mubr.msk.f32.vlgmr.msra.gmra.mxu1 %vm353_vm14, %v5872_v19  ;;  %4205 = vmatmul.mubr.msk.f32.vlgmr.msra.gmra.mxu0 %vm353_vm14, %v5875_v25  ;;  %v1883_v44 = vmul.f32 %v4450_v50, %v5875_v25 }
0x1266   :  { %v2863_v28 = vpop.permute.xlu1 %2862  ;;  %4208 = vmatpush3.msk.msra.mxu1 %vm357_vm12, %v5796_v47  ;;  %4209 = vmatprep.mubr.msk.f32.mxu1 %vm4464_vm13, %v4463_v7 }
0x1267   :  { %v3789_v27 = vadd.f32 %v3786_v57, %v5713_v46  ;;  %vm2864_vm6 = vcmp.eq.s32.totalorder %v4514_v6, %v2863_v28  ;;  %4213 = vmatpush3.msk.msra.mxu0 %vm357_vm12, %v5796_v47  ;;  %4214 = vmatprep.mubr.msk.f32.mxu0 %vm4464_vm13, %v4463_v7  ;;  %v3817_v46 = vrot.slane %v5837_v15, %v4534_v20  ;;  %v4448_v15 = vld [vmem:[#allocation2 + $0x2] sm:$0x3]  ;;  %v1884_v4 = vsel %vm125_vm3, %v1883_v44, 0.0 }
0x1268   :  { %v5897_v26 = vsel %vm2864_vm6, 1.0, %v4463_v7  ;;  %4217 = vmatprep.subr.mxu1 %v4463_v7  ;;  %4222 = vmatprep.subr.mxu0 %v4463_v7  ;;  %v899_v2 = vmul.f32 %v4448_v15, %v5860_v53 }
0x1269   :  { %v3808_v8 = vadd.f32 %v3798_v11, %v3789_v27  ;;  %4210 = vmatmul.mubr.msk.f32.vlgmr.msra.gmra.mxu1 %vm353_vm14, %v5894_v60  ;;  %4215 = vmatmul.mubr.msk.f32.vlgmr.msra.gmra.mxu0 %vm353_vm14, %v5897_v26 }
0x126a   :  { %v3847_v49 = vpop.permute.xlu1 %3846  ;;  %4218 = vmatpush3.msk.msra.mxu1 %vm357_vm12, %v5796_v47  ;;  %4219 = vmatprep.mubr.msk.f32.mxu1 %vm4464_vm13, %v4463_v7  ;;  %v900_v36 = vsel %vm125_vm3, %v899_v2, 0.0 }
0x126b   :  { %v3824_v23 = vmul.f32 %v3817_v46, %v3808_v8  ;;  %vm3848_vm8 = vcmp.eq.s32.totalorder %v4514_v6, %v3847_v49  ;;  %4223 = vmatpush3.msk.msra.mxu0 %vm357_vm12, %v5796_v47  ;;  %4224 = vmatprep.mubr.msk.f32.mxu0 %vm4464_vm13, %v4463_v7  ;;  %v213_v47 = vld [vmem:[%s6103_s4] sm:$0x3] }
0x126c   :  { %v5922_v61 = vsel %vm3848_vm8, 1.0, %v4463_v7 }
0x126d   :  { %v3843_v34 = vadd.f32 %v3841_v17, %v3824_v23  ;;  %4220 = vmatmul.mubr.msk.f32.vlgmr.msra.gmra.mxu1 %vm353_vm14, %v5919_v30  ;;  %4225 = vmatmul.mubr.msk.f32.vlgmr.msra.gmra.mxu0 %vm353_vm14, %v5922_v61  ;;  %v4451_v17 = vld [vmem:[#allocation2 + $0x8] sm:$0x3] }
0x126e   :  { %v2375_v23 = vmul.f32 %v4451_v17, %v5894_v60  ;;  %v4454_v17 = vld [vmem:[%s6099_s3 + $0x2] sm:$0x3] }
0x126f   :  { %v5928_v33 = vadd.f32 %v3942_v38, %v3843_v34 }
0x1271   :  { %3949 = vperm.xlu0 %4235, %v5928_v33  }
0x1275   :  { %344 = vperm.xlu0 %4235, %v213_v47  }
0x1281   :  { %351 = vadd.xlane.f32.xlu1 %v350_v37 }
0x12d8   :  { %v3953_v12 = vpop.permute.xlu1 %3952 }
0x12d9   :  { %v3961_v24 = vrot.slane %v3953_v12, %v4663_v54 }
0x12ec   :  { %v3950_v62 = vpop.permute.xlu0 %3949 }
0x12ed   :  { %v3957_v21 = vrot.slane %v3950_v62, %v4663_v54 }
0x12ef   :  { %v3962_v58 = vsel %vm598_vm4, %v3961_v24, %v3957_v21  ;;  %v4013_v21 = vld [vmem:[%s6099_s3 + $0xa] sm:$0x3] }
0x12f0   :  { %v345_v29 = vpop.permute.xlu0 %344  ;;  %v3964_v8 = vsel %vm125_vm3, %v3962_v58, -inf }
0x12f1   :  { %vm346_vm9 = vcmp.eq.s32.totalorder %v4514_v6, %v345_v29  ;;  %v4452_v29 = vld [vmem:[#allocation2 + $0xa] sm:$0x3] }
0x12f2   :  { %v4115_v52 = vsel %vm346_vm9, 1.0, %v4463_v7 }
0x12f4   :  { %v427_v42 = vpop.f32.mrf.mxu1 }
0x12f5   :  { %v431_v16 = vmul.f32 %v4115_v52, %v427_v42  ;;  %v2867_v52 = vmul.f32 %v4452_v29, %v5897_v26  ;;  %v4051_v29 = vld [vmem:[%s6103_s4] sm:$0x3] }
0x12f6   :  { %v4191_v51 = vpop.f32.mrf.mxu1 }
0x12f7   :  { %v432_v0 = vsel %vm125_vm3, %v431_v16, 0.0  ;;  %v3359_v51 = vmul.f32 %v5919_v30, %v5611_v14  ;;  %v4008_v14 = vld [vmem:[%s6099_s3] sm:$0x3] }
0x12f8   :  { %433 = vadd.xlane.f32.xlu0 %v432_v0  ;;  %v3851_v0 = vmul.f32 %v5922_v61, %v5780_v63  ;;  %v4009_v63 = vld [vmem:[%s6099_s3 + $0x2] sm:$0x3] }
0x12f9   :  { %v3360_v15 = vsel %vm125_vm3, %v3359_v51, 0.0  ;;  %v4018_v61 = vsel %vm4016_vm10, %v4009_v63, 0.0 }
0x12fa   :  { %v3852_v2 = vsel %vm125_vm3, %v3851_v0, 0.0 }
0x12fc   :  { %901 = vadd.xlane.f32.xlu0 %v900_v36 }
0x1300   :  { %1393 = vadd.xlane.f32.xlu0 %v1392_v35  ;;  %v4010_v35 = vld [vmem:[%s6099_s3 + $0x4] sm:$0x3] }
0x1301   :  { %v4020_v44 = vsel %vm4016_vm10, %v4010_v35, 0.0  ;;  %v4054_v35 = vld [vmem:[%s6103_s4 + $0x6] sm:$0x3] }
0x1304   :  { %1885 = vadd.xlane.f32.xlu0 %v1884_v4  ;;  %v4011_v4 = vld [vmem:[%s6099_s3 + $0x6] sm:$0x3] }
0x130a   :  { %v352_v36 = vpop.xlane.xlu1 %351 }
0x1321   :  { %v972_v11 = vpop.f32.mrf.mxu1 }
0x1322   :  { %v976_v9 = vmul.f32 %v5841_v48, %v972_v11 }
0x1323   :  { %v4196_v43 = vpop.f32.mrf.mxu1 }
0x1324   :  { %v977_v13 = vsel %vm125_vm3, %v976_v9, 0.0  ;;  %v4022_v9 = vsel %vm4016_vm10, %v4011_v4, 0.0  ;;  %v4012_v43 = vld [vmem:[%s6099_s3 + $0x8] sm:$0x3] }
0x1325   :  { %v1956_v10 = vpop.f32.mrf.mxu0  ;;  %978 = vadd.xlane.f32.xlu1 %v977_v13  ;;  %v1464_v59 = vpop.f32.mrf.mxu1  ;;  %v4024_v13 = vsel %vm4016_vm10, %v4012_v43, 0.0 }
0x1326   :  { %v1960_v38 = vmul.f32 %v5872_v19, %v1956_v10  ;;  %v1468_v45 = vmul.f32 %v5860_v53, %v1464_v59  ;;  %v4026_v59 = vsel %vm4016_vm10, %v4013_v21, 0.0 }
0x1327   :  { %v4201_v18 = vpop.f32.mrf.mxu1  ;;  %v4206_v31 = vpop.f32.mrf.mxu0 }
0x1328   :  { %v1469_v57 = vsel %vm125_vm3, %v1468_v45, 0.0  ;;  %v1961_v48 = vsel %vm125_vm3, %v1960_v38, 0.0  ;;  %v4014_v38 = vld [vmem:[%s6099_s3 + $0xc] sm:$0x3]  ;;  %v4015_v18 = vld [vmem:[%s6099_s3 + $0xe] sm:$0x3] }
0x1329   :  { %v2940_v22 = vpop.f32.mrf.mxu0  ;;  %1470 = vadd.xlane.f32.xlu1 %v1469_v57  ;;  %v2448_v28 = vpop.f32.mrf.mxu1  ;;  %1962 = vadd.xlane.f32.xlu0 %v1961_v48  ;;  %v4028_v24 = vsel %vm4016_vm10, %v4014_v38, 0.0  ;;  %v4030_v48 = vsel %vm4016_vm10, %v4015_v18, 0.0  ;;  %v4059_v38 = vld [vmem:[%s6103_s4 + $0x10] sm:$0x3] }
0x132a   :  { %v2452_v27 = vmul.f32 %v5875_v25, %v2448_v28  ;;  %v2944_v53 = vmul.f32 %v5894_v60, %v2940_v22  ;;  %v2376_v25 = vsel %vm125_vm3, %v2375_v23, 0.0  ;;  %v2868_v60 = vsel %vm125_vm3, %v2867_v52, 0.0  ;;  %v4455_v52 = vld [vmem:[%s6099_s3 + $0x4] sm:$0x3] }
0x132b   :  { %v4211_v46 = vpop.f32.mrf.mxu1  ;;  %v4216_v19 = vpop.f32.mrf.mxu0 }
0x132c   :  { %v2453_v49 = vsel %vm125_vm3, %v2452_v27, 0.0  ;;  %v2945_v62 = vsel %vm125_vm3, %v2944_v53, 0.0 }
0x132d   :  { %v3432_v34 = vpop.f32.mrf.mxu1  ;;  %v3924_v47 = vpop.f32.mrf.mxu0  ;;  %3965 = vmax.xlane.f32.xlu1 %v3964_v8  ;;  %2454 = vadd.xlane.f32.xlu0 %v2453_v49  ;;  %v4453_v8 = vld [vmem:[%s6099_s3] sm:$0x3] }
0x132e   :  { %v3436_v37 = vmul.f32 %v5897_v26, %v3432_v34  ;;  %v3928_v42 = vmul.f32 %v5919_v30, %v3924_v47  ;;  %v4017_v30 = vsel %vm4016_vm10, %v4008_v14, 0.0 }
0x132f   :  { %v4221_v39 = vpop.f32.mrf.mxu1  ;;  %v4226_v5 = vpop.f32.mrf.mxu0  ;;  %v4019_v50 = vadd.f32 %v4018_v61, %v4017_v30  ;;  %v4053_v61 = vld [vmem:[%s6103_s4 + $0x4] sm:$0x3] }
0x1330   :  { %v3437_v16 = vsel %vm125_vm3, %v3436_v37, 0.0  ;;  %v3929_v26 = vsel %vm125_vm3, %v3928_v42, 0.0 }
0x1331   :  { %2377 = vadd.xlane.f32.xlu1 %v2376_v25  ;;  %2946 = vadd.xlane.f32.xlu0 %v2945_v62  ;;  %v4021_v11 = vadd.f32 %v4020_v44, %v4019_v50 }
0x1333   :  { %v4023_v12 = vadd.f32 %v4022_v9, %v4021_v11 }
0x1335   :  { %2869 = vadd.xlane.f32.xlu1 %v2868_v60  ;;  %3438 = vadd.xlane.f32.xlu0 %v3437_v16  ;;  %v4025_v10 = vadd.f32 %v4024_v13, %v4023_v12  ;;  %v4052_v16 = vld [vmem:[%s6103_s4 + $0x2] sm:$0x3]  ;;  %v4057_v12 = vld [vmem:[%s6103_s4 + $0xc] sm:$0x3]  ;;  %v4058_v13 = vld [vmem:[%s6103_s4 + $0xe] sm:$0x3] }
0x1337   :  { %v4027_v45 = vadd.f32 %v4026_v59, %v4025_v10 }
0x1339   :  { %3361 = vadd.xlane.f32.xlu1 %v3360_v15  ;;  %3930 = vadd.xlane.f32.xlu0 %v3929_v26  ;;  %v4029_v31 = vadd.f32 %v4028_v24, %v4027_v45 }
0x133b   :  { %v4031_v22 = vadd.f32 %v4030_v48, %v4029_v31 }
0x133d   :  { %3853 = vadd.xlane.f32.xlu1 %v3852_v2  ;;  %v4227_v58 = vtrunc.f32 %v4031_v22 }
0x133f   :  { %v4228_v27 = vcvt.f32.s32 %v4227_v58 }
0x1341   :  { %vm4033_vm11 = vcmp.eq.s32.totalorder %v4228_v27, 0  ;;  %vm4037_vm12 = vcmp.eq.s32.totalorder %v4228_v27, 4  ;;  %vm4034_vm13 = vcmp.eq.s32.totalorder %v4228_v27, 1  ;;  %vm4035_vm14 = vcmp.eq.s32.totalorder %v4228_v27, 2 }
0x1342   :  { %vm4036_vm15 = vcmp.eq.s32.totalorder %v4228_v27, 3  ;;  %vm4038_vm0 = vcmp.eq.s32.totalorder %v4228_v27, 5  ;;  %v4042_v25 = vsel %vm4033_vm11, 1, %v4460_v3  ;;  %v4046_v62 = vsel %vm4037_vm12, 1, %v4460_v3 }
0x1343   :  { %vm4039_vm1 = vcmp.eq.s32.totalorder %v4228_v27, 6  ;;  %vm4040_vm2 = vcmp.eq.s32.totalorder %v4228_v27, 7  ;;  %v4043_v60 = vsel %vm4034_vm13, 1, %v4460_v3  ;;  %vm4041_vm5 = vcmp.eq.s32.totalorder %v4228_v27, 8 }
0x1344   :  { %v4044_v15 = vsel %vm4035_vm14, 1, %v4460_v3  ;;  %v4045_v26 = vsel %vm4036_vm15, 1, %v4460_v3  ;;  %v4047_v2 = vsel %vm4038_vm0, 1, %v4460_v3  ;;  %v4048_v50 = vsel %vm4039_vm1, 1, %v4460_v3 }
0x1345   :  { %v4049_v44 = vsel %vm4040_vm2, 1, %v4460_v3  ;;  %v4060_v4 = vmul.u32 %v4051_v29, %v4042_v25  ;;  %v4050_v59 = vsel %vm4041_vm5, 1, %v4460_v3  ;;  %v4063_v45 = vmul.u32 %v4054_v35, %v4045_v26  ;;  %v4457_v3 = vld [vmem:[%s6099_s3 + $0x8] sm:$0x3] }
0x1346   :  { %v4066_v48 = vmul.u32 %v4057_v12, %v4048_v50  ;;  %v4067_v22 = vmul.u32 %v4058_v13, %v4049_v44 }
0x1347   :  { %v4068_v27 = vmul.u32 %v4059_v38, %v4050_v59 }
0x1348   :  { %v4079_v25 = vsel %vm4016_vm10, %v4067_v22, 0 }
0x1381   :  { %v434_v40 = vpop.xlane.xlu0 %433 }
0x1382   :  { %v435_v41 = vadd.f32 %v434_v40, %v352_v36  ;;  %v4055_v36 = vld [vmem:[%s6103_s4 + $0x8] sm:$0x3] }
0x1383   :  { %v4064_v21 = vmul.u32 %v4055_v36, %v4046_v62  ;;  %v4081_v62 = vsel %vm4016_vm10, %v4068_v27, 0 }
0x1384   :  { %v436_v49 = vmul.f32 %v4453_v8, %v435_v41  ;;  %v4456_v41 = vld [vmem:[%s6099_s3 + $0x6] sm:$0x3] }
0x1385   :  { %v902_v57 = vpop.xlane.xlu0 %901 }
0x1389   :  { %v1394_v28 = vpop.xlane.xlu0 %1393 }
0x138d   :  { %v1886_v46 = vpop.xlane.xlu0 %1885 }
0x13ae   :  { %v979_v19 = vpop.xlane.xlu1 %978 }
0x13af   :  { %v980_v53 = vadd.f32 %v979_v19, %v902_v57 }
0x13b1   :  { %v981_v23 = vmul.f32 %v4454_v17, %v980_v53 }
0x13b2   :  { %v1471_v34 = vpop.xlane.xlu1 %1470  ;;  %v1963_v47 = vpop.xlane.xlu0 %1962 }
0x13b3   :  { %v982_v39 = vadd.f32 %v981_v23, %v436_v49  ;;  %v1472_v5 = vadd.f32 %v1471_v34, %v1394_v28  ;;  %v1964_v37 = vadd.f32 %v1963_v47, %v1886_v46  ;;  %v4069_v28 = vsel %vm4016_vm10, %v4060_v4, 0 }
0x13b4   :  { %v4073_v46 = vsel %vm4016_vm10, %v4064_v21, 0  ;;  %v4072_v23 = vsel %vm4016_vm10, %v4063_v45, 0 }
0x13b5   :  { %v1473_v42 = vmul.f32 %v4455_v52, %v1472_v5  ;;  %v1965_v14 = vmul.f32 %v4456_v41, %v1964_v37  ;;  %v4074_v34 = vadd.s32 %v4073_v46, %v4069_v28  ;;  %v4077_v37 = vsel %vm4016_vm10, %v4066_v48, 0 }
0x13b6   :  { %v6023_v51 = vpop.xlane.xlu1 %3965  ;;  %v2455_v0 = vpop.xlane.xlu0 %2454 }
0x13b7   :  { %v1474_v40 = vadd.f32 %v1473_v42, %v982_v39  ;;  %v3971_v63 = vrot.slane %v6023_v51, %v4534_v20  ;;  %v3975_v30 = vrot.slane %v6023_v51, %v4545_v32  ;;  %v4056_v20 = vld [vmem:[%s6103_s4 + $0xa] sm:$0x3]  ;;  %v4061_v32 = vmul.u32 %v4052_v16, %v4043_v60 }
0x13b8   :  { %v4065_v31 = vmul.u32 %v4056_v20, %v4047_v2  ;;  %v4458_v39 = vld [vmem:[%s6099_s3 + $0xa] sm:$0x3]  ;;  %v4082_v26 = vadd.s32 %v4081_v62, %v4074_v34  ;;  %v4459_v2 = vld [vmem:[%s6099_s3 + $0xc] sm:$0x3] }
0x13b9   :  { %v1966_v11 = vadd.f32 %v1965_v14, %v1474_v40  ;;  %v3978_v9 = vsub.f32 %v5928_v33, %v3971_v63  ;;  %v3979_v43 = vsub.f32 %v5855_v56, %v3975_v30  ;;  %v4062_v33 = vmul.u32 %v4053_v61, %v4044_v15 }
0x13ba   :  { %v2378_v10 = vpop.xlane.xlu1 %2377  ;;  %v2947_v57 = vpop.xlane.xlu0 %2946  ;;  %v4070_v49 = vsel %vm4016_vm10, %v4061_v32, 0  ;;  %v4075_v47 = vsel %vm4016_vm10, %v4065_v31, 0  ;;  %v4080_v15 = vadd.s32 %v4079_v25, %v4072_v23 }
0x13bb   :  { %v3980_v56 = vmul.f32 1.442695, %v3978_v9  ;;  %v3982_v24 = vmul.f32 1.442695, %v3979_v43  ;;  %v2456_v18 = vadd.f32 %v2455_v0, %v2378_v10  ;;  %v4071_v17 = vsel %vm4016_vm10, %v4062_v33, 0 }
0x13bc   :  { %v4076_v16 = vadd.s32 %v4075_v47, %v4070_v49  ;;  %v4078_v0 = vadd.s32 %v4077_v37, %v4071_v17 }
0x13bd   :  { %4440 = vpow2.f32 %v3980_v56  ;;  %v2457_v58 = vmul.f32 %v4457_v3, %v2456_v18 }
0x13be   :  { %4442 = vpow2.f32 %v3982_v24  ;;  %v2870_v19 = vpop.xlane.xlu1 %2869  ;;  %v3439_v29 = vpop.xlane.xlu0 %3438  ;;  %v4083_v41 = vadd.s32 %v4082_v26, %v4076_v16  ;;  %v4084_v14 = vadd.s32 %v4080_v15, %v4078_v0 }
0x13bf   :  { %v2458_v53 = vadd.f32 %v2457_v58, %v1966_v11  ;;  %v2948_v8 = vadd.f32 %v2947_v57, %v2870_v19 }
0x13c0   :  { %v4085_v61 = vadd.s32 %v4084_v14, %v4083_v41 }
0x13c1   :  { %v2949_v5 = vmul.f32 %v4458_v39, %v2948_v8 }
0x13c2   :  { %v3362_v52 = vpop.xlane.xlu1 %3361  ;;  %v3931_v50 = vpop.xlane.xlu0 %3930 }
0x13c3   :  { %v2950_v42 = vadd.f32 %v2949_v5, %v2458_v53  ;;  %v3440_v60 = vadd.f32 %v3439_v29, %v3362_v52 }
0x13c5   :  { %v3441_v36 = vmul.f32 %v4459_v2, %v3440_v60 }
0x13c6   :  { %v3854_v35 = vpop.xlane.xlu1 %3853 }
0x13c7   :  { %v3442_v40 = vadd.f32 %v3441_v36, %v2950_v42  ;;  %v3932_v59 = vadd.f32 %v3931_v50, %v3854_v35 }
0x13ca   :  { %v4441_v63 = vpop.eup %4440 }
0x13cb   :  { %v4443_v30 = vpop.eup %4442  ;;  %3987 = vperm.xlu1 %4234, %v4441_v63  }
0x13cc   :  { %3990 = vperm.xlu0 %4235, %v4443_v30  }
0x13d0   :  { %4087 = vperm.xlu0 %4235, %v4085_v61  }
0x1446   :  { %v3988_v44 = vpop.permute.xlu1 %3987 }
0x1447   :  { %v3995_v20 = vrot.slane %v3988_v44, %v4663_v54  ;;  %v3991_v4 = vpop.permute.xlu0 %3990 }
0x1448   :  { %v3999_v32 = vrot.slane %v3991_v4, %v4663_v54  ;;  %v3933_v54 = vmul.f32 %v5756_v55, %v3932_v59 }
0x144a   :  { %v4000_v11 = vsel %vm598_vm4, %v3999_v32, %v3995_v20  ;;  %v3934_v56 = vadd.f32 %v3933_v54, %v3442_v40 }
0x144b   :  { %v4088_v9 = vpop.permute.xlu0 %4087  ;;  %v4002_v43 = vsel %vm125_vm3, %v4000_v11, 0.0 }
0x144c   :  { %vm4089_vm6 = vcmp.eq.s32.totalorder %v4514_v6, %v4088_v9  ;;  %4003 = vadd.xlane.f32.xlu1 %v4002_v43 }
0x144d   :  { %v4153_v12 = vsel %vm4089_vm6, 1.0, %v4463_v7 }
0x144e   :  { %v4092_v13 = vmul.f32 %v4153_v12, %v4580_v1 }
0x1450   :  { %v4093_v21 = vsel %vm125_vm3, %v4092_v13, 0.0 }
0x1451   :  { %4094 = vadd.xlane.f32.xlu0 %v4093_v21 }
0x14d5   :  { %v4004_v10 = vpop.xlane.xlu1 %4003 }
0x14d6   :  { %4444 = vlog2.f32 %v4004_v10 }
0x14da   :  { %v4095_v33 = vpop.xlane.xlu0 %4094 }
0x14db   :  { %v4096_v6 = vadd.f32 %v4095_v33, %v3934_v56 }
0x14e3   :  { %v4445_v38 = vpop.eup %4444 }
0x14e4   :  { %v4006_v45 = vmul.f32 0.6931472, %v4445_v38 }
0x14e6   :  { %v4007_v24 = vadd.f32 %v4006_v45, %v6023_v51 }
0x14e8   :  { %v4097_v18 = vsub.f32 %v4007_v24, %v4096_v6 }
0x14ea   :  { %4098 = vst.msk [vmem:[%s6104_s6] sm:$0x3] %vm4016_vm10, %v4097_v18 }

</bundles_post_ra>
